<compile_context>
chip_gen: v6e
topology: v6e:2x2x1
jax: 0.10.0
libtpu: 0.0.40
codegen_flags: <defaults>
</compile_context>

<pallas_src>
import functools

import jax
import jax.numpy as jnp
from jax.experimental import pallas as pl
from jax.experimental.pallas import tpu as pltpu


NUM_CLASSES = 10
PAD_CIN1 = 8                      # conv1 input channels padded 3 -> 8
_ACT_DTYPE = jnp.bfloat16         # activation / weight carry dtype
_VMEM_LIMIT = 48 << 20            # < v7x 64 MiB physical; ample headroom.


# ----------------------------------------------------------------------------
# Kernel 1: fused matmul + bias (+ ReLU), M-tiled, K untiled (no accumulator
# scratch, no pl.when phases).  Used for both convs after im2col.
# Operands bf16, accumulate f32, bias/ReLU in f32, single cast at the store.
# ----------------------------------------------------------------------------
def _matmul_bias_act_kernel(a_ref, b_ref, bias_ref, o_ref, *, apply_relu):
    out = jnp.dot(a_ref[...], b_ref[...], preferred_element_type=jnp.float32)
    out = out + bias_ref[...]
    if apply_relu:
        out = jnp.maximum(out, 0.0)
    o_ref[...] = out.astype(o_ref.dtype)


def matmul_bias_act(a, b, bias, *, apply_relu, out_dtype):
    """a: (M, K) bf16, b: (K, N) bf16, bias: (N,) f32 -> (M, N) out_dtype."""
    M, K = a.shape
    K2, N = b.shape
    assert K == K2
    bias2d = bias.reshape(1, N).astype(jnp.float32)

    # Robust M tiling: big enough to amortize per-step overhead, bounded so
    # VMEM footprint does not scale with batch.  "parallel" axis lets v7x's
    # second TensorCore take half the row tiles.
    tm = 512 if M >= 512 else M
    mt = pl.cdiv(M, tm)
    M_pad = mt * tm
    if M_pad != M:
        a = jnp.pad(a, ((0, M_pad - M), (0, 0)))

    kernel = functools.partial(_matmul_bias_act_kernel, apply_relu=apply_relu)
    out = pl.pallas_call(
        kernel,
        out_shape=jax.ShapeDtypeStruct((M_pad, N), out_dtype),
        grid_spec=pltpu.PrefetchScalarGridSpec(
            num_scalar_prefetch=0,
            grid=(mt,),
            in_specs=[
                pl.BlockSpec((tm, K), lambda i: (i, 0)),
                pl.BlockSpec((K, N), lambda i: (0, 0)),
                pl.BlockSpec((1, N), lambda i: (0, 0)),
            ],
            out_specs=pl.BlockSpec((tm, N), lambda i: (i, 0)),
        ),
        compiler_params=pltpu.CompilerParams(
            dimension_semantics=("parallel",),
            vmem_limit_bytes=_VMEM_LIMIT,
        ),
    )(a, b, bias2d)
    if M_pad != M:
        out = out[:M]
    return out


# ----------------------------------------------------------------------------
# Kernel 2: fused MLP head  fc1(+ReLU) -> fc2(+ReLU) -> fc3.
# grid = (M tiles [parallel], K tiles [arbitrary, innermost]) so fc1's 8 MB
# bf16 weight remains the streamed operand, the accumulator is bounded per M
# tile, and both v7x TensorCores can split the rows.  fc2/fc3 (small, 128-
# padded, lane-dense) run in the last-K-step epilogue.
# ----------------------------------------------------------------------------
def _fused_mlp_kernel(h_ref, w1_ref, b1_ref, w2_ref, b2_ref, w3_ref, b3_ref,
                      o_ref, acc_ref):
    k = pl.program_id(1)

    @pl.when(k == 0)
    def _():
        acc_ref[...] = jnp.zeros_like(acc_ref)

    acc_ref[...] += jnp.dot(h_ref[...], w1_ref[...],
                            preferred_element_type=jnp.float32)

    @pl.when(k == pl.num_programs(1) - 1)
    def _():
        # bias + ReLU in f32 on the accumulator, single cast before each MXU op.
        h1 = jnp.maximum(acc_ref[...] + b1_ref[...], 0.0)            # (tm, 512) f32
        h2 = jnp.dot(h1.astype(_ACT_DTYPE), w2_ref[...],
                     preferred_element_type=jnp.float32)
        h2 = jnp.maximum(h2 + b2_ref[...], 0.0)                       # (tm, 128) f32
        h3 = jnp.dot(h2.astype(_ACT_DTYPE), w3_ref[...],
                     preferred_element_type=jnp.float32)
        o_ref[...] = (h3 + b3_ref[...]).astype(o_ref.dtype)           # (tm, 128)


def fused_mlp(h, w1, b1, w2, b2, w3, b3, *, tk=4096):
    M, K = h.shape
    K1, N1 = w1.shape
    N1b, N2 = w2.shape
    N2b, N3 = w3.shape
    assert K == K1 and N1 == N1b and N2 == N2b
    if K % tk != 0:
        tk = K
    kt = K // tk

    tm = 256 if M >= 256 else M
    mt = pl.cdiv(M, tm)
    M_pad = mt * tm
    if M_pad != M:
        h = jnp.pad(h, ((0, M_pad - M), (0, 0)))

    out = pl.pallas_call(
        _fused_mlp_kernel,
        out_shape=jax.ShapeDtypeStruct((M_pad, N3), jnp.float32),
        grid_spec=pltpu.PrefetchScalarGridSpec(
            num_scalar_prefetch=0,
            grid=(mt, kt),
            in_specs=[
                pl.BlockSpec((tm, tk), lambda m, k: (m, k)),
                pl.BlockSpec((tk, N1), lambda m, k: (k, 0)),
                pl.BlockSpec((1, N1), lambda m, k: (0, 0)),
                pl.BlockSpec((N1, N2), lambda m, k: (0, 0)),
                pl.BlockSpec((1, N2), lambda m, k: (0, 0)),
                pl.BlockSpec((N2, N3), lambda m, k: (0, 0)),
                pl.BlockSpec((1, N3), lambda m, k: (0, 0)),
            ],
            out_specs=pl.BlockSpec((tm, N3), lambda m, k: (m, 0)),
            scratch_shapes=[pltpu.VMEM((tm, N1), jnp.float32)],
        ),
        compiler_params=pltpu.CompilerParams(
            dimension_semantics=("parallel", "arbitrary"),
            vmem_limit_bytes=_VMEM_LIMIT,
        ),
    )(h, w1, b1.reshape(1, -1), w2, b2.reshape(1, -1), w3, b3.reshape(1, -1))
    if M_pad != M:
        out = out[:M]
    return out


# ----------------------------------------------------------------------------
# Conv2d (k=4, stride=2, pad=1) as one-op im2col + Pallas matmul, NHWC in/out.
# ----------------------------------------------------------------------------
def conv2d_nhwc(x_nhwc, w_mat, bias, *, ksize, stride, pad, apply_relu,
                out_dtype):
    """x: (N, H, W, Cin) bf16, w_mat: (Cin*k*k, Cout) bf16 -> (N, OH, OW, Cout)."""
    N, H, W, C = x_nhwc.shape
    OH = (H + 2 * pad - ksize) // stride + 1
    OW = (W + 2 * pad - ksize) // stride + 1
    # Patch feature order is channel-major: index = c*(k*k) + i*k + j, which
    # matches PyTorch's Conv2d weight.reshape(Cout, Cin*k*k) flatten order.
    patches = jax.lax.conv_general_dilated_patches(
        x_nhwc,
        filter_shape=(ksize, ksize),
        window_strides=(stride, stride),
        padding=((pad, pad), (pad, pad)),
        dimension_numbers=("NHWC", "HWIO", "NHWC"),
    )  # (N, OH, OW, Cin*k*k)
    cols = patches.reshape(N * OH * OW, C * ksize * ksize)
    out = matmul_bias_act(cols, w_mat, bias, apply_relu=apply_relu,
                          out_dtype=out_dtype)
    return out.reshape(N, OH, OW, -1)


# ----------------------------------------------------------------------------
# Parameters: raw PyTorch-layout init, then one-time layout/dtype preparation.
# ----------------------------------------------------------------------------
def init_raw_params(key):
    def uniform(key, shape, fan_in):
        bound = 1.0 / jnp.sqrt(jnp.float32(fan_in))
        return jax.random.uniform(key, shape, jnp.float32, -bound, bound)

    ks = jax.random.split(key, 10)
    return {
        "conv1_w": uniform(ks[0], (64, 3, 4, 4), 3 * 4 * 4),
        "conv1_b": uniform(ks[1], (64,), 3 * 4 * 4),
        "conv2_w": uniform(ks[2], (128, 64, 4, 4), 64 * 4 * 4),
        "conv2_b": uniform(ks[3], (128,), 64 * 4 * 4),
        "fc1_w": uniform(ks[4], (500, 128 * 8 * 8), 128 * 8 * 8),
        "fc1_b": uniform(ks[5], (500,), 128 * 8 * 8),
        "fc2_w": uniform(ks[6], (100, 500), 500),
        "fc2_b": uniform(ks[7], (100,), 500),
        "fc3_w": uniform(ks[8], (10, 100), 100),
        "fc3_b": uniform(ks[9], (10,), 100),
    }


def _pad_to(x, shape):
    return jnp.pad(x, [(0, t - s) for s, t in zip(x.shape, shape)])


def prepare_params(raw):
    """One-time layout/dtype work: pre-transpose matmul weights to bf16,
    pad conv1 Cin 3->8 and Cout 64->128 (lane-dense), pad conv2 Cin rows to
    match, permute fc1 columns to NHWC flatten order, pad FC dims to x128."""
    wd = _ACT_DTYPE
    p = {}
    # conv1: (64,3,4,4) -> pad Cin 3->8 -> (Cin*k*k=128, Cout) -> pad Cout->128.
    w1c = jnp.pad(raw["conv1_w"], ((0, 0), (0, PAD_CIN1 - 3), (0, 0), (0, 0)))
    w1c = w1c.reshape(64, PAD_CIN1 * 16).T                        # (128, 64)
    p["conv1_wm"] = _pad_to(w1c, (PAD_CIN1 * 16, 128)).astype(wd)  # (128, 128)
    p["conv1_b"] = _pad_to(raw["conv1_b"], (128,)).astype(jnp.float32)
    # conv2: (128,64,4,4) -> pad Cin 64->128 (zero rows for conv1's padded
    # channels) -> (Cin*k*k=2048, 128).
    w2c = jnp.pad(raw["conv2_w"], ((0, 0), (0, 64), (0, 0), (0, 0)))
    p["conv2_wm"] = w2c.reshape(128, 128 * 16).T.astype(wd)       # (2048, 128)
    p["conv2_b"] = raw["conv2_b"].astype(jnp.float32)
    # fc1: reorder columns from NCHW flatten (c,h,w) to NHWC flatten (h,w,c),
    # transpose to (K, N), pad N 500 -> 512.
    w1 = raw["fc1_w"].reshape(500, 128, 8, 8).transpose(0, 2, 3, 1)
    w1 = w1.reshape(500, 8 * 8 * 128)
    p["fc1_wm"] = _pad_to(w1.T, (8192, 512)).astype(wd)
    p["fc1_b"] = _pad_to(raw["fc1_b"], (512,)).astype(jnp.float32)
    # fc2: (100, 500) -> (512, 128), zero-padded (padded rows/cols contribute 0).
    p["fc2_wm"] = _pad_to(raw["fc2_w"].T, (512, 128)).astype(wd)
    p["fc2_b"] = _pad_to(raw["fc2_b"], (128,)).astype(jnp.float32)
    # fc3: (10, 100) -> (128, 128), zero-padded.
    p["fc3_wm"] = _pad_to(raw["fc3_w"].T, (128, 128)).astype(wd)
    p["fc3_b"] = _pad_to(raw["fc3_b"], (128,)).astype(jnp.float32)
    return p


# ----------------------------------------------------------------------------
# Full forward pass (matches nn.Sequential in CNNCifar).
# ----------------------------------------------------------------------------
@jax.jit
def cnn_cifar_forward(params, x_nchw):
    # NCHW -> NHWC once; pad channels 3 -> 8 (zeros) so conv1's im2col K = 128;
    # activations stay NHWC bf16 end-to-end.
    x = jnp.transpose(x_nchw, (0, 2, 3, 1))
    x = jnp.pad(x, ((0, 0), (0, 0), (0, 0), (0, PAD_CIN1 - 3)))
    x = x.astype(_ACT_DTYPE)
    # Conv2d(3, 64, 4, stride=2, padding=1) + ReLU  (Cout carried as 128, the
    # extra 64 channels are exact zeros and hit zero rows in conv2_wm).
    h = conv2d_nhwc(x, params["conv1_wm"], params["conv1_b"],
                    ksize=4, stride=2, pad=1, apply_relu=True,
                    out_dtype=_ACT_DTYPE)                        # (N, 16, 16, 128)
    # Conv2d(64, 128, 4, stride=2, padding=1) + ReLU
    h = conv2d_nhwc(h, params["conv2_wm"], params["conv2_b"],
                    ksize=4, stride=2, pad=1, apply_relu=True,
                    out_dtype=_ACT_DTYPE)                        # (N, 8, 8, 128)
    # Flatten (NHWC order; fc1 columns were permuted at init to match).
    h = h.reshape(h.shape[0], 8 * 8 * 128)
    # Linear(8192,500)+ReLU -> Linear(500,100)+ReLU -> Linear(100,10), fused.
    logits_padded = fused_mlp(
        h,
        params["fc1_wm"], params["fc1_b"],
        params["fc2_wm"], params["fc2_b"],
        params["fc3_wm"], params["fc3_b"],
    )
    return logits_padded[:, :NUM_CLASSES]


# ----------------------------------------------------------------------------
# Pure-JAX reference (PyTorch NCHW semantics, raw f32 params) for validation.
# ----------------------------------------------------------------------------
def reference_forward(raw, x_nchw):
    hi = jax.lax.Precision.HIGHEST

    def conv(x, w, b, stride, pad):
        y = jax.lax.conv_general_dilated(
            x, w, window_strides=(stride, stride),
            padding=((pad, pad), (pad, pad)),
            dimension_numbers=("NCHW", "OIHW", "NCHW"),
            precision=hi)
        return jax.nn.relu(y + b[None, :, None, None])

    h = conv(x_nchw, raw["conv1_w"], raw["conv1_b"], 2, 1)
    h = conv(h, raw["conv2_w"], raw["conv2_b"], 2, 1)
    h = h.reshape(h.shape[0], -1)  # NCHW flatten, like torch view(N, -1)
    h = jax.nn.relu(jnp.dot(h, raw["fc1_w"].T, precision=hi) + raw["fc1_b"])
    h = jax.nn.relu(jnp.dot(h, raw["fc2_w"].T, precision=hi) + raw["fc2_b"])
    return jnp.dot(h, raw["fc3_w"].T, precision=hi) + raw["fc3_b"]


if __name__ == "__main__":
    key = jax.random.PRNGKey(0)
    pkey, xkey = jax.random.split(key)
    raw = init_raw_params(pkey)
    params = prepare_params(raw)

    # CIFAR-shaped input (spatial size fixed at 32x32 by the 128*8*8 flatten).
    x = jax.random.normal(xkey, (2, 3, 32, 32), jnp.float32)

    out = cnn_cifar_forward(params, x)
    out = jax.block_until_ready(out)
    assert out.shape == (2, NUM_CLASSES), out.shape
    assert bool(jnp.all(jnp.isfinite(out)))

    # bf16 operands / f32 accumulation vs an f32 HIGHEST-precision reference.
    ref = reference_forward(raw, x)
    err = float(jnp.max(jnp.abs(out.astype(jnp.float32) - ref)))
    assert err < 2.5e-2, f"max abs err vs reference: {err}"
    print("KERNEL_OK")
</pallas_src>

<mosaic_0001>
module attributes {stable_mosaic.version = 11 : i64} {
  func.func @_matmul_bias_act_kernel(%arg0: i32, %arg1: memref<512x128xbf16, #tpu.memory_space<vmem>>, %arg2: memref<128x128xbf16, #tpu.memory_space<vmem>>, %arg3: memref<1x128xf32, #tpu.memory_space<vmem>>, %arg4: memref<512x128xbf16, #tpu.memory_space<vmem>>) attributes {dimension_semantics = [#tpu.dimension_semantics<parallel>], iteration_bounds = array<i64: 1>, scalar_prefetch = 0 : i64, scratch_operands = 0 : i64, tpu.core_type = #tpu.core_type<tc>, window_params = [{transform_indices = @transform_0, window_bounds = array<i64: 512, 128>}, {pipeline_mode = #tpu.pipeline_mode<synchronous>, transform_indices = @transform_1, window_bounds = array<i64: 128, 128>}, {pipeline_mode = #tpu.pipeline_mode<synchronous>, transform_indices = @transform_2, window_bounds = array<i64: 1, 128>}, {transform_indices = @transform_3, window_bounds = array<i64: 512, 128>}]} {
    %c0 = arith.constant 0 : index
    %c0_0 = arith.constant 0 : index
    %0 = vector.load %arg1[%c0, %c0_0] : memref<512x128xbf16, #tpu.memory_space<vmem>>, vector<512x128xbf16>
    %c0_1 = arith.constant 0 : index
    %c0_2 = arith.constant 0 : index
    %1 = vector.load %arg2[%c0_1, %c0_2] : memref<128x128xbf16, #tpu.memory_space<vmem>>, vector<128x128xbf16>
    %cst = arith.constant dense<0.000000e+00> : vector<512x128xf32>
    %2 = tpu.matmul %0, %1, %cst {dimension_numbers = #tpu.dot_dimension_numbers<[1], [0], [0], [1], [0, 0, 1, 1], [], []>} : vector<512x128xbf16>, vector<128x128xbf16>, vector<512x128xf32> -> vector<512x128xf32>
    %c0_3 = arith.constant 0 : index
    %c0_4 = arith.constant 0 : index
    %3 = vector.load %arg3[%c0_3, %c0_4] : memref<1x128xf32, #tpu.memory_space<vmem>>, vector<1x128xf32>
    %4 = vector.broadcast %3 : vector<1x128xf32> to vector<512x128xf32>
    %5 = arith.addf %2, %4 : vector<512x128xf32>
    %cst_5 = arith.constant 0.000000e+00 : f32
    %6 = vector.broadcast %cst_5 : f32 to vector<512x128xf32>
    %7 = arith.maximumf %5, %6 : vector<512x128xf32>
    %8 = arith.truncf %7 : vector<512x128xf32> to vector<512x128xbf16>
    %c0_6 = arith.constant 0 : index
    %c0_7 = arith.constant 0 : index
    %9 = vector.load %arg4[%c0_6, %c0_7] : memref<512x128xbf16, #tpu.memory_space<vmem>>, vector<512x128xbf16>
    tpu.vector_store %arg4[%c0_6, %c0_7], %8 {strides = array<i32>} : memref<512x128xbf16, #tpu.memory_space<vmem>>, vector<512x128xbf16>,
    return
  }
  func.func @transform_0(%arg0: i32) -> (i32, i32) {
    %c0_i32 = arith.constant 0 : i32
    %c0_i32_0 = arith.constant 0 : i32
    return %arg0, %c0_i32 : i32, i32
  }
  func.func @transform_1(%arg0: i32) -> (i32, i32) {
    %c0_i32 = arith.constant 0 : i32
    %c0_i32_0 = arith.constant 0 : i32
    %c0_i32_1 = arith.constant 0 : i32
    return %c0_i32, %c0_i32_0 : i32, i32
  }
  func.func @transform_2(%arg0: i32) -> (i32, i32) {
    %c0_i32 = arith.constant 0 : i32
    %c0_i32_0 = arith.constant 0 : i32
    %c0_i32_1 = arith.constant 0 : i32
    return %c0_i32, %c0_i32_0 : i32, i32
  }
  func.func @transform_3(%arg0: i32) -> (i32, i32) {
    %c0_i32 = arith.constant 0 : i32
    %c0_i32_0 = arith.constant 0 : i32
    return %arg0, %c0_i32 : i32, i32
  }
}

module attributes {stable_mosaic.version = 11 : i64} {
  func.func @_matmul_bias_act_kernel(%arg0: i32, %arg1: memref<128x2048xbf16, #tpu.memory_space<vmem>>, %arg2: memref<2048x128xbf16, #tpu.memory_space<vmem>>, %arg3: memref<1x128xf32, #tpu.memory_space<vmem>>, %arg4: memref<128x128xbf16, #tpu.memory_space<vmem>>) attributes {dimension_semantics = [#tpu.dimension_semantics<parallel>], iteration_bounds = array<i64: 1>, scalar_prefetch = 0 : i64, scratch_operands = 0 : i64, tpu.core_type = #tpu.core_type<tc>, window_params = [{transform_indices = @transform_0, window_bounds = array<i64: 128, 2048>}, {pipeline_mode = #tpu.pipeline_mode<synchronous>, transform_indices = @transform_1, window_bounds = array<i64: 2048, 128>}, {pipeline_mode = #tpu.pipeline_mode<synchronous>, transform_indices = @transform_2, window_bounds = array<i64: 1, 128>}, {transform_indices = @transform_3, window_bounds = array<i64: 128, 128>}]} {
    %c0 = arith.constant 0 : index
    %c0_0 = arith.constant 0 : index
    %0 = vector.load %arg1[%c0, %c0_0] : memref<128x2048xbf16, #tpu.memory_space<vmem>>, vector<128x2048xbf16>
    %c0_1 = arith.constant 0 : index
    %c0_2 = arith.constant 0 : index
    %1 = vector.load %arg2[%c0_1, %c0_2] : memref<2048x128xbf16, #tpu.memory_space<vmem>>, vector<2048x128xbf16>
    %cst = arith.constant dense<0.000000e+00> : vector<128x128xf32>
    %2 = tpu.matmul %0, %1, %cst {dimension_numbers = #tpu.dot_dimension_numbers<[1], [0], [0], [1], [0, 0, 1, 1], [], []>} : vector<128x2048xbf16>, vector<2048x128xbf16>, vector<128x128xf32> -> vector<128x128xf32>
    %c0_3 = arith.constant 0 : index
    %c0_4 = arith.constant 0 : index
    %3 = vector.load %arg3[%c0_3, %c0_4] : memref<1x128xf32, #tpu.memory_space<vmem>>, vector<1x128xf32>
    %4 = vector.broadcast %3 : vector<1x128xf32> to vector<128x128xf32>
    %5 = arith.addf %2, %4 : vector<128x128xf32>
    %cst_5 = arith.constant 0.000000e+00 : f32
    %6 = vector.broadcast %cst_5 : f32 to vector<128x128xf32>
    %7 = arith.maximumf %5, %6 : vector<128x128xf32>
    %8 = arith.truncf %7 : vector<128x128xf32> to vector<128x128xbf16>
    %c0_6 = arith.constant 0 : index
    %c0_7 = arith.constant 0 : index
    %9 = vector.load %arg4[%c0_6, %c0_7] : memref<128x128xbf16, #tpu.memory_space<vmem>>, vector<128x128xbf16>
    tpu.vector_store %arg4[%c0_6, %c0_7], %8 {strides = array<i32>} : memref<128x128xbf16, #tpu.memory_space<vmem>>, vector<128x128xbf16>,
    return
  }
  func.func @transform_0(%arg0: i32) -> (i32, i32) {
    %c0_i32 = arith.constant 0 : i32
    %c0_i32_0 = arith.constant 0 : i32
    return %arg0, %c0_i32 : i32, i32
  }
  func.func @transform_1(%arg0: i32) -> (i32, i32) {
    %c0_i32 = arith.constant 0 : i32
    %c0_i32_0 = arith.constant 0 : i32
    %c0_i32_1 = arith.constant 0 : i32
    return %c0_i32, %c0_i32_0 : i32, i32
  }
  func.func @transform_2(%arg0: i32) -> (i32, i32) {
    %c0_i32 = arith.constant 0 : i32
    %c0_i32_0 = arith.constant 0 : i32
    %c0_i32_1 = arith.constant 0 : i32
    return %c0_i32, %c0_i32_0 : i32, i32
  }
  func.func @transform_3(%arg0: i32) -> (i32, i32) {
    %c0_i32 = arith.constant 0 : i32
    %c0_i32_0 = arith.constant 0 : i32
    return %arg0, %c0_i32 : i32, i32
  }
}

module attributes {stable_mosaic.version = 11 : i64} {
  func.func @_fused_mlp_kernel(%arg0: i32, %arg1: i32, %arg2: memref<2x4096xbf16, #tpu.memory_space<vmem>>, %arg3: memref<4096x512xbf16, #tpu.memory_space<vmem>>, %arg4: memref<1x512xf32, #tpu.memory_space<vmem>>, %arg5: memref<512x128xbf16, #tpu.memory_space<vmem>>, %arg6: memref<1x128xf32, #tpu.memory_space<vmem>>, %arg7: memref<128x128xbf16, #tpu.memory_space<vmem>>, %arg8: memref<1x128xf32, #tpu.memory_space<vmem>>, %arg9: memref<2x128xf32, #tpu.memory_space<vmem>>, %arg10: memref<2x512xf32, #tpu.memory_space<vmem>>) attributes {dimension_semantics = [#tpu.dimension_semantics<parallel>, #tpu.dimension_semantics<arbitrary>], iteration_bounds = array<i64: 1, 2>, scalar_prefetch = 0 : i64, scratch_operands = 1 : i64, tpu.core_type = #tpu.core_type<tc>, window_params = [{transform_indices = @transform_0, window_bounds = array<i64: 2, 4096>}, {transform_indices = @transform_1, window_bounds = array<i64: 4096, 512>}, {pipeline_mode = #tpu.pipeline_mode<synchronous>, transform_indices = @transform_2, window_bounds = array<i64: 1, 512>}, {pipeline_mode = #tpu.pipeline_mode<synchronous>, transform_indices = @transform_3, window_bounds = array<i64: 512, 128>}, {pipeline_mode = #tpu.pipeline_mode<synchronous>, transform_indices = @transform_4, window_bounds = array<i64: 1, 128>}, {pipeline_mode = #tpu.pipeline_mode<synchronous>, transform_indices = @transform_5, window_bounds = array<i64: 128, 128>}, {pipeline_mode = #tpu.pipeline_mode<synchronous>, transform_indices = @transform_6, window_bounds = array<i64: 1, 128>}, {transform_indices = @transform_7, window_bounds = array<i64: 2, 128>}]} {
    %c0_i32 = arith.constant 0 : i32
    %0 = arith.cmpi eq, %arg1, %c0_i32 : i32
    %1 = arith.extui %0 : i1 to i32
    %c0_i32_0 = arith.constant 0 : i32
    %2 = arith.cmpi ne, %1, %c0_i32_0 : i32
    scf.if %2 {
      %cst_9 = arith.constant 0.000000e+00 : f32
      %12 = vector.broadcast %cst_9 : f32 to vector<2x512xf32>
      %c0_10 = arith.constant 0 : index
      %c0_11 = arith.constant 0 : index
      %13 = vector.load %arg10[%c0_10, %c0_11] : memref<2x512xf32, #tpu.memory_space<vmem>>, vector<2x512xf32>
      tpu.vector_store %arg10[%c0_10, %c0_11], %12 {strides = array<i32>} : memref<2x512xf32, #tpu.memory_space<vmem>>, vector<2x512xf32>,
    } else {
    }
    %c0 = arith.constant 0 : index
    %c0_1 = arith.constant 0 : index
    %3 = vector.load %arg10[%c0, %c0_1] : memref<2x512xf32, #tpu.memory_space<vmem>>, vector<2x512xf32>
    %c0_2 = arith.constant 0 : index
    %c0_3 = arith.constant 0 : index
    %4 = vector.load %arg2[%c0_2, %c0_3] : memref<2x4096xbf16, #tpu.memory_space<vmem>>, vector<2x4096xbf16>
    %c0_4 = arith.constant 0 : index
    %c0_5 = arith.constant 0 : index
    %5 = vector.load %arg3[%c0_4, %c0_5] : memref<4096x512xbf16, #tpu.memory_space<vmem>>, vector<4096x512xbf16>
    %cst = arith.constant dense<0.000000e+00> : vector<2x512xf32>
    %6 = tpu.matmul %4, %5, %cst {dimension_numbers = #tpu.dot_dimension_numbers<[1], [0], [0], [1], [0, 0, 1, 1], [], []>} : vector<2x4096xbf16>, vector<4096x512xbf16>, vector<2x512xf32> -> vector<2x512xf32>
    %7 = arith.addf %3, %6 : vector<2x512xf32>
    %c0_6 = arith.constant 0 : index
    %c0_7 = arith.constant 0 : index
    %8 = vector.load %arg10[%c0_6, %c0_7] : memref<2x512xf32, #tpu.memory_space<vmem>>, vector<2x512xf32>
    tpu.vector_store %arg10[%c0_6, %c0_7], %7 {strides = array<i32>} : memref<2x512xf32, #tpu.memory_space<vmem>>, vector<2x512xf32>,
    %c1_i32 = arith.constant 1 : i32
    %9 = arith.cmpi eq, %arg1, %c1_i32 : i32
    %10 = arith.extui %9 : i1 to i32
    %c0_i32_8 = arith.constant 0 : i32
    %11 = arith.cmpi ne, %10, %c0_i32_8 : i32
    scf.if %11 {
      %c0_9 = arith.constant 0 : index
      %c0_10 = arith.constant 0 : index
      %12 = vector.load %arg10[%c0_9, %c0_10] : memref<2x512xf32, #tpu.memory_space<vmem>>, vector<2x512xf32>
      %c0_11 = arith.constant 0 : index
      %c0_12 = arith.constant 0 : index
      %13 = vector.load %arg4[%c0_11, %c0_12] : memref<1x512xf32, #tpu.memory_space<vmem>>, vector<1x512xf32>
      %14 = vector.broadcast %13 : vector<1x512xf32> to vector<2x512xf32>
      %15 = arith.addf %12, %14 : vector<2x512xf32>
      %cst_13 = arith.constant 0.000000e+00 : f32
      %16 = vector.broadcast %cst_13 : f32 to vector<2x512xf32>
      %17 = arith.maximumf %15, %16 : vector<2x512xf32>
      %18 = arith.truncf %17 : vector<2x512xf32> to vector<2x512xbf16>
      %c0_14 = arith.constant 0 : index
      %c0_15 = arith.constant 0 : index
      %19 = vector.load %arg5[%c0_14, %c0_15] : memref<512x128xbf16, #tpu.memory_space<vmem>>, vector<512x128xbf16>
      %cst_16 = arith.constant dense<0.000000e+00> : vector<2x128xf32>
      %20 = tpu.matmul %18, %19, %cst_16 {dimension_numbers = #tpu.dot_dimension_numbers<[1], [0], [0], [1], [0, 0, 1, 1], [], []>} : vector<2x512xbf16>, vector<512x128xbf16>, vector<2x128xf32> -> vector<2x128xf32>
      %c0_17 = arith.constant 0 : index
      %c0_18 = arith.constant 0 : index
      %21 = vector.load %arg6[%c0_17, %c0_18] : memref<1x128xf32, #tpu.memory_space<vmem>>, vector<1x128xf32>
      %22 = vector.broadcast %21 : vector<1x128xf32> to vector<2x128xf32>
      %23 = arith.addf %20, %22 : vector<2x128xf32>
      %cst_19 = arith.constant 0.000000e+00 : f32
      %24 = vector.broadcast %cst_19 : f32 to vector<2x128xf32>
      %25 = arith.maximumf %23, %24 : vector<2x128xf32>
      %26 = arith.truncf %25 : vector<2x128xf32> to vector<2x128xbf16>
      %c0_20 = arith.constant 0 : index
      %c0_21 = arith.constant 0 : index
      %27 = vector.load %arg7[%c0_20, %c0_21] : memref<128x128xbf16, #tpu.memory_space<vmem>>, vector<128x128xbf16>
      %cst_22 = arith.constant dense<0.000000e+00> : vector<2x128xf32>
      %28 = tpu.matmul %26, %27, %cst_22 {dimension_numbers = #tpu.dot_dimension_numbers<[1], [0], [0], [1], [0, 0, 1, 1], [], []>} : vector<2x128xbf16>, vector<128x128xbf16>, vector<2x128xf32> -> vector<2x128xf32>
      %c0_23 = arith.constant 0 : index
      %c0_24 = arith.constant 0 : index
      %29 = vector.load %arg8[%c0_23, %c0_24] : memref<1x128xf32, #tpu.memory_space<vmem>>, vector<1x128xf32>
      %30 = vector.broadcast %29 : vector<1x128xf32> to vector<2x128xf32>
      %31 = arith.addf %28, %30 : vector<2x128xf32>
      %c0_25 = arith.constant 0 : index
      %c0_26 = arith.constant 0 : index
      %32 = vector.load %arg9[%c0_25, %c0_26] : memref<2x128xf32, #tpu.memory_space<vmem>>, vector<2x128xf32>
      tpu.vector_store %arg9[%c0_25, %c0_26], %31 {strides = array<i32>} : memref<2x128xf32, #tpu.memory_space<vmem>>, vector<2x128xf32>,
    } else {
    }
    return
  }
  func.func @transform_0(%arg0: i32, %arg1: i32) -> (i32, i32) {
    %c0_i32 = arith.constant 0 : i32
    return %arg0, %arg1 : i32, i32
  }
  func.func @transform_1(%arg0: i32, %arg1: i32) -> (i32, i32) {
    %c0_i32 = arith.constant 0 : i32
    %c0_i32_0 = arith.constant 0 : i32
    return %arg1, %c0_i32 : i32, i32
  }
  func.func @transform_2(%arg0: i32, %arg1: i32) -> (i32, i32) {
    %c0_i32 = arith.constant 0 : i32
    %c0_i32_0 = arith.constant 0 : i32
    %c0_i32_1 = arith.constant 0 : i32
    return %c0_i32, %c0_i32_0 : i32, i32
  }
  func.func @transform_3(%arg0: i32, %arg1: i32) -> (i32, i32) {
    %c0_i32 = arith.constant 0 : i32
    %c0_i32_0 = arith.constant 0 : i32
    %c0_i32_1 = arith.constant 0 : i32
    return %c0_i32, %c0_i32_0 : i32, i32
  }
  func.func @transform_4(%arg0: i32, %arg1: i32) -> (i32, i32) {
    %c0_i32 = arith.constant 0 : i32
    %c0_i32_0 = arith.constant 0 : i32
    %c0_i32_1 = arith.constant 0 : i32
    return %c0_i32, %c0_i32_0 : i32, i32
  }
  func.func @transform_5(%arg0: i32, %arg1: i32) -> (i32, i32) {
    %c0_i32 = arith.constant 0 : i32
    %c0_i32_0 = arith.constant 0 : i32
    %c0_i32_1 = arith.constant 0 : i32
    return %c0_i32, %c0_i32_0 : i32, i32
  }
  func.func @transform_6(%arg0: i32, %arg1: i32) -> (i32, i32) {
    %c0_i32 = arith.constant 0 : i32
    %c0_i32_0 = arith.constant 0 : i32
    %c0_i32_1 = arith.constant 0 : i32
    return %c0_i32, %c0_i32_0 : i32, i32
  }
  func.func @transform_7(%arg0: i32, %arg1: i32) -> (i32, i32) {
    %c0_i32 = arith.constant 0 : i32
    %c0_i32_0 = arith.constant 0 : i32
    return %arg0, %c0_i32 : i32, i32
  }
}

</mosaic_0001>

<bundles_post_ra>
// kernel: cnn_cifar_forward.3
= control target key start
LH: loop header
LB: loop body
LE: loop exit
PB: predicated region body
PF: predicated region fallthrough
CT: control target
= control target key end

     0   :  { %8 = vsyncpa [#allocation3], 0  ;;  %s1919_s0 = inlined_call_operand.vmem [shape: bf16[512,128], index: 0, kind: input, shape index: {}]   ;;  %s1920_s1 = inlined_call_operand.hbm [shape: bf16[128,128], index: 1, kind: input, shape index: {}]   ;;  %s1921_s2 = inlined_call_operand.hbm [shape: f32[1,128], index: 2, kind: input, shape index: {}]   ;;  %s1922_s3 = inlined_call_operand.vmem [shape: bf16[512,128], index: 3, kind: output, shape index: {}]  }
   0x1   :  { %9 = vsyncpa [#allocation5], 0  ;;  %s1631_s12 = smov [#allocation2]  }
   0x2   :  { %s17_s13 = sshll.u32 %s1631_s12, 4  ;;  %s18_s13 = int_to_ptr.vmem [resolvable:$true] %s17_s13 }
   0x3   :  { %s1595_s14 = scalar_lea.vmem %s18_s13, 1024  ;;  %p1600_p1 = scmp.lt.s32.totalorder %s18_s13, %s18_s13 }
   0x4   :  { %p1596_p0 = scmp.ne.s32.totalorder %s18_s13, %s1595_s14  ;;  %p1601_p2 = scmp.lt.s32.totalorder %s1595_s14, %s1595_s14 }
   0x6   :  { %p1602_p3 = por %p1601_p2, %p1600_p1 }
   0x8   :  { %p1603_p4 = pnand %p1602_p3, %p1596_p0 }
   0xa   :  { %1606 = shalt.err (!%p1603_p4)
}
   0xb   :  { %s1632_s15 = smov 64   ;;  %s1633_s16 = smov 4  }
   0xc   :  { %23 = dma.hbm_to_vmem [thread:$0]  %s1920_s1, 1024, %s18_s13, [#allocation3], %s1632_s15, %s1632_s15, %s1633_s16  }
   0xd   :  { %s1634_s19 = smov [#allocation4]  }
   0xe   :  { %s30_s20 = sshll.u32 %s1634_s19, 4  ;;  %s31_s20 = int_to_ptr.vmem [resolvable:$true] %s30_s20 }
   0xf   :  { %s1615_s21 = scalar_lea.vmem %s31_s20, 16  ;;  %s1619_s22 = scalar_lea.vmem %s31_s20, 32 }
  0x10   :  { %p1616_p5 = scmp.ne.s32.totalorder %s31_s20, %s1615_s21  ;;  %p1620_p6 = scmp.lt.s32.totalorder %s31_s20, %s31_s20 }
  0x11   :  { %p1621_p7 = scmp.lt.s32.totalorder %s1619_s22, %s1615_s21 }
  0x13   :  { %p1622_p8 = por %p1621_p7, %p1620_p6 }
  0x15   :  { %p1623_p9 = pnand %p1622_p8, %p1616_p5 }
  0x17   :  { %1626 = shalt.err (!%p1623_p9)
}
  0x18   :  { %33 = dma.hbm_to_vmem [thread:$0]  %s1921_s2, 16, %s31_s20, [#allocation5]  }
  0x19   :  { %1627 = dma.done.wait [#allocation3], 1024  }
  0x1a   :  { %1628 = vsyncadd [#allocation3], 4294966272 }
  0x1b   :  { %1629 = dma.done.wait [#allocation5], 16  }
  0x1c   :  { %1630 = vsyncadd [#allocation5], 4294967280  ;;  %v1547_v0 = vld [vmem:[#allocation2 + $0x38] sm:$0xff]   ;;  %v1548_v1 = vld [vmem:[#allocation2 + $0x30] sm:$0xff]  }
  0x1d   :  { %1447 = vmatprep.subr.bf16.mxu0 %v1547_v0  ;;  %1527 = vmatprep.subr.bf16.mxu1 %v1547_v0  ;;  %v1549_v2 = vld [vmem:[#allocation2 + $0x28] sm:$0xff]   ;;  %v1550_v3 = vld [vmem:[#allocation2 + $0x20] sm:$0xff]   ;;  %v1551_v6 = vld [vmem:[#allocation2 + $0x18] sm:$0xff]  }
  0x1e   :  { %1448 = vmatpush3.bf16.msra.mxu0 %v1547_v0  ;;  %1535 = vmatpush3.bf16.msra.mxu1 %v1547_v0  ;;  %v1555_v4 = vld [vmem:[%s1919_s0] sm:$0xff]   ;;  %v1552_v7 = vld [vmem:[#allocation2 + $0x10] sm:$0xff]   ;;  %v1553_v8 = vld [vmem:[#allocation2 + $0x8] sm:$0xff]  }
  0x1f   :  { %1449 = vmatprep.subr.bf16.mxu0 %v1548_v1  ;;  %1528 = vmatprep.subr.bf16.mxu1 %v1548_v1  ;;  %v1556_v5 = vld [vmem:[%s1919_s0 + $0x80] sm:$0xff]   ;;  %v1557_v10 = vld [vmem:[%s1919_s0 + $0x8] sm:$0xff]   ;;  %v1559_v12 = vld [vmem:[%s1919_s0 + $0x10] sm:$0xff]  }
  0x20   :  { %1463 = vmatprep.mubr.bf16.mxu0 %v1555_v4  ;;  %1495 = vmatprep.mubr.bf16.mxu1 %v1556_v5  ;;  %v1554_v9 = vld [vmem:[#allocation2] sm:$0xff]   ;;  %v1558_v11 = vld [vmem:[%s1919_s0 + $0x88] sm:$0xff]   ;;  %v1560_v13 = vld [vmem:[%s1919_s0 + $0x90] sm:$0xff]  }
  0x21   :  { %v1561_v14 = vld [vmem:[%s1919_s0 + $0x18] sm:$0xff]   ;;  %v1563_v16 = vld [vmem:[%s1919_s0 + $0x20] sm:$0xff]   ;;  %v1565_v18 = vld [vmem:[%s1919_s0 + $0x28] sm:$0xff]  }
  0x22   :  { %1450 = vmatpush3.bf16.msra.mxu0 %v1548_v1  ;;  %1536 = vmatpush3.bf16.msra.mxu1 %v1548_v1  ;;  %v1562_v15 = vld [vmem:[%s1919_s0 + $0x98] sm:$0xff]   ;;  %v1564_v17 = vld [vmem:[%s1919_s0 + $0xa0] sm:$0xff]   ;;  %v1566_v19 = vld [vmem:[%s1919_s0 + $0xa8] sm:$0xff]  }
  0x23   :  { %1451 = vmatprep.subr.bf16.mxu0 %v1549_v2  ;;  %1529 = vmatprep.subr.bf16.mxu1 %v1549_v2  ;;  %v1567_v20 = vld [vmem:[%s1919_s0 + $0x30] sm:$0xff]   ;;  %v1569_v22 = vld [vmem:[%s1919_s0 + $0x38] sm:$0xff]   ;;  %v1571_v24 = vld [vmem:[%s1919_s0 + $0x40] sm:$0xff]  }
  0x24   :  { %v1568_v21 = vld [vmem:[%s1919_s0 + $0xb0] sm:$0xff]   ;;  %v1570_v23 = vld [vmem:[%s1919_s0 + $0xb8] sm:$0xff]   ;;  %v1572_v25 = vld [vmem:[%s1919_s0 + $0xc0] sm:$0xff]  }
  0x25   :  { %v1573_v26 = vld [vmem:[%s1919_s0 + $0x48] sm:$0xff]   ;;  %v1575_v28 = vld [vmem:[%s1919_s0 + $0x50] sm:$0xff]   ;;  %v1577_v30 = vld [vmem:[%s1919_s0 + $0x58] sm:$0xff]  }
  0x26   :  { %1452 = vmatpush3.bf16.msra.mxu0 %v1549_v2  ;;  %1537 = vmatpush3.bf16.msra.mxu1 %v1549_v2  ;;  %v1574_v27 = vld [vmem:[%s1919_s0 + $0xc8] sm:$0xff]   ;;  %v1576_v29 = vld [vmem:[%s1919_s0 + $0xd0] sm:$0xff]   ;;  %v1578_v31 = vld [vmem:[%s1919_s0 + $0xd8] sm:$0xff]  }
  0x27   :  { %1453 = vmatprep.subr.bf16.mxu0 %v1550_v3  ;;  %1530 = vmatprep.subr.bf16.mxu1 %v1550_v3  ;;  %v1579_v32 = vld [vmem:[%s1919_s0 + $0x60] sm:$0xff]   ;;  %v1581_v34 = vld [vmem:[%s1919_s0 + $0x68] sm:$0xff]   ;;  %v1583_v36 = vld [vmem:[%s1919_s0 + $0x70] sm:$0xff]  }
  0x28   :  { %v1580_v33 = vld [vmem:[%s1919_s0 + $0xe0] sm:$0xff]   ;;  %v1582_v35 = vld [vmem:[%s1919_s0 + $0xe8] sm:$0xff]   ;;  %v1584_v37 = vld [vmem:[%s1919_s0 + $0xf0] sm:$0xff]  }
  0x29   :  { %v1585_v38 = vld [vmem:[%s1919_s0 + $0x78] sm:$0xff]   ;;  %v1757_v40 = vld [vmem:[#allocation4] ss:$0 sm:$0xff] }
  0x2a   :  { %1454 = vmatpush3.bf16.msra.mxu0 %v1550_v3  ;;  %1538 = vmatpush3.bf16.msra.mxu1 %v1550_v3  ;;  %v1586_v39 = vld [vmem:[%s1919_s0 + $0xf8] sm:$0xff]  }
  0x2b   :  { %1455 = vmatprep.subr.bf16.mxu0 %v1551_v6  ;;  %1531 = vmatprep.subr.bf16.mxu1 %v1551_v6 }
  0x2e   :  { %1456 = vmatpush3.bf16.msra.mxu0 %v1551_v6  ;;  %1539 = vmatpush3.bf16.msra.mxu1 %v1551_v6 }
  0x2f   :  { %1457 = vmatprep.subr.bf16.mxu0 %v1552_v7  ;;  %1532 = vmatprep.subr.bf16.mxu1 %v1552_v7 }
  0x32   :  { %1458 = vmatpush3.bf16.msra.mxu0 %v1552_v7  ;;  %1540 = vmatpush3.bf16.msra.mxu1 %v1552_v7 }
  0x33   :  { %1459 = vmatprep.subr.bf16.mxu0 %v1553_v8  ;;  %1533 = vmatprep.subr.bf16.mxu1 %v1553_v8 }
  0x36   :  { %1460 = vmatpush3.bf16.msra.mxu0 %v1553_v8  ;;  %1541 = vmatpush3.bf16.msra.mxu1 %v1553_v8 }
  0x37   :  { %1461 = vmatprep.subr.bf16.mxu0 %v1554_v9  ;;  %1534 = vmatprep.subr.bf16.mxu1 %v1554_v9 }
  0x3a   :  { %1462 = vmatpush3.bf16.msra.mxu0 %v1554_v9  ;;  %1542 = vmatpush3.bf16.msra.mxu1 %v1554_v9 }
  0x3d   :  { %1464 = vmatmul.mubr.bf16.vlgmr.msra.gmra.mxu0 %v1557_v10  ;;  %1496 = vmatmul.mubr.bf16.vlgmr.msra.gmra.mxu1 %v1558_v11 }
  0x3e   :  { %1467 = vmatprep.mubr.bf16.mxu0 %v1559_v12  ;;  %1499 = vmatprep.mubr.bf16.mxu1 %v1560_v13 }
  0x45   :  { %1468 = vmatmul.mubr.bf16.gmra.mxu0 %v1561_v14  ;;  %1500 = vmatmul.mubr.bf16.gmra.mxu1 %v1562_v15 }
  0x46   :  { %1471 = vmatprep.mubr.bf16.mxu0 %v1563_v16  ;;  %1503 = vmatprep.mubr.bf16.mxu1 %v1564_v17 }
  0x4d   :  { %1472 = vmatmul.mubr.bf16.gmra.mxu0 %v1565_v18  ;;  %1504 = vmatmul.mubr.bf16.gmra.mxu1 %v1566_v19 }
  0x4e   :  { %1475 = vmatprep.mubr.bf16.mxu0 %v1567_v20  ;;  %1507 = vmatprep.mubr.bf16.mxu1 %v1568_v21 }
  0x55   :  { %1476 = vmatmul.mubr.bf16.gmra.mxu0 %v1569_v22  ;;  %1508 = vmatmul.mubr.bf16.gmra.mxu1 %v1570_v23 }
  0x56   :  { %1479 = vmatprep.mubr.bf16.mxu0 %v1571_v24  ;;  %1511 = vmatprep.mubr.bf16.mxu1 %v1572_v25 }
  0x5d   :  { %1480 = vmatmul.mubr.bf16.gmra.mxu0 %v1573_v26  ;;  %1512 = vmatmul.mubr.bf16.gmra.mxu1 %v1574_v27 }
  0x5e   :  { %1483 = vmatprep.mubr.bf16.mxu0 %v1575_v28  ;;  %1515 = vmatprep.mubr.bf16.mxu1 %v1576_v29 }
  0x65   :  { %1484 = vmatmul.mubr.bf16.gmra.mxu0 %v1577_v30  ;;  %1516 = vmatmul.mubr.bf16.gmra.mxu1 %v1578_v31 }
  0x66   :  { %1487 = vmatprep.mubr.bf16.mxu0 %v1579_v32  ;;  %1519 = vmatprep.mubr.bf16.mxu1 %v1580_v33 }
  0x6d   :  { %1488 = vmatmul.mubr.bf16.gmra.mxu0 %v1581_v34  ;;  %1520 = vmatmul.mubr.bf16.gmra.mxu1 %v1582_v35 }
  0x6e   :  { %1491 = vmatprep.mubr.bf16.mxu0 %v1583_v36  ;;  %1523 = vmatprep.mubr.bf16.mxu1 %v1584_v37 }
  0x75   :  { %1492 = vmatmul.mubr.bf16.gmra.mxu0 %v1585_v38  ;;  %1524 = vmatmul.mubr.bf16.gmra.mxu1 %v1586_v39 }
  0xfd   :  { %v1465_v41 = vpop.f32.mrf.mxu0  ;;  %v1497_v42 = vpop.f32.mrf.mxu1 }
  0xfe   :  { %v411_v43 = vadd.f32 %v1465_v41, %v1757_v40  ;;  %v539_v44 = vadd.f32 %v1497_v42, %v1757_v40 }
  0xff   :  { %v402_v45 = vpop.f32.mrf.mxu0  ;;  %v530_v46 = vpop.f32.mrf.mxu1 }
 0x100   :  { %v403_v47 = vadd.f32 %v1757_v40, %v402_v45  ;;  %v531_v48 = vadd.f32 %v1757_v40, %v530_v46  ;;  %v659_v53 = vmax.f32 %v411_v43, 0.0  ;;  %v691_v54 = vmax.f32 %v539_v44, 0.0 }
 0x101   :  { %v1466_v49 = vpop.f32.mrf.mxu0  ;;  %v1498_v50 = vpop.f32.mrf.mxu1 }
 0x102   :  { %v414_v51 = vadd.f32 %v1466_v49, %v1757_v40  ;;  %v542_v52 = vadd.f32 %v1498_v50, %v1757_v40  ;;  %v657_v61 = vmax.f32 %v403_v47, 0.0  ;;  %v689_v62 = vmax.f32 %v531_v48, 0.0 }
 0x103   :  { %v405_v55 = vpop.f32.mrf.mxu0  ;;  %v533_v56 = vpop.f32.mrf.mxu1 }
 0x104   :  { %v660_v57 = vmax.f32 %v414_v51, 0.0  ;;  %v692_v58 = vmax.f32 %v542_v52, 0.0  ;;  %v406_v59 = vadd.f32 %v1757_v40, %v405_v55  ;;  %v534_v60 = vadd.f32 %v1757_v40, %v533_v56 }
 0x105   :  { %v1469_v63 = vpop.f32.mrf.mxu0  ;;  %v1501_v0 = vpop.f32.mrf.mxu1 }
 0x106   :  { %v1224_v1 = vpack.c.bf16 %v660_v57, %v659_v53  ;;  %v1304_v2 = vpack.c.bf16 %v692_v58, %v691_v54  ;;  %v658_v3 = vmax.f32 %v406_v59, 0.0  ;;  %v690_v4 = vmax.f32 %v534_v60, 0.0 }
 0x107   :  { %v427_v5 = vadd.f32 %v1469_v63, %v1757_v40  ;;  %v555_v6 = vadd.f32 %v1501_v0, %v1757_v40  ;;  %v418_v7 = vpop.f32.mrf.mxu0  ;;  %v546_v8 = vpop.f32.mrf.mxu1 }
 0x108   :  { %1376 = vst [vmem:[%s1922_s3 + $0x8] sm:$0xff] %v1224_v1   ;;  %1392 = vst [vmem:[%s1922_s3 + $0x88] sm:$0xff] %v1304_v2   ;;  %v1219_v9 = vpack.c.bf16 %v658_v3, %v657_v61  ;;  %v1299_v10 = vpack.c.bf16 %v690_v4, %v689_v62  ;;  %v419_v11 = vadd.f32 %v1757_v40, %v418_v7 }
 0x109   :  { %v547_v12 = vadd.f32 %v1757_v40, %v546_v8  ;;  %v1470_v13 = vpop.f32.mrf.mxu0  ;;  %v1502_v14 = vpop.f32.mrf.mxu1  ;;  %v663_v17 = vmax.f32 %v427_v5, 0.0  ;;  %v695_v18 = vmax.f32 %v555_v6, 0.0 }
 0x10a   :  { %1220 = vst [vmem:[%s1922_s3] sm:$0xff] %v1219_v9   ;;  %1391 = vst [vmem:[%s1922_s3 + $0x80] sm:$0xff] %v1299_v10   ;;  %v430_v15 = vadd.f32 %v1470_v13, %v1757_v40  ;;  %v558_v16 = vadd.f32 %v1502_v14, %v1757_v40  ;;  %v661_v25 = vmax.f32 %v419_v11, 0.0 }
 0x10b   :  { %v421_v19 = vpop.f32.mrf.mxu0  ;;  %v549_v20 = vpop.f32.mrf.mxu1  ;;  %v693_v26 = vmax.f32 %v547_v12, 0.0 }
 0x10c   :  { %v664_v21 = vmax.f32 %v430_v15, 0.0  ;;  %v696_v22 = vmax.f32 %v558_v16, 0.0  ;;  %v422_v23 = vadd.f32 %v1757_v40, %v421_v19  ;;  %v550_v24 = vadd.f32 %v1757_v40, %v549_v20 }
 0x10d   :  { %v1473_v27 = vpop.f32.mrf.mxu0  ;;  %v1505_v28 = vpop.f32.mrf.mxu1 }
 0x10e   :  { %v1234_v29 = vpack.c.bf16 %v664_v21, %v663_v17  ;;  %v1314_v30 = vpack.c.bf16 %v696_v22, %v695_v18  ;;  %v662_v31 = vmax.f32 %v422_v23, 0.0  ;;  %v694_v32 = vmax.f32 %v550_v24, 0.0 }
 0x10f   :  { %v443_v33 = vadd.f32 %v1473_v27, %v1757_v40  ;;  %v571_v34 = vadd.f32 %v1505_v28, %v1757_v40  ;;  %v434_v35 = vpop.f32.mrf.mxu0  ;;  %v562_v36 = vpop.f32.mrf.mxu1 }
 0x110   :  { %1378 = vst [vmem:[%s1922_s3 + $0x18] sm:$0xff] %v1234_v29   ;;  %1394 = vst [vmem:[%s1922_s3 + $0x98] sm:$0xff] %v1314_v30   ;;  %v1229_v37 = vpack.c.bf16 %v662_v31, %v661_v25  ;;  %v1309_v38 = vpack.c.bf16 %v694_v32, %v693_v26  ;;  %v435_v39 = vadd.f32 %v1757_v40, %v434_v35 }
 0x111   :  { %v563_v41 = vadd.f32 %v1757_v40, %v562_v36  ;;  %v1474_v42 = vpop.f32.mrf.mxu0  ;;  %v1506_v43 = vpop.f32.mrf.mxu1  ;;  %v667_v46 = vmax.f32 %v443_v33, 0.0  ;;  %v699_v47 = vmax.f32 %v571_v34, 0.0 }
 0x112   :  { %1377 = vst [vmem:[%s1922_s3 + $0x10] sm:$0xff] %v1229_v37   ;;  %1393 = vst [vmem:[%s1922_s3 + $0x90] sm:$0xff] %v1309_v38   ;;  %v446_v44 = vadd.f32 %v1474_v42, %v1757_v40  ;;  %v574_v45 = vadd.f32 %v1506_v43, %v1757_v40  ;;  %v665_v54 = vmax.f32 %v435_v39, 0.0 }
 0x113   :  { %v437_v48 = vpop.f32.mrf.mxu0  ;;  %v565_v49 = vpop.f32.mrf.mxu1  ;;  %v697_v55 = vmax.f32 %v563_v41, 0.0 }
 0x114   :  { %v668_v50 = vmax.f32 %v446_v44, 0.0  ;;  %v700_v51 = vmax.f32 %v574_v45, 0.0  ;;  %v438_v52 = vadd.f32 %v1757_v40, %v437_v48  ;;  %v566_v53 = vadd.f32 %v1757_v40, %v565_v49 }
 0x115   :  { %v1477_v56 = vpop.f32.mrf.mxu0  ;;  %v1509_v57 = vpop.f32.mrf.mxu1 }
 0x116   :  { %v1244_v58 = vpack.c.bf16 %v668_v50, %v667_v46  ;;  %v1324_v59 = vpack.c.bf16 %v700_v51, %v699_v47  ;;  %v666_v60 = vmax.f32 %v438_v52, 0.0  ;;  %v698_v61 = vmax.f32 %v566_v53, 0.0 }
 0x117   :  { %v459_v62 = vadd.f32 %v1477_v56, %v1757_v40  ;;  %v587_v63 = vadd.f32 %v1509_v57, %v1757_v40  ;;  %v450_v0 = vpop.f32.mrf.mxu0  ;;  %v578_v1 = vpop.f32.mrf.mxu1 }
 0x118   :  { %1380 = vst [vmem:[%s1922_s3 + $0x28] sm:$0xff] %v1244_v58   ;;  %1396 = vst [vmem:[%s1922_s3 + $0xa8] sm:$0xff] %v1324_v59   ;;  %v1239_v2 = vpack.c.bf16 %v666_v60, %v665_v54  ;;  %v1319_v3 = vpack.c.bf16 %v698_v61, %v697_v55  ;;  %v451_v4 = vadd.f32 %v1757_v40, %v450_v0 }
 0x119   :  { %v579_v5 = vadd.f32 %v1757_v40, %v578_v1  ;;  %v1478_v6 = vpop.f32.mrf.mxu0  ;;  %v1510_v7 = vpop.f32.mrf.mxu1  ;;  %v671_v10 = vmax.f32 %v459_v62, 0.0  ;;  %v703_v11 = vmax.f32 %v587_v63, 0.0 }
 0x11a   :  { %1379 = vst [vmem:[%s1922_s3 + $0x20] sm:$0xff] %v1239_v2   ;;  %1395 = vst [vmem:[%s1922_s3 + $0xa0] sm:$0xff] %v1319_v3   ;;  %v462_v8 = vadd.f32 %v1478_v6, %v1757_v40  ;;  %v590_v9 = vadd.f32 %v1510_v7, %v1757_v40  ;;  %v669_v18 = vmax.f32 %v451_v4, 0.0 }
 0x11b   :  { %v453_v12 = vpop.f32.mrf.mxu0  ;;  %v581_v13 = vpop.f32.mrf.mxu1  ;;  %v701_v19 = vmax.f32 %v579_v5, 0.0 }
 0x11c   :  { %v672_v14 = vmax.f32 %v462_v8, 0.0  ;;  %v704_v15 = vmax.f32 %v590_v9, 0.0  ;;  %v454_v16 = vadd.f32 %v1757_v40, %v453_v12  ;;  %v582_v17 = vadd.f32 %v1757_v40, %v581_v13 }
 0x11d   :  { %v1481_v20 = vpop.f32.mrf.mxu0  ;;  %v1513_v21 = vpop.f32.mrf.mxu1 }
 0x11e   :  { %v1254_v22 = vpack.c.bf16 %v672_v14, %v671_v10  ;;  %v1334_v23 = vpack.c.bf16 %v704_v15, %v703_v11  ;;  %v670_v24 = vmax.f32 %v454_v16, 0.0  ;;  %v702_v25 = vmax.f32 %v582_v17, 0.0 }
 0x11f   :  { %v475_v26 = vadd.f32 %v1481_v20, %v1757_v40  ;;  %v603_v27 = vadd.f32 %v1513_v21, %v1757_v40  ;;  %v466_v28 = vpop.f32.mrf.mxu0  ;;  %v594_v29 = vpop.f32.mrf.mxu1 }
 0x120   :  { %1382 = vst [vmem:[%s1922_s3 + $0x38] sm:$0xff] %v1254_v22   ;;  %1398 = vst [vmem:[%s1922_s3 + $0xb8] sm:$0xff] %v1334_v23   ;;  %v1249_v30 = vpack.c.bf16 %v670_v24, %v669_v18  ;;  %v1329_v31 = vpack.c.bf16 %v702_v25, %v701_v19  ;;  %v467_v32 = vadd.f32 %v1757_v40, %v466_v28 }
 0x121   :  { %v595_v33 = vadd.f32 %v1757_v40, %v594_v29  ;;  %v1482_v34 = vpop.f32.mrf.mxu0  ;;  %v1514_v35 = vpop.f32.mrf.mxu1  ;;  %v675_v38 = vmax.f32 %v475_v26, 0.0  ;;  %v707_v39 = vmax.f32 %v603_v27, 0.0 }
 0x122   :  { %1381 = vst [vmem:[%s1922_s3 + $0x30] sm:$0xff] %v1249_v30   ;;  %1397 = vst [vmem:[%s1922_s3 + $0xb0] sm:$0xff] %v1329_v31   ;;  %v478_v36 = vadd.f32 %v1482_v34, %v1757_v40  ;;  %v606_v37 = vadd.f32 %v1514_v35, %v1757_v40  ;;  %v673_v47 = vmax.f32 %v467_v32, 0.0 }
 0x123   :  { %v469_v41 = vpop.f32.mrf.mxu0  ;;  %v597_v42 = vpop.f32.mrf.mxu1  ;;  %v705_v48 = vmax.f32 %v595_v33, 0.0 }
 0x124   :  { %v676_v43 = vmax.f32 %v478_v36, 0.0  ;;  %v708_v44 = vmax.f32 %v606_v37, 0.0  ;;  %v470_v45 = vadd.f32 %v1757_v40, %v469_v41  ;;  %v598_v46 = vadd.f32 %v1757_v40, %v597_v42 }
 0x125   :  { %v1485_v49 = vpop.f32.mrf.mxu0  ;;  %v1517_v50 = vpop.f32.mrf.mxu1 }
 0x126   :  { %v1264_v51 = vpack.c.bf16 %v676_v43, %v675_v38  ;;  %v1344_v52 = vpack.c.bf16 %v708_v44, %v707_v39  ;;  %v674_v53 = vmax.f32 %v470_v45, 0.0  ;;  %v706_v54 = vmax.f32 %v598_v46, 0.0 }
 0x127   :  { %v491_v55 = vadd.f32 %v1485_v49, %v1757_v40  ;;  %v619_v56 = vadd.f32 %v1517_v50, %v1757_v40  ;;  %v482_v57 = vpop.f32.mrf.mxu0  ;;  %v610_v58 = vpop.f32.mrf.mxu1 }
 0x128   :  { %1384 = vst [vmem:[%s1922_s3 + $0x48] sm:$0xff] %v1264_v51   ;;  %1400 = vst [vmem:[%s1922_s3 + $0xc8] sm:$0xff] %v1344_v52   ;;  %v1259_v59 = vpack.c.bf16 %v674_v53, %v673_v47  ;;  %v1339_v60 = vpack.c.bf16 %v706_v54, %v705_v48  ;;  %v483_v61 = vadd.f32 %v1757_v40, %v482_v57 }
 0x129   :  { %v611_v62 = vadd.f32 %v1757_v40, %v610_v58  ;;  %v1486_v63 = vpop.f32.mrf.mxu0  ;;  %v1518_v0 = vpop.f32.mrf.mxu1  ;;  %v679_v3 = vmax.f32 %v491_v55, 0.0  ;;  %v711_v4 = vmax.f32 %v619_v56, 0.0 }
 0x12a   :  { %1383 = vst [vmem:[%s1922_s3 + $0x40] sm:$0xff] %v1259_v59   ;;  %1399 = vst [vmem:[%s1922_s3 + $0xc0] sm:$0xff] %v1339_v60   ;;  %v494_v1 = vadd.f32 %v1486_v63, %v1757_v40  ;;  %v622_v2 = vadd.f32 %v1518_v0, %v1757_v40  ;;  %v677_v11 = vmax.f32 %v483_v61, 0.0 }
 0x12b   :  { %v485_v5 = vpop.f32.mrf.mxu0  ;;  %v613_v6 = vpop.f32.mrf.mxu1  ;;  %v709_v12 = vmax.f32 %v611_v62, 0.0 }
 0x12c   :  { %v680_v7 = vmax.f32 %v494_v1, 0.0  ;;  %v712_v8 = vmax.f32 %v622_v2, 0.0  ;;  %v486_v9 = vadd.f32 %v1757_v40, %v485_v5  ;;  %v614_v10 = vadd.f32 %v1757_v40, %v613_v6 }
 0x12d   :  { %v1489_v13 = vpop.f32.mrf.mxu0  ;;  %v1521_v14 = vpop.f32.mrf.mxu1 }
 0x12e   :  { %v1274_v15 = vpack.c.bf16 %v680_v7, %v679_v3  ;;  %v1354_v16 = vpack.c.bf16 %v712_v8, %v711_v4  ;;  %v678_v17 = vmax.f32 %v486_v9, 0.0  ;;  %v710_v18 = vmax.f32 %v614_v10, 0.0 }
 0x12f   :  { %v507_v19 = vadd.f32 %v1489_v13, %v1757_v40  ;;  %v635_v20 = vadd.f32 %v1521_v14, %v1757_v40  ;;  %v498_v21 = vpop.f32.mrf.mxu0  ;;  %v626_v22 = vpop.f32.mrf.mxu1 }
 0x130   :  { %1386 = vst [vmem:[%s1922_s3 + $0x58] sm:$0xff] %v1274_v15   ;;  %1402 = vst [vmem:[%s1922_s3 + $0xd8] sm:$0xff] %v1354_v16   ;;  %v1269_v23 = vpack.c.bf16 %v678_v17, %v677_v11  ;;  %v1349_v24 = vpack.c.bf16 %v710_v18, %v709_v12  ;;  %v499_v25 = vadd.f32 %v1757_v40, %v498_v21 }
 0x131   :  { %v627_v26 = vadd.f32 %v1757_v40, %v626_v22  ;;  %v1490_v27 = vpop.f32.mrf.mxu0  ;;  %v1522_v28 = vpop.f32.mrf.mxu1  ;;  %v683_v31 = vmax.f32 %v507_v19, 0.0  ;;  %v715_v32 = vmax.f32 %v635_v20, 0.0 }
 0x132   :  { %1385 = vst [vmem:[%s1922_s3 + $0x50] sm:$0xff] %v1269_v23   ;;  %1401 = vst [vmem:[%s1922_s3 + $0xd0] sm:$0xff] %v1349_v24   ;;  %v510_v29 = vadd.f32 %v1490_v27, %v1757_v40  ;;  %v638_v30 = vadd.f32 %v1522_v28, %v1757_v40  ;;  %v681_v39 = vmax.f32 %v499_v25, 0.0 }
 0x133   :  { %v501_v33 = vpop.f32.mrf.mxu0  ;;  %v629_v34 = vpop.f32.mrf.mxu1  ;;  %v713_v41 = vmax.f32 %v627_v26, 0.0 }
 0x134   :  { %v684_v35 = vmax.f32 %v510_v29, 0.0  ;;  %v716_v36 = vmax.f32 %v638_v30, 0.0  ;;  %v502_v37 = vadd.f32 %v1757_v40, %v501_v33  ;;  %v630_v38 = vadd.f32 %v1757_v40, %v629_v34 }
 0x135   :  { %v1493_v42 = vpop.f32.mrf.mxu0  ;;  %v1525_v43 = vpop.f32.mrf.mxu1 }
 0x136   :  { %v1284_v44 = vpack.c.bf16 %v684_v35, %v683_v31  ;;  %v1364_v45 = vpack.c.bf16 %v716_v36, %v715_v32  ;;  %v682_v46 = vmax.f32 %v502_v37, 0.0  ;;  %v714_v47 = vmax.f32 %v630_v38, 0.0 }
 0x137   :  { %v523_v48 = vadd.f32 %v1493_v42, %v1757_v40  ;;  %v651_v49 = vadd.f32 %v1525_v43, %v1757_v40  ;;  %v514_v50 = vpop.f32.mrf.mxu0  ;;  %v642_v51 = vpop.f32.mrf.mxu1 }
 0x138   :  { %1388 = vst [vmem:[%s1922_s3 + $0x68] sm:$0xff] %v1284_v44   ;;  %1404 = vst [vmem:[%s1922_s3 + $0xe8] sm:$0xff] %v1364_v45   ;;  %v1279_v52 = vpack.c.bf16 %v682_v46, %v681_v39  ;;  %v1359_v53 = vpack.c.bf16 %v714_v47, %v713_v41  ;;  %v515_v54 = vadd.f32 %v1757_v40, %v514_v50 }
 0x139   :  { %v643_v55 = vadd.f32 %v1757_v40, %v642_v51  ;;  %v1494_v56 = vpop.f32.mrf.mxu0  ;;  %v1526_v57 = vpop.f32.mrf.mxu1  ;;  %v687_v60 = vmax.f32 %v523_v48, 0.0  ;;  %v719_v61 = vmax.f32 %v651_v49, 0.0 }
 0x13a   :  { %1387 = vst [vmem:[%s1922_s3 + $0x60] sm:$0xff] %v1279_v52   ;;  %1403 = vst [vmem:[%s1922_s3 + $0xe0] sm:$0xff] %v1359_v53   ;;  %v526_v58 = vadd.f32 %v1494_v56, %v1757_v40  ;;  %v654_v59 = vadd.f32 %v1526_v57, %v1757_v40  ;;  %v685_v4 = vmax.f32 %v515_v54, 0.0 }
 0x13b   :  { %v517_v62 = vpop.f32.mrf.mxu0  ;;  %v645_v63 = vpop.f32.mrf.mxu1  ;;  %v717_v5 = vmax.f32 %v643_v55, 0.0 }
 0x13c   :  { %v688_v0 = vmax.f32 %v526_v58, 0.0  ;;  %v720_v1 = vmax.f32 %v654_v59, 0.0  ;;  %v518_v2 = vadd.f32 %v1757_v40, %v517_v62  ;;  %v646_v3 = vadd.f32 %v1757_v40, %v645_v63 }
 0x13e   :  { %v1294_v6 = vpack.c.bf16 %v688_v0, %v687_v60  ;;  %v1374_v7 = vpack.c.bf16 %v720_v1, %v719_v61  ;;  %v686_v8 = vmax.f32 %v518_v2, 0.0  ;;  %v718_v9 = vmax.f32 %v646_v3, 0.0 }
 0x140   :  { %1390 = vst [vmem:[%s1922_s3 + $0x78] sm:$0xff] %v1294_v6   ;;  %1406 = vst [vmem:[%s1922_s3 + $0xf8] sm:$0xff] %v1374_v7   ;;  %v1289_v10 = vpack.c.bf16 %v686_v8, %v685_v4  ;;  %v1369_v11 = vpack.c.bf16 %v718_v9, %v717_v5 }
 0x142   :  { %1389 = vst [vmem:[%s1922_s3 + $0x70] sm:$0xff] %v1289_v10   ;;  %1405 = vst [vmem:[%s1922_s3 + $0xf0] sm:$0xff] %v1369_v11  }
 0x143   :  { %1045 = vsyncpa [#allocation3], 1 }
 0x144   :  { %1046 = vsyncpa [#allocation5], 1 }

// kernel: cnn_cifar_forward.4
= control target key start
LH: loop header
LB: loop body
LE: loop exit
PB: predicated region body
PF: predicated region fallthrough
CT: control target
= control target key end

     0   :  { %s4715_s1 = inlined_call_operand.vmem [shape: bf16[2048,128], index: 1, kind: input, shape index: {}]   ;;  %s4716_s0 = inlined_call_operand.vmem [shape: bf16[128,2048], index: 0, kind: input, shape index: {}]   ;;  %s4717_s2 = inlined_call_operand.vmem [shape: f32[1,128], index: 2, kind: input, shape index: {}]   ;;  %s4718_s3 = inlined_call_operand.vmem [shape: bf16[128,128], index: 3, kind: output, shape index: {}]  }
   0x1   :  { %v3538_v0 = vld [vmem:[%s4715_s1 + $0x78] sm:$0xff]   ;;  %v3542_v4 = vld [vmem:[%s4715_s1 + $0x70] sm:$0xff]   ;;  %v3546_v8 = vld [vmem:[%s4715_s1 + $0x68] sm:$0xff]  }
   0x2   :  { %v3539_v1 = vld [vmem:[%s4715_s1 + $0xf8] sm:$0xff]   ;;  %3026 = vmatprep.subr.bf16.mxu0 %v3538_v0  ;;  %v3543_v5 = vld [vmem:[%s4715_s1 + $0xf0] sm:$0xff]   ;;  %v3547_v9 = vld [vmem:[%s4715_s1 + $0xe8] sm:$0xff]  }
   0x3   :  { %v3540_v2 = vld [vmem:[%s4715_s1 + $0x38] sm:$0xff]   ;;  %3090 = vmatprep.subr.bf16.mxu1 %v3539_v1  ;;  %v3544_v6 = vld [vmem:[%s4715_s1 + $0x30] sm:$0xff]   ;;  %v3548_v10 = vld [vmem:[%s4715_s1 + $0x28] sm:$0xff]  }
   0x4   :  { %v3541_v3 = vld [vmem:[%s4715_s1 + $0xb8] sm:$0xff]   ;;  %3027 = vmatpush3.bf16.msra.mxu0 %v3540_v2  ;;  %v3545_v7 = vld [vmem:[%s4715_s1 + $0xb0] sm:$0xff]   ;;  %v3549_v11 = vld [vmem:[%s4715_s1 + $0xa8] sm:$0xff]  }
   0x5   :  { %3091 = vmatpush3.bf16.msra.mxu1 %v3541_v3  ;;  %3028 = vmatprep.subr.bf16.mxu0 %v3542_v4  ;;  %v3550_v12 = vld [vmem:[%s4715_s1 + $0x60] sm:$0xff]   ;;  %v3554_v16 = vld [vmem:[%s4715_s1 + $0x58] sm:$0xff]   ;;  %v3558_v20 = vld [vmem:[%s4715_s1 + $0x50] sm:$0xff]  }
   0x6   :  { %3092 = vmatprep.subr.bf16.mxu1 %v3543_v5  ;;  %v3551_v13 = vld [vmem:[%s4715_s1 + $0xe0] sm:$0xff]   ;;  %v3555_v17 = vld [vmem:[%s4715_s1 + $0xd8] sm:$0xff]   ;;  %v3559_v21 = vld [vmem:[%s4715_s1 + $0xd0] sm:$0xff]  }
   0x7   :  { %v3552_v14 = vld [vmem:[%s4715_s1 + $0x20] sm:$0xff]   ;;  %v3556_v18 = vld [vmem:[%s4715_s1 + $0x18] sm:$0xff]   ;;  %v3560_v22 = vld [vmem:[%s4715_s1 + $0x10] sm:$0xff]  }
   0x8   :  { %3029 = vmatpush3.bf16.msra.mxu0 %v3544_v6  ;;  %v3553_v15 = vld [vmem:[%s4715_s1 + $0xa0] sm:$0xff]   ;;  %v3557_v19 = vld [vmem:[%s4715_s1 + $0x98] sm:$0xff]   ;;  %v3561_v23 = vld [vmem:[%s4715_s1 + $0x90] sm:$0xff]  }
   0x9   :  { %3093 = vmatpush3.bf16.msra.mxu1 %v3545_v7  ;;  %3030 = vmatprep.subr.bf16.mxu0 %v3546_v8  ;;  %v3562_v24 = vld [vmem:[%s4715_s1 + $0x48] sm:$0xff]   ;;  %v3566_v28 = vld [vmem:[%s4715_s1 + $0x40] sm:$0xff]   ;;  %v3570_v40 = vld [vmem:[%s4715_s1 + $0x178] sm:$0xff]  }
   0xa   :  { %3094 = vmatprep.subr.bf16.mxu1 %v3547_v9  ;;  %v3563_v25 = vld [vmem:[%s4715_s1 + $0xc8] sm:$0xff]   ;;  %v3567_v29 = vld [vmem:[%s4715_s1 + $0xc0] sm:$0xff]   ;;  %v3571_v41 = vld [vmem:[%s4715_s1 + $0x138] sm:$0xff]  }
   0xb   :  { %v3564_v26 = vld [vmem:[%s4715_s1 + $0x8] sm:$0xff]   ;;  %v3568_v30 = vld [vmem:[%s4715_s1] sm:$0xff]   ;;  %v3572_v42 = vld [vmem:[%s4715_s1 + $0x1f8] sm:$0xff]  }
   0xc   :  { %3031 = vmatpush3.bf16.msra.mxu0 %v3548_v10  ;;  %v3565_v27 = vld [vmem:[%s4715_s1 + $0x88] sm:$0xff]   ;;  %v3569_v31 = vld [vmem:[%s4715_s1 + $0x80] sm:$0xff]   ;;  %v3573_v43 = vld [vmem:[%s4715_s1 + $0x1b8] sm:$0xff]  }
   0xd   :  { %3095 = vmatpush3.bf16.msra.mxu1 %v3549_v11  ;;  %3032 = vmatprep.subr.bf16.mxu0 %v3550_v12  ;;  %v15_v32 = vld [vmem:[%s4716_s0] sm:$0xff]  ;;  %v16_v34 = vld [vmem:[%s4716_s0 + $0x8] sm:$0xff]  ;;  %v3574_v50 = vld [vmem:[%s4715_s1 + $0x170] sm:$0xff]  }
   0xe   :  { %3096 = vmatprep.subr.bf16.mxu1 %v3551_v13  ;;  %v23_v33 = vld [vmem:[%s4716_s0 + $0x40] sm:$0xff]  ;;  %v24_v37 = vld [vmem:[%s4716_s0 + $0x48] sm:$0xff]  ;;  %v3575_v52 = vld [vmem:[%s4715_s1 + $0x130] sm:$0xff]  }
   0xf   :  { %v2691_v35 = vcombine.low %v15_v32, %v23_v33  ;;  %v2692_v36 = vcombine.high %v15_v32, %v23_v33  ;;  %v2693_v38 = vcombine.low %v16_v34, %v24_v37  ;;  %v2694_v39 = vcombine.high %v16_v34, %v24_v37  ;;  %v31_v44 = vld [vmem:[%s4716_s0 + $0x80] sm:$0xff]  ;;  %v32_v47 = vld [vmem:[%s4716_s0 + $0x88] sm:$0xff]  ;;  %v3576_v54 = vld [vmem:[%s4715_s1 + $0x1f0] sm:$0xff]  }
  0x10   :  { %3033 = vmatpush3.bf16.msra.mxu0 %v3552_v14  ;;  %v39_v45 = vld [vmem:[%s4716_s0 + $0xc0] sm:$0xff]  ;;  %v40_v48 = vld [vmem:[%s4716_s0 + $0xc8] sm:$0xff]  ;;  %v3577_v55 = vld [vmem:[%s4715_s1 + $0x1b0] sm:$0xff]  }
  0x11   :  { %3097 = vmatpush3.bf16.msra.mxu1 %v3553_v15  ;;  %3034 = vmatprep.subr.bf16.mxu0 %v3554_v16  ;;  %v2708_v46 = vcombine.high %v31_v44, %v39_v45  ;;  %v2710_v49 = vcombine.high %v32_v47, %v40_v48  ;;  %v2707_v51 = vcombine.low %v31_v44, %v39_v45  ;;  %v47_v56 = vld [vmem:[%s4716_s0 + $0x100] sm:$0xff]  ;;  %v48_v58 = vld [vmem:[%s4716_s0 + $0x108] sm:$0xff]  ;;  %v3592_v32 = vld [vmem:[%s4715_s1 + $0x1d0] sm:$0xff]  }
  0x12   :  { %3098 = vmatprep.subr.bf16.mxu1 %v3555_v17  ;;  %1846 = vmatprep.mubr.bf16.mxu0 %v2692_v36  ;;  %v2709_v53 = vcombine.low %v32_v47, %v40_v48  ;;  %v55_v57 = vld [vmem:[%s4716_s0 + $0x140] sm:$0xff]  ;;  %v56_v59 = vld [vmem:[%s4716_s0 + $0x148] sm:$0xff]  ;;  %v3593_v33 = vld [vmem:[%s4715_s1 + $0x190] sm:$0xff]  }
  0x13   :  { %1943 = vmatprep.mubr.bf16.mxu1 %v2694_v39  ;;  %v2724_v60 = vcombine.high %v47_v56, %v55_v57  ;;  %v2726_v61 = vcombine.high %v48_v58, %v56_v59  ;;  %v3578_v62 = vld [vmem:[%s4715_s1 + $0x168] sm:$0xff]   ;;  %v2723_v2 = vcombine.low %v47_v56, %v55_v57  ;;  %v63_v3 = vld [vmem:[%s4716_s0 + $0x180] sm:$0xff]  ;;  %v2725_v6 = vcombine.low %v48_v58, %v56_v59  ;;  %v3602_v56 = vld [vmem:[%s4715_s1 + $0x278] sm:$0xff]  }
  0x14   :  { %3035 = vmatpush3.bf16.msra.mxu0 %v3556_v18  ;;  %v3579_v63 = vld [vmem:[%s4715_s1 + $0x128] sm:$0xff]   ;;  %v71_v4 = vld [vmem:[%s4716_s0 + $0x1c0] sm:$0xff]  ;;  %v3586_v18 = vld [vmem:[%s4715_s1 + $0x158] sm:$0xff]  }
  0x15   :  { %3099 = vmatpush3.bf16.msra.mxu1 %v3557_v19  ;;  %3036 = vmatprep.subr.bf16.mxu0 %v3558_v20  ;;  %v3580_v0 = vld [vmem:[%s4715_s1 + $0x1e8] sm:$0xff]   ;;  %v2740_v7 = vcombine.high %v63_v3, %v71_v4  ;;  %v3582_v10 = vld [vmem:[%s4715_s1 + $0x160] sm:$0xff]   ;;  %v2739_v19 = vcombine.low %v63_v3, %v71_v4  ;;  %v3587_v20 = vld [vmem:[%s4715_s1 + $0x118] sm:$0xff]  }
  0x16   :  { %3100 = vmatprep.subr.bf16.mxu1 %v3559_v21  ;;  %v3581_v1 = vld [vmem:[%s4715_s1 + $0x1a8] sm:$0xff]   ;;  %v3583_v11 = vld [vmem:[%s4715_s1 + $0x120] sm:$0xff]   ;;  %v3604_v58 = vld [vmem:[%s4715_s1 + $0x2f8] sm:$0xff]  }
  0x17   :  { %v64_v5 = vld [vmem:[%s4716_s0 + $0x188] sm:$0xff]  ;;  %v3584_v12 = vld [vmem:[%s4715_s1 + $0x1e0] sm:$0xff]   ;;  %v26_v3 = vld [vmem:[%s4716_s0 + $0x58] sm:$0xff] }
  0x18   :  { %3037 = vmatpush3.bf16.msra.mxu0 %v3560_v22  ;;  %v72_v8 = vld [vmem:[%s4716_s0 + $0x1c8] sm:$0xff]  ;;  %v3585_v13 = vld [vmem:[%s4715_s1 + $0x1a0] sm:$0xff]  }
  0x19   :  { %3101 = vmatpush3.bf16.msra.mxu1 %v3561_v23  ;;  %3038 = vmatprep.subr.bf16.mxu0 %v3562_v24  ;;  %v2742_v9 = vcombine.high %v64_v5, %v72_v8  ;;  %v79_v14 = vld [vmem:[%s4716_s0 + $0x200] sm:$0xff]  ;;  %v80_v16 = vld [vmem:[%s4716_s0 + $0x208] sm:$0xff]  ;;  %v2741_v21 = vcombine.low %v64_v5, %v72_v8  ;;  %v3588_v23 = vld [vmem:[%s4715_s1 + $0x1d8] sm:$0xff]  }
  0x1a   :  { %3102 = vmatprep.subr.bf16.mxu1 %v3563_v25  ;;  %v87_v15 = vld [vmem:[%s4716_s0 + $0x240] sm:$0xff]  ;;  %v88_v17 = vld [vmem:[%s4716_s0 + $0x248] sm:$0xff]  ;;  %v3589_v25 = vld [vmem:[%s4715_s1 + $0x198] sm:$0xff]  }
  0x1b   :  { %v2756_v22 = vcombine.high %v79_v14, %v87_v15  ;;  %v2758_v24 = vcombine.high %v80_v16, %v88_v17  ;;  %v2755_v34 = vcombine.low %v79_v14, %v87_v15  ;;  %v3595_v39 = vld [vmem:[%s4715_s1 + $0x108] sm:$0xff]   ;;  %v3599_v48 = vld [vmem:[%s4715_s1 + $0x100] sm:$0xff]   ;;  %v33_v8 = vld [vmem:[%s4716_s0 + $0x90] sm:$0xff] }
  0x1c   :  { %3039 = vmatpush3.bf16.msra.mxu0 %v3564_v26  ;;  %v95_v26 = vld [vmem:[%s4716_s0 + $0x280] sm:$0xff]  ;;  %v112_v44 = vld [vmem:[%s4716_s0 + $0x308] sm:$0xff]  ;;  %v3605_v15 = vld [vmem:[%s4715_s1 + $0x2b8] sm:$0xff]  }
  0x1d   :  { %3103 = vmatpush3.bf16.msra.mxu1 %v3565_v27  ;;  %3040 = vmatprep.subr.bf16.mxu0 %v3566_v28  ;;  %v103_v27 = vld [vmem:[%s4716_s0 + $0x2c0] sm:$0xff]  ;;  %v3590_v28 = vld [vmem:[%s4715_s1 + $0x150] sm:$0xff]   ;;  %v120_v45 = vld [vmem:[%s4716_s0 + $0x348] sm:$0xff] }
  0x1e   :  { %3104 = vmatprep.subr.bf16.mxu1 %v3567_v29  ;;  %v96_v29 = vld [vmem:[%s4716_s0 + $0x288] sm:$0xff]  ;;  %v2772_v36 = vcombine.high %v95_v26, %v103_v27  ;;  %v2771_v47 = vcombine.low %v95_v26, %v103_v27 }
  0x1f   :  { %v128_v57 = vld [vmem:[%s4716_s0 + $0x388] sm:$0xff] }
  0x20   :  { %3041 = vmatpush3.bf16.msra.mxu0 %v3568_v30  ;;  %v104_v30 = vld [vmem:[%s4716_s0 + $0x2c8] sm:$0xff] }
  0x21   :  { %3105 = vmatpush3.bf16.msra.mxu1 %v3569_v31  ;;  %3154 = vmatprep.subr.bf16.mxu0 %v3570_v40  ;;  %v3591_v31 = vld [vmem:[%s4715_s1 + $0x110] sm:$0xff]   ;;  %v2774_v37 = vcombine.high %v96_v29, %v104_v30  ;;  %v3596_v40 = vld [vmem:[%s4715_s1 + $0x1c8] sm:$0xff]  }
  0x22   :  { %3218 = vmatprep.subr.bf16.mxu1 %v3572_v42  ;;  %v119_v42 = vld [vmem:[%s4716_s0 + $0x340] sm:$0xff]  ;;  %v136_v59 = vld [vmem:[%s4716_s0 + $0x3c8] sm:$0xff] }
  0x23   :  { %1847 = vmatmul.mubr.bf16.vlgmr.msra.gmra.mxu0 %v2691_v35  ;;  %v2757_v35 = vcombine.low %v80_v16, %v88_v17  ;;  %v2805_v5 = vcombine.low %v128_v57, %v136_v59  ;;  %v3606_v17 = vld [vmem:[%s4715_s1 + $0x270] sm:$0xff]   ;;  %v3610_v26 = vld [vmem:[%s4715_s1 + $0x268] sm:$0xff]  }
  0x24   :  { %1944 = vmatmul.mubr.bf16.vlgmr.msra.gmra.mxu1 %v2693_v38  ;;  %3155 = vmatpush3.bf16.msra.mxu0 %v3571_v41  ;;  %v3594_v38 = vld [vmem:[%s4715_s1 + $0x148] sm:$0xff]   ;;  %v111_v41 = vld [vmem:[%s4716_s0 + $0x300] sm:$0xff] }
  0x25   :  { %3219 = vmatpush3.bf16.msra.mxu1 %v3573_v43  ;;  %1854 = vmatprep.mubr.bf16.mxu0 %v2708_v46  ;;  %v3597_v43 = vld [vmem:[%s4715_s1 + $0x188] sm:$0xff]   ;;  %v3598_v46 = vld [vmem:[%s4715_s1 + $0x140] sm:$0xff]  }
  0x26   :  { %1951 = vmatprep.mubr.bf16.mxu1 %v2710_v49  ;;  %3156 = vmatprep.subr.bf16.mxu0 %v3574_v50  ;;  %v2773_v49 = vcombine.low %v96_v29, %v104_v30  ;;  %v2788_v50 = vcombine.high %v111_v41, %v119_v42  ;;  %v3612_v27 = vld [vmem:[%s4715_s1 + $0x2e8] sm:$0xff]  }
  0x27   :  { %3220 = vmatprep.subr.bf16.mxu1 %v3576_v54  ;;  %v127_v54 = vld [vmem:[%s4716_s0 + $0x380] sm:$0xff] }
  0x28   :  { %3157 = vmatpush3.bf16.msra.mxu0 %v3575_v52  ;;  %v2790_v52 = vcombine.high %v112_v44, %v120_v45 }
  0x29   :  { %3221 = vmatpush3.bf16.msra.mxu1 %v3577_v55  ;;  %3158 = vmatprep.subr.bf16.mxu0 %v3578_v62  ;;  %v135_v55 = vld [vmem:[%s4716_s0 + $0x3c0] sm:$0xff] }
  0x2a   :  { %3222 = vmatprep.subr.bf16.mxu1 %v3580_v0  ;;  %v2804_v62 = vcombine.high %v127_v54, %v135_v55  ;;  %v17_v0 = vld [vmem:[%s4716_s0 + $0x10] sm:$0xff]  ;;  %v2803_v4 = vcombine.low %v127_v54, %v135_v55  ;;  %v82_v54 = vld [vmem:[%s4716_s0 + $0x218] sm:$0xff] }
  0x2b   :  { %1855 = vmatmul.mubr.bf16.gmra.mxu0 %v2707_v51  ;;  %v3600_v51 = vld [vmem:[%s4715_s1 + $0x1c0] sm:$0xff]   ;;  %v90_v55 = vld [vmem:[%s4716_s0 + $0x258] sm:$0xff] }
  0x2c   :  { %1952 = vmatmul.mubr.bf16.gmra.mxu1 %v2709_v53  ;;  %1862 = vmatprep.mubr.bf16.mxu0 %v2724_v60  ;;  %v3601_v53 = vld [vmem:[%s4715_s1 + $0x180] sm:$0xff]   ;;  %v2787_v60 = vcombine.low %v111_v41, %v119_v42  ;;  %v3618_v42 = vld [vmem:[%s4715_s1 + $0x258] sm:$0xff]  }
  0x2d   :  { %1959 = vmatprep.mubr.bf16.mxu1 %v2726_v61  ;;  %3159 = vmatpush3.bf16.msra.mxu0 %v3579_v63  ;;  %v2789_v61 = vcombine.low %v112_v44, %v120_v45  ;;  %v2806_v63 = vcombine.high %v128_v57, %v136_v59  ;;  %v3617_v41 = vld [vmem:[%s4715_s1 + $0x2a0] sm:$0xff]   ;;  %v3620_v44 = vld [vmem:[%s4715_s1 + $0x2d8] sm:$0xff]   ;;  %v3625_v57 = vld [vmem:[%s4715_s1 + $0x290] sm:$0xff]  }
  0x2e   :  { %3223 = vmatpush3.bf16.msra.mxu1 %v3581_v1  ;;  %3160 = vmatprep.subr.bf16.mxu0 %v3582_v10  ;;  %v25_v1 = vld [vmem:[%s4716_s0 + $0x50] sm:$0xff] }
  0x2f   :  { %3224 = vmatprep.subr.bf16.mxu1 %v3584_v12  ;;  %v2695_v10 = vcombine.low %v17_v0, %v25_v1  ;;  %v34_v12 = vld [vmem:[%s4716_s0 + $0x98] sm:$0xff] }
  0x31   :  { %3161 = vmatpush3.bf16.msra.mxu0 %v3583_v11  ;;  %v3603_v11 = vld [vmem:[%s4715_s1 + $0x238] sm:$0xff]  }
  0x32   :  { %3225 = vmatpush3.bf16.msra.mxu1 %v3585_v13  ;;  %3162 = vmatprep.subr.bf16.mxu0 %v3586_v18  ;;  %v42_v13 = vld [vmem:[%s4716_s0 + $0xd8] sm:$0xff] }
  0x33   :  { %1863 = vmatmul.mubr.bf16.gmra.mxu0 %v2723_v2  ;;  %3226 = vmatprep.subr.bf16.mxu1 %v3588_v23  ;;  %v18_v2 = vld [vmem:[%s4716_s0 + $0x18] sm:$0xff]  ;;  %v2714_v18 = vcombine.high %v34_v12, %v42_v13  ;;  %v57_v23 = vld [vmem:[%s4716_s0 + $0x150] sm:$0xff]  ;;  %v2713_v29 = vcombine.low %v34_v12, %v42_v13  ;;  %v2761_v13 = vcombine.low %v82_v54, %v90_v55 }
  0x34   :  { %1960 = vmatmul.mubr.bf16.gmra.mxu1 %v2725_v6  ;;  %1870 = vmatprep.mubr.bf16.mxu0 %v2740_v7  ;;  %v2696_v6 = vcombine.high %v17_v0, %v25_v1  ;;  %v2698_v7 = vcombine.high %v18_v2, %v26_v3  ;;  %v2697_v14 = vcombine.low %v18_v2, %v26_v3  ;;  %v3627_v0 = vld [vmem:[%s4715_s1 + $0x208] sm:$0xff]   ;;  %v3630_v2 = vld [vmem:[%s4715_s1 + $0x240] sm:$0xff]   ;;  %v97_v3 = vld [vmem:[%s4716_s0 + $0x290] sm:$0xff] }
  0x35   :  { %1967 = vmatprep.mubr.bf16.mxu1 %v2742_v9  ;;  %3163 = vmatpush3.bf16.msra.mxu0 %v3587_v20  ;;  %v41_v9 = vld [vmem:[%s4716_s0 + $0xd0] sm:$0xff]  ;;  %v3629_v1 = vld [vmem:[%s4715_s1 + $0x288] sm:$0xff]   ;;  %v3636_v12 = vld [vmem:[%s4715_s1 + $0x3f8] sm:$0xff]  }
  0x36   :  { %3227 = vmatpush3.bf16.msra.mxu1 %v3589_v25  ;;  %3164 = vmatprep.subr.bf16.mxu0 %v3590_v28  ;;  %v2712_v16 = vcombine.high %v33_v8, %v41_v9  ;;  %v3608_v20 = vld [vmem:[%s4715_s1 + $0x2f0] sm:$0xff]   ;;  %v58_v25 = vld [vmem:[%s4716_s0 + $0x158] sm:$0xff]  ;;  %v2711_v28 = vcombine.low %v33_v8, %v41_v9  ;;  %v3631_v8 = vld [vmem:[%s4715_s1 + $0x200] sm:$0xff]  }
  0x37   :  { %3228 = vmatprep.subr.bf16.mxu1 %v3592_v32  ;;  %v3611_v32 = vld [vmem:[%s4715_s1 + $0x228] sm:$0xff]   ;;  %v3633_v9 = vld [vmem:[%s4715_s1 + $0x280] sm:$0xff]  }
  0x39   :  { %3165 = vmatpush3.bf16.msra.mxu0 %v3591_v31 }
  0x3a   :  { %3229 = vmatpush3.bf16.msra.mxu1 %v3593_v33  ;;  %3166 = vmatprep.subr.bf16.mxu0 %v3594_v38  ;;  %v3613_v33 = vld [vmem:[%s4715_s1 + $0x2a8] sm:$0xff]   ;;  %v66_v38 = vld [vmem:[%s4716_s0 + $0x198] sm:$0xff] }
  0x3b   :  { %1871 = vmatmul.mubr.bf16.gmra.mxu0 %v2739_v19  ;;  %3230 = vmatprep.subr.bf16.mxu1 %v3596_v40  ;;  %v3607_v19 = vld [vmem:[%s4715_s1 + $0x230] sm:$0xff]   ;;  %v3615_v40 = vld [vmem:[%s4715_s1 + $0x220] sm:$0xff]  }
  0x3c   :  { %1968 = vmatmul.mubr.bf16.gmra.mxu1 %v2741_v21  ;;  %1878 = vmatprep.mubr.bf16.mxu0 %v2756_v22  ;;  %v3609_v21 = vld [vmem:[%s4715_s1 + $0x2b0] sm:$0xff]  }
  0x3d   :  { %1975 = vmatprep.mubr.bf16.mxu1 %v2758_v24  ;;  %3167 = vmatpush3.bf16.msra.mxu0 %v3595_v39  ;;  %v49_v22 = vld [vmem:[%s4716_s0 + $0x110] sm:$0xff]  ;;  %v50_v24 = vld [vmem:[%s4716_s0 + $0x118] sm:$0xff] }
  0x3e   :  { %3231 = vmatpush3.bf16.msra.mxu1 %v3597_v43  ;;  %3168 = vmatprep.subr.bf16.mxu0 %v3598_v46  ;;  %v2728_v30 = vcombine.high %v49_v22, %v57_v23  ;;  %v2730_v31 = vcombine.high %v50_v24, %v58_v25  ;;  %v74_v39 = vld [vmem:[%s4716_s0 + $0x1d8] sm:$0xff]  ;;  %v2727_v43 = vcombine.low %v49_v22, %v57_v23 }
  0x3f   :  { %3232 = vmatprep.subr.bf16.mxu1 %v3600_v51  ;;  %v2729_v45 = vcombine.low %v50_v24, %v58_v25  ;;  %v81_v51 = vld [vmem:[%s4716_s0 + $0x210] sm:$0xff] }
  0x40   :  { %v129_v24 = vld [vmem:[%s4716_s0 + $0x390] sm:$0xff] }
  0x41   :  { %3169 = vmatpush3.bf16.msra.mxu0 %v3599_v48  ;;  %v2746_v48 = vcombine.high %v66_v38, %v74_v39  ;;  %v137_v25 = vld [vmem:[%s4716_s0 + $0x3d0] sm:$0xff] }
  0x42   :  { %3233 = vmatpush3.bf16.msra.mxu1 %v3601_v53  ;;  %3282 = vmatprep.subr.bf16.mxu0 %v3602_v56  ;;  %v89_v53 = vld [vmem:[%s4716_s0 + $0x250] sm:$0xff] }
  0x43   :  { %1879 = vmatmul.mubr.bf16.gmra.mxu0 %v2755_v34  ;;  %3346 = vmatprep.subr.bf16.mxu1 %v3604_v58  ;;  %v3614_v34 = vld [vmem:[%s4715_s1 + $0x260] sm:$0xff]   ;;  %v3623_v56 = vld [vmem:[%s4715_s1 + $0x210] sm:$0xff]   ;;  %v3626_v58 = vld [vmem:[%s4715_s1 + $0x248] sm:$0xff]  }
  0x44   :  { %1976 = vmatmul.mubr.bf16.gmra.mxu1 %v2757_v35  ;;  %1886 = vmatprep.mubr.bf16.mxu0 %v2772_v36  ;;  %v65_v35 = vld [vmem:[%s4716_s0 + $0x190] sm:$0xff] }
  0x45   :  { %1983 = vmatprep.mubr.bf16.mxu1 %v2774_v37  ;;  %v73_v36 = vld [vmem:[%s4716_s0 + $0x1d0] sm:$0xff]  ;;  %v3616_v37 = vld [vmem:[%s4715_s1 + $0x2e0] sm:$0xff]  }
  0x46   :  { %v2744_v46 = vcombine.high %v65_v35, %v73_v36  ;;  %v2743_v59 = vcombine.low %v65_v35, %v73_v36  ;;  %v28_v35 = vld [vmem:[%s4716_s0 + $0x68] sm:$0xff]  ;;  %v2807_v36 = vcombine.low %v129_v24, %v137_v25 }
  0x4b   :  { %1887 = vmatmul.mubr.bf16.gmra.mxu0 %v2771_v47  ;;  %v3619_v47 = vld [vmem:[%s4715_s1 + $0x218] sm:$0xff]  }
  0x4c   :  { %1984 = vmatmul.mubr.bf16.gmra.mxu1 %v2773_v49  ;;  %1894 = vmatprep.mubr.bf16.mxu0 %v2788_v50  ;;  %v3621_v49 = vld [vmem:[%s4715_s1 + $0x298] sm:$0xff]   ;;  %v3622_v50 = vld [vmem:[%s4715_s1 + $0x250] sm:$0xff]  }
  0x4d   :  { %1991 = vmatprep.mubr.bf16.mxu1 %v2790_v52  ;;  %v3624_v52 = vld [vmem:[%s4715_s1 + $0x2d0] sm:$0xff]  }
  0x53   :  { %1895 = vmatmul.mubr.bf16.gmra.mxu0 %v2787_v60  ;;  %v3628_v60 = vld [vmem:[%s4715_s1 + $0x2c8] sm:$0xff]  }
  0x54   :  { %1992 = vmatmul.mubr.bf16.gmra.mxu1 %v2789_v61  ;;  %1902 = vmatprep.mubr.bf16.mxu0 %v2804_v62  ;;  %v2745_v61 = vcombine.low %v66_v38, %v74_v39  ;;  %v2760_v62 = vcombine.high %v81_v51, %v89_v53 }
  0x55   :  { %1999 = vmatprep.mubr.bf16.mxu1 %v2806_v63  ;;  %v2762_v63 = vcombine.high %v82_v54, %v90_v55  ;;  %v51_v54 = vld [vmem:[%s4716_s0 + $0x120] sm:$0xff] }
  0x56   :  { %v59_v55 = vld [vmem:[%s4716_s0 + $0x160] sm:$0xff] }
  0x5b   :  { %1903 = vmatmul.mubr.bf16.gmra.mxu0 %v2803_v4  ;;  %v105_v4 = vld [vmem:[%s4716_s0 + $0x2d0] sm:$0xff] }
  0x5c   :  { %2000 = vmatmul.mubr.bf16.gmra.mxu1 %v2805_v5  ;;  %2040 = vmatprep.mubr.bf16.mxu0 %v2696_v6  ;;  %v3632_v5 = vld [vmem:[%s4715_s1 + $0x2c0] sm:$0xff]   ;;  %v98_v6 = vld [vmem:[%s4716_s0 + $0x298] sm:$0xff] }
  0x5d   :  { %2137 = vmatprep.mubr.bf16.mxu1 %v2698_v7  ;;  %v106_v7 = vld [vmem:[%s4716_s0 + $0x2d8] sm:$0xff] }
  0x63   :  { %2041 = vmatmul.mubr.bf16.vlgmr.msra.gmra.mxu0 %v2695_v10  ;;  %v3634_v10 = vld [vmem:[%s4715_s1 + $0x378] sm:$0xff]  }
  0x64   :  { %2138 = vmatmul.mubr.bf16.vlgmr.msra.gmra.mxu1 %v2697_v14  ;;  %3283 = vmatpush3.bf16.msra.mxu0 %v3603_v11  ;;  %v2759_v11 = vcombine.low %v81_v51, %v89_v53  ;;  %v2776_v14 = vcombine.high %v97_v3, %v105_v4  ;;  %v3640_v51 = vld [vmem:[%s4715_s1 + $0x3f0] sm:$0xff]  }
  0x65   :  { %3347 = vmatpush3.bf16.msra.mxu1 %v3605_v15  ;;  %2048 = vmatprep.mubr.bf16.mxu0 %v2712_v16  ;;  %v2778_v15 = vcombine.high %v98_v6, %v106_v7  ;;  %v113_v16 = vld [vmem:[%s4716_s0 + $0x310] sm:$0xff] }
  0x66   :  { %2145 = vmatprep.mubr.bf16.mxu1 %v2714_v18  ;;  %3284 = vmatprep.subr.bf16.mxu0 %v3606_v17  ;;  %v121_v17 = vld [vmem:[%s4716_s0 + $0x350] sm:$0xff]  ;;  %v114_v18 = vld [vmem:[%s4716_s0 + $0x318] sm:$0xff] }
  0x67   :  { %3348 = vmatprep.subr.bf16.mxu1 %v3608_v20  ;;  %v2775_v20 = vcombine.low %v97_v3, %v105_v4  ;;  %v2792_v22 = vcombine.high %v113_v16, %v121_v17  ;;  %v3641_v53 = vld [vmem:[%s4715_s1 + $0x3b0] sm:$0xff]   ;;  %v3648_v3 = vld [vmem:[%s4715_s1 + $0x3e0] sm:$0xff]  }
  0x68   :  { %3285 = vmatpush3.bf16.msra.mxu0 %v3607_v19  ;;  %v122_v19 = vld [vmem:[%s4716_s0 + $0x358] sm:$0xff]  ;;  %v67_v4 = vld [vmem:[%s4716_s0 + $0x1a0] sm:$0xff] }
  0x69   :  { %3349 = vmatpush3.bf16.msra.mxu1 %v3609_v21  ;;  %3286 = vmatprep.subr.bf16.mxu0 %v3610_v26  ;;  %v2777_v21 = vcombine.low %v98_v6, %v106_v7  ;;  %v2794_v23 = vcombine.high %v114_v18, %v122_v19  ;;  %v130_v26 = vld [vmem:[%s4716_s0 + $0x398] sm:$0xff]  ;;  %v68_v6 = vld [vmem:[%s4716_s0 + $0x1a8] sm:$0xff]  ;;  %v3647_v7 = vld [vmem:[%s4715_s1 + $0x320] sm:$0xff]  }
  0x6a   :  { %3350 = vmatprep.subr.bf16.mxu1 %v3612_v27  ;;  %v138_v27 = vld [vmem:[%s4716_s0 + $0x3d8] sm:$0xff] }
  0x6b   :  { %2049 = vmatmul.mubr.bf16.gmra.mxu0 %v2711_v28  ;;  %v2791_v28 = vcombine.low %v113_v16, %v121_v17  ;;  %v3651_v16 = vld [vmem:[%s4715_s1 + $0x318] sm:$0xff]  }
  0x6c   :  { %2146 = vmatmul.mubr.bf16.gmra.mxu1 %v2713_v29  ;;  %2056 = vmatprep.mubr.bf16.mxu0 %v2728_v30  ;;  %v2793_v29 = vcombine.low %v114_v18, %v122_v19  ;;  %v2808_v30 = vcombine.high %v129_v24, %v137_v25  ;;  %v3653_v17 = vld [vmem:[%s4715_s1 + $0x398] sm:$0xff]   ;;  %v3654_v18 = vld [vmem:[%s4715_s1 + $0x350] sm:$0xff]   ;;  %v92_v24 = vld [vmem:[%s4716_s0 + $0x268] sm:$0xff] }
  0x6d   :  { %2153 = vmatprep.mubr.bf16.mxu1 %v2730_v31  ;;  %3287 = vmatpush3.bf16.msra.mxu0 %v3611_v32  ;;  %v2810_v31 = vcombine.high %v130_v26, %v138_v27  ;;  %v19_v32 = vld [vmem:[%s4716_s0 + $0x20] sm:$0xff]  ;;  %v3656_v19 = vld [vmem:[%s4715_s1 + $0x3d0] sm:$0xff]  }
  0x6e   :  { %3351 = vmatpush3.bf16.msra.mxu1 %v3613_v33  ;;  %3288 = vmatprep.subr.bf16.mxu0 %v3614_v34  ;;  %v27_v33 = vld [vmem:[%s4716_s0 + $0x60] sm:$0xff]  ;;  %v20_v34 = vld [vmem:[%s4716_s0 + $0x28] sm:$0xff]  ;;  %v3657_v25 = vld [vmem:[%s4715_s1 + $0x390] sm:$0xff]  }
  0x6f   :  { %3352 = vmatprep.subr.bf16.mxu1 %v3616_v37  ;;  %v2809_v37 = vcombine.low %v130_v26, %v138_v27  ;;  %v2700_v38 = vcombine.high %v19_v32, %v27_v33  ;;  %v2702_v39 = vcombine.high %v20_v34, %v28_v35  ;;  %v3658_v26 = vld [vmem:[%s4715_s1 + $0x348] sm:$0xff]  }
  0x71   :  { %3289 = vmatpush3.bf16.msra.mxu0 %v3615_v40  ;;  %v35_v40 = vld [vmem:[%s4716_s0 + $0xa0] sm:$0xff] }
  0x72   :  { %3353 = vmatpush3.bf16.msra.mxu1 %v3617_v41  ;;  %3290 = vmatprep.subr.bf16.mxu0 %v3618_v42  ;;  %v43_v41 = vld [vmem:[%s4716_s0 + $0xe0] sm:$0xff]  ;;  %v2699_v42 = vcombine.low %v19_v32, %v27_v33  ;;  %v3659_v32 = vld [vmem:[%s4715_s1 + $0x308] sm:$0xff]  }
  0x73   :  { %2057 = vmatmul.mubr.bf16.gmra.mxu0 %v2727_v43  ;;  %3354 = vmatprep.subr.bf16.mxu1 %v3620_v44  ;;  %v36_v43 = vld [vmem:[%s4716_s0 + $0xa8] sm:$0xff] }
  0x74   :  { %2154 = vmatmul.mubr.bf16.gmra.mxu1 %v2729_v45  ;;  %2064 = vmatprep.mubr.bf16.mxu0 %v2744_v46  ;;  %v44_v44 = vld [vmem:[%s4716_s0 + $0xe8] sm:$0xff]  ;;  %v2701_v45 = vcombine.low %v20_v34, %v28_v35  ;;  %v3635_v46 = vld [vmem:[%s4715_s1 + $0x338] sm:$0xff]   ;;  %v3662_v34 = vld [vmem:[%s4715_s1 + $0x340] sm:$0xff]  }
  0x75   :  { %2161 = vmatprep.mubr.bf16.mxu1 %v2746_v48  ;;  %3291 = vmatpush3.bf16.msra.mxu0 %v3619_v47  ;;  %v3637_v47 = vld [vmem:[%s4715_s1 + $0x3b8] sm:$0xff]   ;;  %v2716_v48 = vcombine.high %v35_v40, %v43_v41  ;;  %v3661_v33 = vld [vmem:[%s4715_s1 + $0x388] sm:$0xff]   ;;  %v3664_v35 = vld [vmem:[%s4715_s1 + $0x3c0] sm:$0xff]  }
  0x76   :  { %3355 = vmatpush3.bf16.msra.mxu1 %v3621_v49  ;;  %3292 = vmatprep.subr.bf16.mxu0 %v3622_v50  ;;  %v2718_v49 = vcombine.high %v36_v43, %v44_v44  ;;  %v3638_v50 = vld [vmem:[%s4715_s1 + $0x370] sm:$0xff]  }
  0x77   :  { %3356 = vmatprep.subr.bf16.mxu1 %v3624_v52  ;;  %v3639_v52 = vld [vmem:[%s4715_s1 + $0x330] sm:$0xff]  }
  0x79   :  { %3293 = vmatpush3.bf16.msra.mxu0 %v3623_v56  ;;  %v3642_v56 = vld [vmem:[%s4715_s1 + $0x368] sm:$0xff]  }
  0x7a   :  { %3357 = vmatpush3.bf16.msra.mxu1 %v3625_v57  ;;  %3294 = vmatprep.subr.bf16.mxu0 %v3626_v58  ;;  %v52_v57 = vld [vmem:[%s4716_s0 + $0x128] sm:$0xff] }
  0x7b   :  { %2065 = vmatmul.mubr.bf16.gmra.mxu0 %v2743_v59  ;;  %3358 = vmatprep.subr.bf16.mxu1 %v3628_v60  ;;  %v60_v58 = vld [vmem:[%s4716_s0 + $0x168] sm:$0xff]  ;;  %v2715_v60 = vcombine.low %v35_v40, %v43_v41  ;;  %v3665_v41 = vld [vmem:[%s4715_s1 + $0x380] sm:$0xff]  }
  0x7c   :  { %2162 = vmatmul.mubr.bf16.gmra.mxu1 %v2745_v61  ;;  %2072 = vmatprep.mubr.bf16.mxu0 %v2760_v62  ;;  %v3644_v59 = vld [vmem:[%s4715_s1 + $0x3e8] sm:$0xff]   ;;  %v2717_v61 = vcombine.low %v36_v43, %v44_v44  ;;  %v2732_v62 = vcombine.high %v51_v54, %v59_v55 }
  0x7d   :  { %2169 = vmatprep.mubr.bf16.mxu1 %v2762_v63  ;;  %3295 = vmatpush3.bf16.msra.mxu0 %v3627_v0  ;;  %v2734_v63 = vcombine.high %v52_v57, %v60_v58  ;;  %v3643_v0 = vld [vmem:[%s4715_s1 + $0x328] sm:$0xff]  }
  0x7e   :  { %3359 = vmatpush3.bf16.msra.mxu1 %v3629_v1  ;;  %3296 = vmatprep.subr.bf16.mxu0 %v3630_v2  ;;  %v3645_v1 = vld [vmem:[%s4715_s1 + $0x3a8] sm:$0xff]   ;;  %v3646_v2 = vld [vmem:[%s4715_s1 + $0x360] sm:$0xff]  }
  0x7f   :  { %3360 = vmatprep.subr.bf16.mxu1 %v3632_v5  ;;  %v75_v5 = vld [vmem:[%s4716_s0 + $0x1e0] sm:$0xff]  ;;  %v108_v40 = vld [vmem:[%s4716_s0 + $0x2e8] sm:$0xff] }
  0x80   :  { %v2747_v27 = vcombine.low %v67_v4, %v75_v5 }
  0x81   :  { %3297 = vmatpush3.bf16.msra.mxu0 %v3631_v8  ;;  %v76_v8 = vld [vmem:[%s4716_s0 + $0x1e8] sm:$0xff] }
  0x82   :  { %3361 = vmatpush3.bf16.msra.mxu1 %v3633_v9  ;;  %3410 = vmatprep.subr.bf16.mxu0 %v3634_v10  ;;  %v3649_v9 = vld [vmem:[%s4715_s1 + $0x3a0] sm:$0xff]   ;;  %v3650_v10 = vld [vmem:[%s4715_s1 + $0x358] sm:$0xff]  }
  0x83   :  { %2073 = vmatmul.mubr.bf16.gmra.mxu0 %v2759_v11  ;;  %3474 = vmatprep.subr.bf16.mxu1 %v3636_v12  ;;  %v2731_v11 = vcombine.low %v51_v54, %v59_v55  ;;  %v3652_v12 = vld [vmem:[%s4715_s1 + $0x3d8] sm:$0xff]   ;;  %v131_v54 = vld [vmem:[%s4716_s0 + $0x3a0] sm:$0xff] }
  0x84   :  { %2170 = vmatmul.mubr.bf16.gmra.mxu1 %v2761_v13  ;;  %2080 = vmatprep.mubr.bf16.mxu0 %v2776_v14  ;;  %v2733_v13 = vcombine.low %v52_v57, %v60_v58  ;;  %v2748_v14 = vcombine.high %v67_v4, %v75_v5  ;;  %v139_v55 = vld [vmem:[%s4716_s0 + $0x3e0] sm:$0xff]  ;;  %v140_v57 = vld [vmem:[%s4716_s0 + $0x3e8] sm:$0xff] }
  0x85   :  { %2177 = vmatprep.mubr.bf16.mxu1 %v2778_v15  ;;  %v2750_v15 = vcombine.high %v68_v6, %v76_v8 }
  0x8b   :  { %2081 = vmatmul.mubr.bf16.gmra.mxu0 %v2775_v20  ;;  %v83_v20 = vld [vmem:[%s4716_s0 + $0x220] sm:$0xff] }
  0x8c   :  { %2178 = vmatmul.mubr.bf16.gmra.mxu1 %v2777_v21  ;;  %2088 = vmatprep.mubr.bf16.mxu0 %v2792_v22  ;;  %v91_v21 = vld [vmem:[%s4716_s0 + $0x260] sm:$0xff]  ;;  %v84_v22 = vld [vmem:[%s4716_s0 + $0x228] sm:$0xff] }
  0x8d   :  { %2185 = vmatprep.mubr.bf16.mxu1 %v2794_v23  ;;  %v3655_v23 = vld [vmem:[%s4715_s1 + $0x310] sm:$0xff]   ;;  %v2765_v43 = vcombine.low %v84_v22, %v92_v24 }
  0x93   :  { %2089 = vmatmul.mubr.bf16.gmra.mxu0 %v2791_v28  ;;  %v3660_v28 = vld [vmem:[%s4715_s1 + $0x3c8] sm:$0xff]  }
  0x94   :  { %2186 = vmatmul.mubr.bf16.gmra.mxu1 %v2793_v29  ;;  %2096 = vmatprep.mubr.bf16.mxu0 %v2808_v30  ;;  %v2749_v29 = vcombine.low %v68_v6, %v76_v8  ;;  %v2764_v30 = vcombine.high %v83_v20, %v91_v21  ;;  %v37_v6 = vld [vmem:[%s4716_s0 + $0xb0] sm:$0xff]  ;;  %v38_v8 = vld [vmem:[%s4716_s0 + $0xb8] sm:$0xff] }
  0x95   :  { %2193 = vmatprep.mubr.bf16.mxu1 %v2810_v31  ;;  %v2766_v31 = vcombine.high %v84_v22, %v92_v24  ;;  %v54_v22 = vld [vmem:[%s4716_s0 + $0x138] sm:$0xff] }
  0x9b   :  { %2097 = vmatmul.mubr.bf16.gmra.mxu0 %v2807_v36  ;;  %v99_v36 = vld [vmem:[%s4716_s0 + $0x2a0] sm:$0xff] }
  0x9c   :  { %2194 = vmatmul.mubr.bf16.gmra.mxu1 %v2809_v37  ;;  %2234 = vmatprep.mubr.bf16.mxu0 %v2700_v38  ;;  %v107_v37 = vld [vmem:[%s4716_s0 + $0x2e0] sm:$0xff] }
  0x9d   :  { %2331 = vmatprep.mubr.bf16.mxu1 %v2702_v39  ;;  %v3663_v38 = vld [vmem:[%s4715_s1 + $0x300] sm:$0xff]   ;;  %v100_v39 = vld [vmem:[%s4716_s0 + $0x2a8] sm:$0xff]  ;;  %v2780_v44 = vcombine.high %v99_v36, %v107_v37 }
  0xa3   :  { %2235 = vmatmul.mubr.bf16.vlgmr.msra.gmra.mxu0 %v2699_v42  ;;  %v2763_v42 = vcombine.low %v83_v20, %v91_v21 }
  0xa4   :  { %2332 = vmatmul.mubr.bf16.vlgmr.msra.gmra.mxu1 %v2701_v45  ;;  %3411 = vmatpush3.bf16.msra.mxu0 %v3635_v46  ;;  %v2782_v45 = vcombine.high %v100_v39, %v108_v40  ;;  %v115_v46 = vld [vmem:[%s4716_s0 + $0x320] sm:$0xff] }
  0xa5   :  { %3475 = vmatpush3.bf16.msra.mxu1 %v3637_v47  ;;  %2242 = vmatprep.mubr.bf16.mxu0 %v2716_v48  ;;  %v123_v47 = vld [vmem:[%s4716_s0 + $0x360] sm:$0xff]  ;;  %v116_v48 = vld [vmem:[%s4716_s0 + $0x328] sm:$0xff] }
  0xa6   :  { %2339 = vmatprep.mubr.bf16.mxu1 %v2718_v49  ;;  %3412 = vmatprep.subr.bf16.mxu0 %v3638_v50  ;;  %v124_v49 = vld [vmem:[%s4716_s0 + $0x368] sm:$0xff]  ;;  %v2779_v50 = vcombine.low %v99_v36, %v107_v37  ;;  %v2795_v58 = vcombine.low %v115_v46, %v123_v47 }
  0xa7   :  { %3476 = vmatprep.subr.bf16.mxu1 %v3640_v51  ;;  %v2781_v51 = vcombine.low %v100_v39, %v108_v40 }
  0xa8   :  { %3413 = vmatpush3.bf16.msra.mxu0 %v3639_v52  ;;  %v2796_v52 = vcombine.high %v115_v46, %v123_v47  ;;  %v70_v46 = vld [vmem:[%s4716_s0 + $0x1b8] sm:$0xff] }
  0xa9   :  { %3477 = vmatpush3.bf16.msra.mxu1 %v3641_v53  ;;  %3414 = vmatprep.subr.bf16.mxu0 %v3642_v56  ;;  %v2798_v53 = vcombine.high %v116_v48, %v124_v49  ;;  %v132_v56 = vld [vmem:[%s4716_s0 + $0x3a8] sm:$0xff]  ;;  %v78_v47 = vld [vmem:[%s4716_s0 + $0x1f8] sm:$0xff] }
  0xaa   :  { %3478 = vmatprep.subr.bf16.mxu1 %v3644_v59  ;;  %v2797_v59 = vcombine.low %v116_v48, %v124_v49 }
  0xab   :  { %2243 = vmatmul.mubr.bf16.gmra.mxu0 %v2715_v60  ;;  %v2812_v60 = vcombine.high %v131_v54, %v139_v55 }
  0xac   :  { %2340 = vmatmul.mubr.bf16.gmra.mxu1 %v2717_v61  ;;  %2250 = vmatprep.mubr.bf16.mxu0 %v2732_v62  ;;  %v2814_v61 = vcombine.high %v132_v56, %v140_v57  ;;  %v21_v62 = vld [vmem:[%s4716_s0 + $0x30] sm:$0xff] }
  0xad   :  { %2347 = vmatprep.mubr.bf16.mxu1 %v2734_v63  ;;  %3415 = vmatpush3.bf16.msra.mxu0 %v3643_v0  ;;  %v29_v63 = vld [vmem:[%s4716_s0 + $0x70] sm:$0xff]  ;;  %v22_v0 = vld [vmem:[%s4716_s0 + $0x38] sm:$0xff] }
  0xae   :  { %3479 = vmatpush3.bf16.msra.mxu1 %v3645_v1  ;;  %3416 = vmatprep.subr.bf16.mxu0 %v3646_v2  ;;  %v30_v1 = vld [vmem:[%s4716_s0 + $0x78] sm:$0xff]  ;;  %v2811_v2 = vcombine.low %v131_v54, %v139_v55  ;;  %v2704_v4 = vcombine.high %v21_v62, %v29_v63 }
  0xaf   :  { %3480 = vmatprep.subr.bf16.mxu1 %v3648_v3  ;;  %v2813_v3 = vcombine.low %v132_v56, %v140_v57  ;;  %v2706_v5 = vcombine.high %v22_v0, %v30_v1  ;;  %v2754_v56 = vcombine.high %v70_v46, %v78_v47 }
  0xb1   :  { %3417 = vmatpush3.bf16.msra.mxu0 %v3647_v7  ;;  %v45_v7 = vld [vmem:[%s4716_s0 + $0xf0] sm:$0xff] }
  0xb2   :  { %3481 = vmatpush3.bf16.msra.mxu1 %v3649_v9  ;;  %3418 = vmatprep.subr.bf16.mxu0 %v3650_v10  ;;  %v46_v9 = vld [vmem:[%s4716_s0 + $0xf8] sm:$0xff]  ;;  %v2703_v10 = vcombine.low %v21_v62, %v29_v63 }
  0xb3   :  { %2251 = vmatmul.mubr.bf16.gmra.mxu0 %v2731_v11  ;;  %3482 = vmatprep.subr.bf16.mxu1 %v3652_v12  ;;  %v2705_v11 = vcombine.low %v22_v0, %v30_v1  ;;  %v2720_v12 = vcombine.high %v37_v6, %v45_v7  ;;  %v85_v1 = vld [vmem:[%s4716_s0 + $0x230] sm:$0xff] }
  0xb4   :  { %2348 = vmatmul.mubr.bf16.gmra.mxu1 %v2733_v13  ;;  %2258 = vmatprep.mubr.bf16.mxu0 %v2748_v14  ;;  %v2722_v13 = vcombine.high %v38_v8, %v46_v9 }
  0xb5   :  { %2355 = vmatprep.mubr.bf16.mxu1 %v2750_v15  ;;  %3419 = vmatpush3.bf16.msra.mxu0 %v3651_v16  ;;  %v4385_v16 = vld [vmem:[%s4717_s2] ss:$0 sm:$0xff] }
  0xb6   :  { %3483 = vmatpush3.bf16.msra.mxu1 %v3653_v17  ;;  %3420 = vmatprep.subr.bf16.mxu0 %v3654_v18  ;;  %v53_v18 = vld [vmem:[%s4716_s0 + $0x130] sm:$0xff] }
  0xb7   :  { %3484 = vmatprep.subr.bf16.mxu1 %v3656_v19  ;;  %v61_v19 = vld [vmem:[%s4716_s0 + $0x170] sm:$0xff] }
  0xb9   :  { %3421 = vmatpush3.bf16.msra.mxu0 %v3655_v23  ;;  %v62_v23 = vld [vmem:[%s4716_s0 + $0x178] sm:$0xff] }
  0xba   :  { %3485 = vmatpush3.bf16.msra.mxu1 %v3657_v25  ;;  %3422 = vmatprep.subr.bf16.mxu0 %v3658_v26  ;;  %v2719_v26 = vcombine.low %v37_v6, %v45_v7  ;;  %v86_v6 = vld [vmem:[%s4716_s0 + $0x238] sm:$0xff] }
  0xbb   :  { %2259 = vmatmul.mubr.bf16.gmra.mxu0 %v2747_v27  ;;  %3486 = vmatprep.subr.bf16.mxu1 %v3660_v28  ;;  %v94_v7 = vld [vmem:[%s4716_s0 + $0x278] sm:$0xff] }
  0xbc   :  { %2356 = vmatmul.mubr.bf16.gmra.mxu1 %v2749_v29  ;;  %2266 = vmatprep.mubr.bf16.mxu0 %v2764_v30  ;;  %v2721_v29 = vcombine.low %v38_v8, %v46_v9  ;;  %v2736_v30 = vcombine.high %v53_v18, %v61_v19 }
  0xbd   :  { %2363 = vmatprep.mubr.bf16.mxu1 %v2766_v31  ;;  %3423 = vmatpush3.bf16.msra.mxu0 %v3659_v32  ;;  %v2738_v32 = vcombine.high %v54_v22, %v62_v23 }
  0xbe   :  { %3487 = vmatpush3.bf16.msra.mxu1 %v3661_v33  ;;  %3424 = vmatprep.subr.bf16.mxu0 %v3662_v34 }
  0xbf   :  { %3488 = vmatprep.subr.bf16.mxu1 %v3664_v35 }
  0xc1   :  { %3425 = vmatpush3.bf16.msra.mxu0 %v3663_v38 }
  0xc2   :  { %3489 = vmatpush3.bf16.msra.mxu1 %v3665_v41  ;;  %v69_v41 = vld [vmem:[%s4716_s0 + $0x1b0] sm:$0xff] }
  0xc3   :  { %2267 = vmatmul.mubr.bf16.gmra.mxu0 %v2763_v42  ;;  %v77_v42 = vld [vmem:[%s4716_s0 + $0x1f0] sm:$0xff] }
  0xc4   :  { %2364 = vmatmul.mubr.bf16.gmra.mxu1 %v2765_v43  ;;  %2274 = vmatprep.mubr.bf16.mxu0 %v2780_v44  ;;  %v2752_v54 = vcombine.high %v69_v41, %v77_v42 }
  0xc5   :  { %2371 = vmatprep.mubr.bf16.mxu1 %v2782_v45 }
  0xcb   :  { %2275 = vmatmul.mubr.bf16.gmra.mxu0 %v2779_v50  ;;  %v2735_v50 = vcombine.low %v53_v18, %v61_v19 }
  0xcc   :  { %2372 = vmatmul.mubr.bf16.gmra.mxu1 %v2781_v51  ;;  %2282 = vmatprep.mubr.bf16.mxu0 %v2796_v52 }
  0xcd   :  { %2379 = vmatprep.mubr.bf16.mxu1 %v2798_v53  ;;  %v2737_v53 = vcombine.low %v54_v22, %v62_v23 }
  0xd3   :  { %2283 = vmatmul.mubr.bf16.gmra.mxu0 %v2795_v58 }
  0xd4   :  { %2380 = vmatmul.mubr.bf16.gmra.mxu1 %v2797_v59  ;;  %2290 = vmatprep.mubr.bf16.mxu0 %v2812_v60 }
  0xd5   :  { %2387 = vmatprep.mubr.bf16.mxu1 %v2814_v61 }
  0xdb   :  { %2291 = vmatmul.mubr.bf16.gmra.mxu0 %v2811_v2  ;;  %v93_v2 = vld [vmem:[%s4716_s0 + $0x270] sm:$0xff] }
  0xdc   :  { %2388 = vmatmul.mubr.bf16.gmra.mxu1 %v2813_v3  ;;  %2428 = vmatprep.mubr.bf16.mxu0 %v2704_v4 }
  0xdd   :  { %2525 = vmatprep.mubr.bf16.mxu1 %v2706_v5 }
  0xe3   :  { %v3042_v14 = vpop.f32.mrf.mxu0  ;;  %2429 = vmatmul.mubr.bf16.vlgmr.msra.gmra.mxu0 %v2703_v10  ;;  %v2751_v10 = vcombine.low %v69_v41, %v77_v42 }
  0xe4   :  { %v3106_v15 = vpop.f32.mrf.mxu1  ;;  %2526 = vmatmul.mubr.bf16.vlgmr.msra.gmra.mxu1 %v2705_v11  ;;  %2436 = vmatprep.mubr.bf16.mxu0 %v2720_v12 }
  0xe5   :  { %v3043_v17 = vpop.f32.mrf.mxu0  ;;  %2533 = vmatprep.mubr.bf16.mxu1 %v2722_v13  ;;  %v2753_v13 = vcombine.low %v70_v46, %v78_v47 }
  0xe6   :  { %v3044_v20 = vadd.f32 %v3043_v17, %v3042_v14  ;;  %v3107_v21 = vpop.f32.mrf.mxu1  ;;  %v2768_v14 = vcombine.high %v85_v1, %v93_v2  ;;  %v2770_v17 = vcombine.high %v86_v6, %v94_v7 }
  0xe7   :  { %v3108_v24 = vadd.f32 %v3107_v21, %v3106_v15  ;;  %v3045_v25 = vpop.f32.mrf.mxu0 }
  0xe8   :  { %v1849_v27 = vadd.f32 %v3044_v20, %v4385_v16  ;;  %v3109_v28 = vpop.f32.mrf.mxu1 }
  0xe9   :  { %v3046_v31 = vpop.f32.mrf.mxu0 }
  0xea   :  { %v4400_v33 = vadd.f32 %v3108_v24, %v1849_v27  ;;  %v3047_v34 = vadd.f32 %v3046_v31, %v3045_v25  ;;  %v3110_v35 = vpop.f32.mrf.mxu1  ;;  %v109_v27 = vld [vmem:[%s4716_s0 + $0x2f0] sm:$0xff]  ;;  %v102_v31 = vld [vmem:[%s4716_s0 + $0x2b8] sm:$0xff] }
  0xeb   :  { %v3111_v36 = vadd.f32 %v3110_v35, %v3109_v28  ;;  %v3048_v37 = vpop.f32.mrf.mxu0  ;;  %2437 = vmatmul.mubr.bf16.gmra.mxu0 %v2719_v26  ;;  %v101_v26 = vld [vmem:[%s4716_s0 + $0x2b0] sm:$0xff] }
  0xec   :  { %v1852_v38 = vadd.f32 %v3047_v34, %v4385_v16  ;;  %v3112_v39 = vpop.f32.mrf.mxu1  ;;  %2534 = vmatmul.mubr.bf16.gmra.mxu1 %v2721_v29  ;;  %2444 = vmatprep.mubr.bf16.mxu0 %v2736_v30 }
  0xed   :  { %v3049_v40 = vpop.f32.mrf.mxu0  ;;  %2541 = vmatprep.mubr.bf16.mxu1 %v2738_v32  ;;  %v110_v32 = vld [vmem:[%s4716_s0 + $0x2f8] sm:$0xff] }
  0xee   :  { %v4409_v43 = vadd.f32 %v3111_v36, %v1852_v38  ;;  %v3050_v44 = vadd.f32 %v3049_v40, %v3048_v37  ;;  %v3113_v45 = vpop.f32.mrf.mxu1  ;;  %v2767_v36 = vcombine.low %v85_v1, %v93_v2  ;;  %v2784_v40 = vcombine.high %v101_v26, %v109_v27 }
  0xef   :  { %v3114_v48 = vadd.f32 %v3113_v45, %v3112_v39  ;;  %v3051_v49 = vpop.f32.mrf.mxu0  ;;  %v2769_v39 = vcombine.low %v86_v6, %v94_v7  ;;  %v2786_v42 = vcombine.high %v102_v31, %v110_v32  ;;  %v2785_v1 = vcombine.low %v102_v31, %v110_v32 }
  0xf0   :  { %v1857_v51 = vadd.f32 %v3050_v44, %v4385_v16  ;;  %v3115_v52 = vpop.f32.mrf.mxu1 }
  0xf1   :  { %v3052_v55 = vpop.f32.mrf.mxu0 }
  0xf2   :  { %v4418_v57 = vadd.f32 %v3114_v48, %v1857_v51  ;;  %v3053_v58 = vadd.f32 %v3052_v55, %v3051_v49  ;;  %v3116_v59 = vpop.f32.mrf.mxu1 }
  0xf3   :  { %v3117_v60 = vadd.f32 %v3116_v59, %v3115_v52  ;;  %v3054_v61 = vpop.f32.mrf.mxu0  ;;  %2445 = vmatmul.mubr.bf16.gmra.mxu0 %v2735_v50  ;;  %v117_v52 = vld [vmem:[%s4716_s0 + $0x330] sm:$0xff]  ;;  %v126_v59 = vld [vmem:[%s4716_s0 + $0x378] sm:$0xff] }
  0xf4   :  { %v1860_v62 = vadd.f32 %v3053_v58, %v4385_v16  ;;  %v3118_v63 = vpop.f32.mrf.mxu1  ;;  %2542 = vmatmul.mubr.bf16.gmra.mxu1 %v2737_v53  ;;  %2452 = vmatprep.mubr.bf16.mxu0 %v2752_v54  ;;  %v125_v53 = vld [vmem:[%s4716_s0 + $0x370] sm:$0xff]  ;;  %v118_v58 = vld [vmem:[%s4716_s0 + $0x338] sm:$0xff] }
  0xf5   :  { %v3055_v0 = vpop.f32.mrf.mxu0  ;;  %2549 = vmatprep.mubr.bf16.mxu1 %v2754_v56  ;;  %v2800_v2 = vcombine.high %v117_v52, %v125_v53 }
  0xf6   :  { %v4427_v3 = vadd.f32 %v3117_v60, %v1860_v62  ;;  %v3056_v4 = vadd.f32 %v3055_v0, %v3054_v61  ;;  %v3119_v5 = vpop.f32.mrf.mxu1  ;;  %v2783_v62 = vcombine.low %v101_v26, %v109_v27 }
  0xf7   :  { %v3120_v8 = vadd.f32 %v3119_v5, %v3118_v63  ;;  %v3057_v9 = vpop.f32.mrf.mxu0  ;;  %v2802_v5 = vcombine.high %v118_v58, %v126_v59 }
  0xf8   :  { %v1865_v11 = vadd.f32 %v3056_v4, %v4385_v16  ;;  %v3121_v12 = vpop.f32.mrf.mxu1 }
  0xf9   :  { %v3058_v15 = vpop.f32.mrf.mxu0 }
  0xfa   :  { %v4436_v18 = vadd.f32 %v3120_v8, %v1865_v11  ;;  %v3059_v19 = vadd.f32 %v3058_v15, %v3057_v9  ;;  %v3122_v20 = vpop.f32.mrf.mxu1  ;;  %v141_v15 = vld [vmem:[%s4716_s0 + $0x3f0] sm:$0xff] }
  0xfb   :  { %v3123_v21 = vadd.f32 %v3122_v20, %v3121_v12  ;;  %v3060_v22 = vpop.f32.mrf.mxu0  ;;  %2453 = vmatmul.mubr.bf16.gmra.mxu0 %v2751_v10 }
  0xfc   :  { %v1868_v23 = vadd.f32 %v3059_v19, %v4385_v16  ;;  %v3124_v24 = vpop.f32.mrf.mxu1  ;;  %2550 = vmatmul.mubr.bf16.gmra.mxu1 %v2753_v13  ;;  %2460 = vmatprep.mubr.bf16.mxu0 %v2768_v14  ;;  %v133_v14 = vld [vmem:[%s4716_s0 + $0x3b0] sm:$0xff] }
  0xfd   :  { %v3061_v25 = vpop.f32.mrf.mxu0  ;;  %2557 = vmatprep.mubr.bf16.mxu1 %v2770_v17 }
  0xfe   :  { %v4445_v28 = vadd.f32 %v3123_v21, %v1868_v23  ;;  %v3062_v29 = vadd.f32 %v3061_v25, %v3060_v22  ;;  %v3125_v30 = vpop.f32.mrf.mxu1  ;;  %v134_v21 = vld [vmem:[%s4716_s0 + $0x3b8] sm:$0xff]  ;;  %v2799_v25 = vcombine.low %v117_v52, %v125_v53 }
  0xff   :  { %v3126_v34 = vadd.f32 %v3125_v30, %v3124_v24  ;;  %v3063_v35 = vpop.f32.mrf.mxu0  ;;  %v142_v22 = vld [vmem:[%s4716_s0 + $0x3f8] sm:$0xff]  ;;  %v2816_v30 = vcombine.high %v133_v14, %v141_v15 }
 0x100   :  { %v1873_v37 = vadd.f32 %v3062_v29, %v4385_v16  ;;  %v3127_v38 = vpop.f32.mrf.mxu1  ;;  %v2801_v29 = vcombine.low %v118_v58, %v126_v59  ;;  %v2818_v32 = vcombine.high %v134_v21, %v142_v22  ;;  %v2817_v52 = vcombine.low %v134_v21, %v142_v22 }
 0x101   :  { %v3064_v41 = vpop.f32.mrf.mxu0 }
 0x102   :  { %v4454_v44 = vadd.f32 %v3126_v34, %v1873_v37  ;;  %v3065_v45 = vadd.f32 %v3064_v41, %v3063_v35  ;;  %v3128_v46 = vpop.f32.mrf.mxu1 }
 0x103   :  { %v3129_v47 = vadd.f32 %v3128_v46, %v3127_v38  ;;  %v3066_v48 = vpop.f32.mrf.mxu0  ;;  %2461 = vmatmul.mubr.bf16.gmra.mxu0 %v2767_v36 }
 0x104   :  { %v1876_v49 = vadd.f32 %v3065_v45, %v4385_v16  ;;  %v3130_v50 = vpop.f32.mrf.mxu1  ;;  %2558 = vmatmul.mubr.bf16.gmra.mxu1 %v2769_v39  ;;  %2468 = vmatprep.mubr.bf16.mxu0 %v2784_v40 }
 0x105   :  { %v3067_v51 = vpop.f32.mrf.mxu0  ;;  %2565 = vmatprep.mubr.bf16.mxu1 %v2786_v42 }
 0x106   :  { %v4463_v54 = vadd.f32 %v3129_v47, %v1876_v49  ;;  %v3068_v55 = vadd.f32 %v3067_v51, %v3066_v48  ;;  %v3131_v56 = vpop.f32.mrf.mxu1  ;;  %v2815_v49 = vcombine.low %v133_v14, %v141_v15 }
 0x107   :  { %v3132_v60 = vadd.f32 %v3131_v56, %v3130_v50  ;;  %v3069_v61 = vpop.f32.mrf.mxu0 }
 0x108   :  { %v1881_v63 = vadd.f32 %v3068_v55, %v4385_v16  ;;  %v3133_v0 = vpop.f32.mrf.mxu1 }
 0x109   :  { %v3070_v4 = vpop.f32.mrf.mxu0 }
 0x10a   :  { %v4472_v6 = vadd.f32 %v3132_v60, %v1881_v63  ;;  %v3071_v7 = vadd.f32 %v3070_v4, %v3069_v61  ;;  %v3134_v8 = vpop.f32.mrf.mxu1 }
 0x10b   :  { %v3135_v9 = vadd.f32 %v3134_v8, %v3133_v0  ;;  %v3072_v10 = vpop.f32.mrf.mxu0  ;;  %2469 = vmatmul.mubr.bf16.gmra.mxu0 %v2783_v62 }
 0x10c   :  { %v1884_v11 = vadd.f32 %v3071_v7, %v4385_v16  ;;  %v3136_v12 = vpop.f32.mrf.mxu1  ;;  %2566 = vmatmul.mubr.bf16.gmra.mxu1 %v2785_v1  ;;  %2476 = vmatprep.mubr.bf16.mxu0 %v2800_v2 }
 0x10d   :  { %v3073_v13 = vpop.f32.mrf.mxu0  ;;  %2573 = vmatprep.mubr.bf16.mxu1 %v2802_v5 }
 0x10e   :  { %v4481_v17 = vadd.f32 %v3135_v9, %v1884_v11  ;;  %v3074_v19 = vadd.f32 %v3073_v13, %v3072_v10  ;;  %v3137_v20 = vpop.f32.mrf.mxu1 }
 0x10f   :  { %v3138_v23 = vadd.f32 %v3137_v20, %v3136_v12  ;;  %v3075_v24 = vpop.f32.mrf.mxu0 }
 0x110   :  { %v1889_v26 = vadd.f32 %v3074_v19, %v4385_v16  ;;  %v3139_v27 = vpop.f32.mrf.mxu1 }
 0x111   :  { %v3076_v31 = vpop.f32.mrf.mxu0 }
 0x112   :  { %v4490_v34 = vadd.f32 %v3138_v23, %v1889_v26  ;;  %v3077_v35 = vadd.f32 %v3076_v31, %v3075_v24  ;;  %v3140_v36 = vpop.f32.mrf.mxu1 }
 0x113   :  { %v3141_v37 = vadd.f32 %v3140_v36, %v3139_v27  ;;  %v3078_v38 = vpop.f32.mrf.mxu0  ;;  %2477 = vmatmul.mubr.bf16.gmra.mxu0 %v2799_v25 }
 0x114   :  { %v1892_v39 = vadd.f32 %v3077_v35, %v4385_v16  ;;  %v3142_v40 = vpop.f32.mrf.mxu1  ;;  %2574 = vmatmul.mubr.bf16.gmra.mxu1 %v2801_v29  ;;  %2484 = vmatprep.mubr.bf16.mxu0 %v2816_v30 }
 0x115   :  { %v3079_v41 = vpop.f32.mrf.mxu0  ;;  %2581 = vmatprep.mubr.bf16.mxu1 %v2818_v32 }
 0x116   :  { %v4493_v42 = vadd.f32 %v3141_v37, %v1892_v39  ;;  %v3080_v45 = vadd.f32 %v3079_v41, %v3078_v38  ;;  %v3143_v46 = vpop.f32.mrf.mxu1 }
 0x117   :  { %v3144_v47 = vadd.f32 %v3143_v46, %v3142_v40  ;;  %v3081_v48 = vpop.f32.mrf.mxu0 }
 0x118   :  { %v1897_v50 = vadd.f32 %v3080_v45, %v4385_v16  ;;  %v3145_v51 = vpop.f32.mrf.mxu1 }
 0x119   :  { %v3082_v53 = vpop.f32.mrf.mxu0 }
 0x11a   :  { %v4496_v55 = vadd.f32 %v3144_v47, %v1897_v50  ;;  %v3083_v56 = vadd.f32 %v3082_v53, %v3081_v48  ;;  %v3146_v58 = vpop.f32.mrf.mxu1 }
 0x11b   :  { %v3147_v59 = vadd.f32 %v3146_v58, %v3145_v51  ;;  %v3084_v60 = vpop.f32.mrf.mxu0  ;;  %2485 = vmatmul.mubr.bf16.gmra.mxu0 %v2815_v49 }
 0x11c   :  { %v1900_v61 = vadd.f32 %v3083_v56, %v4385_v16  ;;  %v3148_v62 = vpop.f32.mrf.mxu1  ;;  %2582 = vmatmul.mubr.bf16.gmra.mxu1 %v2817_v52 }
 0x11d   :  { %v3085_v63 = vpop.f32.mrf.mxu0 }
 0x11e   :  { %v4499_v0 = vadd.f32 %v3147_v59, %v1900_v61  ;;  %v3086_v1 = vadd.f32 %v3085_v63, %v3084_v60  ;;  %v3149_v2 = vpop.f32.mrf.mxu1 }
 0x11f   :  { %v3150_v4 = vadd.f32 %v3149_v2, %v3148_v62  ;;  %v3087_v5 = vpop.f32.mrf.mxu0 }
 0x120   :  { %v1905_v7 = vadd.f32 %v3086_v1, %v4385_v16  ;;  %v3151_v8 = vpop.f32.mrf.mxu1 }
 0x121   :  { %v3088_v9 = vpop.f32.mrf.mxu0 }
 0x122   :  { %v4502_v10 = vadd.f32 %v3150_v4, %v1905_v7  ;;  %v3089_v11 = vadd.f32 %v3088_v9, %v3087_v5  ;;  %v3152_v12 = vpop.f32.mrf.mxu1 }
 0x123   :  { %v3153_v13 = vadd.f32 %v3152_v12, %v3151_v8  ;;  %v3170_v14 = vpop.f32.mrf.mxu0 }
 0x124   :  { %v1908_v15 = vadd.f32 %v3089_v11, %v4385_v16  ;;  %v3234_v19 = vpop.f32.mrf.mxu1 }
 0x125   :  { %v3171_v20 = vpop.f32.mrf.mxu0 }
 0x126   :  { %v4505_v21 = vadd.f32 %v3153_v13, %v1908_v15  ;;  %v3172_v22 = vadd.f32 %v3171_v20, %v3170_v14  ;;  %v3235_v23 = vpop.f32.mrf.mxu1 }
 0x127   :  { %v3236_v24 = vadd.f32 %v3235_v23, %v3234_v19  ;;  %v3173_v25 = vpop.f32.mrf.mxu0 }
 0x128   :  { %v2043_v26 = vadd.f32 %v3172_v22, %v4400_v33  ;;  %v3237_v27 = vpop.f32.mrf.mxu1 }
 0x129   :  { %v3174_v29 = vpop.f32.mrf.mxu0 }
 0x12a   :  { %v4508_v30 = vadd.f32 %v3236_v24, %v2043_v26  ;;  %v3175_v31 = vadd.f32 %v3174_v29, %v3173_v25  ;;  %v3238_v32 = vpop.f32.mrf.mxu1 }
 0x12b   :  { %v3239_v35 = vadd.f32 %v3238_v32, %v3237_v27  ;;  %v3176_v36 = vpop.f32.mrf.mxu0 }
 0x12c   :  { %v2046_v16 = vadd.f32 %v3175_v31, %v4409_v43  ;;  %v3240_v37 = vpop.f32.mrf.mxu1 }
 0x12d   :  { %v3177_v38 = vpop.f32.mrf.mxu0 }
 0x12e   :  { %v4511_v39 = vadd.f32 %v3239_v35, %v2046_v16  ;;  %v3178_v40 = vadd.f32 %v3177_v38, %v3176_v36  ;;  %v3241_v41 = vpop.f32.mrf.mxu1 }
 0x12f   :  { %v3242_v45 = vadd.f32 %v3241_v41, %v3240_v37  ;;  %v3179_v46 = vpop.f32.mrf.mxu0 }
 0x130   :  { %v2051_v33 = vadd.f32 %v3178_v40, %v4418_v57  ;;  %v3243_v47 = vpop.f32.mrf.mxu1 }
 0x131   :  { %v3180_v48 = vpop.f32.mrf.mxu0 }
 0x132   :  { %v4514_v49 = vadd.f32 %v3242_v45, %v2051_v33  ;;  %v3181_v50 = vadd.f32 %v3180_v48, %v3179_v46  ;;  %v3244_v51 = vpop.f32.mrf.mxu1 }
 0x133   :  { %v3245_v52 = vadd.f32 %v3244_v51, %v3243_v47  ;;  %v3182_v53 = vpop.f32.mrf.mxu0 }
 0x134   :  { %v2054_v43 = vadd.f32 %v3181_v50, %v4427_v3  ;;  %v3246_v56 = vpop.f32.mrf.mxu1 }
 0x135   :  { %v3183_v58 = vpop.f32.mrf.mxu0 }
 0x136   :  { %v4517_v59 = vadd.f32 %v3245_v52, %v2054_v43  ;;  %v3184_v60 = vadd.f32 %v3183_v58, %v3182_v53  ;;  %v3247_v61 = vpop.f32.mrf.mxu1 }
 0x137   :  { %v3248_v62 = vadd.f32 %v3247_v61, %v3246_v56  ;;  %v3185_v63 = vpop.f32.mrf.mxu0 }
 0x138   :  { %v2059_v57 = vadd.f32 %v3184_v60, %v4436_v18  ;;  %v3249_v1 = vpop.f32.mrf.mxu1 }
 0x139   :  { %v3186_v2 = vpop.f32.mrf.mxu0 }
 0x13a   :  { %v4520_v4 = vadd.f32 %v3248_v62, %v2059_v57  ;;  %v3187_v5 = vadd.f32 %v3186_v2, %v3185_v63  ;;  %v3250_v7 = vpop.f32.mrf.mxu1 }
 0x13b   :  { %v3251_v8 = vadd.f32 %v3250_v7, %v3249_v1  ;;  %v3188_v9 = vpop.f32.mrf.mxu0 }
 0x13c   :  { %v2062_v3 = vadd.f32 %v3187_v5, %v4445_v28  ;;  %v3252_v11 = vpop.f32.mrf.mxu1 }
 0x13d   :  { %v3189_v12 = vpop.f32.mrf.mxu0 }
 0x13e   :  { %v4523_v13 = vadd.f32 %v3251_v8, %v2062_v3  ;;  %v3190_v14 = vadd.f32 %v3189_v12, %v3188_v9  ;;  %v3253_v15 = vpop.f32.mrf.mxu1 }
 0x13f   :  { %v3254_v19 = vadd.f32 %v3253_v15, %v3252_v11  ;;  %v3191_v20 = vpop.f32.mrf.mxu0 }
 0x140   :  { %v2067_v18 = vadd.f32 %v3190_v14, %v4454_v44  ;;  %v3255_v22 = vpop.f32.mrf.mxu1 }
 0x141   :  { %v3192_v23 = vpop.f32.mrf.mxu0 }
 0x142   :  { %v4526_v24 = vadd.f32 %v3254_v19, %v2067_v18  ;;  %v3193_v25 = vadd.f32 %v3192_v23, %v3191_v20  ;;  %v3256_v26 = vpop.f32.mrf.mxu1 }
 0x143   :  { %v3257_v27 = vadd.f32 %v3256_v26, %v3255_v22  ;;  %v3194_v29 = vpop.f32.mrf.mxu0 }
 0x144   :  { %v2070_v28 = vadd.f32 %v3193_v25, %v4463_v54  ;;  %v3258_v31 = vpop.f32.mrf.mxu1 }
 0x145   :  { %v3195_v32 = vpop.f32.mrf.mxu0 }
 0x146   :  { %v4529_v35 = vadd.f32 %v3257_v27, %v2070_v28  ;;  %v3196_v36 = vadd.f32 %v3195_v32, %v3194_v29  ;;  %v3259_v16 = vpop.f32.mrf.mxu1 }
 0x147   :  { %v3260_v37 = vadd.f32 %v3259_v16, %v3258_v31  ;;  %v3197_v38 = vpop.f32.mrf.mxu0 }
 0x148   :  { %v2075_v44 = vadd.f32 %v3196_v36, %v4472_v6  ;;  %v3261_v40 = vpop.f32.mrf.mxu1 }
 0x149   :  { %v3198_v41 = vpop.f32.mrf.mxu0 }
 0x14a   :  { %v4532_v45 = vadd.f32 %v3260_v37, %v2075_v44  ;;  %v3199_v46 = vadd.f32 %v3198_v41, %v3197_v38  ;;  %v3262_v33 = vpop.f32.mrf.mxu1 }
 0x14b   :  { %v3263_v47 = vadd.f32 %v3262_v33, %v3261_v40  ;;  %v3200_v48 = vpop.f32.mrf.mxu0 }
 0x14c   :  { %v2078_v54 = vadd.f32 %v3199_v46, %v4481_v17  ;;  %v3264_v50 = vpop.f32.mrf.mxu1 }
 0x14d   :  { %v3201_v51 = vpop.f32.mrf.mxu0 }
 0x14e   :  { %v4535_v52 = vadd.f32 %v3263_v47, %v2078_v54  ;;  %v3202_v53 = vadd.f32 %v3201_v51, %v3200_v48  ;;  %v3265_v43 = vpop.f32.mrf.mxu1 }
 0x14f   :  { %v3266_v56 = vadd.f32 %v3265_v43, %v3264_v50  ;;  %v3203_v58 = vpop.f32.mrf.mxu0 }
 0x150   :  { %v2083_v6 = vadd.f32 %v3202_v53, %v4490_v34  ;;  %v3267_v60 = vpop.f32.mrf.mxu1 }
 0x151   :  { %v3204_v61 = vpop.f32.mrf.mxu0 }
 0x152   :  { %v4538_v62 = vadd.f32 %v3266_v56, %v2083_v6  ;;  %v3205_v63 = vadd.f32 %v3204_v61, %v3203_v58  ;;  %v3268_v57 = vpop.f32.mrf.mxu1 }
 0x153   :  { %v3269_v1 = vadd.f32 %v3268_v57, %v3267_v60  ;;  %v3206_v2 = vpop.f32.mrf.mxu0 }
 0x154   :  { %v2086_v17 = vadd.f32 %v3205_v63, %v4493_v42  ;;  %v3270_v5 = vpop.f32.mrf.mxu1 }
 0x155   :  { %v3207_v7 = vpop.f32.mrf.mxu0 }
 0x156   :  { %v4541_v8 = vadd.f32 %v3269_v1, %v2086_v17  ;;  %v3208_v9 = vadd.f32 %v3207_v7, %v3206_v2  ;;  %v3271_v3 = vpop.f32.mrf.mxu1 }
 0x157   :  { %v3272_v11 = vadd.f32 %v3271_v3, %v3270_v5  ;;  %v3209_v12 = vpop.f32.mrf.mxu0 }
 0x158   :  { %v2091_v34 = vadd.f32 %v3208_v9, %v4496_v55  ;;  %v3273_v14 = vpop.f32.mrf.mxu1 }
 0x159   :  { %v3210_v15 = vpop.f32.mrf.mxu0 }
 0x15a   :  { %v4544_v19 = vadd.f32 %v3272_v11, %v2091_v34  ;;  %v3211_v20 = vadd.f32 %v3210_v15, %v3209_v12  ;;  %v3274_v18 = vpop.f32.mrf.mxu1 }
 0x15b   :  { %v3275_v22 = vadd.f32 %v3274_v18, %v3273_v14  ;;  %v3212_v23 = vpop.f32.mrf.mxu0 }
 0x15c   :  { %v2094_v42 = vadd.f32 %v3211_v20, %v4499_v0  ;;  %v3276_v25 = vpop.f32.mrf.mxu1 }
 0x15d   :  { %v3213_v26 = vpop.f32.mrf.mxu0 }
 0x15e   :  { %v4547_v27 = vadd.f32 %v3275_v22, %v2094_v42  ;;  %v3214_v29 = vadd.f32 %v3213_v26, %v3212_v23  ;;  %v3277_v28 = vpop.f32.mrf.mxu1 }
 0x15f   :  { %v3278_v31 = vadd.f32 %v3277_v28, %v3276_v25  ;;  %v3215_v32 = vpop.f32.mrf.mxu0 }
 0x160   :  { %v2099_v55 = vadd.f32 %v3214_v29, %v4502_v10  ;;  %v3279_v36 = vpop.f32.mrf.mxu1 }
 0x161   :  { %v3216_v16 = vpop.f32.mrf.mxu0 }
 0x162   :  { %v4550_v37 = vadd.f32 %v3278_v31, %v2099_v55  ;;  %v3217_v38 = vadd.f32 %v3216_v16, %v3215_v32  ;;  %v3280_v44 = vpop.f32.mrf.mxu1 }
 0x163   :  { %v3281_v40 = vadd.f32 %v3280_v44, %v3279_v36  ;;  %v3298_v41 = vpop.f32.mrf.mxu0 }
 0x164   :  { %v2102_v0 = vadd.f32 %v3217_v38, %v4505_v21  ;;  %v3362_v46 = vpop.f32.mrf.mxu1 }
 0x165   :  { %v3299_v33 = vpop.f32.mrf.mxu0 }
 0x166   :  { %v4553_v47 = vadd.f32 %v3281_v40, %v2102_v0  ;;  %v3300_v48 = vadd.f32 %v3299_v33, %v3298_v41  ;;  %v3363_v54 = vpop.f32.mrf.mxu1 }
 0x167   :  { %v3364_v50 = vadd.f32 %v3363_v54, %v3362_v46  ;;  %v4555_v51 = vpop.f32.mrf.mxu0 }
 0x168   :  { %v2237_v10 = vadd.f32 %v3300_v48, %v4508_v30  ;;  %v4558_v53 = vpop.f32.mrf.mxu1 }
 0x169   :  { %v4560_v43 = vpop.f32.mrf.mxu0 }
 0x16a   :  { %v4562_v56 = vadd.f32 %v3364_v50, %v2237_v10  ;;  %v4564_v58 = vpop.f32.mrf.mxu1 }
 0x16b   :  { %v3304_v21 = vpop.f32.mrf.mxu0 }
 0x16c   :  { %v3368_v6 = vpop.f32.mrf.mxu1 }
 0x16d   :  { %v3305_v60 = vpop.f32.mrf.mxu0 }
 0x16e   :  { %v3306_v61 = vadd.f32 %v3305_v60, %v3304_v21  ;;  %v3369_v63 = vpop.f32.mrf.mxu1 }
 0x16f   :  { %v3370_v57 = vadd.f32 %v3369_v63, %v3368_v6  ;;  %v4566_v1 = vpop.f32.mrf.mxu0 }
 0x170   :  { %v2245_v2 = vadd.f32 %v3306_v61, %v4514_v49  ;;  %v4569_v17 = vpop.f32.mrf.mxu1 }
 0x171   :  { %v4571_v30 = vpop.f32.mrf.mxu0 }
 0x172   :  { %v4573_v5 = vadd.f32 %v3370_v57, %v2245_v2  ;;  %v4575_v7 = vpop.f32.mrf.mxu1 }
 0x173   :  { %v3310_v9 = vpop.f32.mrf.mxu0 }
 0x174   :  { %v3374_v3 = vpop.f32.mrf.mxu1 }
 0x175   :  { %v3311_v11 = vpop.f32.mrf.mxu0 }
 0x176   :  { %v3312_v12 = vadd.f32 %v3311_v11, %v3310_v9  ;;  %v3375_v34 = vpop.f32.mrf.mxu1 }
 0x177   :  { %v3376_v14 = vadd.f32 %v3375_v34, %v3374_v3  ;;  %v4577_v15 = vpop.f32.mrf.mxu0 }
 0x178   :  { %v2253_v20 = vadd.f32 %v3312_v12, %v4520_v4  ;;  %v4580_v18 = vpop.f32.mrf.mxu1 }
 0x179   :  { %v4582_v49 = vpop.f32.mrf.mxu0 }
 0x17a   :  { %v4584_v22 = vadd.f32 %v3376_v14, %v2253_v20  ;;  %v4586_v23 = vpop.f32.mrf.mxu1 }
 0x17b   :  { %v3316_v42 = vpop.f32.mrf.mxu0 }
 0x17c   :  { %v3380_v25 = vpop.f32.mrf.mxu1 }
 0x17d   :  { %v3317_v26 = vpop.f32.mrf.mxu0 }
 0x17e   :  { %v3318_v29 = vadd.f32 %v3317_v26, %v3316_v42  ;;  %v3381_v28 = vpop.f32.mrf.mxu1 }
 0x17f   :  { %v3382_v31 = vadd.f32 %v3381_v28, %v3380_v25  ;;  %v4588_v32 = vpop.f32.mrf.mxu0 }
 0x180   :  { %v2261_v55 = vadd.f32 %v3318_v29, %v4526_v24  ;;  %v4591_v36 = vpop.f32.mrf.mxu1 }
 0x181   :  { %v4593_v4 = vpop.f32.mrf.mxu0 }
 0x182   :  { %v4595_v16 = vadd.f32 %v3382_v31, %v2261_v55  ;;  %v4597_v38 = vpop.f32.mrf.mxu1 }
 0x183   :  { %v3322_v44 = vpop.f32.mrf.mxu0 }
 0x184   :  { %v3386_v40 = vpop.f32.mrf.mxu1 }
 0x185   :  { %v3323_v41 = vpop.f32.mrf.mxu0 }
 0x186   :  { %v3324_v0 = vadd.f32 %v3323_v41, %v3322_v44  ;;  %v3387_v46 = vpop.f32.mrf.mxu1 }
 0x187   :  { %v3388_v33 = vadd.f32 %v3387_v46, %v3386_v40  ;;  %v4599_v48 = vpop.f32.mrf.mxu0 }
 0x188   :  { %v2269_v54 = vadd.f32 %v3324_v0, %v4532_v45  ;;  %v4602_v50 = vpop.f32.mrf.mxu1 }
 0x189   :  { %v4604_v24 = vpop.f32.mrf.mxu0 }
 0x18a   :  { %v4606_v10 = vadd.f32 %v3388_v33, %v2269_v54  ;;  %v4608_v21 = vpop.f32.mrf.mxu1 }
 0x18b   :  { %v3328_v6 = vpop.f32.mrf.mxu0 }
 0x18c   :  { %v3392_v60 = vpop.f32.mrf.mxu1 }
 0x18d   :  { %v3329_v61 = vpop.f32.mrf.mxu0 }
 0x18e   :  { %v3330_v63 = vadd.f32 %v3329_v61, %v3328_v6  ;;  %v3393_v57 = vpop.f32.mrf.mxu1 }
 0x18f   :  { %v3394_v2 = vadd.f32 %v3393_v57, %v3392_v60  ;;  %v4610_v9 = vpop.f32.mrf.mxu0  ;;  %v3303_v57 = vadd.f32 %v4560_v43, %v4555_v51  ;;  %v3309_v43 = vadd.f32 %v4571_v30, %v4566_v1 }
 0x190   :  { %v2277_v3 = vadd.f32 %v3330_v63, %v4538_v62  ;;  %v4613_v11 = vpop.f32.mrf.mxu1 }
 0x191   :  { %v4615_v45 = vpop.f32.mrf.mxu0 }
 0x192   :  { %v4617_v12 = vadd.f32 %v3394_v2, %v2277_v3  ;;  %v4619_v34 = vpop.f32.mrf.mxu1 }
 0x193   :  { %v3334_v14 = vpop.f32.mrf.mxu0 }
 0x194   :  { %v3398_v20 = vpop.f32.mrf.mxu1 }
 0x195   :  { %v3335_v42 = vpop.f32.mrf.mxu0 }
 0x196   :  { %v3336_v25 = vadd.f32 %v3335_v42, %v3334_v14  ;;  %v3399_v26 = vpop.f32.mrf.mxu1 }
 0x197   :  { %v3400_v29 = vadd.f32 %v3399_v26, %v3398_v20  ;;  %v4621_v28 = vpop.f32.mrf.mxu0 }
 0x198   :  { %v2285_v31 = vadd.f32 %v3336_v25, %v4544_v19  ;;  %v4624_v55 = vpop.f32.mrf.mxu1  ;;  %v2240_v25 = vadd.f32 %v3303_v57, %v4511_v39 }
 0x199   :  { %v4626_v62 = vpop.f32.mrf.mxu0 }
 0x19a   :  { %v4628_v44 = vadd.f32 %v3400_v29, %v2285_v31  ;;  %v4630_v40 = vpop.f32.mrf.mxu1 }
 0x19b   :  { %v3340_v41 = vpop.f32.mrf.mxu0 }
 0x19c   :  { %v3404_v0 = vpop.f32.mrf.mxu1 }
 0x19d   :  { %v3341_v46 = vpop.f32.mrf.mxu0 }
 0x19e   :  { %v3342_v33 = vadd.f32 %v3341_v46, %v3340_v41  ;;  %v3405_v54 = vpop.f32.mrf.mxu1 }
 0x19f   :  { %v3406_v6 = vadd.f32 %v3405_v54, %v3404_v0  ;;  %v4632_v60 = vpop.f32.mrf.mxu0 }
 0x1a0   :  { %v2293_v61 = vadd.f32 %v3342_v33, %v4550_v37  ;;  %v4635_v63 = vpop.f32.mrf.mxu1  ;;  %v3367_v37 = vadd.f32 %v4564_v58, %v4558_v53 }
 0x1a1   :  { %v4637_v19 = vpop.f32.mrf.mxu0 }
 0x1a2   :  { %v4641_v2 = vadd.f32 %v3406_v6, %v2293_v61  ;;  %v4643_v3 = vpop.f32.mrf.mxu1  ;;  %v2337_v51 = vadd.f32 %v3367_v37, %v2240_v25  ;;  %v3373_v25 = vadd.f32 %v4575_v7, %v4569_v17 }
 0x1a3   :  { %4720 = vst [vmem:[#allocation3_spill] sm:$0xff] %v4643_v3  ;;  %v3426_v14 = vpop.f32.mrf.mxu0  ;;  %v2248_v3 = vadd.f32 %v3309_v43, %v4517_v59 }
 0x1a4   :  { %4719 = vst [vmem:[#allocation2_spill] sm:$0xff] %v4641_v2  ;;  %v3490_v20 = vpop.f32.mrf.mxu1 }
 0x1a5   :  { %v3427_v42 = vpop.f32.mrf.mxu0 }
 0x1a6   :  { %v3428_v26 = vadd.f32 %v3427_v42, %v3426_v14  ;;  %v3491_v29 = vpop.f32.mrf.mxu1 }
 0x1a7   :  { %v3429_v31 = vpop.f32.mrf.mxu0  ;;  %v3492_v33 = vadd.f32 %v3491_v29, %v3490_v20  ;;  %v3315_v29 = vadd.f32 %v4582_v49, %v4577_v15 }
 0x1a8   :  { %v2431_v41 = vadd.f32 %v3428_v26, %v4562_v56  ;;  %v3493_v0 = vpop.f32.mrf.mxu1 }
 0x1a9   :  { %v3430_v46 = vpop.f32.mrf.mxu0 }
 0x1aa   :  { %v3431_v54 = vadd.f32 %v3430_v46, %v3429_v31  ;;  %v3494_v6 = vpop.f32.mrf.mxu1  ;;  %v2528_v2 = vadd.f32 %v3492_v33, %v2431_v41  ;;  %v2345_v41 = vadd.f32 %v3373_v25, %v2248_v3  ;;  %v3379_v3 = vadd.f32 %v4586_v23, %v4580_v18 }
 0x1ab   :  { %v3432_v61 = vpop.f32.mrf.mxu0  ;;  %v3495_v57 = vadd.f32 %v3494_v6, %v3493_v0 }
 0x1ac   :  { %v2434_v39 = vadd.f32 %v3431_v54, %v2337_v51  ;;  %v3496_v14 = vpop.f32.mrf.mxu1  ;;  %v2590_v37 = vmax.f32 %v2528_v2, 0.0 }
 0x1ad   :  { %v3433_v42 = vpop.f32.mrf.mxu0 }
 0x1ae   :  { %v2531_v53 = vadd.f32 %v3495_v57, %v2434_v39  ;;  %v3434_v58 = vadd.f32 %v3433_v42, %v3432_v61  ;;  %v3497_v56 = vpop.f32.mrf.mxu1 }
 0x1af   :  { %v3435_v26 = vpop.f32.mrf.mxu0  ;;  %v3498_v46 = vadd.f32 %v3497_v56, %v3496_v14  ;;  %v3321_v56 = vadd.f32 %v4593_v4, %v4588_v32  ;;  %v3385_v4 = vadd.f32 %v4597_v38, %v4591_v36 }
 0x1b0   :  { %v2591_v1 = vmax.f32 %v2531_v53, 0.0  ;;  %v2439_v30 = vadd.f32 %v3434_v58, %v4573_v5  ;;  %v3499_v20 = vpop.f32.mrf.mxu1  ;;  %v2256_v5 = vadd.f32 %v3315_v29, %v4523_v13 }
 0x1b1   :  { %v3436_v31 = vpop.f32.mrf.mxu0  ;;  %v2264_v29 = vadd.f32 %v3321_v56, %v4529_v35 }
 0x1b2   :  { %v2982_v0 = vpack.c.bf16 %v2591_v1, %v2590_v37  ;;  %v3437_v59 = vadd.f32 %v3436_v31, %v3435_v26  ;;  %v3500_v51 = vpop.f32.mrf.mxu1  ;;  %v2536_v17 = vadd.f32 %v3498_v46, %v2439_v30  ;;  %v2353_v53 = vadd.f32 %v3379_v3, %v2256_v5 }
 0x1b3   :  { %v3438_v43 = vpop.f32.mrf.mxu0  ;;  %v3501_v2 = vadd.f32 %v3500_v51, %v3499_v20 }
 0x1b4   :  { %2983 = vst [vmem:[%s4718_s3] sm:$0xff] %v2982_v0   ;;  %v2442_v7 = vadd.f32 %v3437_v59, %v2345_v41  ;;  %v3502_v33 = vpop.f32.mrf.mxu1  ;;  %v2592_v39 = vmax.f32 %v2536_v17, 0.0  ;;  %v3327_v17 = vadd.f32 %v4604_v24, %v4599_v48 }
 0x1b5   :  { %v3439_v54 = vpop.f32.mrf.mxu0 }
 0x1b6   :  { %v2539_v6 = vadd.f32 %v3501_v2, %v2442_v7  ;;  %v3440_v15 = vadd.f32 %v3439_v54, %v3438_v43  ;;  %v3503_v49 = vpop.f32.mrf.mxu1  ;;  %v2361_v2 = vadd.f32 %v3385_v4, %v2264_v29 }
 0x1b7   :  { %v3441_v61 = vpop.f32.mrf.mxu0  ;;  %v3504_v13 = vadd.f32 %v3503_v49, %v3502_v33 }
 0x1b8   :  { %v2593_v57 = vmax.f32 %v2539_v6, 0.0  ;;  %v2447_v14 = vadd.f32 %v3440_v15, %v4584_v22  ;;  %v3505_v42 = vpop.f32.mrf.mxu1 }
 0x1b9   :  { %v3442_v58 = vpop.f32.mrf.mxu0 }
 0x1ba   :  { %v2987_v26 = vpack.c.bf16 %v2593_v57, %v2592_v39  ;;  %v3443_v25 = vadd.f32 %v3442_v58, %v3441_v61  ;;  %v3506_v37 = vpop.f32.mrf.mxu1  ;;  %v2544_v18 = vadd.f32 %v3504_v13, %v2447_v14  ;;  %v3391_v39 = vadd.f32 %v4608_v21, %v4602_v50 }
 0x1bb   :  { %v3444_v1 = vpop.f32.mrf.mxu0  ;;  %v3507_v30 = vadd.f32 %v3506_v37, %v3505_v42  ;;  %v3333_v13 = vadd.f32 %v4615_v45, %v4610_v9  ;;  %v3397_v45 = vadd.f32 %v4619_v34, %v4613_v11 }
 0x1bc   :  { %3019 = vst [vmem:[%s4718_s3 + $0x8] sm:$0xff] %v2987_v26   ;;  %v2450_v23 = vadd.f32 %v3443_v25, %v2353_v53  ;;  %v3508_v20 = vpop.f32.mrf.mxu1  ;;  %v2594_v46 = vmax.f32 %v2544_v18, 0.0 }
 0x1bd   :  { %v3445_v22 = vpop.f32.mrf.mxu0 }
 0x1be   :  { %v2547_v31 = vadd.f32 %v3507_v30, %v2450_v23  ;;  %v3446_v41 = vadd.f32 %v3445_v22, %v3444_v1  ;;  %v3509_v0 = vpop.f32.mrf.mxu1 }
 0x1bf   :  { %v3447_v32 = vpop.f32.mrf.mxu0  ;;  %v3510_v5 = vadd.f32 %v3509_v0, %v3508_v20  ;;  %v2280_v20 = vadd.f32 %v3333_v13, %v4541_v8 }
 0x1c0   :  { %v2595_v59 = vmax.f32 %v2547_v31, 0.0  ;;  %v2455_v51 = vadd.f32 %v3446_v41, %v4595_v16  ;;  %v3511_v43 = vpop.f32.mrf.mxu1  ;;  %v2272_v16 = vadd.f32 %v3327_v17, %v4535_v52 }
 0x1c1   :  { %v3448_v7 = vpop.f32.mrf.mxu0 }
 0x1c2   :  { %v2992_v33 = vpack.c.bf16 %v2595_v59, %v2594_v46  ;;  %v3449_v35 = vadd.f32 %v3448_v7, %v3447_v32  ;;  %v3512_v54 = vpop.f32.mrf.mxu1  ;;  %v2552_v36 = vadd.f32 %v3510_v5, %v2455_v51  ;;  %v2369_v56 = vadd.f32 %v3391_v39, %v2272_v16 }
 0x1c3   :  { %v3450_v6 = vpop.f32.mrf.mxu0  ;;  %v3513_v15 = vadd.f32 %v3512_v54, %v3511_v43  ;;  %v3339_v46 = vadd.f32 %v4626_v62, %v4621_v28  ;;  %v2377_v51 = vadd.f32 %v3397_v45, %v2280_v20 }
 0x1c4   :  { %3020 = vst [vmem:[%s4718_s3 + $0x10] sm:$0xff] %v2992_v33   ;;  %v2458_v38 = vadd.f32 %v3449_v35, %v2361_v2  ;;  %v3514_v49 = vpop.f32.mrf.mxu1  ;;  %v2596_v14 = vmax.f32 %v2552_v36, 0.0 }
 0x1c5   :  { %v3451_v3 = vpop.f32.mrf.mxu0 }
 0x1c6   :  { %v2555_v61 = vadd.f32 %v3513_v15, %v2458_v38  ;;  %v3452_v48 = vadd.f32 %v3451_v3, %v3450_v6  ;;  %v3515_v24 = vpop.f32.mrf.mxu1  ;;  %v3403_v6 = vadd.f32 %v4630_v40, %v4624_v55 }
 0x1c7   :  { %v3453_v57 = vpop.f32.mrf.mxu0  ;;  %v3516_v52 = vadd.f32 %v3515_v24, %v3514_v49 }
 0x1c8   :  { %v2597_v42 = vmax.f32 %v2555_v61, 0.0  ;;  %v2463_v53 = vadd.f32 %v3452_v48, %v4606_v10  ;;  %v3517_v58 = vpop.f32.mrf.mxu1  ;;  %v3345_v48 = vadd.f32 %v4637_v19, %v4632_v60  ;;  %v4721_v19 = vld [vmem:[#allocation3_spill] sm:$0xff] }
 0x1c9   :  { %v3454_v26 = vpop.f32.mrf.mxu0 }
 0x1ca   :  { %v2997_v25 = vpack.c.bf16 %v2597_v42, %v2596_v14  ;;  %v3455_v37 = vadd.f32 %v3454_v26, %v3453_v57  ;;  %v3518_v1 = vpop.f32.mrf.mxu1  ;;  %v2560_v50 = vadd.f32 %v3516_v52, %v2463_v53 }
 0x1cb   :  { %v3456_v18 = vpop.f32.mrf.mxu0  ;;  %v3519_v23 = vadd.f32 %v3518_v1, %v3517_v58  ;;  %v2296_v58 = vadd.f32 %v3345_v48, %v4553_v47  ;;  %v4722_v1 = vld [vmem:[#allocation2_spill] sm:$0xff] }
 0x1cc   :  { %3021 = vst [vmem:[%s4718_s3 + $0x18] sm:$0xff] %v2997_v25   ;;  %v2466_v21 = vadd.f32 %v3455_v37, %v2369_v56  ;;  %v3520_v30 = vpop.f32.mrf.mxu1  ;;  %v2598_v41 = vmax.f32 %v2560_v50, 0.0  ;;  %v3409_v25 = vadd.f32 %v4721_v19, %v4635_v63 }
 0x1cd   :  { %v3457_v10 = vpop.f32.mrf.mxu0 }
 0x1ce   :  { %v2563_v22 = vadd.f32 %v3519_v23, %v2466_v21  ;;  %v3458_v29 = vadd.f32 %v3457_v10, %v3456_v18  ;;  %v3521_v31 = vpop.f32.mrf.mxu1  ;;  %v2393_v23 = vadd.f32 %v3409_v25, %v2296_v58 }
 0x1cf   :  { %v3459_v9 = vpop.f32.mrf.mxu0  ;;  %v3522_v17 = vadd.f32 %v3521_v31, %v3520_v30 }
 0x1d0   :  { %v2599_v0 = vmax.f32 %v2563_v22, 0.0  ;;  %v2471_v32 = vadd.f32 %v3458_v29, %v4617_v12  ;;  %v3523_v4 = vpop.f32.mrf.mxu1  ;;  %v2288_v12 = vadd.f32 %v3339_v46, %v4547_v27 }
 0x1d1   :  { %v3460_v59 = vpop.f32.mrf.mxu0 }
 0x1d2   :  { %v3002_v43 = vpack.c.bf16 %v2599_v0, %v2598_v41  ;;  %v3461_v8 = vadd.f32 %v3460_v59, %v3459_v9  ;;  %v3524_v7 = vpop.f32.mrf.mxu1  ;;  %v2568_v11 = vadd.f32 %v3522_v17, %v2471_v32  ;;  %v2385_v3 = vadd.f32 %v3403_v6, %v2288_v12 }
 0x1d3   :  { %v3462_v2 = vpop.f32.mrf.mxu0  ;;  %v3525_v33 = vadd.f32 %v3524_v7, %v3523_v4 }
 0x1d4   :  { %3022 = vst [vmem:[%s4718_s3 + $0x20] sm:$0xff] %v3002_v43   ;;  %v2474_v34 = vadd.f32 %v3461_v8, %v2377_v51  ;;  %v3526_v5 = vpop.f32.mrf.mxu1  ;;  %v2600_v38 = vmax.f32 %v2568_v11, 0.0 }
 0x1d5   :  { %v3463_v35 = vpop.f32.mrf.mxu0 }
 0x1d6   :  { %v2571_v54 = vadd.f32 %v3525_v33, %v2474_v34  ;;  %v3464_v28 = vadd.f32 %v3463_v35, %v3462_v2  ;;  %v3527_v62 = vpop.f32.mrf.mxu1 }
 0x1d7   :  { %v3465_v36 = vpop.f32.mrf.mxu0  ;;  %v3528_v27 = vadd.f32 %v3527_v62, %v3526_v5 }
 0x1d8   :  { %v2601_v15 = vmax.f32 %v2571_v54, 0.0  ;;  %v2479_v49 = vadd.f32 %v3464_v28, %v4628_v44  ;;  %v3529_v16 = vpop.f32.mrf.mxu1 }
 0x1d9   :  { %v3466_v61 = vpop.f32.mrf.mxu0 }
 0x1da   :  { %v3007_v24 = vpack.c.bf16 %v2601_v15, %v2600_v38  ;;  %v3467_v39 = vadd.f32 %v3466_v61, %v3465_v36  ;;  %v3530_v57 = vpop.f32.mrf.mxu1  ;;  %v2576_v55 = vadd.f32 %v3528_v27, %v2479_v49 }
 0x1db   :  { %v3468_v14 = vpop.f32.mrf.mxu0  ;;  %v3531_v42 = vadd.f32 %v3530_v57, %v3529_v16 }
 0x1dc   :  { %3023 = vst [vmem:[%s4718_s3 + $0x28] sm:$0xff] %v3007_v24   ;;  %v2482_v40 = vadd.f32 %v3467_v39, %v2385_v3  ;;  %v3532_v53 = vpop.f32.mrf.mxu1  ;;  %v2602_v52 = vmax.f32 %v2576_v55, 0.0 }
 0x1dd   :  { %v3469_v44 = vpop.f32.mrf.mxu0 }
 0x1de   :  { %v2579_v56 = vadd.f32 %v3531_v42, %v2482_v40  ;;  %v3470_v26 = vadd.f32 %v3469_v44, %v3468_v14  ;;  %v3533_v13 = vpop.f32.mrf.mxu1 }
 0x1df   :  { %v3471_v60 = vpop.f32.mrf.mxu0  ;;  %v3534_v10 = vadd.f32 %v3533_v13, %v3532_v53 }
 0x1e0   :  { %v2603_v37 = vmax.f32 %v2579_v56, 0.0  ;;  %v2487_v18 = vadd.f32 %v3470_v26, %v4722_v1  ;;  %v3535_v50 = vpop.f32.mrf.mxu1 }
 0x1e1   :  { %v3472_v21 = vpop.f32.mrf.mxu0 }
 0x1e2   :  { %v3012_v30 = vpack.c.bf16 %v2603_v37, %v2602_v52  ;;  %v3473_v20 = vadd.f32 %v3472_v21, %v3471_v60  ;;  %v3536_v22 = vpop.f32.mrf.mxu1  ;;  %v2584_v47 = vadd.f32 %v3534_v10, %v2487_v18 }
 0x1e3   :  { %v3537_v31 = vadd.f32 %v3536_v22, %v3535_v50 }
 0x1e4   :  { %3024 = vst [vmem:[%s4718_s3 + $0x30] sm:$0xff] %v3012_v30   ;;  %v2490_v29 = vadd.f32 %v3473_v20, %v2393_v23  ;;  %v2604_v63 = vmax.f32 %v2584_v47, 0.0 }
 0x1e6   :  { %v2587_v9 = vadd.f32 %v3537_v31, %v2490_v29 }
 0x1e8   :  { %v2605_v45 = vmax.f32 %v2587_v9, 0.0 }
 0x1ea   :  { %v3017_v41 = vpack.c.bf16 %v2605_v45, %v2604_v63 }
 0x1ec   :  { %3025 = vst [vmem:[%s4718_s3 + $0x38] sm:$0xff] %v3017_v41  }

// kernel: cnn_cifar_forward.5
= control target key start
LH: loop header
LB: loop body
LE: loop exit
PB: predicated region body
PF: predicated region fallthrough
CT: control target
= control target key end

     0   :  { %12 = vsyncpa [#allocation4], 0  ;;  %s11511_s24 = smov 0   ;;  %s11513_s25 = smov 0   ;;  %s13056_s0 = inlined_call_operand.vmem [shape: bf16[2,8192], index: 0, kind: input, shape index: {}]   ;;  %s13057_s1 = inlined_call_operand.vmem [shape: bf16[8192,512], index: 1, kind: input, shape index: {}]   ;;  %s13058_s2 = inlined_call_operand.vmem [shape: f32[1,512], index: 2, kind: input, shape index: {}]   ;;  %s13059_s3 = inlined_call_operand.vmem [shape: bf16[512,128], index: 3, kind: input, shape index: {}]   ;;  %s13060_s4 = inlined_call_operand.vmem [shape: f32[1,128], index: 4, kind: input, shape index: {}]   ;;  %s13061_s5 = inlined_call_operand.vmem [shape: bf16[128,128], index: 5, kind: input, shape index: {}]   ;;  %s13062_s6 = inlined_call_operand.vmem [shape: f32[1,128], index: 6, kind: input, shape index: {}]   ;;  %s13063_s7 = inlined_call_operand.hbm [shape: f32[2,128], index: 7, kind: output, shape index: {}]  }
   0x1   :  { %s11515_s26 = smov 0  }
   0x2 LB: > { %s8643_s27 = sadd.s32 4294967295, %s11463_s26   ;;  %s27_s28 = sadd.s32 1, %s11459_s25  ;;  %s11463_s26 = sphi %s11515_s26, %s18_s26   ;;  %s11459_s25 = sphi %s11513_s25, %s13066_s25   ;;  %s11455_s24 = sphi %s11511_s24, %s13065_s24  }
   0x3   : > { %p28_p0 = scmp.ge.s32.totalorder %s27_s28, 2  ;;  %p8646_p1 = scmp.ge.s32.totalorder %s11463_s26, 1 }
   0x4   : > { %p268_p2 = scmp.lt.s32.totalorder %s11463_s26, 3 }
   0x5   : > { %s13068_s28 = smov (%p28_p0, %s27_s28), 0 }
   0x6   : > { %p269_p3 = pnand %p8646_p1, %p268_p2 }
   0x7   : > { %s8647_s29 = sshll.u32 (!%p269_p3), %s11455_s24, 5  ;;  %s8648_s30 = sshll.u32 (!%p269_p3), %s11455_s24, 9 }
   0x8   : > { %272 = sbr.rel (%p269_p3) target bundleno = 1708 (0x6ac), region = 48  ;;  %p307_p4 = scmp.lt.s32.totalorder (!%p269_p3), %s8647_s29, 63 }
   0x9   : > { %p314_p5 = scmp.lt.s32.totalorder (!%p269_p3), %s8648_s30, 1023  ;;  %p8651_p6 = scmp.ne.s32.totalorder (!%p269_p3), %s11455_s24, 0 }
   0xd   : > { %s13070_s29 = smov (!%p307_p4, %s8647_s29), 63  ;;  %s13072_s30 = smov (!%p314_p5, %s8648_s30), 1023 }
   0xe   : > { %s11537_s10 = scalar_lea.vmem %s13056_s0, %s13070_s29  ;;  %s9723_s11 = sshll.u32 %s13072_s30, 4 }
   0xf   : > { %s11542_s14 = scalar_lea.vmem %s13057_s1, %s9723_s11  ;;  %324 = sbr.rel (%p8651_p6) target bundleno = 22 (0x16), region = 52 }
  0x14   : > { %v11465_v0 = vmov 0.0  }
  0x15   : > { %325 = vst [vmem:[#allocation2] sm:$0xff] %v11465_v0 }
  0x16 PF: > { %v9833_v1 = vld [vmem:[%s11542_s14 + $0xe4] ss:$16 sps:$4 sm:$0xff]   ;;  %v9837_v3 = vld [vmem:[%s11542_s14 + $0xe0] ss:$16 sps:$4 sm:$0xff]   ;;  %v11466_v37 = vmov 1966171168   ;;  %v1363_v39 = vlaneseq }
  0x17   : > { %v9835_v2 = vld [vmem:[%s11542_s14 + $0x2e4] ss:$16 sps:$4 sm:$0xff]   ;;  %6707 = vmatprep.subr.bf16.mxu0 %v9833_v1  ;;  %v9838_v4 = vld [vmem:[%s11542_s14 + $0x2e0] ss:$16 sps:$4 sm:$0xff]   ;;  %v1361_v38 = vunpack.c.l.s4 %v11466_v37  ;;  %p9676_p7 = scmp.ne.s32.totalorder %s11455_s24, 1 }
  0x18   : > { %6748 = vmatprep.subr.bf16.mxu1 %v9835_v2  ;;  %v9839_v5 = vld [vmem:[%s11542_s14 + $0xc4] ss:$16 sps:$4 sm:$0xff]   ;;  %6708 = vmatpush1.bf16.msra.mxu0 %v9837_v3  ;;  %v9843_v7 = vld [vmem:[%s11542_s14 + $0xc0] ss:$16 sps:$4 sm:$0xff]   ;;  %v11584_v44 = vshrl.u32 %v1363_v39, 7 }
  0x19   : > { %6749 = vmatpush1.bf16.msra.mxu1 %v9838_v4  ;;  %v9841_v6 = vld [vmem:[%s11542_s14 + $0x2c4] ss:$16 sps:$4 sm:$0xff]   ;;  %6709 = vmatprep.subr.bf16.mxu0 %v9839_v5  ;;  %v9844_v8 = vld [vmem:[%s11542_s14 + $0x2c0] ss:$16 sps:$4 sm:$0xff]   ;;  %v1362_v43 = vunpack.c.0.s8 %v1361_v38 }
  0x1a   : > { %6750 = vmatprep.subr.bf16.mxu1 %v9841_v6  ;;  %v9845_v9 = vld [vmem:[%s11542_s14 + $0xa4] ss:$16 sps:$4 sm:$0xff]   ;;  %v9849_v11 = vld [vmem:[%s11542_s14 + $0xa0] ss:$16 sps:$4 sm:$0xff]  }
  0x1b   : > { %v9847_v10 = vld [vmem:[%s11542_s14 + $0x2a4] ss:$16 sps:$4 sm:$0xff]   ;;  %v9850_v12 = vld [vmem:[%s11542_s14 + $0x2a0] ss:$16 sps:$4 sm:$0xff]   ;;  %v11592_v50 = vsub.s32 %v1362_v43, %v11584_v44 }
  0x1c   : > { %6710 = vmatpush1.bf16.msra.mxu0 %v9843_v7  ;;  %v9851_v13 = vld [vmem:[%s11542_s14 + $0x84] ss:$16 sps:$4 sm:$0xff]   ;;  %v9855_v15 = vld [vmem:[%s11542_s14 + $0x80] ss:$16 sps:$4 sm:$0xff]  }
  0x1d   : > { %6751 = vmatpush1.bf16.msra.mxu1 %v9844_v8  ;;  %6711 = vmatprep.subr.bf16.mxu0 %v9845_v9  ;;  %v9853_v14 = vld [vmem:[%s11542_s14 + $0x284] ss:$16 sps:$4 sm:$0xff]   ;;  %v9856_v16 = vld [vmem:[%s11542_s14 + $0x280] ss:$16 sps:$4 sm:$0xff]  }
  0x1e   : > { %6752 = vmatprep.subr.bf16.mxu1 %v9847_v10  ;;  %v9857_v17 = vld [vmem:[%s11542_s14 + $0x64] ss:$16 sps:$4 sm:$0xff]   ;;  %v9861_v19 = vld [vmem:[%s11542_s14 + $0x60] ss:$16 sps:$4 sm:$0xff]  }
  0x1f   : > { %v9859_v18 = vld [vmem:[%s11542_s14 + $0x264] ss:$16 sps:$4 sm:$0xff]   ;;  %v9862_v20 = vld [vmem:[%s11542_s14 + $0x260] ss:$16 sps:$4 sm:$0xff]  }
  0x20   : > { %6712 = vmatpush1.bf16.msra.mxu0 %v9849_v11  ;;  %v9863_v21 = vld [vmem:[%s11542_s14 + $0x44] ss:$16 sps:$4 sm:$0xff]   ;;  %v9867_v23 = vld [vmem:[%s11542_s14 + $0x40] ss:$16 sps:$4 sm:$0xff]  }
  0x21   : > { %6753 = vmatpush1.bf16.msra.mxu1 %v9850_v12  ;;  %6713 = vmatprep.subr.bf16.mxu0 %v9851_v13  ;;  %v9865_v22 = vld [vmem:[%s11542_s14 + $0x244] ss:$16 sps:$4 sm:$0xff]   ;;  %v9868_v24 = vld [vmem:[%s11542_s14 + $0x240] ss:$16 sps:$4 sm:$0xff]  }
  0x22   : > { %6754 = vmatprep.subr.bf16.mxu1 %v9853_v14  ;;  %v9869_v25 = vld [vmem:[%s11542_s14 + $0x24] ss:$16 sps:$4 sm:$0xff]   ;;  %v9873_v27 = vld [vmem:[%s11542_s14 + $0x20] ss:$16 sps:$4 sm:$0xff]  }
  0x23   : > { %v9871_v26 = vld [vmem:[%s11542_s14 + $0x224] ss:$16 sps:$4 sm:$0xff]   ;;  %v9874_v28 = vld [vmem:[%s11542_s14 + $0x220] ss:$16 sps:$4 sm:$0xff]  }
  0x24   : > { %6714 = vmatpush1.bf16.msra.mxu0 %v9855_v15  ;;  %v9875_v29 = vld [vmem:[%s11542_s14 + $0x4] ss:$16 sps:$4 sm:$0xff]   ;;  %v9879_v31 = vld [vmem:[%s11542_s14] ss:$16 sps:$4 sm:$0xff]  }
  0x25   : > { %6755 = vmatpush1.bf16.msra.mxu1 %v9856_v16  ;;  %6715 = vmatprep.subr.bf16.mxu0 %v9857_v17  ;;  %v9877_v30 = vld [vmem:[%s11542_s14 + $0x204] ss:$16 sps:$4 sm:$0xff]   ;;  %v9880_v32 = vld [vmem:[%s11542_s14 + $0x200] ss:$16 sps:$4 sm:$0xff]  }
  0x26   : > { %6756 = vmatprep.subr.bf16.mxu1 %v9859_v18  ;;  %v9881_v33 = vld [vmem:[%s11542_s14 + $0x1e4] ss:$16 sps:$4 sm:$0xff]   ;;  %v9885_v35 = vld [vmem:[%s11542_s14 + $0x1e0] ss:$16 sps:$4 sm:$0xff]  }
  0x27   : > { %v9883_v34 = vld [vmem:[%s11542_s14 + $0x3e4] ss:$16 sps:$4 sm:$0xff]   ;;  %v9886_v36 = vld [vmem:[%s11542_s14 + $0x3e0] ss:$16 sps:$4 sm:$0xff]  }
  0x28   : > { %6716 = vmatpush1.bf16.msra.mxu0 %v9861_v19  ;;  %v9887_v40 = vld [vmem:[%s11542_s14 + $0x1c4] ss:$16 sps:$4 sm:$0xff]   ;;  %v9891_v42 = vld [vmem:[%s11542_s14 + $0x1c0] ss:$16 sps:$4 sm:$0xff]  }
  0x29   : > { %6757 = vmatpush1.bf16.msra.mxu1 %v9862_v20  ;;  %6717 = vmatprep.subr.bf16.mxu0 %v9863_v21  ;;  %v9889_v41 = vld [vmem:[%s11542_s14 + $0x3c4] ss:$16 sps:$4 sm:$0xff]   ;;  %v9892_v45 = vld [vmem:[%s11542_s14 + $0x3c0] ss:$16 sps:$4 sm:$0xff]  }
  0x2a   : > { %6758 = vmatprep.subr.bf16.mxu1 %v9865_v22  ;;  %v9893_v46 = vld [vmem:[%s11542_s14 + $0x1a4] ss:$16 sps:$4 sm:$0xff]   ;;  %v9897_v48 = vld [vmem:[%s11542_s14 + $0x1a0] ss:$16 sps:$4 sm:$0xff]  }
  0x2b   : > { %v9895_v47 = vld [vmem:[%s11542_s14 + $0x3a4] ss:$16 sps:$4 sm:$0xff]   ;;  %v9898_v49 = vld [vmem:[%s11542_s14 + $0x3a0] ss:$16 sps:$4 sm:$0xff]  }
  0x2c   : > { %6718 = vmatpush1.bf16.msra.mxu0 %v9867_v23  ;;  %v9899_v51 = vld [vmem:[%s11542_s14 + $0x184] ss:$16 sps:$4 sm:$0xff]   ;;  %v9903_v54 = vld [vmem:[%s11542_s14 + $0x180] ss:$16 sps:$4 sm:$0xff]  }
  0x2d   : > { %6759 = vmatpush1.bf16.msra.mxu1 %v9868_v24  ;;  %6719 = vmatprep.subr.bf16.mxu0 %v9869_v25  ;;  %v9901_v52 = vld [vmem:[%s11542_s14 + $0x384] ss:$16 sps:$4 sm:$0xff]   ;;  %v9904_v56 = vld [vmem:[%s11542_s14 + $0x380] ss:$16 sps:$4 sm:$0xff]  }
  0x2e   : > { %6760 = vmatprep.subr.bf16.mxu1 %v9871_v26  ;;  %v327_v53 = vld [vmem:[%s11537_s10] sm:$0xff] }
  0x2f   : > { %v1366_v55 = vrot.slane %v327_v53, %v11592_v50  ;;  %v9905_v57 = vld [vmem:[%s11542_s14 + $0x164] ss:$16 sps:$4 sm:$0xff]   ;;  %v9909_v60 = vld [vmem:[%s11542_s14 + $0x160] ss:$16 sps:$4 sm:$0xff]   ;;  %v1359_v2 = vcombine.high %v327_v53, %v327_v53 }
  0x30   : > { %6720 = vmatpush1.bf16.msra.mxu0 %v9873_v27  ;;  %v9907_v58 = vld [vmem:[%s11542_s14 + $0x364] ss:$16 sps:$4 sm:$0xff]   ;;  %v9910_v62 = vld [vmem:[%s11542_s14 + $0x360] ss:$16 sps:$4 sm:$0xff]  }
  0x31   : > { %6761 = vmatpush1.bf16.msra.mxu1 %v9874_v28  ;;  %6721 = vmatprep.subr.bf16.mxu0 %v9875_v29  ;;  %v1374_v59 = vcombine.high %v1366_v55, %v1366_v55  ;;  %v9911_v63 = vld [vmem:[%s11542_s14 + $0x144] ss:$16 sps:$4 sm:$0xff]   ;;  %v9915_v3 = vld [vmem:[%s11542_s14 + $0x140] ss:$16 sps:$4 sm:$0xff]   ;;  %v11620_v7 = vrot.slane %v1359_v2, %v11592_v50  ;;  %v11630_v14 = vrot.slane %v1366_v55, %v11592_v50 }
  0x32   : > { %6762 = vmatprep.subr.bf16.mxu1 %v9877_v30  ;;  %v9913_v0 = vld [vmem:[%s11542_s14 + $0x344] ss:$16 sps:$4 sm:$0xff]   ;;  %v9916_v4 = vld [vmem:[%s11542_s14 + $0x340] ss:$16 sps:$4 sm:$0xff]  }
  0x33   : > { %v11604_v61 = vrot.slane %v1374_v59, %v11592_v50  ;;  %v9917_v5 = vld [vmem:[%s11542_s14 + $0x124] ss:$16 sps:$4 sm:$0xff]   ;;  %v9921_v8 = vld [vmem:[%s11542_s14 + $0x120] ss:$16 sps:$4 sm:$0xff]   ;;  %v1375_v12 = vcombine.high %v11620_v7, %v11620_v7  ;;  %v11640_v19 = vcombine.high %v11630_v14, %v11630_v14 }
  0x34   : > { %6722 = vmatpush1.bf16.msra.mxu0 %v9879_v31  ;;  %v9919_v6 = vld [vmem:[%s11542_s14 + $0x324] ss:$16 sps:$4 sm:$0xff]   ;;  %v9922_v9 = vld [vmem:[%s11542_s14 + $0x320] ss:$16 sps:$4 sm:$0xff]  }
  0x35   : > { %6763 = vmatpush1.bf16.msra.mxu1 %v9880_v32  ;;  %6723 = vmatprep.subr.bf16.mxu0 %v9881_v33  ;;  %v11611_v1 = vcombine.high %v11604_v61, %v11604_v61  ;;  %v9923_v10 = vld [vmem:[%s11542_s14 + $0x104] ss:$16 sps:$4 sm:$0xff]   ;;  %v9927_v13 = vld [vmem:[%s11542_s14 + $0x100] ss:$16 sps:$4 sm:$0xff]   ;;  %v11636_v18 = vrot.slane %v1375_v12, %v11592_v50 }
  0x36   : > { %6764 = vmatprep.subr.bf16.mxu1 %v9883_v34  ;;  %6739 = vmatprep.mubr.bf16.mxu0 %v11604_v61  ;;  %v9925_v11 = vld [vmem:[%s11542_s14 + $0x304] ss:$16 sps:$4 sm:$0xff]   ;;  %v9928_v15 = vld [vmem:[%s11542_s14 + $0x300] ss:$16 sps:$4 sm:$0xff]  }
  0x37   : > { %6780 = vmatprep.mubr.bf16.mxu1 %v11611_v1  ;;  %v9931_v16 = vld [vmem:[%s11542_s14 + $0x4e4] ss:$16 sps:$4 sm:$0xff]   ;;  %v9929_v20 = vld [vmem:[%s11542_s14 + $0x4e0] ss:$16 sps:$4 sm:$0xff]   ;;  %v11648_v24 = vcombine.high %v11636_v18, %v11636_v18 }
  0x38   : > { %6724 = vmatpush2.bf16.msra.mxu0 %v9885_v35  ;;  %v9934_v17 = vld [vmem:[%s11542_s14 + $0x6e4] ss:$16 sps:$4 sm:$0xff]   ;;  %v9932_v21 = vld [vmem:[%s11542_s14 + $0x6e0] ss:$16 sps:$4 sm:$0xff]  }
  0x39   : > { %6765 = vmatpush2.bf16.msra.mxu1 %v9886_v36  ;;  %6725 = vmatprep.subr.bf16.mxu0 %v9887_v40  ;;  %v9937_v22 = vld [vmem:[%s11542_s14 + $0x4c4] ss:$16 sps:$4 sm:$0xff]   ;;  %v9935_v25 = vld [vmem:[%s11542_s14 + $0x4c0] ss:$16 sps:$4 sm:$0xff]  }
  0x3a   : > { %6766 = vmatprep.subr.bf16.mxu1 %v9889_v41  ;;  %v9940_v23 = vld [vmem:[%s11542_s14 + $0x6c4] ss:$16 sps:$4 sm:$0xff]   ;;  %v9938_v26 = vld [vmem:[%s11542_s14 + $0x6c0] ss:$16 sps:$4 sm:$0xff]  }
  0x3b   : > { %v9943_v27 = vld [vmem:[%s11542_s14 + $0x4a4] ss:$16 sps:$4 sm:$0xff]   ;;  %v9941_v29 = vld [vmem:[%s11542_s14 + $0x4a0] ss:$16 sps:$4 sm:$0xff]  }
  0x3c   : > { %6726 = vmatpush2.bf16.msra.mxu0 %v9891_v42  ;;  %v9946_v28 = vld [vmem:[%s11542_s14 + $0x6a4] ss:$16 sps:$4 sm:$0xff]   ;;  %v9944_v30 = vld [vmem:[%s11542_s14 + $0x6a0] ss:$16 sps:$4 sm:$0xff]  }
  0x3d   : > { %6767 = vmatpush2.bf16.msra.mxu1 %v9892_v45  ;;  %6727 = vmatprep.subr.bf16.mxu0 %v9893_v46  ;;  %v9949_v31 = vld [vmem:[%s11542_s14 + $0x484] ss:$16 sps:$4 sm:$0xff]   ;;  %v9947_v33 = vld [vmem:[%s11542_s14 + $0x480] ss:$16 sps:$4 sm:$0xff]  }
  0x3e   : > { %6768 = vmatprep.subr.bf16.mxu1 %v9895_v47  ;;  %v9952_v32 = vld [vmem:[%s11542_s14 + $0x684] ss:$16 sps:$4 sm:$0xff]   ;;  %v9950_v34 = vld [vmem:[%s11542_s14 + $0x680] ss:$16 sps:$4 sm:$0xff]  }
  0x3f   : > { %v9955_v35 = vld [vmem:[%s11542_s14 + $0x464] ss:$16 sps:$4 sm:$0xff]   ;;  %v9953_v37 = vld [vmem:[%s11542_s14 + $0x460] ss:$16 sps:$4 sm:$0xff]  }
  0x40   : > { %6728 = vmatpush2.bf16.msra.mxu0 %v9897_v48  ;;  %v9958_v36 = vld [vmem:[%s11542_s14 + $0x664] ss:$16 sps:$4 sm:$0xff]   ;;  %v9956_v38 = vld [vmem:[%s11542_s14 + $0x660] ss:$16 sps:$4 sm:$0xff]  }
  0x41   : > { %6769 = vmatpush2.bf16.msra.mxu1 %v9898_v49  ;;  %6729 = vmatprep.subr.bf16.mxu0 %v9899_v51  ;;  %v9961_v39 = vld [vmem:[%s11542_s14 + $0x444] ss:$16 sps:$4 sm:$0xff]   ;;  %v9959_v41 = vld [vmem:[%s11542_s14 + $0x440] ss:$16 sps:$4 sm:$0xff]  }
  0x42   : > { %6770 = vmatprep.subr.bf16.mxu1 %v9901_v52  ;;  %v9964_v40 = vld [vmem:[%s11542_s14 + $0x644] ss:$16 sps:$4 sm:$0xff]   ;;  %v9962_v42 = vld [vmem:[%s11542_s14 + $0x640] ss:$16 sps:$4 sm:$0xff]  }
  0x43   : > { %v9967_v43 = vld [vmem:[%s11542_s14 + $0x424] ss:$16 sps:$4 sm:$0xff]   ;;  %v9965_v46 = vld [vmem:[%s11542_s14 + $0x420] ss:$16 sps:$4 sm:$0xff]  }
  0x44   : > { %6730 = vmatpush2.bf16.msra.mxu0 %v9903_v54  ;;  %v9970_v45 = vld [vmem:[%s11542_s14 + $0x624] ss:$16 sps:$4 sm:$0xff]   ;;  %v9968_v47 = vld [vmem:[%s11542_s14 + $0x620] ss:$16 sps:$4 sm:$0xff]  }
  0x45   : > { %6771 = vmatpush2.bf16.msra.mxu1 %v9904_v56  ;;  %6731 = vmatprep.subr.bf16.mxu0 %v9905_v57  ;;  %v9973_v48 = vld [vmem:[%s11542_s14 + $0x404] ss:$16 sps:$4 sm:$0xff]   ;;  %v9971_v51 = vld [vmem:[%s11542_s14 + $0x400] ss:$16 sps:$4 sm:$0xff]  }
  0x46   : > { %6772 = vmatprep.subr.bf16.mxu1 %v9907_v58  ;;  %v9976_v49 = vld [vmem:[%s11542_s14 + $0x604] ss:$16 sps:$4 sm:$0xff]   ;;  %v9974_v52 = vld [vmem:[%s11542_s14 + $0x600] ss:$16 sps:$4 sm:$0xff]  }
  0x47   : > { %v9979_v53 = vld [vmem:[%s11542_s14 + $0x5e4] ss:$16 sps:$4 sm:$0xff]   ;;  %v9977_v55 = vld [vmem:[%s11542_s14 + $0x5e0] ss:$16 sps:$4 sm:$0xff]  }
  0x48   : > { %6732 = vmatpush2.bf16.msra.mxu0 %v9909_v60  ;;  %v9982_v54 = vld [vmem:[%s11542_s14 + $0x7e4] ss:$16 sps:$4 sm:$0xff]   ;;  %v9980_v56 = vld [vmem:[%s11542_s14 + $0x7e0] ss:$16 sps:$4 sm:$0xff]  }
  0x49   : > { %6773 = vmatpush2.bf16.msra.mxu1 %v9910_v62  ;;  %6733 = vmatprep.subr.bf16.mxu0 %v9911_v63  ;;  %v9985_v57 = vld [vmem:[%s11542_s14 + $0x5c4] ss:$16 sps:$4 sm:$0xff]   ;;  %v9983_v59 = vld [vmem:[%s11542_s14 + $0x5c0] ss:$16 sps:$4 sm:$0xff]  }
  0x4a   : > { %6774 = vmatprep.subr.bf16.mxu1 %v9913_v0  ;;  %v9988_v58 = vld [vmem:[%s11542_s14 + $0x7c4] ss:$16 sps:$4 sm:$0xff]   ;;  %v9986_v60 = vld [vmem:[%s11542_s14 + $0x7c0] ss:$16 sps:$4 sm:$0xff]  }
  0x4b   : > { %v9991_v62 = vld [vmem:[%s11542_s14 + $0x5a4] ss:$16 sps:$4 sm:$0xff]   ;;  %v9989_v0 = vld [vmem:[%s11542_s14 + $0x5a0] ss:$16 sps:$4 sm:$0xff]  }
  0x4c   : > { %6734 = vmatpush2.bf16.msra.mxu0 %v9915_v3  ;;  %v9994_v63 = vld [vmem:[%s11542_s14 + $0x7a4] ss:$16 sps:$4 sm:$0xff]   ;;  %v9992_v2 = vld [vmem:[%s11542_s14 + $0x7a0] ss:$16 sps:$4 sm:$0xff]  }
  0x4d   : > { %6775 = vmatpush2.bf16.msra.mxu1 %v9916_v4  ;;  %6735 = vmatprep.subr.bf16.mxu0 %v9917_v5  ;;  %v9997_v3 = vld [vmem:[%s11542_s14 + $0x584] ss:$16 sps:$4 sm:$0xff]   ;;  %v9995_v5 = vld [vmem:[%s11542_s14 + $0x580] ss:$16 sps:$4 sm:$0xff]  }
  0x4e   : > { %6776 = vmatprep.subr.bf16.mxu1 %v9919_v6  ;;  %v10000_v4 = vld [vmem:[%s11542_s14 + $0x784] ss:$16 sps:$4 sm:$0xff]   ;;  %v9998_v6 = vld [vmem:[%s11542_s14 + $0x780] ss:$16 sps:$4 sm:$0xff]  }
  0x4f   : > { %v10009_v12 = vld [vmem:[%s11542_s14 + $0x544] ss:$16 sps:$4 sm:$0xff]  }
  0x50   : > { %6736 = vmatpush2.bf16.msra.mxu0 %v9921_v8  ;;  %v10003_v8 = vld [vmem:[%s11542_s14 + $0x564] ss:$16 sps:$4 sm:$0xff]  }
  0x51   : > { %6777 = vmatpush2.bf16.msra.mxu1 %v9922_v9  ;;  %6737 = vmatprep.subr.bf16.mxu0 %v9923_v10  ;;  %v10006_v9 = vld [vmem:[%s11542_s14 + $0x764] ss:$16 sps:$4 sm:$0xff]   ;;  %v10001_v10 = vld [vmem:[%s11542_s14 + $0x560] ss:$16 sps:$4 sm:$0xff]  }
  0x52   : > { %6778 = vmatprep.subr.bf16.mxu1 %v9925_v11  ;;  %v10004_v11 = vld [vmem:[%s11542_s14 + $0x760] ss:$16 sps:$4 sm:$0xff]  }
  0x54   : > { %6738 = vmatpush2.bf16.msra.mxu0 %v9927_v13  ;;  %v10012_v13 = vld [vmem:[%s11542_s14 + $0x744] ss:$16 sps:$4 sm:$0xff]  }
  0x55   : > { %6779 = vmatpush2.bf16.msra.mxu1 %v9928_v15  ;;  %6789 = vmatprep.subr.bf16.mxu0 %v9931_v16  ;;  %v10007_v15 = vld [vmem:[%s11542_s14 + $0x540] ss:$16 sps:$4 sm:$0xff]  }
  0x56   : > { %6830 = vmatprep.subr.bf16.mxu1 %v9934_v17  ;;  %v10010_v16 = vld [vmem:[%s11542_s14 + $0x740] ss:$16 sps:$4 sm:$0xff]   ;;  %v10015_v17 = vld [vmem:[%s11542_s14 + $0x524] ss:$16 sps:$4 sm:$0xff]  }
  0x57   : > { %6740 = vmatmul.mubr.bf16.vlgmr.msra.gmra.mxu0 %v11630_v14 }
  0x58   : > { %6781 = vmatmul.mubr.bf16.vlgmr.msra.gmra.mxu1 %v11640_v19  ;;  %6790 = vmatpush1.bf16.msra.mxu0 %v9929_v20  ;;  %v10018_v20 = vld [vmem:[%s11542_s14 + $0x724] ss:$16 sps:$4 sm:$0xff]  }
  0x59   : > { %6831 = vmatpush1.bf16.msra.mxu1 %v9932_v21  ;;  %6791 = vmatprep.subr.bf16.mxu0 %v9937_v22  ;;  %v10013_v21 = vld [vmem:[%s11542_s14 + $0x520] ss:$16 sps:$4 sm:$0xff]  }
  0x5a   : > { %6832 = vmatprep.subr.bf16.mxu1 %v9940_v23  ;;  %6821 = vmatprep.mubr.bf16.mxu0 %v11636_v18  ;;  %v10016_v22 = vld [vmem:[%s11542_s14 + $0x720] ss:$16 sps:$4 sm:$0xff]   ;;  %v10021_v23 = vld [vmem:[%s11542_s14 + $0x504] ss:$16 sps:$4 sm:$0xff]  }
  0x5b   : > { %6862 = vmatprep.mubr.bf16.mxu1 %v11648_v24 }
  0x5c   : > { %6792 = vmatpush1.bf16.msra.mxu0 %v9935_v25  ;;  %v10024_v25 = vld [vmem:[%s11542_s14 + $0x704] ss:$16 sps:$4 sm:$0xff]  }
  0x5d   : > { %6833 = vmatpush1.bf16.msra.mxu1 %v9938_v26  ;;  %6793 = vmatprep.subr.bf16.mxu0 %v9943_v27  ;;  %v10019_v26 = vld [vmem:[%s11542_s14 + $0x500] ss:$16 sps:$4 sm:$0xff]   ;;  %v11713_v27 = vrot.slane %v11620_v7, %v11592_v50 }
  0x5e   : > { %6834 = vmatprep.subr.bf16.mxu1 %v9946_v28  ;;  %v10022_v28 = vld [vmem:[%s11542_s14 + $0x700] ss:$16 sps:$4 sm:$0xff]  }
  0x5f   : > { %v10029_v7 = vld [vmem:[%s11542_s14 + $0xae0] ss:$16 sps:$4 sm:$0xff]  }
  0x60   : > { %6794 = vmatpush1.bf16.msra.mxu0 %v9941_v29  ;;  %v10028_v29 = vld [vmem:[%s11542_s14 + $0x8e4] ss:$16 sps:$4 sm:$0xff]  }
  0x61   : > { %6835 = vmatpush1.bf16.msra.mxu1 %v9944_v30  ;;  %6795 = vmatprep.subr.bf16.mxu0 %v9949_v31  ;;  %v10031_v30 = vld [vmem:[%s11542_s14 + $0xae4] ss:$16 sps:$4 sm:$0xff]   ;;  %v11720_v31 = vcombine.high %v11713_v27, %v11713_v27 }
  0x62   : > { %6836 = vmatprep.subr.bf16.mxu1 %v9952_v32  ;;  %v10026_v32 = vld [vmem:[%s11542_s14 + $0x8e0] ss:$16 sps:$4 sm:$0xff]  }
  0x64   : > { %6796 = vmatpush1.bf16.msra.mxu0 %v9947_v33  ;;  %v11725_v33 = vld [vmem:[%s11537_s10 + $0x8] sm:$0xff] }
  0x65   : > { %6837 = vmatpush1.bf16.msra.mxu1 %v9950_v34  ;;  %6797 = vmatprep.subr.bf16.mxu0 %v9955_v35  ;;  %v10034_v34 = vld [vmem:[%s11542_s14 + $0x8c4] ss:$16 sps:$4 sm:$0xff]  }
  0x66   : > { %6838 = vmatprep.subr.bf16.mxu1 %v9958_v36  ;;  %v10037_v35 = vld [vmem:[%s11542_s14 + $0xac4] ss:$16 sps:$4 sm:$0xff]   ;;  %v11731_v36 = vrot.slane %v11725_v33, %v11592_v50 }
  0x68   : > { %6798 = vmatpush1.bf16.msra.mxu0 %v9953_v37  ;;  %v1423_v37 = vcombine.high %v11731_v36, %v11731_v36 }
  0x69   : > { %6839 = vmatpush1.bf16.msra.mxu1 %v9956_v38  ;;  %6799 = vmatprep.subr.bf16.mxu0 %v9961_v39  ;;  %v10032_v38 = vld [vmem:[%s11542_s14 + $0x8c0] ss:$16 sps:$4 sm:$0xff]  }
  0x6a   : > { %6840 = vmatprep.subr.bf16.mxu1 %v9964_v40  ;;  %v10035_v39 = vld [vmem:[%s11542_s14 + $0xac0] ss:$16 sps:$4 sm:$0xff]   ;;  %v10040_v40 = vld [vmem:[%s11542_s14 + $0x8a4] ss:$16 sps:$4 sm:$0xff]  }
  0x6c   : > { %6800 = vmatpush1.bf16.msra.mxu0 %v9959_v41  ;;  %v10043_v41 = vld [vmem:[%s11542_s14 + $0xaa4] ss:$16 sps:$4 sm:$0xff]  }
  0x6d   : > { %6841 = vmatpush1.bf16.msra.mxu1 %v9962_v42  ;;  %6801 = vmatprep.subr.bf16.mxu0 %v9967_v43  ;;  %v11742_v42 = vrot.slane %v1423_v37, %v11592_v50  ;;  %v10104_v37 = vld [vmem:[%s11542_s14 + $0x940] ss:$16 sps:$4 sm:$0xff]  }
  0x6e   : > { %6842 = vmatprep.subr.bf16.mxu1 %v9970_v45  ;;  %v10038_v45 = vld [vmem:[%s11542_s14 + $0x8a0] ss:$16 sps:$4 sm:$0xff]  }
  0x6f   : > { %v11747_v43 = vcombine.high %v11742_v42, %v11742_v42 }
  0x70   : > { %6802 = vmatpush1.bf16.msra.mxu0 %v9965_v46  ;;  %v10041_v46 = vld [vmem:[%s11542_s14 + $0xaa0] ss:$16 sps:$4 sm:$0xff]  }
  0x71   : > { %6843 = vmatpush1.bf16.msra.mxu1 %v9968_v47  ;;  %6803 = vmatprep.subr.bf16.mxu0 %v9973_v48  ;;  %v10046_v47 = vld [vmem:[%s11542_s14 + $0x884] ss:$16 sps:$4 sm:$0xff]  }
  0x72   : > { %6844 = vmatprep.subr.bf16.mxu1 %v9976_v49  ;;  %v10049_v48 = vld [vmem:[%s11542_s14 + $0xa84] ss:$16 sps:$4 sm:$0xff]   ;;  %v10044_v49 = vld [vmem:[%s11542_s14 + $0x880] ss:$16 sps:$4 sm:$0xff]  }
  0x74   : > { %6804 = vmatpush1.bf16.msra.mxu0 %v9971_v51  ;;  %v10047_v51 = vld [vmem:[%s11542_s14 + $0xa80] ss:$16 sps:$4 sm:$0xff]  }
  0x75   : > { %6845 = vmatpush1.bf16.msra.mxu1 %v9974_v52  ;;  %6805 = vmatprep.subr.bf16.mxu0 %v9979_v53  ;;  %v10052_v52 = vld [vmem:[%s11542_s14 + $0x864] ss:$16 sps:$4 sm:$0xff]  }
  0x76   : > { %6846 = vmatprep.subr.bf16.mxu1 %v9982_v54  ;;  %v10055_v53 = vld [vmem:[%s11542_s14 + $0xa64] ss:$16 sps:$4 sm:$0xff]   ;;  %v10050_v54 = vld [vmem:[%s11542_s14 + $0x860] ss:$16 sps:$4 sm:$0xff]  }
  0x78   : > { %6806 = vmatpush2.bf16.msra.mxu0 %v9977_v55  ;;  %v10053_v55 = vld [vmem:[%s11542_s14 + $0xa60] ss:$16 sps:$4 sm:$0xff]  }
  0x79   : > { %6847 = vmatpush2.bf16.msra.mxu1 %v9980_v56  ;;  %6807 = vmatprep.subr.bf16.mxu0 %v9985_v57  ;;  %v10058_v56 = vld [vmem:[%s11542_s14 + $0x844] ss:$16 sps:$4 sm:$0xff]  }
  0x7a   : > { %6848 = vmatprep.subr.bf16.mxu1 %v9988_v58  ;;  %v10061_v57 = vld [vmem:[%s11542_s14 + $0xa44] ss:$16 sps:$4 sm:$0xff]   ;;  %v10056_v58 = vld [vmem:[%s11542_s14 + $0x840] ss:$16 sps:$4 sm:$0xff]  }
  0x7c   : > { %6808 = vmatpush2.bf16.msra.mxu0 %v9983_v59  ;;  %v10059_v59 = vld [vmem:[%s11542_s14 + $0xa40] ss:$16 sps:$4 sm:$0xff]  }
  0x7d   : > { %6849 = vmatpush2.bf16.msra.mxu1 %v9986_v60  ;;  %6809 = vmatprep.subr.bf16.mxu0 %v9991_v62  ;;  %v10064_v60 = vld [vmem:[%s11542_s14 + $0x824] ss:$16 sps:$4 sm:$0xff]  }
  0x7e   : > { %6850 = vmatprep.subr.bf16.mxu1 %v9994_v63  ;;  %v10067_v62 = vld [vmem:[%s11542_s14 + $0xa24] ss:$16 sps:$4 sm:$0xff]   ;;  %v10062_v63 = vld [vmem:[%s11542_s14 + $0x820] ss:$16 sps:$4 sm:$0xff]  }
  0x80   : > { %6810 = vmatpush2.bf16.msra.mxu0 %v9989_v0  ;;  %v10065_v0 = vld [vmem:[%s11542_s14 + $0xa20] ss:$16 sps:$4 sm:$0xff]  }
  0x81   : > { %6851 = vmatpush2.bf16.msra.mxu1 %v9992_v2  ;;  %6811 = vmatprep.subr.bf16.mxu0 %v9997_v3  ;;  %v10070_v2 = vld [vmem:[%s11542_s14 + $0x804] ss:$16 sps:$4 sm:$0xff]  }
  0x82   : > { %6852 = vmatprep.subr.bf16.mxu1 %v10000_v4  ;;  %v10073_v3 = vld [vmem:[%s11542_s14 + $0xa04] ss:$16 sps:$4 sm:$0xff]   ;;  %v10068_v4 = vld [vmem:[%s11542_s14 + $0x800] ss:$16 sps:$4 sm:$0xff]  }
  0x84   : > { %6812 = vmatpush2.bf16.msra.mxu0 %v9995_v5  ;;  %v10071_v5 = vld [vmem:[%s11542_s14 + $0xa00] ss:$16 sps:$4 sm:$0xff]  }
  0x85   : > { %6853 = vmatpush2.bf16.msra.mxu1 %v9998_v6  ;;  %6813 = vmatprep.subr.bf16.mxu0 %v10003_v8  ;;  %v10076_v6 = vld [vmem:[%s11542_s14 + $0x9e4] ss:$16 sps:$4 sm:$0xff]  }
  0x86   : > { %6854 = vmatprep.subr.bf16.mxu1 %v10006_v9  ;;  %v10079_v8 = vld [vmem:[%s11542_s14 + $0xbe4] ss:$16 sps:$4 sm:$0xff]   ;;  %v10074_v9 = vld [vmem:[%s11542_s14 + $0x9e0] ss:$16 sps:$4 sm:$0xff]  }
  0x88   : > { %6814 = vmatpush2.bf16.msra.mxu0 %v10001_v10  ;;  %v10077_v10 = vld [vmem:[%s11542_s14 + $0xbe0] ss:$16 sps:$4 sm:$0xff]  }
  0x89   : > { %6855 = vmatpush2.bf16.msra.mxu1 %v10004_v11  ;;  %6815 = vmatprep.subr.bf16.mxu0 %v10009_v12  ;;  %v10082_v11 = vld [vmem:[%s11542_s14 + $0x9c4] ss:$16 sps:$4 sm:$0xff]  }
  0x8a   : > { %6856 = vmatprep.subr.bf16.mxu1 %v10012_v13  ;;  %v10085_v12 = vld [vmem:[%s11542_s14 + $0xbc4] ss:$16 sps:$4 sm:$0xff]   ;;  %v10080_v13 = vld [vmem:[%s11542_s14 + $0x9c0] ss:$16 sps:$4 sm:$0xff]  }
  0x8c   : > { %6816 = vmatpush2.bf16.msra.mxu0 %v10007_v15  ;;  %v10083_v15 = vld [vmem:[%s11542_s14 + $0xbc0] ss:$16 sps:$4 sm:$0xff]  }
  0x8d   : > { %6857 = vmatpush2.bf16.msra.mxu1 %v10010_v16  ;;  %6817 = vmatprep.subr.bf16.mxu0 %v10015_v17  ;;  %v10088_v16 = vld [vmem:[%s11542_s14 + $0x9a4] ss:$16 sps:$4 sm:$0xff]  }
  0x8e   : > { %6858 = vmatprep.subr.bf16.mxu1 %v10018_v20  ;;  %v10091_v17 = vld [vmem:[%s11542_s14 + $0xba4] ss:$16 sps:$4 sm:$0xff]   ;;  %v10086_v20 = vld [vmem:[%s11542_s14 + $0x9a0] ss:$16 sps:$4 sm:$0xff]  }
  0x90   : > { %6818 = vmatpush2.bf16.msra.mxu0 %v10013_v21  ;;  %v10089_v21 = vld [vmem:[%s11542_s14 + $0xba0] ss:$16 sps:$4 sm:$0xff]  }
  0x91   : > { %6859 = vmatpush2.bf16.msra.mxu1 %v10016_v22  ;;  %6819 = vmatprep.subr.bf16.mxu0 %v10021_v23  ;;  %v10094_v22 = vld [vmem:[%s11542_s14 + $0x984] ss:$16 sps:$4 sm:$0xff]  }
  0x92   : > { %6860 = vmatprep.subr.bf16.mxu1 %v10024_v25  ;;  %v10097_v23 = vld [vmem:[%s11542_s14 + $0xb84] ss:$16 sps:$4 sm:$0xff]   ;;  %v10092_v25 = vld [vmem:[%s11542_s14 + $0x980] ss:$16 sps:$4 sm:$0xff]  }
  0x94   : > { %6820 = vmatpush2.bf16.msra.mxu0 %v10019_v26  ;;  %v10095_v26 = vld [vmem:[%s11542_s14 + $0xb80] ss:$16 sps:$4 sm:$0xff]  }
  0x95   : > { %6861 = vmatpush2.bf16.msra.mxu1 %v10022_v28  ;;  %6871 = vmatprep.subr.bf16.mxu0 %v10028_v29  ;;  %v10100_v28 = vld [vmem:[%s11542_s14 + $0x964] ss:$16 sps:$4 sm:$0xff]  }
  0x96   : > { %6912 = vmatprep.subr.bf16.mxu1 %v10031_v30  ;;  %v10103_v29 = vld [vmem:[%s11542_s14 + $0xb64] ss:$16 sps:$4 sm:$0xff]   ;;  %v10098_v30 = vld [vmem:[%s11542_s14 + $0x960] ss:$16 sps:$4 sm:$0xff]  }
  0x97   : > { %6822 = vmatmul.mubr.bf16.vlgmr.msra.gmra.mxu0 %v11713_v27 }
  0x98   : > { %6863 = vmatmul.mubr.bf16.vlgmr.msra.gmra.mxu1 %v11720_v31  ;;  %6872 = vmatpush1.bf16.msra.mxu0 %v10026_v32  ;;  %v10101_v32 = vld [vmem:[%s11542_s14 + $0xb60] ss:$16 sps:$4 sm:$0xff]  }
  0x99   : > { %6913 = vmatpush1.bf16.msra.mxu1 %v10029_v7  ;;  %6873 = vmatprep.subr.bf16.mxu0 %v10034_v34  ;;  %v10106_v7 = vld [vmem:[%s11542_s14 + $0x944] ss:$16 sps:$4 sm:$0xff]  }
  0x9a   : > { %6914 = vmatprep.subr.bf16.mxu1 %v10037_v35  ;;  %6903 = vmatprep.mubr.bf16.mxu0 %v11742_v42  ;;  %v10109_v34 = vld [vmem:[%s11542_s14 + $0xb44] ss:$16 sps:$4 sm:$0xff]   ;;  %v1408_v35 = vcombine.high %v11725_v33, %v11725_v33  ;;  %v10110_v33 = vld [vmem:[%s11542_s14 + $0x920] ss:$16 sps:$4 sm:$0xff]  }
  0x9b   : > { %6944 = vmatprep.mubr.bf16.mxu1 %v11747_v43 }
  0x9c   : > { %6874 = vmatpush1.bf16.msra.mxu0 %v10032_v38  ;;  %v10107_v38 = vld [vmem:[%s11542_s14 + $0xb40] ss:$16 sps:$4 sm:$0xff]  }
  0x9d   : > { %6915 = vmatpush1.bf16.msra.mxu1 %v10035_v39  ;;  %6875 = vmatprep.subr.bf16.mxu0 %v10040_v40  ;;  %v10112_v39 = vld [vmem:[%s11542_s14 + $0x924] ss:$16 sps:$4 sm:$0xff]  }
  0x9e   : > { %6916 = vmatprep.subr.bf16.mxu1 %v10043_v41  ;;  %v10115_v40 = vld [vmem:[%s11542_s14 + $0xb24] ss:$16 sps:$4 sm:$0xff]   ;;  %v11801_v41 = vrot.slane %v1408_v35, %v11592_v50  ;;  %v10173_v35 = vld [vmem:[%s11542_s14 + $0xfe0] ss:$16 sps:$4 sm:$0xff]  }
  0xa0   : > { %6876 = vmatpush1.bf16.msra.mxu0 %v10038_v45  ;;  %v10113_v45 = vld [vmem:[%s11542_s14 + $0xb20] ss:$16 sps:$4 sm:$0xff]  }
  0xa1   : > { %6917 = vmatpush1.bf16.msra.mxu1 %v10041_v46  ;;  %6877 = vmatprep.subr.bf16.mxu0 %v10046_v47  ;;  %v10118_v46 = vld [vmem:[%s11542_s14 + $0x904] ss:$16 sps:$4 sm:$0xff]  }
  0xa2   : > { %6918 = vmatprep.subr.bf16.mxu1 %v10049_v48  ;;  %v10121_v47 = vld [vmem:[%s11542_s14 + $0xb04] ss:$16 sps:$4 sm:$0xff]   ;;  %v1424_v48 = vcombine.high %v11801_v41, %v11801_v41 }
  0xa4   : > { %6878 = vmatpush1.bf16.msra.mxu0 %v10044_v49  ;;  %v11811_v49 = vrot.slane %v11731_v36, %v11592_v50  ;;  %v10122_v36 = vld [vmem:[%s11542_s14 + $0xce0] ss:$16 sps:$4 sm:$0xff]  }
  0xa5   : > { %6919 = vmatpush1.bf16.msra.mxu1 %v10047_v51  ;;  %6879 = vmatprep.subr.bf16.mxu0 %v10052_v52  ;;  %v10116_v51 = vld [vmem:[%s11542_s14 + $0x900] ss:$16 sps:$4 sm:$0xff]  }
  0xa6   : > { %6920 = vmatprep.subr.bf16.mxu1 %v10055_v53  ;;  %v10119_v52 = vld [vmem:[%s11542_s14 + $0xb00] ss:$16 sps:$4 sm:$0xff]   ;;  %v10124_v53 = vld [vmem:[%s11542_s14 + $0xce4] ss:$16 sps:$4 sm:$0xff]  }
  0xa8   : > { %6880 = vmatpush1.bf16.msra.mxu0 %v10050_v54  ;;  %v10127_v54 = vld [vmem:[%s11542_s14 + $0xee4] ss:$16 sps:$4 sm:$0xff]  }
  0xa9   : > { %6921 = vmatpush1.bf16.msra.mxu1 %v10053_v55  ;;  %6881 = vmatprep.subr.bf16.mxu0 %v10058_v56  ;;  %v11818_v55 = vrot.slane %v1424_v48, %v11592_v50  ;;  %v11822_v56 = vcombine.high %v11811_v49, %v11811_v49  ;;  %v10190_v48 = vld [vmem:[%s11542_s14 + $0xd84] ss:$16 sps:$4 sm:$0xff]  }
  0xaa   : > { %6922 = vmatprep.subr.bf16.mxu1 %v10061_v57  ;;  %v10125_v57 = vld [vmem:[%s11542_s14 + $0xee0] ss:$16 sps:$4 sm:$0xff]  }
  0xac   : > { %6882 = vmatpush1.bf16.msra.mxu0 %v10056_v58  ;;  %v10130_v58 = vld [vmem:[%s11542_s14 + $0xcc4] ss:$16 sps:$4 sm:$0xff]  }
  0xad   : > { %6923 = vmatpush1.bf16.msra.mxu1 %v10059_v59  ;;  %6883 = vmatprep.subr.bf16.mxu0 %v10064_v60  ;;  %v10133_v59 = vld [vmem:[%s11542_s14 + $0xec4] ss:$16 sps:$4 sm:$0xff]   ;;  %v11830_v60 = vcombine.high %v11818_v55, %v11818_v55 }
  0xae   : > { %6924 = vmatprep.subr.bf16.mxu1 %v10067_v62  ;;  %v10128_v62 = vld [vmem:[%s11542_s14 + $0xcc0] ss:$16 sps:$4 sm:$0xff]  }
  0xb0   : > { %6884 = vmatpush1.bf16.msra.mxu0 %v10062_v63  ;;  %v10131_v63 = vld [vmem:[%s11542_s14 + $0xec0] ss:$16 sps:$4 sm:$0xff]  }
  0xb1   : > { %6925 = vmatpush1.bf16.msra.mxu1 %v10065_v0  ;;  %6885 = vmatprep.subr.bf16.mxu0 %v10070_v2  ;;  %v10136_v0 = vld [vmem:[%s11542_s14 + $0xca4] ss:$16 sps:$4 sm:$0xff]  }
  0xb2   : > { %6926 = vmatprep.subr.bf16.mxu1 %v10073_v3  ;;  %v10139_v2 = vld [vmem:[%s11542_s14 + $0xea4] ss:$16 sps:$4 sm:$0xff]   ;;  %v10134_v3 = vld [vmem:[%s11542_s14 + $0xca0] ss:$16 sps:$4 sm:$0xff]  }
  0xb4   : > { %6886 = vmatpush1.bf16.msra.mxu0 %v10068_v4  ;;  %v10137_v4 = vld [vmem:[%s11542_s14 + $0xea0] ss:$16 sps:$4 sm:$0xff]  }
  0xb5   : > { %6927 = vmatpush1.bf16.msra.mxu1 %v10071_v5  ;;  %6887 = vmatprep.subr.bf16.mxu0 %v10076_v6  ;;  %v10142_v5 = vld [vmem:[%s11542_s14 + $0xc84] ss:$16 sps:$4 sm:$0xff]  }
  0xb6   : > { %6928 = vmatprep.subr.bf16.mxu1 %v10079_v8  ;;  %v10145_v6 = vld [vmem:[%s11542_s14 + $0xe84] ss:$16 sps:$4 sm:$0xff]   ;;  %v10140_v8 = vld [vmem:[%s11542_s14 + $0xc80] ss:$16 sps:$4 sm:$0xff]  }
  0xb8   : > { %6888 = vmatpush2.bf16.msra.mxu0 %v10074_v9  ;;  %v10143_v9 = vld [vmem:[%s11542_s14 + $0xe80] ss:$16 sps:$4 sm:$0xff]  }
  0xb9   : > { %6929 = vmatpush2.bf16.msra.mxu1 %v10077_v10  ;;  %6889 = vmatprep.subr.bf16.mxu0 %v10082_v11  ;;  %v10148_v10 = vld [vmem:[%s11542_s14 + $0xc64] ss:$16 sps:$4 sm:$0xff]  }
  0xba   : > { %6930 = vmatprep.subr.bf16.mxu1 %v10085_v12  ;;  %v10151_v11 = vld [vmem:[%s11542_s14 + $0xe64] ss:$16 sps:$4 sm:$0xff]   ;;  %v10146_v12 = vld [vmem:[%s11542_s14 + $0xc60] ss:$16 sps:$4 sm:$0xff]  }
  0xbc   : > { %6890 = vmatpush2.bf16.msra.mxu0 %v10080_v13  ;;  %v10149_v13 = vld [vmem:[%s11542_s14 + $0xe60] ss:$16 sps:$4 sm:$0xff]  }
  0xbd   : > { %6931 = vmatpush2.bf16.msra.mxu1 %v10083_v15  ;;  %6891 = vmatprep.subr.bf16.mxu0 %v10088_v16  ;;  %v10154_v15 = vld [vmem:[%s11542_s14 + $0xc44] ss:$16 sps:$4 sm:$0xff]  }
  0xbe   : > { %6932 = vmatprep.subr.bf16.mxu1 %v10091_v17  ;;  %v10157_v16 = vld [vmem:[%s11542_s14 + $0xe44] ss:$16 sps:$4 sm:$0xff]   ;;  %v10152_v17 = vld [vmem:[%s11542_s14 + $0xc40] ss:$16 sps:$4 sm:$0xff]  }
  0xc0   : > { %6892 = vmatpush2.bf16.msra.mxu0 %v10086_v20  ;;  %v10155_v20 = vld [vmem:[%s11542_s14 + $0xe40] ss:$16 sps:$4 sm:$0xff]  }
  0xc1   : > { %6933 = vmatpush2.bf16.msra.mxu1 %v10089_v21  ;;  %6893 = vmatprep.subr.bf16.mxu0 %v10094_v22  ;;  %v10160_v21 = vld [vmem:[%s11542_s14 + $0xc24] ss:$16 sps:$4 sm:$0xff]  }
  0xc2   : > { %6934 = vmatprep.subr.bf16.mxu1 %v10097_v23  ;;  %v10163_v22 = vld [vmem:[%s11542_s14 + $0xe24] ss:$16 sps:$4 sm:$0xff]   ;;  %v10158_v23 = vld [vmem:[%s11542_s14 + $0xc20] ss:$16 sps:$4 sm:$0xff]  }
  0xc4   : > { %6894 = vmatpush2.bf16.msra.mxu0 %v10092_v25  ;;  %v10161_v25 = vld [vmem:[%s11542_s14 + $0xe20] ss:$16 sps:$4 sm:$0xff]  }
  0xc5   : > { %6935 = vmatpush2.bf16.msra.mxu1 %v10095_v26  ;;  %6895 = vmatprep.subr.bf16.mxu0 %v10100_v28  ;;  %v10166_v26 = vld [vmem:[%s11542_s14 + $0xc04] ss:$16 sps:$4 sm:$0xff]  }
  0xc6   : > { %6936 = vmatprep.subr.bf16.mxu1 %v10103_v29  ;;  %v10169_v28 = vld [vmem:[%s11542_s14 + $0xe04] ss:$16 sps:$4 sm:$0xff]   ;;  %v10164_v29 = vld [vmem:[%s11542_s14 + $0xc00] ss:$16 sps:$4 sm:$0xff]  }
  0xc8   : > { %6896 = vmatpush2.bf16.msra.mxu0 %v10098_v30  ;;  %v10167_v30 = vld [vmem:[%s11542_s14 + $0xe00] ss:$16 sps:$4 sm:$0xff]  }
  0xc9   : > { %6937 = vmatpush2.bf16.msra.mxu1 %v10101_v32  ;;  %6897 = vmatprep.subr.bf16.mxu0 %v10106_v7  ;;  %v10172_v32 = vld [vmem:[%s11542_s14 + $0xde4] ss:$16 sps:$4 sm:$0xff]  }
  0xca   : > { %6938 = vmatprep.subr.bf16.mxu1 %v10109_v34  ;;  %v10175_v7 = vld [vmem:[%s11542_s14 + $0xfe4] ss:$16 sps:$4 sm:$0xff]   ;;  %v10170_v34 = vld [vmem:[%s11542_s14 + $0xde0] ss:$16 sps:$4 sm:$0xff]  }
  0xcc   : > { %6898 = vmatpush2.bf16.msra.mxu0 %v10104_v37  ;;  %v10178_v37 = vld [vmem:[%s11542_s14 + $0xdc4] ss:$16 sps:$4 sm:$0xff]  }
  0xcd   : > { %6939 = vmatpush2.bf16.msra.mxu1 %v10107_v38  ;;  %6899 = vmatprep.subr.bf16.mxu0 %v10112_v39  ;;  %v10181_v38 = vld [vmem:[%s11542_s14 + $0xfc4] ss:$16 sps:$4 sm:$0xff]   ;;  %v10176_v39 = vld [vmem:[%s11542_s14 + $0xdc0] ss:$16 sps:$4 sm:$0xff]  }
  0xce   : > { %6940 = vmatprep.subr.bf16.mxu1 %v10115_v40  ;;  %v10179_v40 = vld [vmem:[%s11542_s14 + $0xfc0] ss:$16 sps:$4 sm:$0xff]  }
  0xd0   : > { %6900 = vmatpush2.bf16.msra.mxu0 %v10110_v33  ;;  %v10184_v33 = vld [vmem:[%s11542_s14 + $0xda4] ss:$16 sps:$4 sm:$0xff]  }
  0xd1   : > { %6941 = vmatpush2.bf16.msra.mxu1 %v10113_v45  ;;  %6901 = vmatprep.subr.bf16.mxu0 %v10118_v46  ;;  %v10187_v45 = vld [vmem:[%s11542_s14 + $0xfa4] ss:$16 sps:$4 sm:$0xff]   ;;  %v10182_v46 = vld [vmem:[%s11542_s14 + $0xda0] ss:$16 sps:$4 sm:$0xff]  }
  0xd2   : > { %6942 = vmatprep.subr.bf16.mxu1 %v10121_v47  ;;  %v10185_v47 = vld [vmem:[%s11542_s14 + $0xfa0] ss:$16 sps:$4 sm:$0xff]  }
  0xd4   : > { %6902 = vmatpush2.bf16.msra.mxu0 %v10116_v51  ;;  %v10193_v51 = vld [vmem:[%s11542_s14 + $0xf84] ss:$16 sps:$4 sm:$0xff]  }
  0xd5   : > { %6943 = vmatpush2.bf16.msra.mxu1 %v10119_v52  ;;  %6953 = vmatprep.subr.bf16.mxu0 %v10124_v53  ;;  %v10188_v52 = vld [vmem:[%s11542_s14 + $0xd80] ss:$16 sps:$4 sm:$0xff]  }
  0xd6   : > { %6994 = vmatprep.subr.bf16.mxu1 %v10127_v54  ;;  %v10191_v53 = vld [vmem:[%s11542_s14 + $0xf80] ss:$16 sps:$4 sm:$0xff]   ;;  %v10196_v54 = vld [vmem:[%s11542_s14 + $0xd64] ss:$16 sps:$4 sm:$0xff]  }
  0xd7   : > { %6904 = vmatmul.mubr.bf16.vlgmr.msra.gmra.mxu0 %v11811_v49 }
  0xd8   : > { %6945 = vmatmul.mubr.bf16.vlgmr.msra.gmra.mxu1 %v11822_v56  ;;  %6954 = vmatpush1.bf16.msra.mxu0 %v10122_v36  ;;  %v10199_v36 = vld [vmem:[%s11542_s14 + $0xf64] ss:$16 sps:$4 sm:$0xff]  }
  0xd9   : > { %6995 = vmatpush1.bf16.msra.mxu1 %v10125_v57  ;;  %6955 = vmatprep.subr.bf16.mxu0 %v10130_v58  ;;  %v10194_v57 = vld [vmem:[%s11542_s14 + $0xd60] ss:$16 sps:$4 sm:$0xff]  }
  0xda   : > { %6996 = vmatprep.subr.bf16.mxu1 %v10133_v59  ;;  %6985 = vmatprep.mubr.bf16.mxu0 %v11818_v55  ;;  %v10197_v58 = vld [vmem:[%s11542_s14 + $0xf60] ss:$16 sps:$4 sm:$0xff]   ;;  %v10202_v59 = vld [vmem:[%s11542_s14 + $0xd44] ss:$16 sps:$4 sm:$0xff]  }
  0xdb   : > { %7026 = vmatprep.mubr.bf16.mxu1 %v11830_v60 }
  0xdc   : > { %6956 = vmatpush1.bf16.msra.mxu0 %v10128_v62  ;;  %v10205_v62 = vld [vmem:[%s11542_s14 + $0xf44] ss:$16 sps:$4 sm:$0xff]  }
  0xdd   : > { %6997 = vmatpush1.bf16.msra.mxu1 %v10131_v63  ;;  %6957 = vmatprep.subr.bf16.mxu0 %v10136_v0  ;;  %v10200_v63 = vld [vmem:[%s11542_s14 + $0xd40] ss:$16 sps:$4 sm:$0xff]  }
  0xde   : > { %6998 = vmatprep.subr.bf16.mxu1 %v10139_v2  ;;  %v11886_v0 = vld [vmem:[%s11537_s10 + $0x10] sm:$0xff] }
  0xdf   : > { %v10203_v2 = vld [vmem:[%s11542_s14 + $0xf40] ss:$16 sps:$4 sm:$0xff]  }
  0xe0   : > { %6958 = vmatpush1.bf16.msra.mxu0 %v10134_v3  ;;  %v10208_v3 = vld [vmem:[%s11542_s14 + $0xd24] ss:$16 sps:$4 sm:$0xff]  }
  0xe1   : > { %6999 = vmatpush1.bf16.msra.mxu1 %v10137_v4  ;;  %6959 = vmatprep.subr.bf16.mxu0 %v10142_v5  ;;  %v10211_v4 = vld [vmem:[%s11542_s14 + $0xf24] ss:$16 sps:$4 sm:$0xff]   ;;  %v11893_v5 = vrot.slane %v11886_v0, %v11592_v50 }
  0xe2   : > { %7000 = vmatprep.subr.bf16.mxu1 %v10145_v6  ;;  %v10206_v6 = vld [vmem:[%s11542_s14 + $0xd20] ss:$16 sps:$4 sm:$0xff]  }
  0xe4   : > { %6960 = vmatpush1.bf16.msra.mxu0 %v10140_v8  ;;  %v10209_v8 = vld [vmem:[%s11542_s14 + $0xf20] ss:$16 sps:$4 sm:$0xff]  }
  0xe5   : > { %7001 = vmatpush1.bf16.msra.mxu1 %v10143_v9  ;;  %6961 = vmatprep.subr.bf16.mxu0 %v10148_v10  ;;  %v10214_v9 = vld [vmem:[%s11542_s14 + $0xd04] ss:$16 sps:$4 sm:$0xff]  }
  0xe6   : > { %7002 = vmatprep.subr.bf16.mxu1 %v10151_v11  ;;  %v10217_v10 = vld [vmem:[%s11542_s14 + $0xf04] ss:$16 sps:$4 sm:$0xff]   ;;  %v1472_v11 = vcombine.high %v11893_v5, %v11893_v5 }
  0xe8   : > { %6962 = vmatpush1.bf16.msra.mxu0 %v10146_v12  ;;  %v10212_v12 = vld [vmem:[%s11542_s14 + $0xd00] ss:$16 sps:$4 sm:$0xff]  }
  0xe9   : > { %7003 = vmatpush1.bf16.msra.mxu1 %v10149_v13  ;;  %6963 = vmatprep.subr.bf16.mxu0 %v10154_v15  ;;  %v11904_v13 = vrot.slane %v11801_v41, %v11592_v50  ;;  %v10215_v15 = vld [vmem:[%s11542_s14 + $0xf00] ss:$16 sps:$4 sm:$0xff]  }
  0xea   : > { %7004 = vmatprep.subr.bf16.mxu1 %v10157_v16  ;;  %v10221_v16 = vld [vmem:[%s11542_s14 + $0x10e4] ss:$16 sps:$4 sm:$0xff]   ;;  %v10222_v41 = vld [vmem:[%s11542_s14 + $0x12e0] ss:$16 sps:$4 sm:$0xff]  }
  0xec   : > { %6964 = vmatpush1.bf16.msra.mxu0 %v10152_v17  ;;  %v10224_v17 = vld [vmem:[%s11542_s14 + $0x12e4] ss:$16 sps:$4 sm:$0xff]  }
  0xed   : > { %7005 = vmatpush1.bf16.msra.mxu1 %v10155_v20  ;;  %6965 = vmatprep.subr.bf16.mxu0 %v10160_v21  ;;  %v11910_v20 = vrot.slane %v1472_v11, %v11592_v50  ;;  %v11914_v21 = vcombine.high %v11904_v13, %v11904_v13  ;;  %v10266_v11 = vld [vmem:[%s11542_s14 + $0x1204] ss:$16 sps:$4 sm:$0xff]  }
  0xee   : > { %7006 = vmatprep.subr.bf16.mxu1 %v10163_v22  ;;  %v10219_v22 = vld [vmem:[%s11542_s14 + $0x10e0] ss:$16 sps:$4 sm:$0xff]  }
  0xf0   : > { %6966 = vmatpush1.bf16.msra.mxu0 %v10158_v23  ;;  %v10227_v23 = vld [vmem:[%s11542_s14 + $0x10c4] ss:$16 sps:$4 sm:$0xff]  }
  0xf1   : > { %7007 = vmatpush1.bf16.msra.mxu1 %v10161_v25  ;;  %6967 = vmatprep.subr.bf16.mxu0 %v10166_v26  ;;  %v10230_v25 = vld [vmem:[%s11542_s14 + $0x12c4] ss:$16 sps:$4 sm:$0xff]   ;;  %v11922_v26 = vcombine.high %v11910_v20, %v11910_v20 }
  0xf2   : > { %7008 = vmatprep.subr.bf16.mxu1 %v10169_v28 }
  0xf4   : > { %6968 = vmatpush1.bf16.msra.mxu0 %v10164_v29 }
  0xf5   : > { %7009 = vmatpush1.bf16.msra.mxu1 %v10167_v30  ;;  %6969 = vmatprep.subr.bf16.mxu0 %v10172_v32  ;;  %v10225_v30 = vld [vmem:[%s11542_s14 + $0x10c0] ss:$16 sps:$4 sm:$0xff]  }
  0xf6   : > { %7010 = vmatprep.subr.bf16.mxu1 %v10175_v7  ;;  %v10228_v32 = vld [vmem:[%s11542_s14 + $0x12c0] ss:$16 sps:$4 sm:$0xff]  }
  0xf8   : > { %6970 = vmatpush2.bf16.msra.mxu0 %v10170_v34 }
  0xf9   : > { %7011 = vmatpush2.bf16.msra.mxu1 %v10173_v35  ;;  %6971 = vmatprep.subr.bf16.mxu0 %v10178_v37  ;;  %v10233_v37 = vld [vmem:[%s11542_s14 + $0x10a4] ss:$16 sps:$4 sm:$0xff]  }
  0xfa   : > { %7012 = vmatprep.subr.bf16.mxu1 %v10181_v38  ;;  %v10236_v38 = vld [vmem:[%s11542_s14 + $0x12a4] ss:$16 sps:$4 sm:$0xff]  }
  0xfc   : > { %6972 = vmatpush2.bf16.msra.mxu0 %v10176_v39 }
  0xfd   : > { %7013 = vmatpush2.bf16.msra.mxu1 %v10179_v40  ;;  %6973 = vmatprep.subr.bf16.mxu0 %v10184_v33  ;;  %v10231_v40 = vld [vmem:[%s11542_s14 + $0x10a0] ss:$16 sps:$4 sm:$0xff]  }
  0xfe   : > { %7014 = vmatprep.subr.bf16.mxu1 %v10187_v45  ;;  %v10234_v33 = vld [vmem:[%s11542_s14 + $0x12a0] ss:$16 sps:$4 sm:$0xff]  }
 0x100   : > { %6974 = vmatpush2.bf16.msra.mxu0 %v10182_v46 }
 0x101   : > { %7015 = vmatpush2.bf16.msra.mxu1 %v10185_v47  ;;  %6975 = vmatprep.subr.bf16.mxu0 %v10190_v48 }
 0x102   : > { %7016 = vmatprep.subr.bf16.mxu1 %v10193_v51  ;;  %v10239_v51 = vld [vmem:[%s11542_s14 + $0x1084] ss:$16 sps:$4 sm:$0xff]  }
 0x104   : > { %6976 = vmatpush2.bf16.msra.mxu0 %v10188_v52  ;;  %v10242_v52 = vld [vmem:[%s11542_s14 + $0x1284] ss:$16 sps:$4 sm:$0xff]  }
 0x105   : > { %7017 = vmatpush2.bf16.msra.mxu1 %v10191_v53  ;;  %6977 = vmatprep.subr.bf16.mxu0 %v10196_v54  ;;  %v10237_v53 = vld [vmem:[%s11542_s14 + $0x1080] ss:$16 sps:$4 sm:$0xff]  }
 0x106   : > { %7018 = vmatprep.subr.bf16.mxu1 %v10199_v36  ;;  %v10240_v54 = vld [vmem:[%s11542_s14 + $0x1280] ss:$16 sps:$4 sm:$0xff]   ;;  %v10245_v36 = vld [vmem:[%s11542_s14 + $0x1064] ss:$16 sps:$4 sm:$0xff]  }
 0x108   : > { %6978 = vmatpush2.bf16.msra.mxu0 %v10194_v57  ;;  %v10248_v57 = vld [vmem:[%s11542_s14 + $0x1264] ss:$16 sps:$4 sm:$0xff]  }
 0x109   : > { %7019 = vmatpush2.bf16.msra.mxu1 %v10197_v58  ;;  %6979 = vmatprep.subr.bf16.mxu0 %v10202_v59  ;;  %v10243_v58 = vld [vmem:[%s11542_s14 + $0x1060] ss:$16 sps:$4 sm:$0xff]  }
 0x10a   : > { %7020 = vmatprep.subr.bf16.mxu1 %v10205_v62  ;;  %v10246_v59 = vld [vmem:[%s11542_s14 + $0x1260] ss:$16 sps:$4 sm:$0xff]   ;;  %v10251_v62 = vld [vmem:[%s11542_s14 + $0x1044] ss:$16 sps:$4 sm:$0xff]  }
 0x10c   : > { %6980 = vmatpush2.bf16.msra.mxu0 %v10200_v63  ;;  %v10254_v63 = vld [vmem:[%s11542_s14 + $0x1244] ss:$16 sps:$4 sm:$0xff]  }
 0x10d   : > { %7021 = vmatpush2.bf16.msra.mxu1 %v10203_v2  ;;  %6981 = vmatprep.subr.bf16.mxu0 %v10208_v3  ;;  %v10249_v2 = vld [vmem:[%s11542_s14 + $0x1040] ss:$16 sps:$4 sm:$0xff]  }
 0x10e   : > { %7022 = vmatprep.subr.bf16.mxu1 %v10211_v4  ;;  %v10252_v3 = vld [vmem:[%s11542_s14 + $0x1240] ss:$16 sps:$4 sm:$0xff]   ;;  %v10257_v4 = vld [vmem:[%s11542_s14 + $0x1024] ss:$16 sps:$4 sm:$0xff]  }
 0x110   : > { %6982 = vmatpush2.bf16.msra.mxu0 %v10206_v6  ;;  %v10260_v6 = vld [vmem:[%s11542_s14 + $0x1224] ss:$16 sps:$4 sm:$0xff]  }
 0x111   : > { %7023 = vmatpush2.bf16.msra.mxu1 %v10209_v8  ;;  %6983 = vmatprep.subr.bf16.mxu0 %v10214_v9  ;;  %v10255_v8 = vld [vmem:[%s11542_s14 + $0x1020] ss:$16 sps:$4 sm:$0xff]  }
 0x112   : > { %7024 = vmatprep.subr.bf16.mxu1 %v10217_v10  ;;  %v10258_v9 = vld [vmem:[%s11542_s14 + $0x1220] ss:$16 sps:$4 sm:$0xff]   ;;  %v10263_v10 = vld [vmem:[%s11542_s14 + $0x1004] ss:$16 sps:$4 sm:$0xff]  }
 0x114   : > { %6984 = vmatpush2.bf16.msra.mxu0 %v10212_v12  ;;  %v10261_v12 = vld [vmem:[%s11542_s14 + $0x1000] ss:$16 sps:$4 sm:$0xff]  }
 0x115   : > { %7025 = vmatpush2.bf16.msra.mxu1 %v10215_v15  ;;  %7035 = vmatprep.subr.bf16.mxu0 %v10221_v16  ;;  %v10264_v15 = vld [vmem:[%s11542_s14 + $0x1200] ss:$16 sps:$4 sm:$0xff]   ;;  %v10269_v16 = vld [vmem:[%s11542_s14 + $0x11e4] ss:$16 sps:$4 sm:$0xff]  }
 0x116   : > { %7076 = vmatprep.subr.bf16.mxu1 %v10224_v17  ;;  %v10272_v17 = vld [vmem:[%s11542_s14 + $0x13e4] ss:$16 sps:$4 sm:$0xff]  }
 0x117   : > { %v6741_v28 = vpop.f32.mrf.mxu0  ;;  %6986 = vmatmul.mubr.bf16.vlgmr.msra.gmra.mxu0 %v11904_v13 }
 0x118   : > { %v6782_v29 = vpop.f32.mrf.mxu1  ;;  %7027 = vmatmul.mubr.bf16.vlgmr.msra.gmra.mxu1 %v11914_v21  ;;  %7036 = vmatpush1.bf16.msra.mxu0 %v10219_v22  ;;  %v10267_v22 = vld [vmem:[%s11542_s14 + $0x11e0] ss:$16 sps:$4 sm:$0xff]  }
 0x119   : > { %v11928_v7 = vadd.f32 %v6782_v29, %v6741_v28  ;;  %7077 = vmatpush1.bf16.msra.mxu1 %v10222_v41  ;;  %v6743_v34 = vpop.f32.mrf.mxu0  ;;  %7037 = vmatprep.subr.bf16.mxu0 %v10227_v23  ;;  %v10270_v41 = vld [vmem:[%s11542_s14 + $0x13e0] ss:$16 sps:$4 sm:$0xff]   ;;  %v10275_v23 = vld [vmem:[%s11542_s14 + $0x11c4] ss:$16 sps:$4 sm:$0xff]  }
 0x11a   : > { %v6784_v35 = vpop.f32.mrf.mxu1  ;;  %7078 = vmatprep.subr.bf16.mxu1 %v10230_v25  ;;  %7067 = vmatprep.mubr.bf16.mxu0 %v11910_v20  ;;  %v10278_v25 = vld [vmem:[%s11542_s14 + $0x13c4] ss:$16 sps:$4 sm:$0xff]   ;;  %v10273_v28 = vld [vmem:[%s11542_s14 + $0x11c0] ss:$16 sps:$4 sm:$0xff]  }
 0x11b   : > { %v11932_v39 = vadd.f32 %v6784_v35, %v6743_v34  ;;  %7108 = vmatprep.mubr.bf16.mxu1 %v11922_v26  ;;  %v6745_v45 = vpop.f32.mrf.mxu0  ;;  %v10276_v29 = vld [vmem:[%s11542_s14 + $0x13c0] ss:$16 sps:$4 sm:$0xff]  }
 0x11c   : > { %v6786_v46 = vpop.f32.mrf.mxu1  ;;  %7038 = vmatpush1.bf16.msra.mxu0 %v10225_v30  ;;  %v10281_v30 = vld [vmem:[%s11542_s14 + $0x11a4] ss:$16 sps:$4 sm:$0xff]   ;;  %v10279_v34 = vld [vmem:[%s11542_s14 + $0x11a0] ss:$16 sps:$4 sm:$0xff]  }
 0x11d   : > { %7079 = vmatpush1.bf16.msra.mxu1 %v10228_v32  ;;  %v6746_v47 = vpop.f32.mrf.mxu0  ;;  %7039 = vmatprep.subr.bf16.mxu0 %v10233_v37  ;;  %v10284_v32 = vld [vmem:[%s11542_s14 + $0x13a4] ss:$16 sps:$4 sm:$0xff]   ;;  %v10282_v35 = vld [vmem:[%s11542_s14 + $0x13a0] ss:$16 sps:$4 sm:$0xff]  }
 0x11e   : > { %v6787_v48 = vpop.f32.mrf.mxu1  ;;  %7080 = vmatprep.subr.bf16.mxu1 %v10236_v38  ;;  %v10287_v37 = vld [vmem:[%s11542_s14 + $0x1184] ss:$16 sps:$4 sm:$0xff]   ;;  %v10291_v47 = vld [vmem:[%s11542_s14 + $0x1160] ss:$16 sps:$4 sm:$0xff]  }
 0x11f   : > { %v10290_v38 = vld [vmem:[%s11542_s14 + $0x1384] ss:$16 sps:$4 sm:$0xff]   ;;  %v10294_v48 = vld [vmem:[%s11542_s14 + $0x1360] ss:$16 sps:$4 sm:$0xff]  }
 0x120   : > { %7040 = vmatpush1.bf16.msra.mxu0 %v10231_v40  ;;  %v10285_v40 = vld [vmem:[%s11542_s14 + $0x1180] ss:$16 sps:$4 sm:$0xff]   ;;  %v10293_v45 = vld [vmem:[%s11542_s14 + $0x1164] ss:$16 sps:$4 sm:$0xff]  }
 0x121   : > { %7081 = vmatpush1.bf16.msra.mxu1 %v10234_v33  ;;  %7041 = vmatprep.subr.bf16.mxu0 %v10239_v51  ;;  %v10288_v33 = vld [vmem:[%s11542_s14 + $0x1380] ss:$16 sps:$4 sm:$0xff]   ;;  %v10296_v46 = vld [vmem:[%s11542_s14 + $0x1364] ss:$16 sps:$4 sm:$0xff]  }
 0x122   : > { %7082 = vmatprep.subr.bf16.mxu1 %v10242_v52  ;;  %v10299_v51 = vld [vmem:[%s11542_s14 + $0x1144] ss:$16 sps:$4 sm:$0xff]  }
 0x123   : > { %v10302_v52 = vld [vmem:[%s11542_s14 + $0x1344] ss:$16 sps:$4 sm:$0xff]  }
 0x124   : > { %7042 = vmatpush1.bf16.msra.mxu0 %v10237_v53  ;;  %v1457_v53 = vcombine.high %v11886_v0, %v11886_v0  ;;  %v10303_v0 = vld [vmem:[%s11542_s14 + $0x1120] ss:$16 sps:$4 sm:$0xff]  }
 0x125   : > { %7083 = vmatpush1.bf16.msra.mxu1 %v10240_v54  ;;  %7043 = vmatprep.subr.bf16.mxu0 %v10245_v36  ;;  %v10297_v54 = vld [vmem:[%s11542_s14 + $0x1140] ss:$16 sps:$4 sm:$0xff]  }
 0x126   : > { %7084 = vmatprep.subr.bf16.mxu1 %v10248_v57  ;;  %v10300_v36 = vld [vmem:[%s11542_s14 + $0x1340] ss:$16 sps:$4 sm:$0xff]   ;;  %v10305_v57 = vld [vmem:[%s11542_s14 + $0x1124] ss:$16 sps:$4 sm:$0xff]  }
 0x128   : > { %7044 = vmatpush1.bf16.msra.mxu0 %v10243_v58  ;;  %v10308_v58 = vld [vmem:[%s11542_s14 + $0x1324] ss:$16 sps:$4 sm:$0xff]  }
 0x129   : > { %7085 = vmatpush1.bf16.msra.mxu1 %v10246_v59  ;;  %7045 = vmatprep.subr.bf16.mxu0 %v10251_v62  ;;  %v11987_v59 = vrot.slane %v1457_v53, %v11592_v50  ;;  %v10306_v62 = vld [vmem:[%s11542_s14 + $0x1320] ss:$16 sps:$4 sm:$0xff]  }
 0x12a   : > { %7086 = vmatprep.subr.bf16.mxu1 %v10254_v63  ;;  %v10311_v63 = vld [vmem:[%s11542_s14 + $0x1104] ss:$16 sps:$4 sm:$0xff]   ;;  %v10336_v53 = vld [vmem:[%s11542_s14 + $0x1680] ss:$16 sps:$4 sm:$0xff]  }
 0x12c   : > { %7046 = vmatpush1.bf16.msra.mxu0 %v10249_v2  ;;  %v10314_v2 = vld [vmem:[%s11542_s14 + $0x1304] ss:$16 sps:$4 sm:$0xff]  }
 0x12d   : > { %7087 = vmatpush1.bf16.msra.mxu1 %v10252_v3  ;;  %7047 = vmatprep.subr.bf16.mxu0 %v10257_v4  ;;  %v1473_v3 = vcombine.high %v11987_v59, %v11987_v59  ;;  %v11997_v4 = vrot.slane %v11893_v5, %v11592_v50 }
 0x12e   : > { %7088 = vmatprep.subr.bf16.mxu1 %v10260_v6  ;;  %v10309_v6 = vld [vmem:[%s11542_s14 + $0x1100] ss:$16 sps:$4 sm:$0xff]  }
 0x12f   : > { %v12010_v5 = vcombine.high %v11997_v4, %v11997_v4 }
 0x130   : > { %7048 = vmatpush1.bf16.msra.mxu0 %v10255_v8  ;;  %v10312_v8 = vld [vmem:[%s11542_s14 + $0x1300] ss:$16 sps:$4 sm:$0xff]  }
 0x131   : > { %7089 = vmatpush1.bf16.msra.mxu1 %v10258_v9  ;;  %7049 = vmatprep.subr.bf16.mxu0 %v10263_v10  ;;  %v10317_v9 = vld [vmem:[%s11542_s14 + $0x14e4] ss:$16 sps:$4 sm:$0xff]  }
 0x132   : > { %7090 = vmatprep.subr.bf16.mxu1 %v10266_v11  ;;  %v10320_v10 = vld [vmem:[%s11542_s14 + $0x16e4] ss:$16 sps:$4 sm:$0xff]   ;;  %v10315_v11 = vld [vmem:[%s11542_s14 + $0x14e0] ss:$16 sps:$4 sm:$0xff]  }
 0x134   : > { %7050 = vmatpush1.bf16.msra.mxu0 %v10261_v12  ;;  %v10318_v12 = vld [vmem:[%s11542_s14 + $0x16e0] ss:$16 sps:$4 sm:$0xff]  }
 0x135   : > { %7091 = vmatpush1.bf16.msra.mxu1 %v10264_v15  ;;  %7051 = vmatprep.subr.bf16.mxu0 %v10269_v16  ;;  %v12006_v15 = vrot.slane %v1473_v3, %v11592_v50  ;;  %v10323_v16 = vld [vmem:[%s11542_s14 + $0x14c4] ss:$16 sps:$4 sm:$0xff]  }
 0x136   : > { %7092 = vmatprep.subr.bf16.mxu1 %v10272_v17  ;;  %v10326_v17 = vld [vmem:[%s11542_s14 + $0x16c4] ss:$16 sps:$4 sm:$0xff]  }
 0x137   : > { %v10353_v3 = vld [vmem:[%s11542_s14 + $0x1424] ss:$16 sps:$4 sm:$0xff]  }
 0x138   : > { %7052 = vmatpush2.bf16.msra.mxu0 %v10267_v22  ;;  %v10321_v22 = vld [vmem:[%s11542_s14 + $0x14c0] ss:$16 sps:$4 sm:$0xff]  }
 0x139   : > { %7093 = vmatpush2.bf16.msra.mxu1 %v10270_v41  ;;  %7053 = vmatprep.subr.bf16.mxu0 %v10275_v23  ;;  %v10324_v41 = vld [vmem:[%s11542_s14 + $0x16c0] ss:$16 sps:$4 sm:$0xff]   ;;  %v12018_v23 = vcombine.high %v12006_v15, %v12006_v15 }
 0x13a   : > { %7094 = vmatprep.subr.bf16.mxu1 %v10278_v25 }
 0x13c   : > { %7054 = vmatpush2.bf16.msra.mxu0 %v10273_v28 }
 0x13d   : > { %7095 = vmatpush2.bf16.msra.mxu1 %v10276_v29  ;;  %7055 = vmatprep.subr.bf16.mxu0 %v10281_v30 }
 0x13e   : > { %7096 = vmatprep.subr.bf16.mxu1 %v10284_v32 }
 0x140   : > { %7056 = vmatpush2.bf16.msra.mxu0 %v10279_v34  ;;  %v10329_v34 = vld [vmem:[%s11542_s14 + $0x14a4] ss:$16 sps:$4 sm:$0xff]  }
 0x141   : > { %7097 = vmatpush2.bf16.msra.mxu1 %v10282_v35  ;;  %7057 = vmatprep.subr.bf16.mxu0 %v10287_v37  ;;  %v10332_v35 = vld [vmem:[%s11542_s14 + $0x16a4] ss:$16 sps:$4 sm:$0xff]  }
 0x142   : > { %7098 = vmatprep.subr.bf16.mxu1 %v10290_v38 }
 0x144   : > { %7058 = vmatpush2.bf16.msra.mxu0 %v10285_v40  ;;  %v10327_v40 = vld [vmem:[%s11542_s14 + $0x14a0] ss:$16 sps:$4 sm:$0xff]  }
 0x145   : > { %7099 = vmatpush2.bf16.msra.mxu1 %v10288_v33  ;;  %7059 = vmatprep.subr.bf16.mxu0 %v10293_v45  ;;  %v10330_v33 = vld [vmem:[%s11542_s14 + $0x16a0] ss:$16 sps:$4 sm:$0xff]  }
 0x146   : > { %7100 = vmatprep.subr.bf16.mxu1 %v10296_v46 }
 0x148   : > { %7060 = vmatpush2.bf16.msra.mxu0 %v10291_v47 }
 0x149   : > { %7101 = vmatpush2.bf16.msra.mxu1 %v10294_v48  ;;  %7061 = vmatprep.subr.bf16.mxu0 %v10299_v51  ;;  %v10338_v51 = vld [vmem:[%s11542_s14 + $0x1684] ss:$16 sps:$4 sm:$0xff]  }
 0x14a   : > { %7102 = vmatprep.subr.bf16.mxu1 %v10302_v52  ;;  %v10333_v52 = vld [vmem:[%s11542_s14 + $0x1480] ss:$16 sps:$4 sm:$0xff]  }
 0x14c   : > { %7062 = vmatpush2.bf16.msra.mxu0 %v10297_v54  ;;  %v10341_v54 = vld [vmem:[%s11542_s14 + $0x1464] ss:$16 sps:$4 sm:$0xff]  }
 0x14d   : > { %7103 = vmatpush2.bf16.msra.mxu1 %v10300_v36  ;;  %7063 = vmatprep.subr.bf16.mxu0 %v10305_v57  ;;  %v10344_v36 = vld [vmem:[%s11542_s14 + $0x1664] ss:$16 sps:$4 sm:$0xff]   ;;  %v10339_v57 = vld [vmem:[%s11542_s14 + $0x1460] ss:$16 sps:$4 sm:$0xff]  }
 0x14e   : > { %7104 = vmatprep.subr.bf16.mxu1 %v10308_v58  ;;  %v10342_v58 = vld [vmem:[%s11542_s14 + $0x1660] ss:$16 sps:$4 sm:$0xff]  }
 0x150   : > { %7064 = vmatpush2.bf16.msra.mxu0 %v10303_v0  ;;  %v10347_v0 = vld [vmem:[%s11542_s14 + $0x1444] ss:$16 sps:$4 sm:$0xff]  }
 0x151   : > { %7105 = vmatpush2.bf16.msra.mxu1 %v10306_v62  ;;  %7065 = vmatprep.subr.bf16.mxu0 %v10311_v63  ;;  %v10350_v62 = vld [vmem:[%s11542_s14 + $0x1644] ss:$16 sps:$4 sm:$0xff]   ;;  %v10345_v63 = vld [vmem:[%s11542_s14 + $0x1440] ss:$16 sps:$4 sm:$0xff]  }
 0x152   : > { %7106 = vmatprep.subr.bf16.mxu1 %v10314_v2  ;;  %v10348_v2 = vld [vmem:[%s11542_s14 + $0x1640] ss:$16 sps:$4 sm:$0xff]  }
 0x154   : > { %7066 = vmatpush2.bf16.msra.mxu0 %v10309_v6  ;;  %v10356_v6 = vld [vmem:[%s11542_s14 + $0x1624] ss:$16 sps:$4 sm:$0xff]  }
 0x155   : > { %7107 = vmatpush2.bf16.msra.mxu1 %v10312_v8  ;;  %7117 = vmatprep.subr.bf16.mxu0 %v10317_v9  ;;  %v10351_v8 = vld [vmem:[%s11542_s14 + $0x1420] ss:$16 sps:$4 sm:$0xff]  }
 0x156   : > { %7158 = vmatprep.subr.bf16.mxu1 %v10320_v10  ;;  %v10354_v9 = vld [vmem:[%s11542_s14 + $0x1620] ss:$16 sps:$4 sm:$0xff]   ;;  %v10359_v10 = vld [vmem:[%s11542_s14 + $0x1404] ss:$16 sps:$4 sm:$0xff]  }
 0x157   : > { %v6823_v25 = vpop.f32.mrf.mxu0  ;;  %7068 = vmatmul.mubr.bf16.vlgmr.msra.gmra.mxu0 %v11997_v4 }
 0x158   : > { %v6864_v28 = vpop.f32.mrf.mxu1  ;;  %7109 = vmatmul.mubr.bf16.vlgmr.msra.gmra.mxu1 %v12010_v5  ;;  %v6824_v29 = vadd.f32 %v6823_v25, %v11928_v7  ;;  %7118 = vmatpush1.bf16.msra.mxu0 %v10315_v11  ;;  %v10362_v11 = vld [vmem:[%s11542_s14 + $0x1604] ss:$16 sps:$4 sm:$0xff]   ;;  %v10366_v25 = vld [vmem:[%s11542_s14 + $0x17e0] ss:$16 sps:$4 sm:$0xff]  }
 0x159   : > { %7159 = vmatpush1.bf16.msra.mxu1 %v10318_v12  ;;  %v6825_v30 = vpop.f32.mrf.mxu0  ;;  %7119 = vmatprep.subr.bf16.mxu0 %v10323_v16  ;;  %v10357_v12 = vld [vmem:[%s11542_s14 + $0x1400] ss:$16 sps:$4 sm:$0xff]  }
 0x15a   : > { %v6866_v32 = vpop.f32.mrf.mxu1  ;;  %7160 = vmatprep.subr.bf16.mxu1 %v10326_v17  ;;  %v12025_v37 = vadd.f32 %v6864_v28, %v6824_v29  ;;  %v6826_v38 = vadd.f32 %v6825_v30, %v11932_v39  ;;  %7149 = vmatprep.mubr.bf16.mxu0 %v12006_v15  ;;  %v10335_v39 = vld [vmem:[%s11542_s14 + $0x1484] ss:$16 sps:$4 sm:$0xff]   ;;  %v10360_v16 = vld [vmem:[%s11542_s14 + $0x1600] ss:$16 sps:$4 sm:$0xff]  }
 0x15b   : > { %7190 = vmatprep.mubr.bf16.mxu1 %v12018_v23  ;;  %v6827_v7 = vpop.f32.mrf.mxu0  ;;  %v10365_v17 = vld [vmem:[%s11542_s14 + $0x15e4] ss:$16 sps:$4 sm:$0xff]   ;;  %v10369_v30 = vld [vmem:[%s11542_s14 + $0x15c0] ss:$16 sps:$4 sm:$0xff]  }
 0x15c   : > { %v6868_v45 = vpop.f32.mrf.mxu1  ;;  %v12032_v46 = vadd.f32 %v6866_v32, %v6826_v38  ;;  %7120 = vmatpush1.bf16.msra.mxu0 %v10321_v22  ;;  %v10368_v22 = vld [vmem:[%s11542_s14 + $0x17e4] ss:$16 sps:$4 sm:$0xff]   ;;  %v10372_v32 = vld [vmem:[%s11542_s14 + $0x17c0] ss:$16 sps:$4 sm:$0xff]  }
 0x15d   : > { %7161 = vmatpush1.bf16.msra.mxu1 %v10324_v41  ;;  %v6828_v47 = vpop.f32.mrf.mxu0  ;;  %7121 = vmatprep.subr.bf16.mxu0 %v10329_v34  ;;  %v10363_v41 = vld [vmem:[%s11542_s14 + $0x15e0] ss:$16 sps:$4 sm:$0xff]   ;;  %v10371_v28 = vld [vmem:[%s11542_s14 + $0x15c4] ss:$16 sps:$4 sm:$0xff]  }
 0x15e   : > { %v6869_v48 = vpop.f32.mrf.mxu1  ;;  %7162 = vmatprep.subr.bf16.mxu1 %v10332_v35  ;;  %v10374_v29 = vld [vmem:[%s11542_s14 + $0x17c4] ss:$16 sps:$4 sm:$0xff]   ;;  %v10375_v38 = vld [vmem:[%s11542_s14 + $0x15a0] ss:$16 sps:$4 sm:$0xff]  }
 0x15f   : > { %v10377_v34 = vld [vmem:[%s11542_s14 + $0x15a4] ss:$16 sps:$4 sm:$0xff]   ;;  %v10381_v45 = vld [vmem:[%s11542_s14 + $0x1580] ss:$16 sps:$4 sm:$0xff]  }
 0x160   : > { %7122 = vmatpush1.bf16.msra.mxu0 %v10327_v40  ;;  %v10380_v35 = vld [vmem:[%s11542_s14 + $0x17a4] ss:$16 sps:$4 sm:$0xff]   ;;  %v10378_v40 = vld [vmem:[%s11542_s14 + $0x17a0] ss:$16 sps:$4 sm:$0xff]  }
 0x161   : > { %7163 = vmatpush1.bf16.msra.mxu1 %v10330_v33  ;;  %7123 = vmatprep.subr.bf16.mxu0 %v10335_v39  ;;  %v10383_v33 = vld [vmem:[%s11542_s14 + $0x1584] ss:$16 sps:$4 sm:$0xff]   ;;  %v10384_v47 = vld [vmem:[%s11542_s14 + $0x1780] ss:$16 sps:$4 sm:$0xff]  }
 0x162   : > { %7164 = vmatprep.subr.bf16.mxu1 %v10338_v51  ;;  %v10386_v7 = vld [vmem:[%s11542_s14 + $0x1784] ss:$16 sps:$4 sm:$0xff]   ;;  %v10387_v51 = vld [vmem:[%s11542_s14 + $0x1560] ss:$16 sps:$4 sm:$0xff]  }
 0x163   : > { %v10389_v48 = vld [vmem:[%s11542_s14 + $0x1564] ss:$16 sps:$4 sm:$0xff]  }
 0x164   : > { %7124 = vmatpush1.bf16.msra.mxu0 %v10333_v52  ;;  %v10392_v39 = vld [vmem:[%s11542_s14 + $0x1764] ss:$16 sps:$4 sm:$0xff]   ;;  %v10390_v52 = vld [vmem:[%s11542_s14 + $0x1760] ss:$16 sps:$4 sm:$0xff]  }
 0x165   : > { %7165 = vmatpush1.bf16.msra.mxu1 %v10336_v53  ;;  %7125 = vmatprep.subr.bf16.mxu0 %v10341_v54  ;;  %v10395_v53 = vld [vmem:[%s11542_s14 + $0x1544] ss:$16 sps:$4 sm:$0xff]  }
 0x166   : > { %7166 = vmatprep.subr.bf16.mxu1 %v10344_v36  ;;  %v10398_v54 = vld [vmem:[%s11542_s14 + $0x1744] ss:$16 sps:$4 sm:$0xff]   ;;  %v12077_v36 = vld [vmem:[%s11537_s10 + $0x18] sm:$0xff] }
 0x168   : > { %7126 = vmatpush1.bf16.msra.mxu0 %v10339_v57  ;;  %v10393_v57 = vld [vmem:[%s11542_s14 + $0x1540] ss:$16 sps:$4 sm:$0xff]  }
 0x169   : > { %7167 = vmatpush1.bf16.msra.mxu1 %v10342_v58  ;;  %7127 = vmatprep.subr.bf16.mxu0 %v10347_v0  ;;  %v10396_v58 = vld [vmem:[%s11542_s14 + $0x1740] ss:$16 sps:$4 sm:$0xff]   ;;  %v10401_v0 = vld [vmem:[%s11542_s14 + $0x1524] ss:$16 sps:$4 sm:$0xff]  }
 0x16a   : > { %7168 = vmatprep.subr.bf16.mxu1 %v10350_v62  ;;  %v10404_v62 = vld [vmem:[%s11542_s14 + $0x1724] ss:$16 sps:$4 sm:$0xff]  }
 0x16c   : > { %7128 = vmatpush1.bf16.msra.mxu0 %v10345_v63  ;;  %v12085_v63 = vrot.slane %v12077_v36, %v11592_v50 }
 0x16d   : > { %7169 = vmatpush1.bf16.msra.mxu1 %v10348_v2  ;;  %7129 = vmatprep.subr.bf16.mxu0 %v10353_v3  ;;  %v10399_v2 = vld [vmem:[%s11542_s14 + $0x1520] ss:$16 sps:$4 sm:$0xff]  }
 0x16e   : > { %7170 = vmatprep.subr.bf16.mxu1 %v10356_v6  ;;  %v10402_v3 = vld [vmem:[%s11542_s14 + $0x1720] ss:$16 sps:$4 sm:$0xff]   ;;  %v10407_v6 = vld [vmem:[%s11542_s14 + $0x1504] ss:$16 sps:$4 sm:$0xff]  }
 0x170   : > { %7130 = vmatpush1.bf16.msra.mxu0 %v10351_v8  ;;  %v10410_v8 = vld [vmem:[%s11542_s14 + $0x1704] ss:$16 sps:$4 sm:$0xff]  }
 0x171   : > { %7171 = vmatpush1.bf16.msra.mxu1 %v10354_v9  ;;  %7131 = vmatprep.subr.bf16.mxu0 %v10359_v10  ;;  %v1521_v9 = vcombine.high %v12085_v63, %v12085_v63  ;;  %v12095_v10 = vrot.slane %v11987_v59, %v11592_v50 }
 0x172   : > { %7172 = vmatprep.subr.bf16.mxu1 %v10362_v11  ;;  %v10405_v11 = vld [vmem:[%s11542_s14 + $0x1500] ss:$16 sps:$4 sm:$0xff]  }
 0x173   : > { %v12108_v59 = vcombine.high %v12095_v10, %v12095_v10 }
 0x174   : > { %7132 = vmatpush1.bf16.msra.mxu0 %v10357_v12  ;;  %v10408_v12 = vld [vmem:[%s11542_s14 + $0x1700] ss:$16 sps:$4 sm:$0xff]  }
 0x175   : > { %7173 = vmatpush1.bf16.msra.mxu1 %v10360_v16  ;;  %7133 = vmatprep.subr.bf16.mxu0 %v10365_v17  ;;  %v10414_v16 = vld [vmem:[%s11542_s14 + $0x18e4] ss:$16 sps:$4 sm:$0xff]  }
 0x176   : > { %7174 = vmatprep.subr.bf16.mxu1 %v10368_v22  ;;  %v10417_v17 = vld [vmem:[%s11542_s14 + $0x1ae4] ss:$16 sps:$4 sm:$0xff]   ;;  %v10412_v22 = vld [vmem:[%s11542_s14 + $0x18e0] ss:$16 sps:$4 sm:$0xff]  }
 0x178   : > { %7134 = vmatpush2.bf16.msra.mxu0 %v10363_v41  ;;  %v10415_v41 = vld [vmem:[%s11542_s14 + $0x1ae0] ss:$16 sps:$4 sm:$0xff]  }
 0x179   : > { %7175 = vmatpush2.bf16.msra.mxu1 %v10366_v25  ;;  %7135 = vmatprep.subr.bf16.mxu0 %v10371_v28  ;;  %v12104_v25 = vrot.slane %v1521_v9, %v11592_v50  ;;  %v10420_v28 = vld [vmem:[%s11542_s14 + $0x18c4] ss:$16 sps:$4 sm:$0xff]   ;;  %v10439_v9 = vld [vmem:[%s11542_s14 + $0x1a60] ss:$16 sps:$4 sm:$0xff]  }
 0x17a   : > { %7176 = vmatprep.subr.bf16.mxu1 %v10374_v29  ;;  %v10423_v29 = vld [vmem:[%s11542_s14 + $0x1ac4] ss:$16 sps:$4 sm:$0xff]  }
 0x17c   : > { %7136 = vmatpush2.bf16.msra.mxu0 %v10369_v30  ;;  %v10418_v30 = vld [vmem:[%s11542_s14 + $0x18c0] ss:$16 sps:$4 sm:$0xff]  }
 0x17d   : > { %7177 = vmatpush2.bf16.msra.mxu1 %v10372_v32  ;;  %7137 = vmatprep.subr.bf16.mxu0 %v10377_v34  ;;  %v10421_v32 = vld [vmem:[%s11542_s14 + $0x1ac0] ss:$16 sps:$4 sm:$0xff]   ;;  %v12116_v34 = vcombine.high %v12104_v25, %v12104_v25 }
 0x17e   : > { %7178 = vmatprep.subr.bf16.mxu1 %v10380_v35 }
 0x180   : > { %7138 = vmatpush2.bf16.msra.mxu0 %v10375_v38 }
 0x181   : > { %7179 = vmatpush2.bf16.msra.mxu1 %v10378_v40  ;;  %7139 = vmatprep.subr.bf16.mxu0 %v10383_v33 }
 0x182   : > { %7180 = vmatprep.subr.bf16.mxu1 %v10386_v7 }
 0x184   : > { %7140 = vmatpush2.bf16.msra.mxu0 %v10381_v45  ;;  %v10426_v45 = vld [vmem:[%s11542_s14 + $0x18a4] ss:$16 sps:$4 sm:$0xff]  }
 0x185   : > { %7181 = vmatpush2.bf16.msra.mxu1 %v10384_v47  ;;  %7141 = vmatprep.subr.bf16.mxu0 %v10389_v48  ;;  %v10429_v47 = vld [vmem:[%s11542_s14 + $0x1aa4] ss:$16 sps:$4 sm:$0xff]  }
 0x186   : > { %7182 = vmatprep.subr.bf16.mxu1 %v10392_v39 }
 0x188   : > { %7142 = vmatpush2.bf16.msra.mxu0 %v10387_v51  ;;  %v10424_v51 = vld [vmem:[%s11542_s14 + $0x18a0] ss:$16 sps:$4 sm:$0xff]  }
 0x189   : > { %7183 = vmatpush2.bf16.msra.mxu1 %v10390_v52  ;;  %7143 = vmatprep.subr.bf16.mxu0 %v10395_v53  ;;  %v10427_v52 = vld [vmem:[%s11542_s14 + $0x1aa0] ss:$16 sps:$4 sm:$0xff]  }
 0x18a   : > { %7184 = vmatprep.subr.bf16.mxu1 %v10398_v54 }
 0x18c   : > { %7144 = vmatpush2.bf16.msra.mxu0 %v10393_v57 }
 0x18d   : > { %7185 = vmatpush2.bf16.msra.mxu1 %v10396_v58  ;;  %7145 = vmatprep.subr.bf16.mxu0 %v10401_v0  ;;  %v10435_v0 = vld [vmem:[%s11542_s14 + $0x1a84] ss:$16 sps:$4 sm:$0xff]  }
 0x18e   : > { %7186 = vmatprep.subr.bf16.mxu1 %v10404_v62  ;;  %v10430_v62 = vld [vmem:[%s11542_s14 + $0x1880] ss:$16 sps:$4 sm:$0xff]  }
 0x190   : > { %7146 = vmatpush2.bf16.msra.mxu0 %v10399_v2  ;;  %v10433_v2 = vld [vmem:[%s11542_s14 + $0x1a80] ss:$16 sps:$4 sm:$0xff]  }
 0x191   : > { %7187 = vmatpush2.bf16.msra.mxu1 %v10402_v3  ;;  %7147 = vmatprep.subr.bf16.mxu0 %v10407_v6  ;;  %v10438_v3 = vld [vmem:[%s11542_s14 + $0x1864] ss:$16 sps:$4 sm:$0xff]  }
 0x192   : > { %7188 = vmatprep.subr.bf16.mxu1 %v10410_v8  ;;  %v10441_v6 = vld [vmem:[%s11542_s14 + $0x1a64] ss:$16 sps:$4 sm:$0xff]   ;;  %v10436_v8 = vld [vmem:[%s11542_s14 + $0x1860] ss:$16 sps:$4 sm:$0xff]  }
 0x194   : > { %7148 = vmatpush2.bf16.msra.mxu0 %v10405_v11  ;;  %v10444_v11 = vld [vmem:[%s11542_s14 + $0x1844] ss:$16 sps:$4 sm:$0xff]  }
 0x195   : > { %7189 = vmatpush2.bf16.msra.mxu1 %v10408_v12  ;;  %7199 = vmatprep.subr.bf16.mxu0 %v10414_v16  ;;  %v10447_v12 = vld [vmem:[%s11542_s14 + $0x1a44] ss:$16 sps:$4 sm:$0xff]   ;;  %v10442_v16 = vld [vmem:[%s11542_s14 + $0x1840] ss:$16 sps:$4 sm:$0xff]  }
 0x196   : > { %7240 = vmatprep.subr.bf16.mxu1 %v10417_v17  ;;  %v10445_v17 = vld [vmem:[%s11542_s14 + $0x1a40] ss:$16 sps:$4 sm:$0xff]  }
 0x197   : > { %v6905_v35 = vpop.f32.mrf.mxu0  ;;  %7150 = vmatmul.mubr.bf16.vlgmr.msra.gmra.mxu0 %v12095_v10 }
 0x198   : > { %v6946_v38 = vpop.f32.mrf.mxu1  ;;  %7191 = vmatmul.mubr.bf16.vlgmr.msra.gmra.mxu1 %v12108_v59  ;;  %v6906_v40 = vadd.f32 %v6905_v35, %v12025_v37  ;;  %7200 = vmatpush1.bf16.msra.mxu0 %v10412_v22  ;;  %v10450_v22 = vld [vmem:[%s11542_s14 + $0x1824] ss:$16 sps:$4 sm:$0xff]   ;;  %v10454_v35 = vld [vmem:[%s11542_s14 + $0x1800] ss:$16 sps:$4 sm:$0xff]  }
 0x199   : > { %7241 = vmatpush1.bf16.msra.mxu1 %v10415_v41  ;;  %v6907_v33 = vpop.f32.mrf.mxu0  ;;  %7201 = vmatprep.subr.bf16.mxu0 %v10420_v28  ;;  %v10453_v41 = vld [vmem:[%s11542_s14 + $0x1a24] ss:$16 sps:$4 sm:$0xff]   ;;  %v10448_v28 = vld [vmem:[%s11542_s14 + $0x1820] ss:$16 sps:$4 sm:$0xff]  }
 0x19a   : > { %v6948_v7 = vpop.f32.mrf.mxu1  ;;  %7242 = vmatprep.subr.bf16.mxu1 %v10423_v29  ;;  %v12123_v48 = vadd.f32 %v6946_v38, %v6906_v40  ;;  %v6908_v39 = vadd.f32 %v6907_v33, %v12032_v46  ;;  %7231 = vmatprep.mubr.bf16.mxu0 %v12104_v25  ;;  %v10432_v46 = vld [vmem:[%s11542_s14 + $0x1884] ss:$16 sps:$4 sm:$0xff]   ;;  %v10451_v29 = vld [vmem:[%s11542_s14 + $0x1a20] ss:$16 sps:$4 sm:$0xff]  }
 0x19b   : > { %7272 = vmatprep.mubr.bf16.mxu1 %v12116_v34  ;;  %v6909_v37 = vpop.f32.mrf.mxu0  ;;  %v10457_v38 = vld [vmem:[%s11542_s14 + $0x1a00] ss:$16 sps:$4 sm:$0xff]   ;;  %v10462_v40 = vld [vmem:[%s11542_s14 + $0x19e4] ss:$16 sps:$4 sm:$0xff]  }
 0x19c   : > { %v6950_v53 = vpop.f32.mrf.mxu1  ;;  %v12130_v54 = vadd.f32 %v6948_v7, %v6908_v39  ;;  %7202 = vmatpush1.bf16.msra.mxu0 %v10418_v30  ;;  %v10456_v30 = vld [vmem:[%s11542_s14 + $0x1804] ss:$16 sps:$4 sm:$0xff]   ;;  %v10460_v7 = vld [vmem:[%s11542_s14 + $0x19e0] ss:$16 sps:$4 sm:$0xff]  }
 0x19d   : > { %7243 = vmatpush1.bf16.msra.mxu1 %v10421_v32  ;;  %v6910_v57 = vpop.f32.mrf.mxu0  ;;  %7203 = vmatprep.subr.bf16.mxu0 %v10426_v45  ;;  %v10459_v32 = vld [vmem:[%s11542_s14 + $0x1a04] ss:$16 sps:$4 sm:$0xff]   ;;  %v10463_v45 = vld [vmem:[%s11542_s14 + $0x1be0] ss:$16 sps:$4 sm:$0xff]  }
 0x19e   : > { %v6951_v58 = vpop.f32.mrf.mxu1  ;;  %7244 = vmatprep.subr.bf16.mxu1 %v10429_v47  ;;  %v10465_v33 = vld [vmem:[%s11542_s14 + $0x1be4] ss:$16 sps:$4 sm:$0xff]   ;;  %v10472_v57 = vld [vmem:[%s11542_s14 + $0x19a0] ss:$16 sps:$4 sm:$0xff]  }
 0x19f   : > { %v10468_v47 = vld [vmem:[%s11542_s14 + $0x19c4] ss:$16 sps:$4 sm:$0xff]   ;;  %v10475_v58 = vld [vmem:[%s11542_s14 + $0x1ba0] ss:$16 sps:$4 sm:$0xff]  }
 0x1a0   : > { %7204 = vmatpush1.bf16.msra.mxu0 %v10424_v51  ;;  %v10471_v39 = vld [vmem:[%s11542_s14 + $0x1bc4] ss:$16 sps:$4 sm:$0xff]   ;;  %v10466_v51 = vld [vmem:[%s11542_s14 + $0x19c0] ss:$16 sps:$4 sm:$0xff]  }
 0x1a1   : > { %7245 = vmatpush1.bf16.msra.mxu1 %v10427_v52  ;;  %7205 = vmatprep.subr.bf16.mxu0 %v10432_v46  ;;  %v10469_v52 = vld [vmem:[%s11542_s14 + $0x1bc0] ss:$16 sps:$4 sm:$0xff]   ;;  %v10474_v37 = vld [vmem:[%s11542_s14 + $0x19a4] ss:$16 sps:$4 sm:$0xff]  }
 0x1a2   : > { %7246 = vmatprep.subr.bf16.mxu1 %v10435_v0  ;;  %v10477_v53 = vld [vmem:[%s11542_s14 + $0x1ba4] ss:$16 sps:$4 sm:$0xff]  }
 0x1a3   : > { %v10480_v46 = vld [vmem:[%s11542_s14 + $0x1984] ss:$16 sps:$4 sm:$0xff]  }
 0x1a4   : > { %7206 = vmatpush1.bf16.msra.mxu0 %v10430_v62  ;;  %v10483_v0 = vld [vmem:[%s11542_s14 + $0x1b84] ss:$16 sps:$4 sm:$0xff]   ;;  %v10478_v62 = vld [vmem:[%s11542_s14 + $0x1980] ss:$16 sps:$4 sm:$0xff]  }
 0x1a5   : > { %7247 = vmatpush1.bf16.msra.mxu1 %v10433_v2  ;;  %7207 = vmatprep.subr.bf16.mxu0 %v10438_v3  ;;  %v10481_v2 = vld [vmem:[%s11542_s14 + $0x1b80] ss:$16 sps:$4 sm:$0xff]   ;;  %v10486_v3 = vld [vmem:[%s11542_s14 + $0x1964] ss:$16 sps:$4 sm:$0xff]  }
 0x1a6   : > { %7248 = vmatprep.subr.bf16.mxu1 %v10441_v6  ;;  %v10489_v6 = vld [vmem:[%s11542_s14 + $0x1b64] ss:$16 sps:$4 sm:$0xff]  }
 0x1a8   : > { %7208 = vmatpush1.bf16.msra.mxu0 %v10436_v8  ;;  %v10484_v8 = vld [vmem:[%s11542_s14 + $0x1960] ss:$16 sps:$4 sm:$0xff]  }
 0x1a9   : > { %7249 = vmatpush1.bf16.msra.mxu1 %v10439_v9  ;;  %7209 = vmatprep.subr.bf16.mxu0 %v10444_v11  ;;  %v10487_v9 = vld [vmem:[%s11542_s14 + $0x1b60] ss:$16 sps:$4 sm:$0xff]   ;;  %v10492_v11 = vld [vmem:[%s11542_s14 + $0x1944] ss:$16 sps:$4 sm:$0xff]  }
 0x1aa   : > { %7250 = vmatprep.subr.bf16.mxu1 %v10447_v12  ;;  %v10495_v12 = vld [vmem:[%s11542_s14 + $0x1b44] ss:$16 sps:$4 sm:$0xff]  }
 0x1ac   : > { %7210 = vmatpush1.bf16.msra.mxu0 %v10442_v16  ;;  %v1506_v16 = vcombine.high %v12077_v36, %v12077_v36  ;;  %v10496_v36 = vld [vmem:[%s11542_s14 + $0x1920] ss:$16 sps:$4 sm:$0xff]  }
 0x1ad   : > { %7251 = vmatpush1.bf16.msra.mxu1 %v10445_v17  ;;  %7211 = vmatprep.subr.bf16.mxu0 %v10450_v22  ;;  %v10490_v17 = vld [vmem:[%s11542_s14 + $0x1940] ss:$16 sps:$4 sm:$0xff]  }
 0x1ae   : > { %7252 = vmatprep.subr.bf16.mxu1 %v10453_v41  ;;  %v10493_v22 = vld [vmem:[%s11542_s14 + $0x1b40] ss:$16 sps:$4 sm:$0xff]   ;;  %v10498_v41 = vld [vmem:[%s11542_s14 + $0x1924] ss:$16 sps:$4 sm:$0xff]  }
 0x1b0   : > { %7212 = vmatpush1.bf16.msra.mxu0 %v10448_v28  ;;  %v10501_v28 = vld [vmem:[%s11542_s14 + $0x1b24] ss:$16 sps:$4 sm:$0xff]  }
 0x1b1   : > { %7253 = vmatpush1.bf16.msra.mxu1 %v10451_v29  ;;  %7213 = vmatprep.subr.bf16.mxu0 %v10456_v30  ;;  %v12181_v29 = vrot.slane %v1506_v16, %v11592_v50  ;;  %v10499_v30 = vld [vmem:[%s11542_s14 + $0x1b20] ss:$16 sps:$4 sm:$0xff]  }
 0x1b2   : > { %7254 = vmatprep.subr.bf16.mxu1 %v10459_v32  ;;  %v10504_v32 = vld [vmem:[%s11542_s14 + $0x1904] ss:$16 sps:$4 sm:$0xff]   ;;  %v10520_v16 = vld [vmem:[%s11542_s14 + $0x1ca0] ss:$16 sps:$4 sm:$0xff]  }
 0x1b4   : > { %7214 = vmatpush1.bf16.msra.mxu0 %v10454_v35  ;;  %v10507_v35 = vld [vmem:[%s11542_s14 + $0x1b04] ss:$16 sps:$4 sm:$0xff]  }
 0x1b5   : > { %7255 = vmatpush1.bf16.msra.mxu1 %v10457_v38  ;;  %7215 = vmatprep.subr.bf16.mxu0 %v10462_v40  ;;  %v1522_v38 = vcombine.high %v12181_v29, %v12181_v29  ;;  %v12191_v40 = vrot.slane %v12085_v63, %v11592_v50 }
 0x1b6   : > { %7256 = vmatprep.subr.bf16.mxu1 %v10465_v33  ;;  %v10502_v33 = vld [vmem:[%s11542_s14 + $0x1900] ss:$16 sps:$4 sm:$0xff]  }
 0x1b7   : > { %v12204_v63 = vcombine.high %v12191_v40, %v12191_v40 }
 0x1b8   : > { %7216 = vmatpush2.bf16.msra.mxu0 %v10460_v7  ;;  %v10505_v7 = vld [vmem:[%s11542_s14 + $0x1b00] ss:$16 sps:$4 sm:$0xff]  }
 0x1b9   : > { %7257 = vmatpush2.bf16.msra.mxu1 %v10463_v45  ;;  %7217 = vmatprep.subr.bf16.mxu0 %v10468_v47  ;;  %v10510_v45 = vld [vmem:[%s11542_s14 + $0x1ce4] ss:$16 sps:$4 sm:$0xff]  }
 0x1ba   : > { %7258 = vmatprep.subr.bf16.mxu1 %v10471_v39  ;;  %v10513_v47 = vld [vmem:[%s11542_s14 + $0x1ee4] ss:$16 sps:$4 sm:$0xff]   ;;  %v10508_v39 = vld [vmem:[%s11542_s14 + $0x1ce0] ss:$16 sps:$4 sm:$0xff]  }
 0x1bc   : > { %7218 = vmatpush2.bf16.msra.mxu0 %v10466_v51  ;;  %v10511_v51 = vld [vmem:[%s11542_s14 + $0x1ee0] ss:$16 sps:$4 sm:$0xff]  }
 0x1bd   : > { %7259 = vmatpush2.bf16.msra.mxu1 %v10469_v52  ;;  %7219 = vmatprep.subr.bf16.mxu0 %v10474_v37  ;;  %v12200_v52 = vrot.slane %v1522_v38, %v11592_v50  ;;  %v10516_v37 = vld [vmem:[%s11542_s14 + $0x1cc4] ss:$16 sps:$4 sm:$0xff]  }
 0x1be   : > { %7260 = vmatprep.subr.bf16.mxu1 %v10477_v53  ;;  %v10519_v53 = vld [vmem:[%s11542_s14 + $0x1ec4] ss:$16 sps:$4 sm:$0xff]  }
 0x1bf   : > { %v10534_v38 = vld [vmem:[%s11542_s14 + $0x1c64] ss:$16 sps:$4 sm:$0xff]  }
 0x1c0   : > { %7220 = vmatpush2.bf16.msra.mxu0 %v10472_v57  ;;  %v10514_v57 = vld [vmem:[%s11542_s14 + $0x1cc0] ss:$16 sps:$4 sm:$0xff]  }
 0x1c1   : > { %7261 = vmatpush2.bf16.msra.mxu1 %v10475_v58  ;;  %7221 = vmatprep.subr.bf16.mxu0 %v10480_v46  ;;  %v10517_v58 = vld [vmem:[%s11542_s14 + $0x1ec0] ss:$16 sps:$4 sm:$0xff]   ;;  %v12212_v46 = vcombine.high %v12200_v52, %v12200_v52 }
 0x1c2   : > { %7262 = vmatprep.subr.bf16.mxu1 %v10483_v0 }
 0x1c4   : > { %7222 = vmatpush2.bf16.msra.mxu0 %v10478_v62 }
 0x1c5   : > { %7263 = vmatpush2.bf16.msra.mxu1 %v10481_v2  ;;  %7223 = vmatprep.subr.bf16.mxu0 %v10486_v3 }
 0x1c6   : > { %7264 = vmatprep.subr.bf16.mxu1 %v10489_v6 }
 0x1c8   : > { %7224 = vmatpush2.bf16.msra.mxu0 %v10484_v8  ;;  %v10522_v8 = vld [vmem:[%s11542_s14 + $0x1ca4] ss:$16 sps:$4 sm:$0xff]  }
 0x1c9   : > { %7265 = vmatpush2.bf16.msra.mxu1 %v10487_v9  ;;  %7225 = vmatprep.subr.bf16.mxu0 %v10492_v11  ;;  %v10525_v9 = vld [vmem:[%s11542_s14 + $0x1ea4] ss:$16 sps:$4 sm:$0xff]  }
 0x1ca   : > { %7266 = vmatprep.subr.bf16.mxu1 %v10495_v12 }
 0x1cc   : > { %7226 = vmatpush2.bf16.msra.mxu0 %v10490_v17  ;;  %v10523_v17 = vld [vmem:[%s11542_s14 + $0x1ea0] ss:$16 sps:$4 sm:$0xff]  }
 0x1cd   : > { %7267 = vmatpush2.bf16.msra.mxu1 %v10493_v22  ;;  %7227 = vmatprep.subr.bf16.mxu0 %v10498_v41 }
 0x1ce   : > { %7268 = vmatprep.subr.bf16.mxu1 %v10501_v28 }
 0x1d0   : > { %7228 = vmatpush2.bf16.msra.mxu0 %v10496_v36 }
 0x1d1   : > { %7269 = vmatpush2.bf16.msra.mxu1 %v10499_v30  ;;  %7229 = vmatprep.subr.bf16.mxu0 %v10504_v32  ;;  %v10531_v30 = vld [vmem:[%s11542_s14 + $0x1e84] ss:$16 sps:$4 sm:$0xff]   ;;  %v10526_v32 = vld [vmem:[%s11542_s14 + $0x1c80] ss:$16 sps:$4 sm:$0xff]  }
 0x1d2   : > { %7270 = vmatprep.subr.bf16.mxu1 %v10507_v35  ;;  %v10529_v35 = vld [vmem:[%s11542_s14 + $0x1e80] ss:$16 sps:$4 sm:$0xff]  }
 0x1d4   : > { %7230 = vmatpush2.bf16.msra.mxu0 %v10502_v33  ;;  %v10537_v33 = vld [vmem:[%s11542_s14 + $0x1e64] ss:$16 sps:$4 sm:$0xff]  }
 0x1d5   : > { %7271 = vmatpush2.bf16.msra.mxu1 %v10505_v7  ;;  %7281 = vmatprep.subr.bf16.mxu0 %v10510_v45  ;;  %v10532_v7 = vld [vmem:[%s11542_s14 + $0x1c60] ss:$16 sps:$4 sm:$0xff]  }
 0x1d6   : > { %7322 = vmatprep.subr.bf16.mxu1 %v10513_v47  ;;  %v10535_v45 = vld [vmem:[%s11542_s14 + $0x1e60] ss:$16 sps:$4 sm:$0xff]   ;;  %v10540_v47 = vld [vmem:[%s11542_s14 + $0x1c44] ss:$16 sps:$4 sm:$0xff]  }
 0x1d7   : > { %v6987_v0 = vpop.f32.mrf.mxu0  ;;  %7232 = vmatmul.mubr.bf16.vlgmr.msra.gmra.mxu0 %v12191_v40 }
 0x1d8   : > { %v7028_v62 = vpop.f32.mrf.mxu1  ;;  %7273 = vmatmul.mubr.bf16.vlgmr.msra.gmra.mxu1 %v12204_v63  ;;  %v6988_v2 = vadd.f32 %v6987_v0, %v12123_v48  ;;  %7282 = vmatpush1.bf16.msra.mxu0 %v10508_v39  ;;  %v10543_v39 = vld [vmem:[%s11542_s14 + $0x1e44] ss:$16 sps:$4 sm:$0xff]   ;;  %v10547_v0 = vld [vmem:[%s11542_s14 + $0x1e20] ss:$16 sps:$4 sm:$0xff]  }
 0x1d9   : > { %7323 = vmatpush1.bf16.msra.mxu1 %v10511_v51  ;;  %v6989_v3 = vpop.f32.mrf.mxu0  ;;  %7283 = vmatprep.subr.bf16.mxu0 %v10516_v37  ;;  %v10538_v51 = vld [vmem:[%s11542_s14 + $0x1c40] ss:$16 sps:$4 sm:$0xff]  }
 0x1da   : > { %v7030_v6 = vpop.f32.mrf.mxu1  ;;  %7324 = vmatprep.subr.bf16.mxu1 %v10519_v53  ;;  %v12219_v11 = vadd.f32 %v7028_v62, %v6988_v2  ;;  %v6990_v12 = vadd.f32 %v6989_v3, %v12130_v54  ;;  %7313 = vmatprep.mubr.bf16.mxu0 %v12200_v52  ;;  %v10528_v54 = vld [vmem:[%s11542_s14 + $0x1c84] ss:$16 sps:$4 sm:$0xff]   ;;  %v10541_v37 = vld [vmem:[%s11542_s14 + $0x1e40] ss:$16 sps:$4 sm:$0xff]  }
 0x1db   : > { %7354 = vmatprep.mubr.bf16.mxu1 %v12212_v46  ;;  %v6991_v48 = vpop.f32.mrf.mxu0  ;;  %v10546_v53 = vld [vmem:[%s11542_s14 + $0x1c24] ss:$16 sps:$4 sm:$0xff]   ;;  %v10550_v3 = vld [vmem:[%s11542_s14 + $0x1c00] ss:$16 sps:$4 sm:$0xff]  }
 0x1dc   : > { %v7032_v22 = vpop.f32.mrf.mxu1  ;;  %v12226_v41 = vadd.f32 %v7030_v6, %v6990_v12  ;;  %7284 = vmatpush1.bf16.msra.mxu0 %v10514_v57  ;;  %v10549_v57 = vld [vmem:[%s11542_s14 + $0x1e24] ss:$16 sps:$4 sm:$0xff]   ;;  %v10553_v6 = vld [vmem:[%s11542_s14 + $0x1e00] ss:$16 sps:$4 sm:$0xff]  }
 0x1dd   : > { %7325 = vmatpush1.bf16.msra.mxu1 %v10517_v58  ;;  %v6992_v28 = vpop.f32.mrf.mxu0  ;;  %7285 = vmatprep.subr.bf16.mxu0 %v10522_v8  ;;  %v10544_v58 = vld [vmem:[%s11542_s14 + $0x1c20] ss:$16 sps:$4 sm:$0xff]   ;;  %v10552_v62 = vld [vmem:[%s11542_s14 + $0x1c04] ss:$16 sps:$4 sm:$0xff]  }
 0x1de   : > { %v7033_v36 = vpop.f32.mrf.mxu1  ;;  %7326 = vmatprep.subr.bf16.mxu1 %v10525_v9  ;;  %v10555_v2 = vld [vmem:[%s11542_s14 + $0x1e04] ss:$16 sps:$4 sm:$0xff]   ;;  %v10556_v12 = vld [vmem:[%s11542_s14 + $0x1de0] ss:$16 sps:$4 sm:$0xff]  }
 0x1df   : > { %v10558_v8 = vld [vmem:[%s11542_s14 + $0x1de4] ss:$16 sps:$4 sm:$0xff]   ;;  %v10562_v22 = vld [vmem:[%s11542_s14 + $0x1dc0] ss:$16 sps:$4 sm:$0xff]  }
 0x1e0   : > { %7286 = vmatpush1.bf16.msra.mxu0 %v10520_v16  ;;  %v10561_v9 = vld [vmem:[%s11542_s14 + $0x1fe4] ss:$16 sps:$4 sm:$0xff]   ;;  %v10559_v16 = vld [vmem:[%s11542_s14 + $0x1fe0] ss:$16 sps:$4 sm:$0xff]  }
 0x1e1   : > { %7327 = vmatpush1.bf16.msra.mxu1 %v10523_v17  ;;  %7287 = vmatprep.subr.bf16.mxu0 %v10528_v54  ;;  %v10564_v17 = vld [vmem:[%s11542_s14 + $0x1dc4] ss:$16 sps:$4 sm:$0xff]   ;;  %v10565_v28 = vld [vmem:[%s11542_s14 + $0x1fc0] ss:$16 sps:$4 sm:$0xff]  }
 0x1e2   : > { %7328 = vmatprep.subr.bf16.mxu1 %v10531_v30  ;;  %v10567_v48 = vld [vmem:[%s11542_s14 + $0x1fc4] ss:$16 sps:$4 sm:$0xff]   ;;  %v10568_v30 = vld [vmem:[%s11542_s14 + $0x1da0] ss:$16 sps:$4 sm:$0xff]  }
 0x1e3   : > { %v10570_v36 = vld [vmem:[%s11542_s14 + $0x1da4] ss:$16 sps:$4 sm:$0xff]  }
 0x1e4   : > { %7288 = vmatpush1.bf16.msra.mxu0 %v10526_v32  ;;  %v10573_v54 = vld [vmem:[%s11542_s14 + $0x1fa4] ss:$16 sps:$4 sm:$0xff]   ;;  %v10571_v32 = vld [vmem:[%s11542_s14 + $0x1fa0] ss:$16 sps:$4 sm:$0xff]  }
 0x1e5   : > { %7329 = vmatpush1.bf16.msra.mxu1 %v10529_v35  ;;  %7289 = vmatprep.subr.bf16.mxu0 %v10534_v38  ;;  %v10576_v35 = vld [vmem:[%s11542_s14 + $0x1d84] ss:$16 sps:$4 sm:$0xff]  }
 0x1e6   : > { %7330 = vmatprep.subr.bf16.mxu1 %v10537_v33  ;;  %v10579_v38 = vld [vmem:[%s11542_s14 + $0x1f84] ss:$16 sps:$4 sm:$0xff]   ;;  %v10574_v33 = vld [vmem:[%s11542_s14 + $0x1d80] ss:$16 sps:$4 sm:$0xff]  }
 0x1e8   : > { %7290 = vmatpush1.bf16.msra.mxu0 %v10532_v7  ;;  %v10577_v7 = vld [vmem:[%s11542_s14 + $0x1f80] ss:$16 sps:$4 sm:$0xff]  }
 0x1e9   : > { %7331 = vmatpush1.bf16.msra.mxu1 %v10535_v45  ;;  %7291 = vmatprep.subr.bf16.mxu0 %v10540_v47  ;;  %v10582_v45 = vld [vmem:[%s11542_s14 + $0x1d64] ss:$16 sps:$4 sm:$0xff]  }
 0x1ea   : > { %7332 = vmatprep.subr.bf16.mxu1 %v10543_v39  ;;  %v10585_v47 = vld [vmem:[%s11542_s14 + $0x1f64] ss:$16 sps:$4 sm:$0xff]   ;;  %v10580_v39 = vld [vmem:[%s11542_s14 + $0x1d60] ss:$16 sps:$4 sm:$0xff]  }
 0x1ec   : > { %7292 = vmatpush1.bf16.msra.mxu0 %v10538_v51  ;;  %v10583_v51 = vld [vmem:[%s11542_s14 + $0x1f60] ss:$16 sps:$4 sm:$0xff]  }
 0x1ed   : > { %7333 = vmatpush1.bf16.msra.mxu1 %v10541_v37  ;;  %7293 = vmatprep.subr.bf16.mxu0 %v10546_v53  ;;  %v10588_v37 = vld [vmem:[%s11542_s14 + $0x1d44] ss:$16 sps:$4 sm:$0xff]  }
 0x1ee   : > { %7334 = vmatprep.subr.bf16.mxu1 %v10549_v57  ;;  %v10591_v53 = vld [vmem:[%s11542_s14 + $0x1f44] ss:$16 sps:$4 sm:$0xff]   ;;  %v10586_v57 = vld [vmem:[%s11542_s14 + $0x1d40] ss:$16 sps:$4 sm:$0xff]  }
 0x1f0   : > { %7294 = vmatpush1.bf16.msra.mxu0 %v10544_v58  ;;  %v10589_v58 = vld [vmem:[%s11542_s14 + $0x1f40] ss:$16 sps:$4 sm:$0xff]  }
 0x1f1   : > { %7335 = vmatpush1.bf16.msra.mxu1 %v10547_v0  ;;  %7295 = vmatprep.subr.bf16.mxu0 %v10552_v62  ;;  %v10594_v0 = vld [vmem:[%s11542_s14 + $0x1d24] ss:$16 sps:$4 sm:$0xff]  }
 0x1f2   : > { %7336 = vmatprep.subr.bf16.mxu1 %v10555_v2  ;;  %v10597_v62 = vld [vmem:[%s11542_s14 + $0x1f24] ss:$16 sps:$4 sm:$0xff]   ;;  %v10592_v2 = vld [vmem:[%s11542_s14 + $0x1d20] ss:$16 sps:$4 sm:$0xff]  }
 0x1f4   : > { %7296 = vmatpush1.bf16.msra.mxu0 %v10550_v3  ;;  %v10595_v3 = vld [vmem:[%s11542_s14 + $0x1f20] ss:$16 sps:$4 sm:$0xff]  }
 0x1f5   : > { %7337 = vmatpush1.bf16.msra.mxu1 %v10553_v6  ;;  %7297 = vmatprep.subr.bf16.mxu0 %v10558_v8  ;;  %v10600_v6 = vld [vmem:[%s11542_s14 + $0x1d04] ss:$16 sps:$4 sm:$0xff]  }
 0x1f6   : > { %7338 = vmatprep.subr.bf16.mxu1 %v10561_v9  ;;  %v10603_v8 = vld [vmem:[%s11542_s14 + $0x1f04] ss:$16 sps:$4 sm:$0xff]   ;;  %v12280_v9 = vrot.slane %v12181_v29, %v11592_v50  ;;  %v10613_v50 = vld [vmem:[%s11542_s14 + $0xcc] ss:$16 sps:$4 sm:$0xff]  }
 0x1f7   : > { %v10616_v29 = vld [vmem:[%s11542_s14 + $0x2cc] ss:$16 sps:$4 sm:$0xff]  }
 0x1f8   : > { %7298 = vmatpush2.bf16.msra.mxu0 %v10556_v12  ;;  %v10598_v12 = vld [vmem:[%s11542_s14 + $0x1d00] ss:$16 sps:$4 sm:$0xff]  }
 0x1f9   : > { %7339 = vmatpush2.bf16.msra.mxu1 %v10559_v16  ;;  %7299 = vmatprep.subr.bf16.mxu0 %v10564_v17  ;;  %v10601_v16 = vld [vmem:[%s11542_s14 + $0x1f00] ss:$16 sps:$4 sm:$0xff]   ;;  %v10607_v17 = vld [vmem:[%s11542_s14 + $0xec] ss:$16 sps:$4 sm:$0xff]  }
 0x1fa   : > { %7340 = vmatprep.subr.bf16.mxu1 %v10567_v48  ;;  %v10610_v48 = vld [vmem:[%s11542_s14 + $0x2ec] ss:$16 sps:$4 sm:$0xff]  }
 0x1fc   : > { %7300 = vmatpush2.bf16.msra.mxu0 %v10562_v22  ;;  %v10605_v22 = vld [vmem:[%s11542_s14 + $0xe8] ss:$16 sps:$4 sm:$0xff]  }
 0x1fd   : > { %7341 = vmatpush2.bf16.msra.mxu1 %v10565_v28  ;;  %7301 = vmatprep.subr.bf16.mxu0 %v10570_v36  ;;  %v10608_v28 = vld [vmem:[%s11542_s14 + $0x2e8] ss:$16 sps:$4 sm:$0xff]   ;;  %v12290_v36 = vcombine.high %v12280_v9, %v12280_v9 }
 0x1fe   : > { %7342 = vmatprep.subr.bf16.mxu1 %v10573_v54  ;;  %v10611_v54 = vld [vmem:[%s11542_s14 + $0xc8] ss:$16 sps:$4 sm:$0xff]  }
 0x200   : > { %7302 = vmatpush2.bf16.msra.mxu0 %v10568_v30  ;;  %v10614_v30 = vld [vmem:[%s11542_s14 + $0x2c8] ss:$16 sps:$4 sm:$0xff]  }
 0x201   : > { %7343 = vmatpush2.bf16.msra.mxu1 %v10571_v32  ;;  %7303 = vmatprep.subr.bf16.mxu0 %v10576_v35 }
 0x202   : > { %7344 = vmatprep.subr.bf16.mxu1 %v10579_v38 }
 0x204   : > { %7304 = vmatpush2.bf16.msra.mxu0 %v10574_v33 }
 0x205   : > { %7345 = vmatpush2.bf16.msra.mxu1 %v10577_v7  ;;  %7305 = vmatprep.subr.bf16.mxu0 %v10582_v45  ;;  %v10619_v45 = vld [vmem:[%s11542_s14 + $0xac] ss:$16 sps:$4 sm:$0xff]  }
 0x206   : > { %7346 = vmatprep.subr.bf16.mxu1 %v10585_v47  ;;  %v10622_v47 = vld [vmem:[%s11542_s14 + $0x2ac] ss:$16 sps:$4 sm:$0xff]  }
 0x208   : > { %7306 = vmatpush2.bf16.msra.mxu0 %v10580_v39 }
 0x209   : > { %7347 = vmatpush2.bf16.msra.mxu1 %v10583_v51  ;;  %7307 = vmatprep.subr.bf16.mxu0 %v10588_v37  ;;  %v10617_v37 = vld [vmem:[%s11542_s14 + $0xa8] ss:$16 sps:$4 sm:$0xff]  }
 0x20a   : > { %7348 = vmatprep.subr.bf16.mxu1 %v10591_v53  ;;  %v10620_v53 = vld [vmem:[%s11542_s14 + $0x2a8] ss:$16 sps:$4 sm:$0xff]  }
 0x20c   : > { %7308 = vmatpush2.bf16.msra.mxu0 %v10586_v57 }
 0x20d   : > { %7349 = vmatpush2.bf16.msra.mxu1 %v10589_v58  ;;  %7309 = vmatprep.subr.bf16.mxu0 %v10594_v0 }
 0x20e   : > { %7350 = vmatprep.subr.bf16.mxu1 %v10597_v62 }
 0x210   : > { %7310 = vmatpush2.bf16.msra.mxu0 %v10592_v2  ;;  %v10626_v2 = vld [vmem:[%s11542_s14 + $0x288] ss:$16 sps:$4 sm:$0xff]  }
 0x211   : > { %7351 = vmatpush2.bf16.msra.mxu1 %v10595_v3  ;;  %7311 = vmatprep.subr.bf16.mxu0 %v10600_v6  ;;  %v10631_v3 = vld [vmem:[%s11542_s14 + $0x6c] ss:$16 sps:$4 sm:$0xff]  }
 0x212   : > { %7352 = vmatprep.subr.bf16.mxu1 %v10603_v8  ;;  %v10634_v6 = vld [vmem:[%s11542_s14 + $0x26c] ss:$16 sps:$4 sm:$0xff]   ;;  %v10629_v8 = vld [vmem:[%s11542_s14 + $0x68] ss:$16 sps:$4 sm:$0xff]  }
 0x214   : > { %7312 = vmatpush2.bf16.msra.mxu0 %v10598_v12  ;;  %v10632_v12 = vld [vmem:[%s11542_s14 + $0x268] ss:$16 sps:$4 sm:$0xff]  }
 0x215   : > { %7353 = vmatpush2.bf16.msra.mxu1 %v10601_v16  ;;  %7363 = vmatprep.subr.bf16.mxu0 %v10607_v17  ;;  %v10637_v16 = vld [vmem:[%s11542_s14 + $0x4c] ss:$16 sps:$4 sm:$0xff]  }
 0x216   : > { %7404 = vmatprep.subr.bf16.mxu1 %v10610_v48  ;;  %v10640_v17 = vld [vmem:[%s11542_s14 + $0x24c] ss:$16 sps:$4 sm:$0xff]   ;;  %v10635_v48 = vld [vmem:[%s11542_s14 + $0x48] ss:$16 sps:$4 sm:$0xff]  }
 0x217   : > { %v7069_v32 = vpop.f32.mrf.mxu0  ;;  %7314 = vmatmul.mubr.bf16.vlgmr.msra.gmra.mxu0 %v12280_v9 }
 0x218   : > { %v7110_v35 = vpop.f32.mrf.mxu1  ;;  %7355 = vmatmul.mubr.bf16.vlgmr.msra.gmra.mxu1 %v12290_v36  ;;  %v7070_v38 = vadd.f32 %v7069_v32, %v12219_v11  ;;  %7364 = vmatpush1.bf16.msra.mxu0 %v10605_v22  ;;  %v10638_v22 = vld [vmem:[%s11542_s14 + $0x248] ss:$16 sps:$4 sm:$0xff]   ;;  %v10652_v32 = vld [vmem:[%s11542_s14 + $0x20c] ss:$16 sps:$4 sm:$0xff]  }
 0x219   : > { %7405 = vmatpush1.bf16.msra.mxu1 %v10608_v28  ;;  %v7071_v33 = vpop.f32.mrf.mxu0  ;;  %7365 = vmatprep.subr.bf16.mxu0 %v10613_v50  ;;  %v10643_v28 = vld [vmem:[%s11542_s14 + $0x2c] ss:$16 sps:$4 sm:$0xff]  }
 0x21a   : > { %v7112_v7 = vpop.f32.mrf.mxu1  ;;  %7406 = vmatprep.subr.bf16.mxu1 %v10616_v29  ;;  %v12301_v39 = vadd.f32 %v7110_v35, %v7070_v38  ;;  %v7072_v51 = vadd.f32 %v7071_v33, %v12226_v41  ;;  %7395 = vmatprep.mubr.bf16.mxu0 %v11604_v61  ;;  %v10625_v41 = vld [vmem:[%s11542_s14 + $0x8c] ss:$16 sps:$4 sm:$0xff]   ;;  %v10641_v29 = vld [vmem:[%s11542_s14 + $0x28] ss:$16 sps:$4 sm:$0xff]  }
 0x21b   : > { %7436 = vmatprep.mubr.bf16.mxu1 %v11611_v1  ;;  %v7073_v11 = vpop.f32.mrf.mxu0  ;;  %v10628_v61 = vld [vmem:[%s11542_s14 + $0x28c] ss:$16 sps:$4 sm:$0xff]   ;;  %v10623_v1 = vld [vmem:[%s11542_s14 + $0x88] ss:$16 sps:$4 sm:$0xff]  }
 0x21c   : > { %v7114_v57 = vpop.f32.mrf.mxu1  ;;  %v12308_v58 = vadd.f32 %v7112_v7, %v7072_v51  ;;  %7366 = vmatpush1.bf16.msra.mxu0 %v10611_v54  ;;  %v10646_v50 = vld [vmem:[%s11542_s14 + $0x22c] ss:$16 sps:$4 sm:$0xff]   ;;  %v10644_v54 = vld [vmem:[%s11542_s14 + $0x228] ss:$16 sps:$4 sm:$0xff]  }
 0x21d   : > { %7407 = vmatpush1.bf16.msra.mxu1 %v10614_v30  ;;  %v7074_v0 = vpop.f32.mrf.mxu0  ;;  %7367 = vmatprep.subr.bf16.mxu0 %v10619_v45  ;;  %v10649_v30 = vld [vmem:[%s11542_s14 + $0xc] ss:$16 sps:$4 sm:$0xff]   ;;  %v10647_v35 = vld [vmem:[%s11542_s14 + $0x8] ss:$16 sps:$4 sm:$0xff]  }
 0x21e   : > { %v7115_v62 = vpop.f32.mrf.mxu1  ;;  %7408 = vmatprep.subr.bf16.mxu1 %v10622_v47  ;;  %v10650_v38 = vld [vmem:[%s11542_s14 + $0x208] ss:$16 sps:$4 sm:$0xff]   ;;  %v10655_v33 = vld [vmem:[%s11542_s14 + $0x1ec] ss:$16 sps:$4 sm:$0xff]  }
 0x21f   : > { %v10658_v7 = vld [vmem:[%s11542_s14 + $0x3ec] ss:$16 sps:$4 sm:$0xff]   ;;  %v10653_v45 = vld [vmem:[%s11542_s14 + $0x1e8] ss:$16 sps:$4 sm:$0xff]  }
 0x220   : > { %7368 = vmatpush1.bf16.msra.mxu0 %v10617_v37  ;;  %v10656_v47 = vld [vmem:[%s11542_s14 + $0x3e8] ss:$16 sps:$4 sm:$0xff]   ;;  %v10661_v51 = vld [vmem:[%s11542_s14 + $0x1cc] ss:$16 sps:$4 sm:$0xff]  }
 0x221   : > { %7409 = vmatpush1.bf16.msra.mxu1 %v10620_v53  ;;  %7369 = vmatprep.subr.bf16.mxu0 %v10625_v41  ;;  %v10664_v37 = vld [vmem:[%s11542_s14 + $0x3cc] ss:$16 sps:$4 sm:$0xff]   ;;  %v10659_v53 = vld [vmem:[%s11542_s14 + $0x1c8] ss:$16 sps:$4 sm:$0xff]  }
 0x222   : > { %7410 = vmatprep.subr.bf16.mxu1 %v10628_v61  ;;  %v10662_v11 = vld [vmem:[%s11542_s14 + $0x3c8] ss:$16 sps:$4 sm:$0xff]   ;;  %v10667_v57 = vld [vmem:[%s11542_s14 + $0x1ac] ss:$16 sps:$4 sm:$0xff]  }
 0x223   : > { %v10670_v0 = vld [vmem:[%s11542_s14 + $0x3ac] ss:$16 sps:$4 sm:$0xff]   ;;  %v10665_v62 = vld [vmem:[%s11542_s14 + $0x1a8] ss:$16 sps:$4 sm:$0xff]  }
 0x224   : > { %7370 = vmatpush1.bf16.msra.mxu0 %v10623_v1  ;;  %v10668_v41 = vld [vmem:[%s11542_s14 + $0x3a8] ss:$16 sps:$4 sm:$0xff]   ;;  %v10673_v61 = vld [vmem:[%s11542_s14 + $0x18c] ss:$16 sps:$4 sm:$0xff]  }
 0x225   : > { %7411 = vmatpush1.bf16.msra.mxu1 %v10626_v2  ;;  %7371 = vmatprep.subr.bf16.mxu0 %v10631_v3  ;;  %v10676_v1 = vld [vmem:[%s11542_s14 + $0x38c] ss:$16 sps:$4 sm:$0xff]   ;;  %v10671_v2 = vld [vmem:[%s11542_s14 + $0x188] ss:$16 sps:$4 sm:$0xff]  }
 0x226   : > { %7412 = vmatprep.subr.bf16.mxu1 %v10634_v6  ;;  %v10674_v3 = vld [vmem:[%s11542_s14 + $0x388] ss:$16 sps:$4 sm:$0xff]   ;;  %v10679_v6 = vld [vmem:[%s11542_s14 + $0x16c] ss:$16 sps:$4 sm:$0xff]  }
 0x228   : > { %7372 = vmatpush1.bf16.msra.mxu0 %v10629_v8  ;;  %v10682_v8 = vld [vmem:[%s11542_s14 + $0x36c] ss:$16 sps:$4 sm:$0xff]  }
 0x229   : > { %7413 = vmatpush1.bf16.msra.mxu1 %v10632_v12  ;;  %7373 = vmatprep.subr.bf16.mxu0 %v10637_v16  ;;  %v10677_v12 = vld [vmem:[%s11542_s14 + $0x168] ss:$16 sps:$4 sm:$0xff]  }
 0x22a   : > { %7414 = vmatprep.subr.bf16.mxu1 %v10640_v17  ;;  %v10680_v16 = vld [vmem:[%s11542_s14 + $0x368] ss:$16 sps:$4 sm:$0xff]   ;;  %v10685_v17 = vld [vmem:[%s11542_s14 + $0x14c] ss:$16 sps:$4 sm:$0xff]  }
 0x22c   : > { %7374 = vmatpush1.bf16.msra.mxu0 %v10635_v48  ;;  %v10688_v48 = vld [vmem:[%s11542_s14 + $0x34c] ss:$16 sps:$4 sm:$0xff]  }
 0x22d   : > { %7415 = vmatpush1.bf16.msra.mxu1 %v10638_v22  ;;  %7375 = vmatprep.subr.bf16.mxu0 %v10643_v28  ;;  %v10683_v22 = vld [vmem:[%s11542_s14 + $0x148] ss:$16 sps:$4 sm:$0xff]  }
 0x22e   : > { %7416 = vmatprep.subr.bf16.mxu1 %v10646_v50  ;;  %v10686_v28 = vld [vmem:[%s11542_s14 + $0x348] ss:$16 sps:$4 sm:$0xff]   ;;  %v10691_v50 = vld [vmem:[%s11542_s14 + $0x12c] ss:$16 sps:$4 sm:$0xff]  }
 0x230   : > { %7376 = vmatpush1.bf16.msra.mxu0 %v10641_v29  ;;  %v10694_v29 = vld [vmem:[%s11542_s14 + $0x32c] ss:$16 sps:$4 sm:$0xff]  }
 0x231   : > { %7417 = vmatpush1.bf16.msra.mxu1 %v10644_v54  ;;  %7377 = vmatprep.subr.bf16.mxu0 %v10649_v30  ;;  %v10689_v54 = vld [vmem:[%s11542_s14 + $0x128] ss:$16 sps:$4 sm:$0xff]  }
 0x232   : > { %7418 = vmatprep.subr.bf16.mxu1 %v10652_v32  ;;  %v10692_v30 = vld [vmem:[%s11542_s14 + $0x328] ss:$16 sps:$4 sm:$0xff]   ;;  %v10697_v32 = vld [vmem:[%s11542_s14 + $0x10c] ss:$16 sps:$4 sm:$0xff]  }
 0x234   : > { %7378 = vmatpush1.bf16.msra.mxu0 %v10647_v35  ;;  %v10700_v35 = vld [vmem:[%s11542_s14 + $0x30c] ss:$16 sps:$4 sm:$0xff]  }
 0x235   : > { %7419 = vmatpush1.bf16.msra.mxu1 %v10650_v38  ;;  %7379 = vmatprep.subr.bf16.mxu0 %v10655_v33  ;;  %v10695_v38 = vld [vmem:[%s11542_s14 + $0x108] ss:$16 sps:$4 sm:$0xff]  }
 0x236   : > { %7420 = vmatprep.subr.bf16.mxu1 %v10658_v7  ;;  %v10698_v33 = vld [vmem:[%s11542_s14 + $0x308] ss:$16 sps:$4 sm:$0xff]   ;;  %v10703_v7 = vld [vmem:[%s11542_s14 + $0x4ec] ss:$16 sps:$4 sm:$0xff]  }
 0x238   : > { %7380 = vmatpush2.bf16.msra.mxu0 %v10653_v45  ;;  %v10706_v45 = vld [vmem:[%s11542_s14 + $0x6ec] ss:$16 sps:$4 sm:$0xff]  }
 0x239   : > { %7421 = vmatpush2.bf16.msra.mxu1 %v10656_v47  ;;  %7381 = vmatprep.subr.bf16.mxu0 %v10661_v51  ;;  %v10701_v47 = vld [vmem:[%s11542_s14 + $0x4e8] ss:$16 sps:$4 sm:$0xff]  }
 0x23a   : > { %7422 = vmatprep.subr.bf16.mxu1 %v10664_v37  ;;  %v10704_v51 = vld [vmem:[%s11542_s14 + $0x6e8] ss:$16 sps:$4 sm:$0xff]   ;;  %v10709_v37 = vld [vmem:[%s11542_s14 + $0x4cc] ss:$16 sps:$4 sm:$0xff]  }
 0x23c   : > { %7382 = vmatpush2.bf16.msra.mxu0 %v10659_v53  ;;  %v10712_v53 = vld [vmem:[%s11542_s14 + $0x6cc] ss:$16 sps:$4 sm:$0xff]  }
 0x23d   : > { %7423 = vmatpush2.bf16.msra.mxu1 %v10662_v11  ;;  %7383 = vmatprep.subr.bf16.mxu0 %v10667_v57 }
 0x23e   : > { %7424 = vmatprep.subr.bf16.mxu1 %v10670_v0 }
 0x240   : > { %7384 = vmatpush2.bf16.msra.mxu0 %v10665_v62  ;;  %v10707_v62 = vld [vmem:[%s11542_s14 + $0x4c8] ss:$16 sps:$4 sm:$0xff]  }
 0x241   : > { %7425 = vmatpush2.bf16.msra.mxu1 %v10668_v41  ;;  %7385 = vmatprep.subr.bf16.mxu0 %v10673_v61  ;;  %v10710_v41 = vld [vmem:[%s11542_s14 + $0x6c8] ss:$16 sps:$4 sm:$0xff]  }
 0x242   : > { %7426 = vmatprep.subr.bf16.mxu1 %v10676_v1 }
 0x244   : > { %7386 = vmatpush2.bf16.msra.mxu0 %v10671_v2  ;;  %v10715_v2 = vld [vmem:[%s11542_s14 + $0x4ac] ss:$16 sps:$4 sm:$0xff]  }
 0x245   : > { %7427 = vmatpush2.bf16.msra.mxu1 %v10674_v3  ;;  %7387 = vmatprep.subr.bf16.mxu0 %v10679_v6  ;;  %v10718_v3 = vld [vmem:[%s11542_s14 + $0x6ac] ss:$16 sps:$4 sm:$0xff]  }
 0x246   : > { %7428 = vmatprep.subr.bf16.mxu1 %v10682_v8 }
 0x248   : > { %7388 = vmatpush2.bf16.msra.mxu0 %v10677_v12  ;;  %v10713_v12 = vld [vmem:[%s11542_s14 + $0x4a8] ss:$16 sps:$4 sm:$0xff]  }
 0x249   : > { %7429 = vmatpush2.bf16.msra.mxu1 %v10680_v16  ;;  %7389 = vmatprep.subr.bf16.mxu0 %v10685_v17  ;;  %v10716_v16 = vld [vmem:[%s11542_s14 + $0x6a8] ss:$16 sps:$4 sm:$0xff]  }
 0x24a   : > { %7430 = vmatprep.subr.bf16.mxu1 %v10688_v48 }
 0x24c   : > { %7390 = vmatpush2.bf16.msra.mxu0 %v10683_v22  ;;  %v10722_v22 = vld [vmem:[%s11542_s14 + $0x688] ss:$16 sps:$4 sm:$0xff]  }
 0x24d   : > { %7431 = vmatpush2.bf16.msra.mxu1 %v10686_v28  ;;  %7391 = vmatprep.subr.bf16.mxu0 %v10691_v50  ;;  %v10727_v28 = vld [vmem:[%s11542_s14 + $0x46c] ss:$16 sps:$4 sm:$0xff]  }
 0x24e   : > { %7432 = vmatprep.subr.bf16.mxu1 %v10694_v29  ;;  %v10730_v50 = vld [vmem:[%s11542_s14 + $0x66c] ss:$16 sps:$4 sm:$0xff]   ;;  %v10725_v29 = vld [vmem:[%s11542_s14 + $0x468] ss:$16 sps:$4 sm:$0xff]  }
 0x250   : > { %7392 = vmatpush2.bf16.msra.mxu0 %v10689_v54  ;;  %v10728_v54 = vld [vmem:[%s11542_s14 + $0x668] ss:$16 sps:$4 sm:$0xff]  }
 0x251   : > { %7433 = vmatpush2.bf16.msra.mxu1 %v10692_v30  ;;  %7393 = vmatprep.subr.bf16.mxu0 %v10697_v32  ;;  %v10733_v30 = vld [vmem:[%s11542_s14 + $0x44c] ss:$16 sps:$4 sm:$0xff]  }
 0x252   : > { %7434 = vmatprep.subr.bf16.mxu1 %v10700_v35  ;;  %v10736_v32 = vld [vmem:[%s11542_s14 + $0x64c] ss:$16 sps:$4 sm:$0xff]   ;;  %v10731_v35 = vld [vmem:[%s11542_s14 + $0x448] ss:$16 sps:$4 sm:$0xff]  }
 0x254   : > { %7394 = vmatpush2.bf16.msra.mxu0 %v10695_v38  ;;  %v10734_v38 = vld [vmem:[%s11542_s14 + $0x648] ss:$16 sps:$4 sm:$0xff]  }
 0x255   : > { %7435 = vmatpush2.bf16.msra.mxu1 %v10698_v33  ;;  %7445 = vmatprep.subr.bf16.mxu0 %v10703_v7  ;;  %v10739_v33 = vld [vmem:[%s11542_s14 + $0x42c] ss:$16 sps:$4 sm:$0xff]  }
 0x256   : > { %7486 = vmatprep.subr.bf16.mxu1 %v10706_v45  ;;  %v10742_v7 = vld [vmem:[%s11542_s14 + $0x62c] ss:$16 sps:$4 sm:$0xff]   ;;  %v10737_v45 = vld [vmem:[%s11542_s14 + $0x428] ss:$16 sps:$4 sm:$0xff]  }
 0x257   : > { %v7151_v11 = vpop.f32.mrf.mxu0  ;;  %7396 = vmatmul.mubr.bf16.vlgmr.msra.gmra.mxu0 %v11630_v14 }
 0x258   : > { %v7192_v57 = vpop.f32.mrf.mxu1  ;;  %7437 = vmatmul.mubr.bf16.vlgmr.msra.gmra.mxu1 %v11640_v19  ;;  %v7152_v0 = vadd.f32 %v7151_v11, %v12301_v39  ;;  %7446 = vmatpush1.bf16.msra.mxu0 %v10701_v47  ;;  %v10740_v47 = vld [vmem:[%s11542_s14 + $0x628] ss:$16 sps:$4 sm:$0xff]  }
 0x259   : > { %7487 = vmatpush1.bf16.msra.mxu1 %v10704_v51  ;;  %v7153_v61 = vpop.f32.mrf.mxu0  ;;  %7447 = vmatprep.subr.bf16.mxu0 %v10709_v37  ;;  %v10745_v51 = vld [vmem:[%s11542_s14 + $0x40c] ss:$16 sps:$4 sm:$0xff]   ;;  %v10746_v11 = vld [vmem:[%s11542_s14 + $0x608] ss:$16 sps:$4 sm:$0xff]  }
 0x25a   : > { %v7194_v1 = vpop.f32.mrf.mxu1  ;;  %7488 = vmatprep.subr.bf16.mxu1 %v10712_v53  ;;  %v12375_v6 = vadd.f32 %v7192_v57, %v7152_v0  ;;  %v7154_v14 = vadd.f32 %v7153_v61, %v12308_v58  ;;  %7477 = vmatprep.mubr.bf16.mxu0 %v11636_v18  ;;  %v10721_v18 = vld [vmem:[%s11542_s14 + $0x48c] ss:$16 sps:$4 sm:$0xff]   ;;  %v10719_v58 = vld [vmem:[%s11542_s14 + $0x488] ss:$16 sps:$4 sm:$0xff]  }
 0x25b   : > { %7518 = vmatprep.mubr.bf16.mxu1 %v11648_v24  ;;  %v7155_v19 = vpop.f32.mrf.mxu0  ;;  %v10724_v24 = vld [vmem:[%s11542_s14 + $0x68c] ss:$16 sps:$4 sm:$0xff]   ;;  %v10743_v53 = vld [vmem:[%s11542_s14 + $0x408] ss:$16 sps:$4 sm:$0xff]  }
 0x25c   : > { %v7196_v39 = vpop.f32.mrf.mxu1  ;;  %v12380_v8 = vadd.f32 %v7194_v1, %v7154_v14  ;;  %7448 = vmatpush1.bf16.msra.mxu0 %v10707_v62  ;;  %v10748_v37 = vld [vmem:[%s11542_s14 + $0x60c] ss:$16 sps:$4 sm:$0xff]   ;;  %v10749_v62 = vld [vmem:[%s11542_s14 + $0x5e8] ss:$16 sps:$4 sm:$0xff]  }
 0x25d   : > { %7489 = vmatpush1.bf16.msra.mxu1 %v10710_v41  ;;  %v7156_v17 = vpop.f32.mrf.mxu0  ;;  %7449 = vmatprep.subr.bf16.mxu0 %v10715_v2  ;;  %v10751_v57 = vld [vmem:[%s11542_s14 + $0x5ec] ss:$16 sps:$4 sm:$0xff]   ;;  %v10752_v41 = vld [vmem:[%s11542_s14 + $0x7e8] ss:$16 sps:$4 sm:$0xff]  }
 0x25e   : > { %v7197_v48 = vpop.f32.mrf.mxu1  ;;  %7490 = vmatprep.subr.bf16.mxu1 %v10718_v3  ;;  %v10754_v0 = vld [vmem:[%s11542_s14 + $0x7ec] ss:$16 sps:$4 sm:$0xff]   ;;  %v10755_v2 = vld [vmem:[%s11542_s14 + $0x5c8] ss:$16 sps:$4 sm:$0xff]  }
 0x25f   : > { %v10757_v61 = vld [vmem:[%s11542_s14 + $0x5cc] ss:$16 sps:$4 sm:$0xff]   ;;  %v10758_v3 = vld [vmem:[%s11542_s14 + $0x7c8] ss:$16 sps:$4 sm:$0xff]  }
 0x260   : > { %7450 = vmatpush1.bf16.msra.mxu0 %v10713_v12  ;;  %v10760_v1 = vld [vmem:[%s11542_s14 + $0x7cc] ss:$16 sps:$4 sm:$0xff]   ;;  %v10761_v39 = vld [vmem:[%s11542_s14 + $0x5a8] ss:$16 sps:$4 sm:$0xff]  }
 0x261   : > { %7491 = vmatpush1.bf16.msra.mxu1 %v10716_v16  ;;  %7451 = vmatprep.subr.bf16.mxu0 %v10721_v18  ;;  %v10763_v14 = vld [vmem:[%s11542_s14 + $0x5ac] ss:$16 sps:$4 sm:$0xff]   ;;  %v10764_v12 = vld [vmem:[%s11542_s14 + $0x7a8] ss:$16 sps:$4 sm:$0xff]  }
 0x262   : > { %7492 = vmatprep.subr.bf16.mxu1 %v10724_v24  ;;  %v10766_v19 = vld [vmem:[%s11542_s14 + $0x7ac] ss:$16 sps:$4 sm:$0xff]   ;;  %v10767_v48 = vld [vmem:[%s11542_s14 + $0x588] ss:$16 sps:$4 sm:$0xff]  }
 0x263   : > { %v10769_v16 = vld [vmem:[%s11542_s14 + $0x58c] ss:$16 sps:$4 sm:$0xff]   ;;  %v10770_v18 = vld [vmem:[%s11542_s14 + $0x788] ss:$16 sps:$4 sm:$0xff]  }
 0x264   : > { %7452 = vmatpush1.bf16.msra.mxu0 %v10719_v58  ;;  %v10772_v17 = vld [vmem:[%s11542_s14 + $0x78c] ss:$16 sps:$4 sm:$0xff]  }
 0x265   : > { %7493 = vmatpush1.bf16.msra.mxu1 %v10722_v22  ;;  %7453 = vmatprep.subr.bf16.mxu0 %v10727_v28  ;;  %v10775_v24 = vld [vmem:[%s11542_s14 + $0x56c] ss:$16 sps:$4 sm:$0xff]   ;;  %v10773_v22 = vld [vmem:[%s11542_s14 + $0x568] ss:$16 sps:$4 sm:$0xff]  }
 0x266   : > { %7494 = vmatprep.subr.bf16.mxu1 %v10730_v50  ;;  %v10778_v58 = vld [vmem:[%s11542_s14 + $0x76c] ss:$16 sps:$4 sm:$0xff]   ;;  %v10776_v28 = vld [vmem:[%s11542_s14 + $0x768] ss:$16 sps:$4 sm:$0xff]  }
 0x267   : > { %v10781_v50 = vld [vmem:[%s11542_s14 + $0x54c] ss:$16 sps:$4 sm:$0xff]  }
 0x268   : > { %7454 = vmatpush1.bf16.msra.mxu0 %v10725_v29  ;;  %v10784_v29 = vld [vmem:[%s11542_s14 + $0x74c] ss:$16 sps:$4 sm:$0xff]  }
 0x269   : > { %7495 = vmatpush1.bf16.msra.mxu1 %v10728_v54  ;;  %7455 = vmatprep.subr.bf16.mxu0 %v10733_v30  ;;  %v10779_v54 = vld [vmem:[%s11542_s14 + $0x548] ss:$16 sps:$4 sm:$0xff]  }
 0x26a   : > { %7496 = vmatprep.subr.bf16.mxu1 %v10736_v32  ;;  %v10782_v30 = vld [vmem:[%s11542_s14 + $0x748] ss:$16 sps:$4 sm:$0xff]   ;;  %v10787_v32 = vld [vmem:[%s11542_s14 + $0x52c] ss:$16 sps:$4 sm:$0xff]  }
 0x26c   : > { %7456 = vmatpush1.bf16.msra.mxu0 %v10731_v35  ;;  %v10790_v35 = vld [vmem:[%s11542_s14 + $0x72c] ss:$16 sps:$4 sm:$0xff]  }
 0x26d   : > { %7497 = vmatpush1.bf16.msra.mxu1 %v10734_v38  ;;  %7457 = vmatprep.subr.bf16.mxu0 %v10739_v33  ;;  %v10785_v38 = vld [vmem:[%s11542_s14 + $0x528] ss:$16 sps:$4 sm:$0xff]  }
 0x26e   : > { %7498 = vmatprep.subr.bf16.mxu1 %v10742_v7  ;;  %v10788_v33 = vld [vmem:[%s11542_s14 + $0x728] ss:$16 sps:$4 sm:$0xff]   ;;  %v10793_v7 = vld [vmem:[%s11542_s14 + $0x50c] ss:$16 sps:$4 sm:$0xff]  }
 0x270   : > { %7458 = vmatpush1.bf16.msra.mxu0 %v10737_v45  ;;  %v10796_v45 = vld [vmem:[%s11542_s14 + $0x70c] ss:$16 sps:$4 sm:$0xff]  }
 0x271   : > { %7499 = vmatpush1.bf16.msra.mxu1 %v10740_v47  ;;  %7459 = vmatprep.subr.bf16.mxu0 %v10745_v51  ;;  %v10791_v47 = vld [vmem:[%s11542_s14 + $0x508] ss:$16 sps:$4 sm:$0xff]  }
 0x272   : > { %7500 = vmatprep.subr.bf16.mxu1 %v10748_v37  ;;  %v10794_v51 = vld [vmem:[%s11542_s14 + $0x708] ss:$16 sps:$4 sm:$0xff]   ;;  %v10799_v37 = vld [vmem:[%s11542_s14 + $0x8ec] ss:$16 sps:$4 sm:$0xff]  }
 0x274   : > { %7460 = vmatpush1.bf16.msra.mxu0 %v10743_v53  ;;  %v10802_v53 = vld [vmem:[%s11542_s14 + $0xaec] ss:$16 sps:$4 sm:$0xff]  }
 0x275   : > { %7501 = vmatpush1.bf16.msra.mxu1 %v10746_v11  ;;  %7461 = vmatprep.subr.bf16.mxu0 %v10751_v57  ;;  %v10797_v11 = vld [vmem:[%s11542_s14 + $0x8e8] ss:$16 sps:$4 sm:$0xff]  }
 0x276   : > { %7502 = vmatprep.subr.bf16.mxu1 %v10754_v0  ;;  %v10800_v57 = vld [vmem:[%s11542_s14 + $0xae8] ss:$16 sps:$4 sm:$0xff]   ;;  %v10805_v0 = vld [vmem:[%s11542_s14 + $0x8cc] ss:$16 sps:$4 sm:$0xff]  }
 0x278   : > { %7462 = vmatpush2.bf16.msra.mxu0 %v10749_v62  ;;  %v10808_v62 = vld [vmem:[%s11542_s14 + $0xacc] ss:$16 sps:$4 sm:$0xff]  }
 0x279   : > { %7503 = vmatpush2.bf16.msra.mxu1 %v10752_v41  ;;  %7463 = vmatprep.subr.bf16.mxu0 %v10757_v61 }
 0x27a   : > { %7504 = vmatprep.subr.bf16.mxu1 %v10760_v1 }
 0x27c   : > { %7464 = vmatpush2.bf16.msra.mxu0 %v10755_v2  ;;  %v10803_v2 = vld [vmem:[%s11542_s14 + $0x8c8] ss:$16 sps:$4 sm:$0xff]  }
 0x27d   : > { %7505 = vmatpush2.bf16.msra.mxu1 %v10758_v3  ;;  %7465 = vmatprep.subr.bf16.mxu0 %v10763_v14  ;;  %v10806_v3 = vld [vmem:[%s11542_s14 + $0xac8] ss:$16 sps:$4 sm:$0xff]  }
 0x27e   : > { %7506 = vmatprep.subr.bf16.mxu1 %v10766_v19 }
 0x280   : > { %7466 = vmatpush2.bf16.msra.mxu0 %v10761_v39  ;;  %v10811_v39 = vld [vmem:[%s11542_s14 + $0x8ac] ss:$16 sps:$4 sm:$0xff]  }
 0x281   : > { %7507 = vmatpush2.bf16.msra.mxu1 %v10764_v12  ;;  %7467 = vmatprep.subr.bf16.mxu0 %v10769_v16  ;;  %v10814_v12 = vld [vmem:[%s11542_s14 + $0xaac] ss:$16 sps:$4 sm:$0xff]  }
 0x282   : > { %7508 = vmatprep.subr.bf16.mxu1 %v10772_v17 }
 0x284   : > { %7468 = vmatpush2.bf16.msra.mxu0 %v10767_v48  ;;  %v10809_v48 = vld [vmem:[%s11542_s14 + $0x8a8] ss:$16 sps:$4 sm:$0xff]  }
 0x285   : > { %7509 = vmatpush2.bf16.msra.mxu1 %v10770_v18  ;;  %7469 = vmatprep.subr.bf16.mxu0 %v10775_v24  ;;  %v10812_v18 = vld [vmem:[%s11542_s14 + $0xaa8] ss:$16 sps:$4 sm:$0xff]  }
 0x286   : > { %7510 = vmatprep.subr.bf16.mxu1 %v10778_v58 }
 0x288   : > { %7470 = vmatpush2.bf16.msra.mxu0 %v10773_v22  ;;  %v10818_v22 = vld [vmem:[%s11542_s14 + $0xa88] ss:$16 sps:$4 sm:$0xff]  }
 0x289   : > { %7511 = vmatpush2.bf16.msra.mxu1 %v10776_v28  ;;  %7471 = vmatprep.subr.bf16.mxu0 %v10781_v50  ;;  %v10823_v28 = vld [vmem:[%s11542_s14 + $0x86c] ss:$16 sps:$4 sm:$0xff]  }
 0x28a   : > { %7512 = vmatprep.subr.bf16.mxu1 %v10784_v29  ;;  %v10826_v50 = vld [vmem:[%s11542_s14 + $0xa6c] ss:$16 sps:$4 sm:$0xff]   ;;  %v10821_v29 = vld [vmem:[%s11542_s14 + $0x868] ss:$16 sps:$4 sm:$0xff]  }
 0x28c   : > { %7472 = vmatpush2.bf16.msra.mxu0 %v10779_v54  ;;  %v10824_v54 = vld [vmem:[%s11542_s14 + $0xa68] ss:$16 sps:$4 sm:$0xff]  }
 0x28d   : > { %7513 = vmatpush2.bf16.msra.mxu1 %v10782_v30  ;;  %7473 = vmatprep.subr.bf16.mxu0 %v10787_v32  ;;  %v10829_v30 = vld [vmem:[%s11542_s14 + $0x84c] ss:$16 sps:$4 sm:$0xff]  }
 0x28e   : > { %7514 = vmatprep.subr.bf16.mxu1 %v10790_v35  ;;  %v10832_v32 = vld [vmem:[%s11542_s14 + $0xa4c] ss:$16 sps:$4 sm:$0xff]   ;;  %v10827_v35 = vld [vmem:[%s11542_s14 + $0x848] ss:$16 sps:$4 sm:$0xff]  }
 0x290   : > { %7474 = vmatpush2.bf16.msra.mxu0 %v10785_v38  ;;  %v10830_v38 = vld [vmem:[%s11542_s14 + $0xa48] ss:$16 sps:$4 sm:$0xff]  }
 0x291   : > { %7515 = vmatpush2.bf16.msra.mxu1 %v10788_v33  ;;  %7475 = vmatprep.subr.bf16.mxu0 %v10793_v7  ;;  %v10835_v33 = vld [vmem:[%s11542_s14 + $0x82c] ss:$16 sps:$4 sm:$0xff]  }
 0x292   : > { %7516 = vmatprep.subr.bf16.mxu1 %v10796_v45  ;;  %v10838_v7 = vld [vmem:[%s11542_s14 + $0xa2c] ss:$16 sps:$4 sm:$0xff]   ;;  %v10833_v45 = vld [vmem:[%s11542_s14 + $0x828] ss:$16 sps:$4 sm:$0xff]  }
 0x294   : > { %7476 = vmatpush2.bf16.msra.mxu0 %v10791_v47  ;;  %v10836_v47 = vld [vmem:[%s11542_s14 + $0xa28] ss:$16 sps:$4 sm:$0xff]  }
 0x295   : > { %7517 = vmatpush2.bf16.msra.mxu1 %v10794_v51  ;;  %7527 = vmatprep.subr.bf16.mxu0 %v10799_v37  ;;  %v10841_v51 = vld [vmem:[%s11542_s14 + $0x80c] ss:$16 sps:$4 sm:$0xff]  }
 0x296   : > { %7568 = vmatprep.subr.bf16.mxu1 %v10802_v53  ;;  %v10844_v37 = vld [vmem:[%s11542_s14 + $0xa0c] ss:$16 sps:$4 sm:$0xff]   ;;  %v10839_v53 = vld [vmem:[%s11542_s14 + $0x808] ss:$16 sps:$4 sm:$0xff]  }
 0x297   : > { %v7233_v41 = vpop.f32.mrf.mxu0  ;;  %7478 = vmatmul.mubr.bf16.vlgmr.msra.gmra.mxu0 %v11713_v27 }
 0x298   : > { %v7274_v61 = vpop.f32.mrf.mxu1  ;;  %7519 = vmatmul.mubr.bf16.vlgmr.msra.gmra.mxu1 %v11720_v31  ;;  %v7234_v1 = vadd.f32 %v7233_v41, %v12375_v6  ;;  %7528 = vmatpush1.bf16.msra.mxu0 %v10797_v11  ;;  %v10842_v11 = vld [vmem:[%s11542_s14 + $0xa08] ss:$16 sps:$4 sm:$0xff]  }
 0x299   : > { %7569 = vmatpush1.bf16.msra.mxu1 %v10800_v57  ;;  %v7235_v14 = vpop.f32.mrf.mxu0  ;;  %7529 = vmatprep.subr.bf16.mxu0 %v10805_v0  ;;  %v10847_v57 = vld [vmem:[%s11542_s14 + $0x9ec] ss:$16 sps:$4 sm:$0xff]   ;;  %v10848_v41 = vld [vmem:[%s11542_s14 + $0xbe8] ss:$16 sps:$4 sm:$0xff]  }
 0x29a   : > { %v7276_v19 = vpop.f32.mrf.mxu1  ;;  %7570 = vmatprep.subr.bf16.mxu1 %v10808_v62  ;;  %v12449_v16 = vadd.f32 %v7274_v61, %v7234_v1  ;;  %v7236_v27 = vadd.f32 %v7235_v14, %v12380_v8  ;;  %7559 = vmatprep.mubr.bf16.mxu0 %v11742_v42  ;;  %v10817_v42 = vld [vmem:[%s11542_s14 + $0x88c] ss:$16 sps:$4 sm:$0xff]   ;;  %v10815_v8 = vld [vmem:[%s11542_s14 + $0x888] ss:$16 sps:$4 sm:$0xff]  }
 0x29b   : > { %7600 = vmatprep.mubr.bf16.mxu1 %v11747_v43  ;;  %v7237_v31 = vpop.f32.mrf.mxu0  ;;  %v10820_v43 = vld [vmem:[%s11542_s14 + $0xa8c] ss:$16 sps:$4 sm:$0xff]   ;;  %v10845_v62 = vld [vmem:[%s11542_s14 + $0x9e8] ss:$16 sps:$4 sm:$0xff]  }
 0x29c   : > { %v7278_v6 = vpop.f32.mrf.mxu1  ;;  %v12454_v17 = vadd.f32 %v7276_v19, %v7236_v27  ;;  %7530 = vmatpush1.bf16.msra.mxu0 %v10803_v2  ;;  %v10850_v0 = vld [vmem:[%s11542_s14 + $0xbec] ss:$16 sps:$4 sm:$0xff]   ;;  %v10851_v2 = vld [vmem:[%s11542_s14 + $0x9c8] ss:$16 sps:$4 sm:$0xff]  }
 0x29d   : > { %7571 = vmatpush1.bf16.msra.mxu1 %v10806_v3  ;;  %v7238_v24 = vpop.f32.mrf.mxu0  ;;  %7531 = vmatprep.subr.bf16.mxu0 %v10811_v39  ;;  %v10853_v61 = vld [vmem:[%s11542_s14 + $0x9cc] ss:$16 sps:$4 sm:$0xff]   ;;  %v10854_v3 = vld [vmem:[%s11542_s14 + $0xbc8] ss:$16 sps:$4 sm:$0xff]  }
 0x29e   : > { %v7279_v58 = vpop.f32.mrf.mxu1  ;;  %7572 = vmatprep.subr.bf16.mxu1 %v10814_v12  ;;  %v10856_v1 = vld [vmem:[%s11542_s14 + $0xbcc] ss:$16 sps:$4 sm:$0xff]   ;;  %v10857_v39 = vld [vmem:[%s11542_s14 + $0x9a8] ss:$16 sps:$4 sm:$0xff]  }
 0x29f   : > { %v10859_v14 = vld [vmem:[%s11542_s14 + $0x9ac] ss:$16 sps:$4 sm:$0xff]   ;;  %v10860_v12 = vld [vmem:[%s11542_s14 + $0xba8] ss:$16 sps:$4 sm:$0xff]  }
 0x2a0   : > { %7532 = vmatpush1.bf16.msra.mxu0 %v10809_v48  ;;  %v10862_v19 = vld [vmem:[%s11542_s14 + $0xbac] ss:$16 sps:$4 sm:$0xff]   ;;  %v10863_v6 = vld [vmem:[%s11542_s14 + $0x988] ss:$16 sps:$4 sm:$0xff]  }
 0x2a1   : > { %7573 = vmatpush1.bf16.msra.mxu1 %v10812_v18  ;;  %7533 = vmatprep.subr.bf16.mxu0 %v10817_v42  ;;  %v10865_v27 = vld [vmem:[%s11542_s14 + $0x98c] ss:$16 sps:$4 sm:$0xff]   ;;  %v10866_v48 = vld [vmem:[%s11542_s14 + $0xb88] ss:$16 sps:$4 sm:$0xff]  }
 0x2a2   : > { %7574 = vmatprep.subr.bf16.mxu1 %v10820_v43  ;;  %v10868_v31 = vld [vmem:[%s11542_s14 + $0xb8c] ss:$16 sps:$4 sm:$0xff]   ;;  %v10869_v58 = vld [vmem:[%s11542_s14 + $0x968] ss:$16 sps:$4 sm:$0xff]  }
 0x2a3   : > { %v10871_v18 = vld [vmem:[%s11542_s14 + $0x96c] ss:$16 sps:$4 sm:$0xff]   ;;  %v10872_v42 = vld [vmem:[%s11542_s14 + $0xb68] ss:$16 sps:$4 sm:$0xff]  }
 0x2a4   : > { %7534 = vmatpush1.bf16.msra.mxu0 %v10815_v8  ;;  %v10874_v24 = vld [vmem:[%s11542_s14 + $0xb6c] ss:$16 sps:$4 sm:$0xff]  }
 0x2a5   : > { %7575 = vmatpush1.bf16.msra.mxu1 %v10818_v22  ;;  %7535 = vmatprep.subr.bf16.mxu0 %v10823_v28  ;;  %v10877_v43 = vld [vmem:[%s11542_s14 + $0x94c] ss:$16 sps:$4 sm:$0xff]   ;;  %v10875_v22 = vld [vmem:[%s11542_s14 + $0x948] ss:$16 sps:$4 sm:$0xff]  }
 0x2a6   : > { %7576 = vmatprep.subr.bf16.mxu1 %v10826_v50  ;;  %v10880_v8 = vld [vmem:[%s11542_s14 + $0xb4c] ss:$16 sps:$4 sm:$0xff]   ;;  %v10878_v28 = vld [vmem:[%s11542_s14 + $0xb48] ss:$16 sps:$4 sm:$0xff]  }
 0x2a7   : > { %v10883_v50 = vld [vmem:[%s11542_s14 + $0x92c] ss:$16 sps:$4 sm:$0xff]  }
 0x2a8   : > { %7536 = vmatpush1.bf16.msra.mxu0 %v10821_v29  ;;  %v10886_v29 = vld [vmem:[%s11542_s14 + $0xb2c] ss:$16 sps:$4 sm:$0xff]  }
 0x2a9   : > { %7577 = vmatpush1.bf16.msra.mxu1 %v10824_v54  ;;  %7537 = vmatprep.subr.bf16.mxu0 %v10829_v30  ;;  %v10881_v54 = vld [vmem:[%s11542_s14 + $0x928] ss:$16 sps:$4 sm:$0xff]  }
 0x2aa   : > { %7578 = vmatprep.subr.bf16.mxu1 %v10832_v32  ;;  %v10884_v30 = vld [vmem:[%s11542_s14 + $0xb28] ss:$16 sps:$4 sm:$0xff]   ;;  %v10889_v32 = vld [vmem:[%s11542_s14 + $0x90c] ss:$16 sps:$4 sm:$0xff]  }
 0x2ac   : > { %7538 = vmatpush1.bf16.msra.mxu0 %v10827_v35  ;;  %v10892_v35 = vld [vmem:[%s11542_s14 + $0xb0c] ss:$16 sps:$4 sm:$0xff]  }
 0x2ad   : > { %7579 = vmatpush1.bf16.msra.mxu1 %v10830_v38  ;;  %7539 = vmatprep.subr.bf16.mxu0 %v10835_v33  ;;  %v10887_v38 = vld [vmem:[%s11542_s14 + $0x908] ss:$16 sps:$4 sm:$0xff]  }
 0x2ae   : > { %7580 = vmatprep.subr.bf16.mxu1 %v10838_v7  ;;  %v10890_v33 = vld [vmem:[%s11542_s14 + $0xb08] ss:$16 sps:$4 sm:$0xff]   ;;  %v10895_v7 = vld [vmem:[%s11542_s14 + $0xcec] ss:$16 sps:$4 sm:$0xff]  }
 0x2b0   : > { %7540 = vmatpush1.bf16.msra.mxu0 %v10833_v45  ;;  %v10898_v45 = vld [vmem:[%s11542_s14 + $0xeec] ss:$16 sps:$4 sm:$0xff]  }
 0x2b1   : > { %7581 = vmatpush1.bf16.msra.mxu1 %v10836_v47  ;;  %7541 = vmatprep.subr.bf16.mxu0 %v10841_v51  ;;  %v10893_v47 = vld [vmem:[%s11542_s14 + $0xce8] ss:$16 sps:$4 sm:$0xff]  }
 0x2b2   : > { %7582 = vmatprep.subr.bf16.mxu1 %v10844_v37  ;;  %v10896_v51 = vld [vmem:[%s11542_s14 + $0xee8] ss:$16 sps:$4 sm:$0xff]   ;;  %v10901_v37 = vld [vmem:[%s11542_s14 + $0xccc] ss:$16 sps:$4 sm:$0xff]  }
 0x2b4   : > { %7542 = vmatpush1.bf16.msra.mxu0 %v10839_v53  ;;  %v10904_v53 = vld [vmem:[%s11542_s14 + $0xecc] ss:$16 sps:$4 sm:$0xff]  }
 0x2b5   : > { %7583 = vmatpush1.bf16.msra.mxu1 %v10842_v11  ;;  %7543 = vmatprep.subr.bf16.mxu0 %v10847_v57 }
 0x2b6   : > { %7584 = vmatprep.subr.bf16.mxu1 %v10850_v0 }
 0x2b8   : > { %7544 = vmatpush2.bf16.msra.mxu0 %v10845_v62  ;;  %v10899_v62 = vld [vmem:[%s11542_s14 + $0xcc8] ss:$16 sps:$4 sm:$0xff]  }
 0x2b9   : > { %7585 = vmatpush2.bf16.msra.mxu1 %v10848_v41  ;;  %7545 = vmatprep.subr.bf16.mxu0 %v10853_v61  ;;  %v10902_v41 = vld [vmem:[%s11542_s14 + $0xec8] ss:$16 sps:$4 sm:$0xff]  }
 0x2ba   : > { %7586 = vmatprep.subr.bf16.mxu1 %v10856_v1 }
 0x2bc   : > { %7546 = vmatpush2.bf16.msra.mxu0 %v10851_v2  ;;  %v10907_v2 = vld [vmem:[%s11542_s14 + $0xcac] ss:$16 sps:$4 sm:$0xff]  }
 0x2bd   : > { %7587 = vmatpush2.bf16.msra.mxu1 %v10854_v3  ;;  %7547 = vmatprep.subr.bf16.mxu0 %v10859_v14  ;;  %v10910_v3 = vld [vmem:[%s11542_s14 + $0xeac] ss:$16 sps:$4 sm:$0xff]  }
 0x2be   : > { %7588 = vmatprep.subr.bf16.mxu1 %v10862_v19 }
 0x2c0   : > { %7548 = vmatpush2.bf16.msra.mxu0 %v10857_v39  ;;  %v10905_v39 = vld [vmem:[%s11542_s14 + $0xca8] ss:$16 sps:$4 sm:$0xff]  }
 0x2c1   : > { %7589 = vmatpush2.bf16.msra.mxu1 %v10860_v12  ;;  %7549 = vmatprep.subr.bf16.mxu0 %v10865_v27  ;;  %v10908_v12 = vld [vmem:[%s11542_s14 + $0xea8] ss:$16 sps:$4 sm:$0xff]  }
 0x2c2   : > { %7590 = vmatprep.subr.bf16.mxu1 %v10868_v31 }
 0x2c4   : > { %7550 = vmatpush2.bf16.msra.mxu0 %v10863_v6  ;;  %v10911_v6 = vld [vmem:[%s11542_s14 + $0xc88] ss:$16 sps:$4 sm:$0xff]  }
 0x2c5   : > { %7591 = vmatpush2.bf16.msra.mxu1 %v10866_v48  ;;  %7551 = vmatprep.subr.bf16.mxu0 %v10871_v18  ;;  %v10914_v48 = vld [vmem:[%s11542_s14 + $0xe88] ss:$16 sps:$4 sm:$0xff]   ;;  %v10919_v18 = vld [vmem:[%s11542_s14 + $0xc6c] ss:$16 sps:$4 sm:$0xff]  }
 0x2c6   : > { %7592 = vmatprep.subr.bf16.mxu1 %v10874_v24  ;;  %v10922_v24 = vld [vmem:[%s11542_s14 + $0xe6c] ss:$16 sps:$4 sm:$0xff]  }
 0x2c8   : > { %7552 = vmatpush2.bf16.msra.mxu0 %v10869_v58  ;;  %v10917_v58 = vld [vmem:[%s11542_s14 + $0xc68] ss:$16 sps:$4 sm:$0xff]  }
 0x2c9   : > { %7593 = vmatpush2.bf16.msra.mxu1 %v10872_v42  ;;  %7553 = vmatprep.subr.bf16.mxu0 %v10877_v43  ;;  %v10920_v42 = vld [vmem:[%s11542_s14 + $0xe68] ss:$16 sps:$4 sm:$0xff]   ;;  %v10925_v43 = vld [vmem:[%s11542_s14 + $0xc4c] ss:$16 sps:$4 sm:$0xff]  }
 0x2ca   : > { %7594 = vmatprep.subr.bf16.mxu1 %v10880_v8  ;;  %v10928_v8 = vld [vmem:[%s11542_s14 + $0xe4c] ss:$16 sps:$4 sm:$0xff]  }
 0x2cc   : > { %7554 = vmatpush2.bf16.msra.mxu0 %v10875_v22  ;;  %v10923_v22 = vld [vmem:[%s11542_s14 + $0xc48] ss:$16 sps:$4 sm:$0xff]  }
 0x2cd   : > { %7595 = vmatpush2.bf16.msra.mxu1 %v10878_v28  ;;  %7555 = vmatprep.subr.bf16.mxu0 %v10883_v50  ;;  %v10926_v28 = vld [vmem:[%s11542_s14 + $0xe48] ss:$16 sps:$4 sm:$0xff]   ;;  %v10931_v50 = vld [vmem:[%s11542_s14 + $0xc2c] ss:$16 sps:$4 sm:$0xff]  }
 0x2ce   : > { %7596 = vmatprep.subr.bf16.mxu1 %v10886_v29  ;;  %v10934_v29 = vld [vmem:[%s11542_s14 + $0xe2c] ss:$16 sps:$4 sm:$0xff]  }
 0x2d0   : > { %7556 = vmatpush2.bf16.msra.mxu0 %v10881_v54  ;;  %v10929_v54 = vld [vmem:[%s11542_s14 + $0xc28] ss:$16 sps:$4 sm:$0xff]  }
 0x2d1   : > { %7597 = vmatpush2.bf16.msra.mxu1 %v10884_v30  ;;  %7557 = vmatprep.subr.bf16.mxu0 %v10889_v32  ;;  %v10932_v30 = vld [vmem:[%s11542_s14 + $0xe28] ss:$16 sps:$4 sm:$0xff]   ;;  %v10937_v32 = vld [vmem:[%s11542_s14 + $0xc0c] ss:$16 sps:$4 sm:$0xff]  }
 0x2d2   : > { %7598 = vmatprep.subr.bf16.mxu1 %v10892_v35  ;;  %v10940_v35 = vld [vmem:[%s11542_s14 + $0xe0c] ss:$16 sps:$4 sm:$0xff]  }
 0x2d4   : > { %7558 = vmatpush2.bf16.msra.mxu0 %v10887_v38  ;;  %v10935_v38 = vld [vmem:[%s11542_s14 + $0xc08] ss:$16 sps:$4 sm:$0xff]  }
 0x2d5   : > { %7599 = vmatpush2.bf16.msra.mxu1 %v10890_v33  ;;  %7609 = vmatprep.subr.bf16.mxu0 %v10895_v7  ;;  %v10938_v33 = vld [vmem:[%s11542_s14 + $0xe08] ss:$16 sps:$4 sm:$0xff]   ;;  %v10943_v7 = vld [vmem:[%s11542_s14 + $0xdec] ss:$16 sps:$4 sm:$0xff]  }
 0x2d6   : > { %7650 = vmatprep.subr.bf16.mxu1 %v10898_v45  ;;  %v10946_v45 = vld [vmem:[%s11542_s14 + $0xfec] ss:$16 sps:$4 sm:$0xff]  }
 0x2d7   : > { %v7315_v11 = vpop.f32.mrf.mxu0  ;;  %7560 = vmatmul.mubr.bf16.vlgmr.msra.gmra.mxu0 %v11811_v49 }
 0x2d8   : > { %v7356_v57 = vpop.f32.mrf.mxu1  ;;  %7601 = vmatmul.mubr.bf16.vlgmr.msra.gmra.mxu1 %v11822_v56  ;;  %v7316_v0 = vadd.f32 %v7315_v11, %v12449_v16  ;;  %7610 = vmatpush1.bf16.msra.mxu0 %v10893_v47  ;;  %v10941_v47 = vld [vmem:[%s11542_s14 + $0xde8] ss:$16 sps:$4 sm:$0xff]  }
 0x2d9   : > { %7651 = vmatpush1.bf16.msra.mxu1 %v10896_v51  ;;  %v7317_v61 = vpop.f32.mrf.mxu0  ;;  %7611 = vmatprep.subr.bf16.mxu0 %v10901_v37  ;;  %v10944_v51 = vld [vmem:[%s11542_s14 + $0xfe8] ss:$16 sps:$4 sm:$0xff]   ;;  %v10949_v37 = vld [vmem:[%s11542_s14 + $0xdcc] ss:$16 sps:$4 sm:$0xff]  }
 0x2da   : > { %v7358_v1 = vpop.f32.mrf.mxu1  ;;  %7652 = vmatprep.subr.bf16.mxu1 %v10904_v53  ;;  %v12523_v14 = vadd.f32 %v7356_v57, %v7316_v0  ;;  %v7318_v49 = vadd.f32 %v7317_v61, %v12454_v17  ;;  %7641 = vmatprep.mubr.bf16.mxu0 %v11818_v55  ;;  %v10913_v55 = vld [vmem:[%s11542_s14 + $0xc8c] ss:$16 sps:$4 sm:$0xff]   ;;  %v10947_v11 = vld [vmem:[%s11542_s14 + $0xdc8] ss:$16 sps:$4 sm:$0xff]  }
 0x2db   : > { %7682 = vmatprep.mubr.bf16.mxu1 %v11830_v60  ;;  %v7319_v56 = vpop.f32.mrf.mxu0  ;;  %v10916_v60 = vld [vmem:[%s11542_s14 + $0xe8c] ss:$16 sps:$4 sm:$0xff]   ;;  %v10950_v57 = vld [vmem:[%s11542_s14 + $0xfc8] ss:$16 sps:$4 sm:$0xff]  }
 0x2dc   : > { %v7360_v16 = vpop.f32.mrf.mxu1  ;;  %v12528_v19 = vadd.f32 %v7358_v1, %v7318_v49  ;;  %7612 = vmatpush1.bf16.msra.mxu0 %v10899_v62  ;;  %v10952_v53 = vld [vmem:[%s11542_s14 + $0xfcc] ss:$16 sps:$4 sm:$0xff]   ;;  %v10956_v61 = vld [vmem:[%s11542_s14 + $0xfa8] ss:$16 sps:$4 sm:$0xff]  }
 0x2dd   : > { %7653 = vmatpush1.bf16.msra.mxu1 %v10902_v41  ;;  %v7320_v27 = vpop.f32.mrf.mxu0  ;;  %7613 = vmatprep.subr.bf16.mxu0 %v10907_v2  ;;  %v10955_v0 = vld [vmem:[%s11542_s14 + $0xdac] ss:$16 sps:$4 sm:$0xff]   ;;  %v10953_v41 = vld [vmem:[%s11542_s14 + $0xda8] ss:$16 sps:$4 sm:$0xff]  }
 0x2de   : > { %v7361_v31 = vpop.f32.mrf.mxu1  ;;  %7654 = vmatprep.subr.bf16.mxu1 %v10910_v3  ;;  %v8023_v17 = vcombine.low %v12523_v14, %v12528_v19  ;;  %v10958_v62 = vld [vmem:[%s11542_s14 + $0xfac] ss:$16 sps:$4 sm:$0xff]   ;;  %v10959_v3 = vld [vmem:[%s11542_s14 + $0xd88] ss:$16 sps:$4 sm:$0xff]  }
 0x2df   : > { %v10961_v1 = vld [vmem:[%s11542_s14 + $0xd8c] ss:$16 sps:$4 sm:$0xff]   ;;  %v10962_v49 = vld [vmem:[%s11542_s14 + $0xf88] ss:$16 sps:$4 sm:$0xff]  }
 0x2e0   : > { %7614 = vmatpush1.bf16.msra.mxu0 %v10905_v39  ;;  %v10964_v2 = vld [vmem:[%s11542_s14 + $0xf8c] ss:$16 sps:$4 sm:$0xff]   ;;  %v10965_v39 = vld [vmem:[%s11542_s14 + $0xd68] ss:$16 sps:$4 sm:$0xff]  }
 0x2e1   : > { %7655 = vmatpush1.bf16.msra.mxu1 %v10908_v12  ;;  %7615 = vmatprep.subr.bf16.mxu0 %v10913_v55  ;;  %v10967_v56 = vld [vmem:[%s11542_s14 + $0xd6c] ss:$16 sps:$4 sm:$0xff]   ;;  %v10968_v12 = vld [vmem:[%s11542_s14 + $0xf68] ss:$16 sps:$4 sm:$0xff]  }
 0x2e2   : > { %7656 = vmatprep.subr.bf16.mxu1 %v10916_v60  ;;  %v10970_v16 = vld [vmem:[%s11542_s14 + $0xf6c] ss:$16 sps:$4 sm:$0xff]   ;;  %v10971_v55 = vld [vmem:[%s11542_s14 + $0xd48] ss:$16 sps:$4 sm:$0xff]  }
 0x2e3   : > { %v10973_v27 = vld [vmem:[%s11542_s14 + $0xd4c] ss:$16 sps:$4 sm:$0xff]   ;;  %v10974_v60 = vld [vmem:[%s11542_s14 + $0xf48] ss:$16 sps:$4 sm:$0xff]  }
 0x2e4   : > { %7616 = vmatpush1.bf16.msra.mxu0 %v10911_v6  ;;  %v10976_v31 = vld [vmem:[%s11542_s14 + $0xf4c] ss:$16 sps:$4 sm:$0xff]  }
 0x2e5   : > { %7657 = vmatpush1.bf16.msra.mxu1 %v10914_v48  ;;  %7617 = vmatprep.subr.bf16.mxu0 %v10919_v18  ;;  %v10979_v6 = vld [vmem:[%s11542_s14 + $0xd2c] ss:$16 sps:$4 sm:$0xff]   ;;  %v10977_v18 = vld [vmem:[%s11542_s14 + $0xd28] ss:$16 sps:$4 sm:$0xff]  }
 0x2e6   : > { %7658 = vmatprep.subr.bf16.mxu1 %v10922_v24  ;;  %v10982_v48 = vld [vmem:[%s11542_s14 + $0xf2c] ss:$16 sps:$4 sm:$0xff]   ;;  %v10980_v24 = vld [vmem:[%s11542_s14 + $0xf28] ss:$16 sps:$4 sm:$0xff]  }
 0x2e8   : > { %7618 = vmatpush1.bf16.msra.mxu0 %v10917_v58  ;;  %v10985_v58 = vld [vmem:[%s11542_s14 + $0xd0c] ss:$16 sps:$4 sm:$0xff]  }
 0x2e9   : > { %7659 = vmatpush1.bf16.msra.mxu1 %v10920_v42  ;;  %7619 = vmatprep.subr.bf16.mxu0 %v10925_v43  ;;  %v10988_v42 = vld [vmem:[%s11542_s14 + $0xf0c] ss:$16 sps:$4 sm:$0xff]   ;;  %v10983_v43 = vld [vmem:[%s11542_s14 + $0xd08] ss:$16 sps:$4 sm:$0xff]  }
 0x2ea   : > { %7660 = vmatprep.subr.bf16.mxu1 %v10928_v8  ;;  %v10986_v8 = vld [vmem:[%s11542_s14 + $0xf08] ss:$16 sps:$4 sm:$0xff]  }
 0x2ec   : > { %7620 = vmatpush1.bf16.msra.mxu0 %v10923_v22  ;;  %v10991_v22 = vld [vmem:[%s11542_s14 + $0x10ec] ss:$16 sps:$4 sm:$0xff]  }
 0x2ed   : > { %7661 = vmatpush1.bf16.msra.mxu1 %v10926_v28  ;;  %7621 = vmatprep.subr.bf16.mxu0 %v10931_v50  ;;  %v10994_v28 = vld [vmem:[%s11542_s14 + $0x12ec] ss:$16 sps:$4 sm:$0xff]   ;;  %v10989_v50 = vld [vmem:[%s11542_s14 + $0x10e8] ss:$16 sps:$4 sm:$0xff]  }
 0x2ee   : > { %7662 = vmatprep.subr.bf16.mxu1 %v10934_v29  ;;  %v10992_v29 = vld [vmem:[%s11542_s14 + $0x12e8] ss:$16 sps:$4 sm:$0xff]  }
 0x2f0   : > { %7622 = vmatpush1.bf16.msra.mxu0 %v10929_v54  ;;  %v10997_v54 = vld [vmem:[%s11542_s14 + $0x10cc] ss:$16 sps:$4 sm:$0xff]  }
 0x2f1   : > { %7663 = vmatpush1.bf16.msra.mxu1 %v10932_v30  ;;  %7623 = vmatprep.subr.bf16.mxu0 %v10937_v32  ;;  %v11000_v30 = vld [vmem:[%s11542_s14 + $0x12cc] ss:$16 sps:$4 sm:$0xff]  }
 0x2f2   : > { %7664 = vmatprep.subr.bf16.mxu1 %v10940_v35 }
 0x2f4   : > { %7624 = vmatpush1.bf16.msra.mxu0 %v10935_v38 }
 0x2f5   : > { %7665 = vmatpush1.bf16.msra.mxu1 %v10938_v33  ;;  %7625 = vmatprep.subr.bf16.mxu0 %v10943_v7  ;;  %v10995_v33 = vld [vmem:[%s11542_s14 + $0x10c8] ss:$16 sps:$4 sm:$0xff]  }
 0x2f6   : > { %7666 = vmatprep.subr.bf16.mxu1 %v10946_v45  ;;  %v10998_v7 = vld [vmem:[%s11542_s14 + $0x12c8] ss:$16 sps:$4 sm:$0xff]  }
 0x2f8   : > { %7626 = vmatpush2.bf16.msra.mxu0 %v10941_v47 }
 0x2f9   : > { %7667 = vmatpush2.bf16.msra.mxu1 %v10944_v51  ;;  %7627 = vmatprep.subr.bf16.mxu0 %v10949_v37  ;;  %v11003_v51 = vld [vmem:[%s11542_s14 + $0x10ac] ss:$16 sps:$4 sm:$0xff]  }
 0x2fa   : > { %7668 = vmatprep.subr.bf16.mxu1 %v10952_v53  ;;  %v11006_v37 = vld [vmem:[%s11542_s14 + $0x12ac] ss:$16 sps:$4 sm:$0xff]  }
 0x2fc   : > { %7628 = vmatpush2.bf16.msra.mxu0 %v10947_v11  ;;  %v11001_v11 = vld [vmem:[%s11542_s14 + $0x10a8] ss:$16 sps:$4 sm:$0xff]  }
 0x2fd   : > { %7669 = vmatpush2.bf16.msra.mxu1 %v10950_v57  ;;  %7629 = vmatprep.subr.bf16.mxu0 %v10955_v0  ;;  %v11004_v57 = vld [vmem:[%s11542_s14 + $0x12a8] ss:$16 sps:$4 sm:$0xff]  }
 0x2fe   : > { %7670 = vmatprep.subr.bf16.mxu1 %v10958_v62 }
 0x300   : > { %7630 = vmatpush2.bf16.msra.mxu0 %v10953_v41  ;;  %v11009_v41 = vld [vmem:[%s11542_s14 + $0x108c] ss:$16 sps:$4 sm:$0xff]  }
 0x301   : > { %7671 = vmatpush2.bf16.msra.mxu1 %v10956_v61  ;;  %7631 = vmatprep.subr.bf16.mxu0 %v10961_v1  ;;  %v11010_v61 = vld [vmem:[%s11542_s14 + $0x1288] ss:$16 sps:$4 sm:$0xff]   ;;  %v11015_v1 = vld [vmem:[%s11542_s14 + $0x106c] ss:$16 sps:$4 sm:$0xff]  }
 0x302   : > { %7672 = vmatprep.subr.bf16.mxu1 %v10964_v2  ;;  %v11018_v2 = vld [vmem:[%s11542_s14 + $0x126c] ss:$16 sps:$4 sm:$0xff]  }
 0x304   : > { %7632 = vmatpush2.bf16.msra.mxu0 %v10959_v3  ;;  %v11013_v3 = vld [vmem:[%s11542_s14 + $0x1068] ss:$16 sps:$4 sm:$0xff]  }
 0x305   : > { %7673 = vmatpush2.bf16.msra.mxu1 %v10962_v49  ;;  %7633 = vmatprep.subr.bf16.mxu0 %v10967_v56  ;;  %v11016_v49 = vld [vmem:[%s11542_s14 + $0x1268] ss:$16 sps:$4 sm:$0xff]   ;;  %v11021_v56 = vld [vmem:[%s11542_s14 + $0x104c] ss:$16 sps:$4 sm:$0xff]  }
 0x306   : > { %7674 = vmatprep.subr.bf16.mxu1 %v10970_v16  ;;  %v11024_v16 = vld [vmem:[%s11542_s14 + $0x124c] ss:$16 sps:$4 sm:$0xff]  }
 0x308   : > { %7634 = vmatpush2.bf16.msra.mxu0 %v10965_v39  ;;  %v11019_v39 = vld [vmem:[%s11542_s14 + $0x1048] ss:$16 sps:$4 sm:$0xff]  }
 0x309   : > { %7675 = vmatpush2.bf16.msra.mxu1 %v10968_v12  ;;  %7635 = vmatprep.subr.bf16.mxu0 %v10973_v27  ;;  %v11022_v12 = vld [vmem:[%s11542_s14 + $0x1248] ss:$16 sps:$4 sm:$0xff]   ;;  %v11027_v27 = vld [vmem:[%s11542_s14 + $0x102c] ss:$16 sps:$4 sm:$0xff]  }
 0x30a   : > { %7676 = vmatprep.subr.bf16.mxu1 %v10976_v31  ;;  %v11030_v31 = vld [vmem:[%s11542_s14 + $0x122c] ss:$16 sps:$4 sm:$0xff]  }
 0x30c   : > { %7636 = vmatpush2.bf16.msra.mxu0 %v10971_v55  ;;  %v11025_v55 = vld [vmem:[%s11542_s14 + $0x1028] ss:$16 sps:$4 sm:$0xff]  }
 0x30d   : > { %7677 = vmatpush2.bf16.msra.mxu1 %v10974_v60  ;;  %7637 = vmatprep.subr.bf16.mxu0 %v10979_v6  ;;  %v11028_v60 = vld [vmem:[%s11542_s14 + $0x1228] ss:$16 sps:$4 sm:$0xff]   ;;  %v11033_v6 = vld [vmem:[%s11542_s14 + $0x100c] ss:$16 sps:$4 sm:$0xff]  }
 0x30e   : > { %7678 = vmatprep.subr.bf16.mxu1 %v10982_v48  ;;  %v11036_v48 = vld [vmem:[%s11542_s14 + $0x120c] ss:$16 sps:$4 sm:$0xff]  }
 0x310   : > { %7638 = vmatpush2.bf16.msra.mxu0 %v10977_v18  ;;  %v11031_v18 = vld [vmem:[%s11542_s14 + $0x1008] ss:$16 sps:$4 sm:$0xff]  }
 0x311   : > { %7679 = vmatpush2.bf16.msra.mxu1 %v10980_v24  ;;  %7639 = vmatprep.subr.bf16.mxu0 %v10985_v58  ;;  %v11034_v24 = vld [vmem:[%s11542_s14 + $0x1208] ss:$16 sps:$4 sm:$0xff]   ;;  %v11039_v58 = vld [vmem:[%s11542_s14 + $0x11ec] ss:$16 sps:$4 sm:$0xff]  }
 0x312   : > { %7680 = vmatprep.subr.bf16.mxu1 %v10988_v42  ;;  %v11042_v42 = vld [vmem:[%s11542_s14 + $0x13ec] ss:$16 sps:$4 sm:$0xff]  }
 0x314   : > { %7640 = vmatpush2.bf16.msra.mxu0 %v10983_v43  ;;  %v11037_v43 = vld [vmem:[%s11542_s14 + $0x11e8] ss:$16 sps:$4 sm:$0xff]  }
 0x315   : > { %7681 = vmatpush2.bf16.msra.mxu1 %v10986_v8  ;;  %7691 = vmatprep.subr.bf16.mxu0 %v10991_v22  ;;  %v11040_v8 = vld [vmem:[%s11542_s14 + $0x13e8] ss:$16 sps:$4 sm:$0xff]   ;;  %v11045_v22 = vld [vmem:[%s11542_s14 + $0x11cc] ss:$16 sps:$4 sm:$0xff]  }
 0x316   : > { %7732 = vmatprep.subr.bf16.mxu1 %v10994_v28  ;;  %v11048_v28 = vld [vmem:[%s11542_s14 + $0x13cc] ss:$16 sps:$4 sm:$0xff]  }
 0x317   : > { %v7397_v32 = vpop.f32.mrf.mxu0  ;;  %7642 = vmatmul.mubr.bf16.vlgmr.msra.gmra.mxu0 %v11904_v13 }
 0x318   : > { %v7438_v35 = vpop.f32.mrf.mxu1  ;;  %7683 = vmatmul.mubr.bf16.vlgmr.msra.gmra.mxu1 %v11914_v21  ;;  %7692 = vmatpush1.bf16.msra.mxu0 %v10989_v50  ;;  %v11043_v50 = vld [vmem:[%s11542_s14 + $0x11c8] ss:$16 sps:$4 sm:$0xff]  }
 0x319   : > { %v12594_v38 = vadd.f32 %v7438_v35, %v7397_v32  ;;  %7733 = vmatpush1.bf16.msra.mxu1 %v10992_v29  ;;  %v7399_v45 = vpop.f32.mrf.mxu0  ;;  %7693 = vmatprep.subr.bf16.mxu0 %v10997_v54  ;;  %v11046_v29 = vld [vmem:[%s11542_s14 + $0x13c8] ss:$16 sps:$4 sm:$0xff]   ;;  %v11051_v54 = vld [vmem:[%s11542_s14 + $0x11ac] ss:$16 sps:$4 sm:$0xff]  }
 0x31a   : > { %v7440_v47 = vpop.f32.mrf.mxu1  ;;  %7734 = vmatprep.subr.bf16.mxu1 %v11000_v30  ;;  %7723 = vmatprep.mubr.bf16.mxu0 %v11910_v20  ;;  %v11012_v20 = vld [vmem:[%s11542_s14 + $0x128c] ss:$16 sps:$4 sm:$0xff]   ;;  %v11049_v32 = vld [vmem:[%s11542_s14 + $0x11a8] ss:$16 sps:$4 sm:$0xff]  }
 0x31b   : > { %v12600_v53 = vadd.f32 %v7440_v47, %v7399_v45  ;;  %7764 = vmatprep.mubr.bf16.mxu1 %v11922_v26  ;;  %v7401_v13 = vpop.f32.mrf.mxu0  ;;  %v11007_v26 = vld [vmem:[%s11542_s14 + $0x1088] ss:$16 sps:$4 sm:$0xff]   ;;  %v11054_v30 = vld [vmem:[%s11542_s14 + $0x13ac] ss:$16 sps:$4 sm:$0xff]  }
 0x31c   : > { %v7442_v21 = vpop.f32.mrf.mxu1  ;;  %7694 = vmatpush1.bf16.msra.mxu0 %v10995_v33  ;;  %v11052_v35 = vld [vmem:[%s11542_s14 + $0x13a8] ss:$16 sps:$4 sm:$0xff]   ;;  %v11057_v33 = vld [vmem:[%s11542_s14 + $0x118c] ss:$16 sps:$4 sm:$0xff]  }
 0x31d   : > { %7735 = vmatpush1.bf16.msra.mxu1 %v10998_v7  ;;  %v7402_v0 = vpop.f32.mrf.mxu0  ;;  %7695 = vmatprep.subr.bf16.mxu0 %v11003_v51  ;;  %v11060_v7 = vld [vmem:[%s11542_s14 + $0x138c] ss:$16 sps:$4 sm:$0xff]   ;;  %v11055_v45 = vld [vmem:[%s11542_s14 + $0x1188] ss:$16 sps:$4 sm:$0xff]  }
 0x31e   : > { %v7443_v62 = vpop.f32.mrf.mxu1  ;;  %7736 = vmatprep.subr.bf16.mxu1 %v11006_v37  ;;  %v11058_v47 = vld [vmem:[%s11542_s14 + $0x1388] ss:$16 sps:$4 sm:$0xff]   ;;  %v11063_v51 = vld [vmem:[%s11542_s14 + $0x116c] ss:$16 sps:$4 sm:$0xff]  }
 0x31f   : > { %v11066_v37 = vld [vmem:[%s11542_s14 + $0x136c] ss:$16 sps:$4 sm:$0xff]   ;;  %v11061_v13 = vld [vmem:[%s11542_s14 + $0x1168] ss:$16 sps:$4 sm:$0xff]  }
 0x320   : > { %7696 = vmatpush1.bf16.msra.mxu0 %v11001_v11  ;;  %v11064_v21 = vld [vmem:[%s11542_s14 + $0x1368] ss:$16 sps:$4 sm:$0xff]   ;;  %v11069_v11 = vld [vmem:[%s11542_s14 + $0x114c] ss:$16 sps:$4 sm:$0xff]  }
 0x321   : > { %7737 = vmatpush1.bf16.msra.mxu1 %v11004_v57  ;;  %7697 = vmatprep.subr.bf16.mxu0 %v11009_v41  ;;  %v11072_v57 = vld [vmem:[%s11542_s14 + $0x134c] ss:$16 sps:$4 sm:$0xff]   ;;  %v11067_v0 = vld [vmem:[%s11542_s14 + $0x1148] ss:$16 sps:$4 sm:$0xff]  }
 0x322   : > { %7738 = vmatprep.subr.bf16.mxu1 %v11012_v20  ;;  %v11070_v62 = vld [vmem:[%s11542_s14 + $0x1348] ss:$16 sps:$4 sm:$0xff]   ;;  %v11075_v41 = vld [vmem:[%s11542_s14 + $0x112c] ss:$16 sps:$4 sm:$0xff]  }
 0x323   : > { %v11078_v20 = vld [vmem:[%s11542_s14 + $0x132c] ss:$16 sps:$4 sm:$0xff]  }
 0x324   : > { %7698 = vmatpush1.bf16.msra.mxu0 %v11007_v26  ;;  %v11073_v26 = vld [vmem:[%s11542_s14 + $0x1128] ss:$16 sps:$4 sm:$0xff]  }
 0x325   : > { %7739 = vmatpush1.bf16.msra.mxu1 %v11010_v61  ;;  %7699 = vmatprep.subr.bf16.mxu0 %v11015_v1  ;;  %v11076_v61 = vld [vmem:[%s11542_s14 + $0x1328] ss:$16 sps:$4 sm:$0xff]   ;;  %v11081_v1 = vld [vmem:[%s11542_s14 + $0x110c] ss:$16 sps:$4 sm:$0xff]  }
 0x326   : > { %7740 = vmatprep.subr.bf16.mxu1 %v11018_v2  ;;  %v11084_v2 = vld [vmem:[%s11542_s14 + $0x130c] ss:$16 sps:$4 sm:$0xff]  }
 0x328   : > { %7700 = vmatpush1.bf16.msra.mxu0 %v11013_v3  ;;  %v11079_v3 = vld [vmem:[%s11542_s14 + $0x1108] ss:$16 sps:$4 sm:$0xff]  }
 0x329   : > { %7741 = vmatpush1.bf16.msra.mxu1 %v11016_v49  ;;  %7701 = vmatprep.subr.bf16.mxu0 %v11021_v56  ;;  %v11082_v49 = vld [vmem:[%s11542_s14 + $0x1308] ss:$16 sps:$4 sm:$0xff]   ;;  %v11087_v56 = vld [vmem:[%s11542_s14 + $0x14ec] ss:$16 sps:$4 sm:$0xff]  }
 0x32a   : > { %7742 = vmatprep.subr.bf16.mxu1 %v11024_v16  ;;  %v11090_v16 = vld [vmem:[%s11542_s14 + $0x16ec] ss:$16 sps:$4 sm:$0xff]  }
 0x32c   : > { %7702 = vmatpush1.bf16.msra.mxu0 %v11019_v39  ;;  %v11085_v39 = vld [vmem:[%s11542_s14 + $0x14e8] ss:$16 sps:$4 sm:$0xff]  }
 0x32d   : > { %7743 = vmatpush1.bf16.msra.mxu1 %v11022_v12  ;;  %7703 = vmatprep.subr.bf16.mxu0 %v11027_v27  ;;  %v11088_v12 = vld [vmem:[%s11542_s14 + $0x16e8] ss:$16 sps:$4 sm:$0xff]   ;;  %v11093_v27 = vld [vmem:[%s11542_s14 + $0x14cc] ss:$16 sps:$4 sm:$0xff]  }
 0x32e   : > { %7744 = vmatprep.subr.bf16.mxu1 %v11030_v31  ;;  %v11096_v31 = vld [vmem:[%s11542_s14 + $0x16cc] ss:$16 sps:$4 sm:$0xff]  }
 0x330   : > { %7704 = vmatpush1.bf16.msra.mxu0 %v11025_v55 }
 0x331   : > { %7745 = vmatpush1.bf16.msra.mxu1 %v11028_v60  ;;  %7705 = vmatprep.subr.bf16.mxu0 %v11033_v6 }
 0x332   : > { %7746 = vmatprep.subr.bf16.mxu1 %v11036_v48  ;;  %v11091_v48 = vld [vmem:[%s11542_s14 + $0x14c8] ss:$16 sps:$4 sm:$0xff]  }
 0x334   : > { %7706 = vmatpush1.bf16.msra.mxu0 %v11031_v18  ;;  %v11094_v18 = vld [vmem:[%s11542_s14 + $0x16c8] ss:$16 sps:$4 sm:$0xff]  }
 0x335   : > { %7747 = vmatpush1.bf16.msra.mxu1 %v11034_v24  ;;  %7707 = vmatprep.subr.bf16.mxu0 %v11039_v58 }
 0x336   : > { %7748 = vmatprep.subr.bf16.mxu1 %v11042_v42  ;;  %v11099_v42 = vld [vmem:[%s11542_s14 + $0x14ac] ss:$16 sps:$4 sm:$0xff]  }
 0x338   : > { %7708 = vmatpush2.bf16.msra.mxu0 %v11037_v43  ;;  %v11102_v43 = vld [vmem:[%s11542_s14 + $0x16ac] ss:$16 sps:$4 sm:$0xff]  }
 0x339   : > { %7749 = vmatpush2.bf16.msra.mxu1 %v11040_v8  ;;  %7709 = vmatprep.subr.bf16.mxu0 %v11045_v22 }
 0x33a   : > { %7750 = vmatprep.subr.bf16.mxu1 %v11048_v28  ;;  %v11097_v28 = vld [vmem:[%s11542_s14 + $0x14a8] ss:$16 sps:$4 sm:$0xff]  }
 0x33c   : > { %7710 = vmatpush2.bf16.msra.mxu0 %v11043_v50  ;;  %v11100_v50 = vld [vmem:[%s11542_s14 + $0x16a8] ss:$16 sps:$4 sm:$0xff]  }
 0x33d   : > { %7751 = vmatpush2.bf16.msra.mxu1 %v11046_v29  ;;  %7711 = vmatprep.subr.bf16.mxu0 %v11051_v54 }
 0x33e   : > { %7752 = vmatprep.subr.bf16.mxu1 %v11054_v30  ;;  %v11106_v30 = vld [vmem:[%s11542_s14 + $0x1688] ss:$16 sps:$4 sm:$0xff]  }
 0x340   : > { %7712 = vmatpush2.bf16.msra.mxu0 %v11049_v32  ;;  %v11111_v32 = vld [vmem:[%s11542_s14 + $0x146c] ss:$16 sps:$4 sm:$0xff]  }
 0x341   : > { %7753 = vmatpush2.bf16.msra.mxu1 %v11052_v35  ;;  %7713 = vmatprep.subr.bf16.mxu0 %v11057_v33  ;;  %v11114_v35 = vld [vmem:[%s11542_s14 + $0x166c] ss:$16 sps:$4 sm:$0xff]   ;;  %v11109_v33 = vld [vmem:[%s11542_s14 + $0x1468] ss:$16 sps:$4 sm:$0xff]  }
 0x342   : > { %7754 = vmatprep.subr.bf16.mxu1 %v11060_v7  ;;  %v11112_v7 = vld [vmem:[%s11542_s14 + $0x1668] ss:$16 sps:$4 sm:$0xff]  }
 0x344   : > { %7714 = vmatpush2.bf16.msra.mxu0 %v11055_v45  ;;  %v11117_v45 = vld [vmem:[%s11542_s14 + $0x144c] ss:$16 sps:$4 sm:$0xff]  }
 0x345   : > { %7755 = vmatpush2.bf16.msra.mxu1 %v11058_v47  ;;  %7715 = vmatprep.subr.bf16.mxu0 %v11063_v51  ;;  %v11120_v47 = vld [vmem:[%s11542_s14 + $0x164c] ss:$16 sps:$4 sm:$0xff]   ;;  %v11115_v51 = vld [vmem:[%s11542_s14 + $0x1448] ss:$16 sps:$4 sm:$0xff]  }
 0x346   : > { %7756 = vmatprep.subr.bf16.mxu1 %v11066_v37  ;;  %v11118_v37 = vld [vmem:[%s11542_s14 + $0x1648] ss:$16 sps:$4 sm:$0xff]  }
 0x348   : > { %7716 = vmatpush2.bf16.msra.mxu0 %v11061_v13  ;;  %v11123_v13 = vld [vmem:[%s11542_s14 + $0x142c] ss:$16 sps:$4 sm:$0xff]  }
 0x349   : > { %7757 = vmatpush2.bf16.msra.mxu1 %v11064_v21  ;;  %7717 = vmatprep.subr.bf16.mxu0 %v11069_v11  ;;  %v11126_v21 = vld [vmem:[%s11542_s14 + $0x162c] ss:$16 sps:$4 sm:$0xff]   ;;  %v11121_v11 = vld [vmem:[%s11542_s14 + $0x1428] ss:$16 sps:$4 sm:$0xff]  }
 0x34a   : > { %7758 = vmatprep.subr.bf16.mxu1 %v11072_v57  ;;  %v11124_v57 = vld [vmem:[%s11542_s14 + $0x1628] ss:$16 sps:$4 sm:$0xff]  }
 0x34c   : > { %7718 = vmatpush2.bf16.msra.mxu0 %v11067_v0  ;;  %v11129_v0 = vld [vmem:[%s11542_s14 + $0x140c] ss:$16 sps:$4 sm:$0xff]  }
 0x34d   : > { %7759 = vmatpush2.bf16.msra.mxu1 %v11070_v62  ;;  %7719 = vmatprep.subr.bf16.mxu0 %v11075_v41  ;;  %v11132_v62 = vld [vmem:[%s11542_s14 + $0x160c] ss:$16 sps:$4 sm:$0xff]   ;;  %v11127_v41 = vld [vmem:[%s11542_s14 + $0x1408] ss:$16 sps:$4 sm:$0xff]  }
 0x34e   : > { %7760 = vmatprep.subr.bf16.mxu1 %v11078_v20  ;;  %v11130_v20 = vld [vmem:[%s11542_s14 + $0x1608] ss:$16 sps:$4 sm:$0xff]  }
 0x350   : > { %7720 = vmatpush2.bf16.msra.mxu0 %v11073_v26  ;;  %v11135_v26 = vld [vmem:[%s11542_s14 + $0x15ec] ss:$16 sps:$4 sm:$0xff]  }
 0x351   : > { %7761 = vmatpush2.bf16.msra.mxu1 %v11076_v61  ;;  %7721 = vmatprep.subr.bf16.mxu0 %v11081_v1  ;;  %v11138_v61 = vld [vmem:[%s11542_s14 + $0x17ec] ss:$16 sps:$4 sm:$0xff]   ;;  %v11133_v1 = vld [vmem:[%s11542_s14 + $0x15e8] ss:$16 sps:$4 sm:$0xff]  }
 0x352   : > { %7762 = vmatprep.subr.bf16.mxu1 %v11084_v2  ;;  %v11136_v2 = vld [vmem:[%s11542_s14 + $0x17e8] ss:$16 sps:$4 sm:$0xff]  }
 0x354   : > { %7722 = vmatpush2.bf16.msra.mxu0 %v11079_v3  ;;  %v11141_v3 = vld [vmem:[%s11542_s14 + $0x15cc] ss:$16 sps:$4 sm:$0xff]  }
 0x355   : > { %7763 = vmatpush2.bf16.msra.mxu1 %v11082_v49  ;;  %7773 = vmatprep.subr.bf16.mxu0 %v11087_v56  ;;  %v11144_v49 = vld [vmem:[%s11542_s14 + $0x17cc] ss:$16 sps:$4 sm:$0xff]   ;;  %v11139_v56 = vld [vmem:[%s11542_s14 + $0x15c8] ss:$16 sps:$4 sm:$0xff]  }
 0x356   : > { %7814 = vmatprep.subr.bf16.mxu1 %v11090_v16  ;;  %v11142_v16 = vld [vmem:[%s11542_s14 + $0x17c8] ss:$16 sps:$4 sm:$0xff]  }
 0x357   : > { %v7479_v55 = vpop.f32.mrf.mxu0  ;;  %7724 = vmatmul.mubr.bf16.vlgmr.msra.gmra.mxu0 %v11997_v4 }
 0x358   : > { %v7520_v60 = vpop.f32.mrf.mxu1  ;;  %7765 = vmatmul.mubr.bf16.vlgmr.msra.gmra.mxu1 %v12010_v5  ;;  %v7480_v6 = vadd.f32 %v7479_v55, %v12594_v38  ;;  %7774 = vmatpush1.bf16.msra.mxu0 %v11085_v39  ;;  %v11147_v39 = vld [vmem:[%s11542_s14 + $0x15ac] ss:$16 sps:$4 sm:$0xff]  }
 0x359   : > { %7815 = vmatpush1.bf16.msra.mxu1 %v11088_v12  ;;  %v7481_v24 = vpop.f32.mrf.mxu0  ;;  %7775 = vmatprep.subr.bf16.mxu0 %v11093_v27  ;;  %v11150_v12 = vld [vmem:[%s11542_s14 + $0x17ac] ss:$16 sps:$4 sm:$0xff]   ;;  %v11145_v27 = vld [vmem:[%s11542_s14 + $0x15a8] ss:$16 sps:$4 sm:$0xff]  }
 0x35a   : > { %v7522_v58 = vpop.f32.mrf.mxu1  ;;  %7816 = vmatprep.subr.bf16.mxu1 %v11096_v31  ;;  %v12671_v8 = vadd.f32 %v7520_v60, %v7480_v6  ;;  %v7482_v4 = vadd.f32 %v7481_v24, %v12600_v53  ;;  %7805 = vmatprep.mubr.bf16.mxu0 %v12006_v15  ;;  %v11105_v15 = vld [vmem:[%s11542_s14 + $0x148c] ss:$16 sps:$4 sm:$0xff]   ;;  %v11103_v53 = vld [vmem:[%s11542_s14 + $0x1488] ss:$16 sps:$4 sm:$0xff]  }
 0x35b   : > { %7846 = vmatprep.mubr.bf16.mxu1 %v12018_v23  ;;  %v7483_v5 = vpop.f32.mrf.mxu0  ;;  %v11108_v23 = vld [vmem:[%s11542_s14 + $0x168c] ss:$16 sps:$4 sm:$0xff]   ;;  %v11148_v31 = vld [vmem:[%s11542_s14 + $0x17a8] ss:$16 sps:$4 sm:$0xff]  }
 0x35c   : > { %v7524_v38 = vpop.f32.mrf.mxu1  ;;  %v12676_v22 = vadd.f32 %v7522_v58, %v7482_v4  ;;  %7776 = vmatpush1.bf16.msra.mxu0 %v11091_v48  ;;  %v11153_v55 = vld [vmem:[%s11542_s14 + $0x158c] ss:$16 sps:$4 sm:$0xff]   ;;  %v11151_v6 = vld [vmem:[%s11542_s14 + $0x1588] ss:$16 sps:$4 sm:$0xff]  }
 0x35d   : > { %7817 = vmatpush1.bf16.msra.mxu1 %v11094_v18  ;;  %v7484_v29 = vpop.f32.mrf.mxu0  ;;  %7777 = vmatprep.subr.bf16.mxu0 %v11099_v42  ;;  %v11156_v60 = vld [vmem:[%s11542_s14 + $0x178c] ss:$16 sps:$4 sm:$0xff]   ;;  %v11154_v48 = vld [vmem:[%s11542_s14 + $0x1788] ss:$16 sps:$4 sm:$0xff]  }
 0x35e   : > { %v7525_v54 = vpop.f32.mrf.mxu1  ;;  %7818 = vmatprep.subr.bf16.mxu1 %v11102_v43  ;;  %v11159_v18 = vld [vmem:[%s11542_s14 + $0x156c] ss:$16 sps:$4 sm:$0xff]   ;;  %v11157_v58 = vld [vmem:[%s11542_s14 + $0x1568] ss:$16 sps:$4 sm:$0xff]  }
 0x35f   : > { %v11162_v24 = vld [vmem:[%s11542_s14 + $0x176c] ss:$16 sps:$4 sm:$0xff]   ;;  %v11160_v42 = vld [vmem:[%s11542_s14 + $0x1768] ss:$16 sps:$4 sm:$0xff]  }
 0x360   : > { %7778 = vmatpush1.bf16.msra.mxu0 %v11097_v28  ;;  %v11165_v43 = vld [vmem:[%s11542_s14 + $0x154c] ss:$16 sps:$4 sm:$0xff]   ;;  %v11163_v5 = vld [vmem:[%s11542_s14 + $0x1548] ss:$16 sps:$4 sm:$0xff]  }
 0x361   : > { %7819 = vmatpush1.bf16.msra.mxu1 %v11100_v50  ;;  %7779 = vmatprep.subr.bf16.mxu0 %v11105_v15  ;;  %v11168_v4 = vld [vmem:[%s11542_s14 + $0x174c] ss:$16 sps:$4 sm:$0xff]   ;;  %v11166_v38 = vld [vmem:[%s11542_s14 + $0x1748] ss:$16 sps:$4 sm:$0xff]  }
 0x362   : > { %7820 = vmatprep.subr.bf16.mxu1 %v11108_v23  ;;  %v11171_v28 = vld [vmem:[%s11542_s14 + $0x152c] ss:$16 sps:$4 sm:$0xff]   ;;  %v11169_v29 = vld [vmem:[%s11542_s14 + $0x1528] ss:$16 sps:$4 sm:$0xff]  }
 0x363   : > { %v11174_v50 = vld [vmem:[%s11542_s14 + $0x172c] ss:$16 sps:$4 sm:$0xff]   ;;  %v11172_v54 = vld [vmem:[%s11542_s14 + $0x1728] ss:$16 sps:$4 sm:$0xff]  }
 0x364   : > { %7780 = vmatpush1.bf16.msra.mxu0 %v11103_v53  ;;  %v11177_v15 = vld [vmem:[%s11542_s14 + $0x150c] ss:$16 sps:$4 sm:$0xff]   ;;  %v11175_v53 = vld [vmem:[%s11542_s14 + $0x1508] ss:$16 sps:$4 sm:$0xff]  }
 0x365   : > { %7821 = vmatpush1.bf16.msra.mxu1 %v11106_v30  ;;  %7781 = vmatprep.subr.bf16.mxu0 %v11111_v32  ;;  %v11180_v23 = vld [vmem:[%s11542_s14 + $0x170c] ss:$16 sps:$4 sm:$0xff]   ;;  %v11178_v30 = vld [vmem:[%s11542_s14 + $0x1708] ss:$16 sps:$4 sm:$0xff]  }
 0x366   : > { %7822 = vmatprep.subr.bf16.mxu1 %v11114_v35  ;;  %v11183_v32 = vld [vmem:[%s11542_s14 + $0x18ec] ss:$16 sps:$4 sm:$0xff]  }
 0x367   : > { %v11186_v35 = vld [vmem:[%s11542_s14 + $0x1aec] ss:$16 sps:$4 sm:$0xff]  }
 0x368   : > { %7782 = vmatpush1.bf16.msra.mxu0 %v11109_v33  ;;  %v11181_v33 = vld [vmem:[%s11542_s14 + $0x18e8] ss:$16 sps:$4 sm:$0xff]  }
 0x369   : > { %7823 = vmatpush1.bf16.msra.mxu1 %v11112_v7  ;;  %7783 = vmatprep.subr.bf16.mxu0 %v11117_v45  ;;  %v11184_v7 = vld [vmem:[%s11542_s14 + $0x1ae8] ss:$16 sps:$4 sm:$0xff]   ;;  %v11189_v45 = vld [vmem:[%s11542_s14 + $0x18cc] ss:$16 sps:$4 sm:$0xff]  }
 0x36a   : > { %7824 = vmatprep.subr.bf16.mxu1 %v11120_v47  ;;  %v11192_v47 = vld [vmem:[%s11542_s14 + $0x1acc] ss:$16 sps:$4 sm:$0xff]  }
 0x36c   : > { %7784 = vmatpush1.bf16.msra.mxu0 %v11115_v51 }
 0x36d   : > { %7825 = vmatpush1.bf16.msra.mxu1 %v11118_v37  ;;  %7785 = vmatprep.subr.bf16.mxu0 %v11123_v13 }
 0x36e   : > { %7826 = vmatprep.subr.bf16.mxu1 %v11126_v21  ;;  %v11187_v21 = vld [vmem:[%s11542_s14 + $0x18c8] ss:$16 sps:$4 sm:$0xff]  }
 0x370   : > { %7786 = vmatpush1.bf16.msra.mxu0 %v11121_v11  ;;  %v11190_v11 = vld [vmem:[%s11542_s14 + $0x1ac8] ss:$16 sps:$4 sm:$0xff]  }
 0x371   : > { %7827 = vmatpush1.bf16.msra.mxu1 %v11124_v57  ;;  %7787 = vmatprep.subr.bf16.mxu0 %v11129_v0 }
 0x372   : > { %7828 = vmatprep.subr.bf16.mxu1 %v11132_v62  ;;  %v11195_v62 = vld [vmem:[%s11542_s14 + $0x18ac] ss:$16 sps:$4 sm:$0xff]  }
 0x374   : > { %7788 = vmatpush1.bf16.msra.mxu0 %v11127_v41  ;;  %v11198_v41 = vld [vmem:[%s11542_s14 + $0x1aac] ss:$16 sps:$4 sm:$0xff]  }
 0x375   : > { %7829 = vmatpush1.bf16.msra.mxu1 %v11130_v20  ;;  %7789 = vmatprep.subr.bf16.mxu0 %v11135_v26 }
 0x376   : > { %7830 = vmatprep.subr.bf16.mxu1 %v11138_v61  ;;  %v11193_v61 = vld [vmem:[%s11542_s14 + $0x18a8] ss:$16 sps:$4 sm:$0xff]  }
 0x378   : > { %7790 = vmatpush2.bf16.msra.mxu0 %v11133_v1  ;;  %v11196_v1 = vld [vmem:[%s11542_s14 + $0x1aa8] ss:$16 sps:$4 sm:$0xff]  }
 0x379   : > { %7831 = vmatpush2.bf16.msra.mxu1 %v11136_v2  ;;  %7791 = vmatprep.subr.bf16.mxu0 %v11141_v3 }
 0x37a   : > { %7832 = vmatprep.subr.bf16.mxu1 %v11144_v49  ;;  %v11202_v49 = vld [vmem:[%s11542_s14 + $0x1a88] ss:$16 sps:$4 sm:$0xff]  }
 0x37c   : > { %7792 = vmatpush2.bf16.msra.mxu0 %v11139_v56  ;;  %v11207_v56 = vld [vmem:[%s11542_s14 + $0x186c] ss:$16 sps:$4 sm:$0xff]  }
 0x37d   : > { %7833 = vmatpush2.bf16.msra.mxu1 %v11142_v16  ;;  %7793 = vmatprep.subr.bf16.mxu0 %v11147_v39  ;;  %v11210_v16 = vld [vmem:[%s11542_s14 + $0x1a6c] ss:$16 sps:$4 sm:$0xff]   ;;  %v11205_v39 = vld [vmem:[%s11542_s14 + $0x1868] ss:$16 sps:$4 sm:$0xff]  }
 0x37e   : > { %7834 = vmatprep.subr.bf16.mxu1 %v11150_v12  ;;  %v11208_v12 = vld [vmem:[%s11542_s14 + $0x1a68] ss:$16 sps:$4 sm:$0xff]  }
 0x380   : > { %7794 = vmatpush2.bf16.msra.mxu0 %v11145_v27  ;;  %v11213_v27 = vld [vmem:[%s11542_s14 + $0x184c] ss:$16 sps:$4 sm:$0xff]  }
 0x381   : > { %7835 = vmatpush2.bf16.msra.mxu1 %v11148_v31  ;;  %7795 = vmatprep.subr.bf16.mxu0 %v11153_v55  ;;  %v11216_v31 = vld [vmem:[%s11542_s14 + $0x1a4c] ss:$16 sps:$4 sm:$0xff]   ;;  %v11211_v55 = vld [vmem:[%s11542_s14 + $0x1848] ss:$16 sps:$4 sm:$0xff]  }
 0x382   : > { %7836 = vmatprep.subr.bf16.mxu1 %v11156_v60  ;;  %v11214_v60 = vld [vmem:[%s11542_s14 + $0x1a48] ss:$16 sps:$4 sm:$0xff]  }
 0x384   : > { %7796 = vmatpush2.bf16.msra.mxu0 %v11151_v6  ;;  %v11219_v6 = vld [vmem:[%s11542_s14 + $0x182c] ss:$16 sps:$4 sm:$0xff]  }
 0x385   : > { %7837 = vmatpush2.bf16.msra.mxu1 %v11154_v48  ;;  %7797 = vmatprep.subr.bf16.mxu0 %v11159_v18  ;;  %v11222_v48 = vld [vmem:[%s11542_s14 + $0x1a2c] ss:$16 sps:$4 sm:$0xff]   ;;  %v11217_v18 = vld [vmem:[%s11542_s14 + $0x1828] ss:$16 sps:$4 sm:$0xff]  }
 0x386   : > { %7838 = vmatprep.subr.bf16.mxu1 %v11162_v24  ;;  %v11220_v24 = vld [vmem:[%s11542_s14 + $0x1a28] ss:$16 sps:$4 sm:$0xff]  }
 0x388   : > { %7798 = vmatpush2.bf16.msra.mxu0 %v11157_v58  ;;  %v11225_v58 = vld [vmem:[%s11542_s14 + $0x180c] ss:$16 sps:$4 sm:$0xff]  }
 0x389   : > { %7839 = vmatpush2.bf16.msra.mxu1 %v11160_v42  ;;  %7799 = vmatprep.subr.bf16.mxu0 %v11165_v43  ;;  %v11228_v42 = vld [vmem:[%s11542_s14 + $0x1a0c] ss:$16 sps:$4 sm:$0xff]   ;;  %v11223_v43 = vld [vmem:[%s11542_s14 + $0x1808] ss:$16 sps:$4 sm:$0xff]  }
 0x38a   : > { %7840 = vmatprep.subr.bf16.mxu1 %v11168_v4  ;;  %v11226_v4 = vld [vmem:[%s11542_s14 + $0x1a08] ss:$16 sps:$4 sm:$0xff]  }
 0x38c   : > { %7800 = vmatpush2.bf16.msra.mxu0 %v11163_v5  ;;  %v11231_v5 = vld [vmem:[%s11542_s14 + $0x19ec] ss:$16 sps:$4 sm:$0xff]  }
 0x38d   : > { %7841 = vmatpush2.bf16.msra.mxu1 %v11166_v38  ;;  %7801 = vmatprep.subr.bf16.mxu0 %v11171_v28  ;;  %v11234_v38 = vld [vmem:[%s11542_s14 + $0x1bec] ss:$16 sps:$4 sm:$0xff]   ;;  %v11229_v28 = vld [vmem:[%s11542_s14 + $0x19e8] ss:$16 sps:$4 sm:$0xff]  }
 0x38e   : > { %7842 = vmatprep.subr.bf16.mxu1 %v11174_v50  ;;  %v11232_v50 = vld [vmem:[%s11542_s14 + $0x1be8] ss:$16 sps:$4 sm:$0xff]  }
 0x390   : > { %7802 = vmatpush2.bf16.msra.mxu0 %v11169_v29  ;;  %v11237_v29 = vld [vmem:[%s11542_s14 + $0x19cc] ss:$16 sps:$4 sm:$0xff]  }
 0x391   : > { %7843 = vmatpush2.bf16.msra.mxu1 %v11172_v54  ;;  %7803 = vmatprep.subr.bf16.mxu0 %v11177_v15  ;;  %v11240_v54 = vld [vmem:[%s11542_s14 + $0x1bcc] ss:$16 sps:$4 sm:$0xff]   ;;  %v11235_v15 = vld [vmem:[%s11542_s14 + $0x19c8] ss:$16 sps:$4 sm:$0xff]  }
 0x392   : > { %7844 = vmatprep.subr.bf16.mxu1 %v11180_v23  ;;  %v11238_v23 = vld [vmem:[%s11542_s14 + $0x1bc8] ss:$16 sps:$4 sm:$0xff]  }
 0x394   : > { %7804 = vmatpush2.bf16.msra.mxu0 %v11175_v53  ;;  %v11243_v53 = vld [vmem:[%s11542_s14 + $0x19ac] ss:$16 sps:$4 sm:$0xff]  }
 0x395   : > { %7845 = vmatpush2.bf16.msra.mxu1 %v11178_v30  ;;  %7855 = vmatprep.subr.bf16.mxu0 %v11183_v32  ;;  %v11246_v30 = vld [vmem:[%s11542_s14 + $0x1bac] ss:$16 sps:$4 sm:$0xff]   ;;  %v11241_v32 = vld [vmem:[%s11542_s14 + $0x19a8] ss:$16 sps:$4 sm:$0xff]  }
 0x396   : > { %7896 = vmatprep.subr.bf16.mxu1 %v11186_v35  ;;  %v11244_v35 = vld [vmem:[%s11542_s14 + $0x1ba8] ss:$16 sps:$4 sm:$0xff]  }
 0x397   : > { %v7561_v51 = vpop.f32.mrf.mxu0  ;;  %7806 = vmatmul.mubr.bf16.vlgmr.msra.gmra.mxu0 %v12095_v10 }
 0x398   : > { %v7602_v37 = vpop.f32.mrf.mxu1  ;;  %7847 = vmatmul.mubr.bf16.vlgmr.msra.gmra.mxu1 %v12108_v59  ;;  %v7562_v13 = vadd.f32 %v7561_v51, %v12671_v8  ;;  %7856 = vmatpush1.bf16.msra.mxu0 %v11181_v33  ;;  %v11249_v33 = vld [vmem:[%s11542_s14 + $0x198c] ss:$16 sps:$4 sm:$0xff]  }
 0x399   : > { %7897 = vmatpush1.bf16.msra.mxu1 %v11184_v7  ;;  %v7563_v57 = vpop.f32.mrf.mxu0  ;;  %7857 = vmatprep.subr.bf16.mxu0 %v11189_v45  ;;  %v11252_v7 = vld [vmem:[%s11542_s14 + $0x1b8c] ss:$16 sps:$4 sm:$0xff]   ;;  %v11247_v45 = vld [vmem:[%s11542_s14 + $0x1988] ss:$16 sps:$4 sm:$0xff]  }
 0x39a   : > { %v7604_v0 = vpop.f32.mrf.mxu1  ;;  %7898 = vmatprep.subr.bf16.mxu1 %v11192_v47  ;;  %v12745_v20 = vadd.f32 %v7602_v37, %v7562_v13  ;;  %v7564_v10 = vadd.f32 %v7563_v57, %v12676_v22  ;;  %7887 = vmatprep.mubr.bf16.mxu0 %v12104_v25  ;;  %v11201_v25 = vld [vmem:[%s11542_s14 + $0x188c] ss:$16 sps:$4 sm:$0xff]   ;;  %v11199_v22 = vld [vmem:[%s11542_s14 + $0x1888] ss:$16 sps:$4 sm:$0xff]  }
 0x39b   : > { %7928 = vmatprep.mubr.bf16.mxu1 %v12116_v34  ;;  %v7565_v59 = vpop.f32.mrf.mxu0  ;;  %v11204_v34 = vld [vmem:[%s11542_s14 + $0x1a8c] ss:$16 sps:$4 sm:$0xff]   ;;  %v11250_v47 = vld [vmem:[%s11542_s14 + $0x1b88] ss:$16 sps:$4 sm:$0xff]  }
 0x39c   : > { %v7606_v8 = vpop.f32.mrf.mxu1  ;;  %v12750_v26 = vadd.f32 %v7604_v0, %v7564_v10  ;;  %7858 = vmatpush1.bf16.msra.mxu0 %v11187_v21  ;;  %v11255_v51 = vld [vmem:[%s11542_s14 + $0x196c] ss:$16 sps:$4 sm:$0xff]   ;;  %v11253_v13 = vld [vmem:[%s11542_s14 + $0x1968] ss:$16 sps:$4 sm:$0xff]  }
 0x39d   : > { %7899 = vmatpush1.bf16.msra.mxu1 %v11190_v11  ;;  %v7566_v2 = vpop.f32.mrf.mxu0  ;;  %7859 = vmatprep.subr.bf16.mxu0 %v11195_v62  ;;  %v11258_v37 = vld [vmem:[%s11542_s14 + $0x1b6c] ss:$16 sps:$4 sm:$0xff]   ;;  %v11256_v21 = vld [vmem:[%s11542_s14 + $0x1b68] ss:$16 sps:$4 sm:$0xff]  }
 0x39e   : > { %v7607_v3 = vpop.f32.mrf.mxu1  ;;  %7900 = vmatprep.subr.bf16.mxu1 %v11198_v41  ;;  %v11261_v11 = vld [vmem:[%s11542_s14 + $0x194c] ss:$16 sps:$4 sm:$0xff]   ;;  %v11259_v0 = vld [vmem:[%s11542_s14 + $0x1948] ss:$16 sps:$4 sm:$0xff]  }
 0x39f   : > { %v11264_v57 = vld [vmem:[%s11542_s14 + $0x1b4c] ss:$16 sps:$4 sm:$0xff]   ;;  %v11262_v62 = vld [vmem:[%s11542_s14 + $0x1b48] ss:$16 sps:$4 sm:$0xff]  }
 0x3a0   : > { %7860 = vmatpush1.bf16.msra.mxu0 %v11193_v61  ;;  %v11267_v41 = vld [vmem:[%s11542_s14 + $0x192c] ss:$16 sps:$4 sm:$0xff]   ;;  %v11265_v59 = vld [vmem:[%s11542_s14 + $0x1928] ss:$16 sps:$4 sm:$0xff]  }
 0x3a1   : > { %7901 = vmatpush1.bf16.msra.mxu1 %v11196_v1  ;;  %7861 = vmatprep.subr.bf16.mxu0 %v11201_v25  ;;  %v11270_v10 = vld [vmem:[%s11542_s14 + $0x1b2c] ss:$16 sps:$4 sm:$0xff]   ;;  %v11268_v8 = vld [vmem:[%s11542_s14 + $0x1b28] ss:$16 sps:$4 sm:$0xff]  }
 0x3a2   : > { %7902 = vmatprep.subr.bf16.mxu1 %v11204_v34  ;;  %v11273_v61 = vld [vmem:[%s11542_s14 + $0x190c] ss:$16 sps:$4 sm:$0xff]   ;;  %v11271_v2 = vld [vmem:[%s11542_s14 + $0x1908] ss:$16 sps:$4 sm:$0xff]  }
 0x3a3   : > { %v11276_v1 = vld [vmem:[%s11542_s14 + $0x1b0c] ss:$16 sps:$4 sm:$0xff]   ;;  %v11274_v3 = vld [vmem:[%s11542_s14 + $0x1b08] ss:$16 sps:$4 sm:$0xff]  }
 0x3a4   : > { %7862 = vmatpush1.bf16.msra.mxu0 %v11199_v22  ;;  %v11279_v25 = vld [vmem:[%s11542_s14 + $0x1cec] ss:$16 sps:$4 sm:$0xff]   ;;  %v11277_v22 = vld [vmem:[%s11542_s14 + $0x1ce8] ss:$16 sps:$4 sm:$0xff]  }
 0x3a5   : > { %7903 = vmatpush1.bf16.msra.mxu1 %v11202_v49  ;;  %7863 = vmatprep.subr.bf16.mxu0 %v11207_v56  ;;  %v11282_v34 = vld [vmem:[%s11542_s14 + $0x1eec] ss:$16 sps:$4 sm:$0xff]   ;;  %v11280_v49 = vld [vmem:[%s11542_s14 + $0x1ee8] ss:$16 sps:$4 sm:$0xff]  }
 0x3a6   : > { %7904 = vmatprep.subr.bf16.mxu1 %v11210_v16  ;;  %v11285_v56 = vld [vmem:[%s11542_s14 + $0x1ccc] ss:$16 sps:$4 sm:$0xff]  }
 0x3a7   : > { %v11288_v16 = vld [vmem:[%s11542_s14 + $0x1ecc] ss:$16 sps:$4 sm:$0xff]  }
 0x3a8   : > { %7864 = vmatpush1.bf16.msra.mxu0 %v11205_v39 }
 0x3a9   : > { %7905 = vmatpush1.bf16.msra.mxu1 %v11208_v12  ;;  %7865 = vmatprep.subr.bf16.mxu0 %v11213_v27 }
 0x3aa   : > { %7906 = vmatprep.subr.bf16.mxu1 %v11216_v31  ;;  %v11283_v31 = vld [vmem:[%s11542_s14 + $0x1cc8] ss:$16 sps:$4 sm:$0xff]  }
 0x3ac   : > { %7866 = vmatpush1.bf16.msra.mxu0 %v11211_v55  ;;  %v11286_v55 = vld [vmem:[%s11542_s14 + $0x1ec8] ss:$16 sps:$4 sm:$0xff]  }
 0x3ad   : > { %7907 = vmatpush1.bf16.msra.mxu1 %v11214_v60  ;;  %7867 = vmatprep.subr.bf16.mxu0 %v11219_v6 }
 0x3ae   : > { %7908 = vmatprep.subr.bf16.mxu1 %v11222_v48  ;;  %v11291_v48 = vld [vmem:[%s11542_s14 + $0x1cac] ss:$16 sps:$4 sm:$0xff]  }
 0x3b0   : > { %7868 = vmatpush1.bf16.msra.mxu0 %v11217_v18  ;;  %v11294_v18 = vld [vmem:[%s11542_s14 + $0x1eac] ss:$16 sps:$4 sm:$0xff]  }
 0x3b1   : > { %7909 = vmatpush1.bf16.msra.mxu1 %v11220_v24  ;;  %7869 = vmatprep.subr.bf16.mxu0 %v11225_v58 }
 0x3b2   : > { %7910 = vmatprep.subr.bf16.mxu1 %v11228_v42  ;;  %v11289_v42 = vld [vmem:[%s11542_s14 + $0x1ca8] ss:$16 sps:$4 sm:$0xff]  }
 0x3b4   : > { %7870 = vmatpush1.bf16.msra.mxu0 %v11223_v43  ;;  %v11292_v43 = vld [vmem:[%s11542_s14 + $0x1ea8] ss:$16 sps:$4 sm:$0xff]  }
 0x3b5   : > { %7911 = vmatpush1.bf16.msra.mxu1 %v11226_v4  ;;  %7871 = vmatprep.subr.bf16.mxu0 %v11231_v5 }
 0x3b6   : > { %7912 = vmatprep.subr.bf16.mxu1 %v11234_v38  ;;  %v11298_v38 = vld [vmem:[%s11542_s14 + $0x1e88] ss:$16 sps:$4 sm:$0xff]  }
 0x3b8   : > { %7872 = vmatpush2.bf16.msra.mxu0 %v11229_v28  ;;  %v11303_v28 = vld [vmem:[%s11542_s14 + $0x1c6c] ss:$16 sps:$4 sm:$0xff]  }
 0x3b9   : > { %7913 = vmatpush2.bf16.msra.mxu1 %v11232_v50  ;;  %7873 = vmatprep.subr.bf16.mxu0 %v11237_v29  ;;  %v11306_v50 = vld [vmem:[%s11542_s14 + $0x1e6c] ss:$16 sps:$4 sm:$0xff]   ;;  %v11301_v29 = vld [vmem:[%s11542_s14 + $0x1c68] ss:$16 sps:$4 sm:$0xff]  }
 0x3ba   : > { %7914 = vmatprep.subr.bf16.mxu1 %v11240_v54  ;;  %v11304_v54 = vld [vmem:[%s11542_s14 + $0x1e68] ss:$16 sps:$4 sm:$0xff]  }
 0x3bc   : > { %7874 = vmatpush2.bf16.msra.mxu0 %v11235_v15  ;;  %v11309_v15 = vld [vmem:[%s11542_s14 + $0x1c4c] ss:$16 sps:$4 sm:$0xff]  }
 0x3bd   : > { %7915 = vmatpush2.bf16.msra.mxu1 %v11238_v23  ;;  %7875 = vmatprep.subr.bf16.mxu0 %v11243_v53  ;;  %v11312_v23 = vld [vmem:[%s11542_s14 + $0x1e4c] ss:$16 sps:$4 sm:$0xff]   ;;  %v11307_v53 = vld [vmem:[%s11542_s14 + $0x1c48] ss:$16 sps:$4 sm:$0xff]  }
 0x3be   : > { %7916 = vmatprep.subr.bf16.mxu1 %v11246_v30  ;;  %v11310_v30 = vld [vmem:[%s11542_s14 + $0x1e48] ss:$16 sps:$4 sm:$0xff]  }
 0x3c0   : > { %7876 = vmatpush2.bf16.msra.mxu0 %v11241_v32  ;;  %v11315_v32 = vld [vmem:[%s11542_s14 + $0x1c2c] ss:$16 sps:$4 sm:$0xff]  }
 0x3c1   : > { %7917 = vmatpush2.bf16.msra.mxu1 %v11244_v35  ;;  %7877 = vmatprep.subr.bf16.mxu0 %v11249_v33  ;;  %v11318_v35 = vld [vmem:[%s11542_s14 + $0x1e2c] ss:$16 sps:$4 sm:$0xff]   ;;  %v11313_v33 = vld [vmem:[%s11542_s14 + $0x1c28] ss:$16 sps:$4 sm:$0xff]  }
 0x3c2   : > { %7918 = vmatprep.subr.bf16.mxu1 %v11252_v7  ;;  %v11316_v7 = vld [vmem:[%s11542_s14 + $0x1e28] ss:$16 sps:$4 sm:$0xff]  }
 0x3c4   : > { %7878 = vmatpush2.bf16.msra.mxu0 %v11247_v45  ;;  %v11321_v45 = vld [vmem:[%s11542_s14 + $0x1c0c] ss:$16 sps:$4 sm:$0xff]  }
 0x3c5   : > { %7919 = vmatpush2.bf16.msra.mxu1 %v11250_v47  ;;  %7879 = vmatprep.subr.bf16.mxu0 %v11255_v51  ;;  %v11324_v47 = vld [vmem:[%s11542_s14 + $0x1e0c] ss:$16 sps:$4 sm:$0xff]   ;;  %v11319_v51 = vld [vmem:[%s11542_s14 + $0x1c08] ss:$16 sps:$4 sm:$0xff]  }
 0x3c6   : > { %7920 = vmatprep.subr.bf16.mxu1 %v11258_v37  ;;  %v11322_v37 = vld [vmem:[%s11542_s14 + $0x1e08] ss:$16 sps:$4 sm:$0xff]  }
 0x3c8   : > { %7880 = vmatpush2.bf16.msra.mxu0 %v11253_v13  ;;  %v11327_v13 = vld [vmem:[%s11542_s14 + $0x1dec] ss:$16 sps:$4 sm:$0xff]  }
 0x3c9   : > { %7921 = vmatpush2.bf16.msra.mxu1 %v11256_v21  ;;  %7881 = vmatprep.subr.bf16.mxu0 %v11261_v11  ;;  %v11330_v21 = vld [vmem:[%s11542_s14 + $0x1fec] ss:$16 sps:$4 sm:$0xff]   ;;  %v11325_v11 = vld [vmem:[%s11542_s14 + $0x1de8] ss:$16 sps:$4 sm:$0xff]  }
 0x3ca   : > { %7922 = vmatprep.subr.bf16.mxu1 %v11264_v57  ;;  %v11328_v57 = vld [vmem:[%s11542_s14 + $0x1fe8] ss:$16 sps:$4 sm:$0xff]  }
 0x3cc   : > { %7882 = vmatpush2.bf16.msra.mxu0 %v11259_v0  ;;  %v11333_v0 = vld [vmem:[%s11542_s14 + $0x1dcc] ss:$16 sps:$4 sm:$0xff]  }
 0x3cd   : > { %7923 = vmatpush2.bf16.msra.mxu1 %v11262_v62  ;;  %7883 = vmatprep.subr.bf16.mxu0 %v11267_v41  ;;  %v11336_v62 = vld [vmem:[%s11542_s14 + $0x1fcc] ss:$16 sps:$4 sm:$0xff]   ;;  %v11331_v41 = vld [vmem:[%s11542_s14 + $0x1dc8] ss:$16 sps:$4 sm:$0xff]  }
 0x3ce   : > { %7924 = vmatprep.subr.bf16.mxu1 %v11270_v10  ;;  %v11334_v10 = vld [vmem:[%s11542_s14 + $0x1fc8] ss:$16 sps:$4 sm:$0xff]  }
 0x3d0   : > { %7884 = vmatpush2.bf16.msra.mxu0 %v11265_v59  ;;  %v11339_v59 = vld [vmem:[%s11542_s14 + $0x1dac] ss:$16 sps:$4 sm:$0xff]  }
 0x3d1   : > { %7925 = vmatpush2.bf16.msra.mxu1 %v11268_v8  ;;  %7885 = vmatprep.subr.bf16.mxu0 %v11273_v61  ;;  %v11342_v8 = vld [vmem:[%s11542_s14 + $0x1fac] ss:$16 sps:$4 sm:$0xff]   ;;  %v11337_v61 = vld [vmem:[%s11542_s14 + $0x1da8] ss:$16 sps:$4 sm:$0xff]  }
 0x3d2   : > { %7926 = vmatprep.subr.bf16.mxu1 %v11276_v1  ;;  %v11340_v1 = vld [vmem:[%s11542_s14 + $0x1fa8] ss:$16 sps:$4 sm:$0xff]  }
 0x3d4   : > { %7886 = vmatpush2.bf16.msra.mxu0 %v11271_v2  ;;  %v11345_v2 = vld [vmem:[%s11542_s14 + $0x1d8c] ss:$16 sps:$4 sm:$0xff]  }
 0x3d5   : > { %7927 = vmatpush2.bf16.msra.mxu1 %v11274_v3  ;;  %7937 = vmatprep.subr.bf16.mxu0 %v11279_v25  ;;  %v11348_v3 = vld [vmem:[%s11542_s14 + $0x1f8c] ss:$16 sps:$4 sm:$0xff]   ;;  %v11343_v25 = vld [vmem:[%s11542_s14 + $0x1d88] ss:$16 sps:$4 sm:$0xff]  }
 0x3d6   : > { %7978 = vmatprep.subr.bf16.mxu1 %v11282_v34  ;;  %v11346_v34 = vld [vmem:[%s11542_s14 + $0x1f88] ss:$16 sps:$4 sm:$0xff]  }
 0x3d7   : > { %v7643_v39 = vpop.f32.mrf.mxu0  ;;  %7888 = vmatmul.mubr.bf16.vlgmr.msra.gmra.mxu0 %v12191_v40 }
 0x3d8   : > { %v7684_v12 = vpop.f32.mrf.mxu1  ;;  %7929 = vmatmul.mubr.bf16.vlgmr.msra.gmra.mxu1 %v12204_v63  ;;  %v7644_v27 = vadd.f32 %v7643_v39, %v12745_v20  ;;  %7938 = vmatpush1.bf16.msra.mxu0 %v11277_v22  ;;  %v11351_v22 = vld [vmem:[%s11542_s14 + $0x1d6c] ss:$16 sps:$4 sm:$0xff]  }
 0x3d9   : > { %7979 = vmatpush1.bf16.msra.mxu1 %v11280_v49  ;;  %v7645_v60 = vpop.f32.mrf.mxu0  ;;  %7939 = vmatprep.subr.bf16.mxu0 %v11285_v56  ;;  %v11354_v49 = vld [vmem:[%s11542_s14 + $0x1f6c] ss:$16 sps:$4 sm:$0xff]   ;;  %v11349_v56 = vld [vmem:[%s11542_s14 + $0x1d68] ss:$16 sps:$4 sm:$0xff]  }
 0x3da   : > { %v7686_v6 = vpop.f32.mrf.mxu1  ;;  %7980 = vmatprep.subr.bf16.mxu1 %v11288_v16  ;;  %v12819_v24 = vadd.f32 %v7684_v12, %v7644_v27  ;;  %v7646_v40 = vadd.f32 %v7645_v60, %v12750_v26  ;;  %7969 = vmatprep.mubr.bf16.mxu0 %v12200_v52  ;;  %v11297_v52 = vld [vmem:[%s11542_s14 + $0x1c8c] ss:$16 sps:$4 sm:$0xff]   ;;  %v11295_v26 = vld [vmem:[%s11542_s14 + $0x1c88] ss:$16 sps:$4 sm:$0xff]  }
 0x3db   : > { %8010 = vmatprep.mubr.bf16.mxu1 %v12212_v46  ;;  %v7647_v63 = vpop.f32.mrf.mxu0  ;;  %v11300_v46 = vld [vmem:[%s11542_s14 + $0x1e8c] ss:$16 sps:$4 sm:$0xff]   ;;  %v11352_v16 = vld [vmem:[%s11542_s14 + $0x1f68] ss:$16 sps:$4 sm:$0xff]  }
 0x3dc   : > { %v7688_v20 = vpop.f32.mrf.mxu1  ;;  %v12824_v58 = vadd.f32 %v7686_v6, %v7646_v40  ;;  %7940 = vmatpush1.bf16.msra.mxu0 %v11283_v31  ;;  %v11357_v39 = vld [vmem:[%s11542_s14 + $0x1d4c] ss:$16 sps:$4 sm:$0xff]   ;;  %v11355_v27 = vld [vmem:[%s11542_s14 + $0x1d48] ss:$16 sps:$4 sm:$0xff]  }
 0x3dd   : > { %7981 = vmatpush1.bf16.msra.mxu1 %v11286_v55  ;;  %v7648_v4 = vpop.f32.mrf.mxu0  ;;  %7941 = vmatprep.subr.bf16.mxu0 %v11291_v48  ;;  %v11360_v12 = vld [vmem:[%s11542_s14 + $0x1f4c] ss:$16 sps:$4 sm:$0xff]   ;;  %v11358_v31 = vld [vmem:[%s11542_s14 + $0x1f48] ss:$16 sps:$4 sm:$0xff]  }
 0x3de   : > { %v7689_v5 = vpop.f32.mrf.mxu1  ;;  %7982 = vmatprep.subr.bf16.mxu1 %v11294_v18  ;;  %v11363_v55 = vld [vmem:[%s11542_s14 + $0x1d2c] ss:$16 sps:$4 sm:$0xff]   ;;  %v11361_v6 = vld [vmem:[%s11542_s14 + $0x1d28] ss:$16 sps:$4 sm:$0xff]  }
 0x3df   : > { %v11366_v60 = vld [vmem:[%s11542_s14 + $0x1f2c] ss:$16 sps:$4 sm:$0xff]   ;;  %v11364_v48 = vld [vmem:[%s11542_s14 + $0x1f28] ss:$16 sps:$4 sm:$0xff]  }
 0x3e0   : > { %7942 = vmatpush1.bf16.msra.mxu0 %v11289_v42  ;;  %v11369_v18 = vld [vmem:[%s11542_s14 + $0x1d0c] ss:$16 sps:$4 sm:$0xff]   ;;  %v11367_v63 = vld [vmem:[%s11542_s14 + $0x1d08] ss:$16 sps:$4 sm:$0xff]  }
 0x3e1   : > { %7983 = vmatpush1.bf16.msra.mxu1 %v11292_v43  ;;  %7943 = vmatprep.subr.bf16.mxu0 %v11297_v52  ;;  %v11372_v40 = vld [vmem:[%s11542_s14 + $0x1f0c] ss:$16 sps:$4 sm:$0xff]   ;;  %v11370_v20 = vld [vmem:[%s11542_s14 + $0x1f08] ss:$16 sps:$4 sm:$0xff]  }
 0x3e2   : > { %7984 = vmatprep.subr.bf16.mxu1 %v11300_v46 }
 0x3e4   : > { %7944 = vmatpush1.bf16.msra.mxu0 %v11295_v26 }
 0x3e5   : > { %7985 = vmatpush1.bf16.msra.mxu1 %v11298_v38  ;;  %7945 = vmatprep.subr.bf16.mxu0 %v11303_v28 }
 0x3e6   : > { %7986 = vmatprep.subr.bf16.mxu1 %v11306_v50 }
 0x3e8   : > { %7946 = vmatpush1.bf16.msra.mxu0 %v11301_v29 }
 0x3e9   : > { %7987 = vmatpush1.bf16.msra.mxu1 %v11304_v54  ;;  %7947 = vmatprep.subr.bf16.mxu0 %v11309_v15 }
 0x3ea   : > { %7988 = vmatprep.subr.bf16.mxu1 %v11312_v23 }
 0x3ec   : > { %7948 = vmatpush1.bf16.msra.mxu0 %v11307_v53 }
 0x3ed   : > { %7989 = vmatpush1.bf16.msra.mxu1 %v11310_v30  ;;  %7949 = vmatprep.subr.bf16.mxu0 %v11315_v32 }
 0x3ee   : > { %7990 = vmatprep.subr.bf16.mxu1 %v11318_v35 }
 0x3f0   : > { %7950 = vmatpush1.bf16.msra.mxu0 %v11313_v33 }
 0x3f1   : > { %7991 = vmatpush1.bf16.msra.mxu1 %v11316_v7  ;;  %7951 = vmatprep.subr.bf16.mxu0 %v11321_v45 }
 0x3f2   : > { %7992 = vmatprep.subr.bf16.mxu1 %v11324_v47 }
 0x3f4   : > { %7952 = vmatpush1.bf16.msra.mxu0 %v11319_v51 }
 0x3f5   : > { %7993 = vmatpush1.bf16.msra.mxu1 %v11322_v37  ;;  %7953 = vmatprep.subr.bf16.mxu0 %v11327_v13 }
 0x3f6   : > { %7994 = vmatprep.subr.bf16.mxu1 %v11330_v21 }
 0x3f8   : > { %7954 = vmatpush2.bf16.msra.mxu0 %v11325_v11 }
 0x3f9   : > { %7995 = vmatpush2.bf16.msra.mxu1 %v11328_v57  ;;  %7955 = vmatprep.subr.bf16.mxu0 %v11333_v0 }
 0x3fa   : > { %7996 = vmatprep.subr.bf16.mxu1 %v11336_v62 }
 0x3fc   : > { %7956 = vmatpush2.bf16.msra.mxu0 %v11331_v41  ;;  %v11467_v41 = vmov 1983009808  }
 0x3fd   : > { %7997 = vmatpush2.bf16.msra.mxu1 %v11334_v10  ;;  %7957 = vmatprep.subr.bf16.mxu0 %v11339_v59  ;;  %v8026_v10 = vunpack.c.l.s4 %v11467_v41 }
 0x3fe   : > { %7998 = vmatprep.subr.bf16.mxu1 %v11342_v8 }
 0x400   : > { %7958 = vmatpush2.bf16.msra.mxu0 %v11337_v61 }
 0x401   : > { %7999 = vmatpush2.bf16.msra.mxu1 %v11340_v1  ;;  %7959 = vmatprep.subr.bf16.mxu0 %v11345_v2  ;;  %v8027_v1 = vunpack.c.0.s8 %v8026_v10 }
 0x402   : > { %8000 = vmatprep.subr.bf16.mxu1 %v11348_v3 }
 0x404   : > { %7960 = vmatpush2.bf16.msra.mxu0 %v11343_v25 }
 0x405   : > { %8001 = vmatpush2.bf16.msra.mxu1 %v11346_v34  ;;  %7961 = vmatprep.subr.bf16.mxu0 %v11351_v22 }
 0x406   : > { %8002 = vmatprep.subr.bf16.mxu1 %v11354_v49 }
 0x408   : > { %7962 = vmatpush2.bf16.msra.mxu0 %v11349_v56 }
 0x409   : > { %8003 = vmatpush2.bf16.msra.mxu1 %v11352_v16  ;;  %7963 = vmatprep.subr.bf16.mxu0 %v11357_v39  ;;  %v12885_v16 = vsub.s32 %v8027_v1, %v11584_v44 }
 0x40a   : > { %8004 = vmatprep.subr.bf16.mxu1 %v11360_v12 }
 0x40c   : > { %7964 = vmatpush2.bf16.msra.mxu0 %v11355_v27 }
 0x40d   : > { %8005 = vmatpush2.bf16.msra.mxu1 %v11358_v31  ;;  %7965 = vmatprep.subr.bf16.mxu0 %v11363_v55 }
 0x40e   : > { %8006 = vmatprep.subr.bf16.mxu1 %v11366_v60  ;;  %v8031_v60 = vrot.slane %v8023_v17, %v12885_v16 }
 0x410   : > { %7966 = vmatpush2.bf16.msra.mxu0 %v11361_v6 }
 0x411   : > { %8007 = vmatpush2.bf16.msra.mxu1 %v11364_v48  ;;  %7967 = vmatprep.subr.bf16.mxu0 %v11369_v18  ;;  %v326_v48 = vld [vmem:[#allocation2] sm:$0xff] }
 0x412   : > { %8008 = vmatprep.subr.bf16.mxu1 %v11372_v40 }
 0x414   : > { %7968 = vmatpush2.bf16.msra.mxu0 %v11367_v63 }
 0x415   : > { %8009 = vmatpush2.bf16.msra.mxu1 %v11370_v20 }
 0x417   : > { %v7725_v42 = vpop.f32.mrf.mxu0  ;;  %7970 = vmatmul.mubr.bf16.vlgmr.msra.gmra.mxu0 %v12280_v9 }
 0x418   : > { %v7766_v43 = vpop.f32.mrf.mxu1  ;;  %8011 = vmatmul.mubr.bf16.vlgmr.msra.gmra.mxu1 %v12290_v36  ;;  %v7726_v4 = vadd.f32 %v7725_v42, %v12819_v24 }
 0x419   : > { %v7727_v5 = vpop.f32.mrf.mxu0 }
 0x41a   : > { %v7768_v52 = vpop.f32.mrf.mxu1  ;;  %v7767_v46 = vadd.f32 %v7766_v43, %v7726_v4  ;;  %v7728_v26 = vadd.f32 %v7727_v5, %v12824_v58 }
 0x41b   : > { %v7729_v38 = vpop.f32.mrf.mxu0 }
 0x41c   : > { %v7770_v28 = vpop.f32.mrf.mxu1  ;;  %v7769_v50 = vadd.f32 %v7768_v52, %v7728_v26 }
 0x41d   : > { %v7730_v29 = vpop.f32.mrf.mxu0 }
 0x41e   : > { %v7771_v54 = vpop.f32.mrf.mxu1 }
 0x457   : > { %v7807_v15 = vpop.f32.mrf.mxu0 }
 0x458   : > { %v7848_v23 = vpop.f32.mrf.mxu1  ;;  %v7808_v53 = vadd.f32 %v7807_v15, %v7767_v46 }
 0x459   : > { %v7809_v30 = vpop.f32.mrf.mxu0 }
 0x45a   : > { %v7850_v32 = vpop.f32.mrf.mxu1  ;;  %v7849_v9 = vadd.f32 %v7848_v23, %v7808_v53  ;;  %v7810_v35 = vadd.f32 %v7809_v30, %v7769_v50 }
 0x45b   : > { %v7811_v36 = vpop.f32.mrf.mxu0 }
 0x45c   : > { %v7852_v33 = vpop.f32.mrf.mxu1  ;;  %v7851_v24 = vadd.f32 %v7850_v32, %v7810_v35 }
 0x45d   : > { %v7812_v7 = vpop.f32.mrf.mxu0 }
 0x45e   : > { %v7853_v45 = vpop.f32.mrf.mxu1 }
 0x497   : > { %v7889_v47 = vpop.f32.mrf.mxu0 }
 0x498   : > { %v7930_v51 = vpop.f32.mrf.mxu1  ;;  %v7890_v58 = vadd.f32 %v7889_v47, %v7849_v9 }
 0x499   : > { %v7891_v37 = vpop.f32.mrf.mxu0 }
 0x49a   : > { %v7932_v13 = vpop.f32.mrf.mxu1  ;;  %v7931_v21 = vadd.f32 %v7930_v51, %v7890_v58  ;;  %v7892_v59 = vadd.f32 %v7891_v37, %v7851_v24 }
 0x49b   : > { %v7893_v11 = vpop.f32.mrf.mxu0 }
 0x49c   : > { %v7934_v57 = vpop.f32.mrf.mxu1  ;;  %v7933_v2 = vadd.f32 %v7932_v13, %v7892_v59 }
 0x49d   : > { %v7894_v0 = vpop.f32.mrf.mxu0 }
 0x49e   : > { %v7935_v62 = vpop.f32.mrf.mxu1 }
 0x4d7   : > { %v7971_v8 = vpop.f32.mrf.mxu0 }
 0x4d8   : > { %v8012_v61 = vpop.f32.mrf.mxu1  ;;  %v7972_v3 = vadd.f32 %v7971_v8, %v7931_v21 }
 0x4d9   : > { %v7973_v25 = vpop.f32.mrf.mxu0 }
 0x4da   : > { %v8014_v34 = vpop.f32.mrf.mxu1  ;;  %v7974_v22 = vadd.f32 %v7973_v25, %v7933_v2  ;;  %v8013_v39 = vadd.f32 %v8012_v61, %v7972_v3 }
 0x4db   : > { %v7975_v49 = vpop.f32.mrf.mxu0 }
 0x4dc   : > { %v8016_v56 = vpop.f32.mrf.mxu1  ;;  %v8015_v12 = vadd.f32 %v8014_v34, %v7974_v22 }
 0x4dd   : > { %v7976_v27 = vpop.f32.mrf.mxu0 }
 0x4de   : > { %v8017_v31 = vpop.f32.mrf.mxu1  ;;  %v8024_v55 = vcombine.low %v8013_v39, %v8015_v12 }
 0x4e0   : > { %v8038_v6 = vrot.slane %v8024_v55, %v12885_v16 }
 0x4e2   : > { %v8039_v18 = vcombine.low %v8031_v60, %v8038_v6  ;;  %8046 = sbr.rel (%p9676_p7) target bundleno = 1693 (0x69d), region = 56 }
 0x4e4   : > { %v8041_v40 = vadd.f32 %v8039_v18, %v326_v48 }
 0x4e6   : > { %8042 = vst [vmem:[#allocation2] sm:$0xff] %v8041_v40 }
 0x4e7   : > { %v11373_v63 = vld [vmem:[%s13059_s3 + $0x78] sm:$0xff]   ;;  %v11377_v17 = vld [vmem:[%s13059_s3 + $0x70] sm:$0xff]   ;;  %v11381_v5 = vld [vmem:[%s13059_s3 + $0x68] sm:$0xff]   ;;  %v8052_v7 = vsub.s32 0, %v11584_v44  ;;  %v8056_v47 = vsub.s32 1, %v11584_v44  ;;  %v8060_v58 = vsub.s32 2, %v11584_v44 }
 0x4e8   : > { %v11374_v20 = vld [vmem:[%s13059_s3 + $0xf8] sm:$0xff]   ;;  %9724 = vmatprep.subr.bf16.mxu0 %v11373_v63  ;;  %v11378_v42 = vld [vmem:[%s13059_s3 + $0xf0] sm:$0xff]   ;;  %v11382_v52 = vld [vmem:[%s13059_s3 + $0xe8] sm:$0xff]   ;;  %v8064_v13 = vsub.s32 3, %v11584_v44  ;;  %v11468_v10 = vmov 0.0   ;;  %vm11469_vm0 = vmmov 0  }
 0x4e9   : > { %v11375_v14 = vld [vmem:[%s13059_s3 + $0x38] sm:$0xff]   ;;  %9746 = vmatprep.subr.bf16.mxu1 %v11374_v20  ;;  %v11379_v43 = vld [vmem:[%s13059_s3 + $0x30] sm:$0xff]   ;;  %v11383_v46 = vld [vmem:[%s13059_s3 + $0x28] sm:$0xff]  }
 0x4ea   : > { %v11376_v19 = vld [vmem:[%s13059_s3 + $0xb8] sm:$0xff]   ;;  %9725 = vmatpush3.bf16.msra.mxu0 %v11375_v14  ;;  %v11380_v4 = vld [vmem:[%s13059_s3 + $0xb0] sm:$0xff]   ;;  %v11384_v26 = vld [vmem:[%s13059_s3 + $0xa8] sm:$0xff]  }
 0x4eb   : > { %9747 = vmatpush3.bf16.msra.mxu1 %v11376_v19  ;;  %9726 = vmatprep.subr.bf16.mxu0 %v11377_v17  ;;  %v11385_v38 = vld [vmem:[%s13059_s3 + $0x60] sm:$0xff]   ;;  %v11389_v54 = vld [vmem:[%s13059_s3 + $0x58] sm:$0xff]   ;;  %v11393_v30 = vld [vmem:[%s13059_s3 + $0x50] sm:$0xff]  }
 0x4ec   : > { %9748 = vmatprep.subr.bf16.mxu1 %v11378_v42  ;;  %v11386_v28 = vld [vmem:[%s13059_s3 + $0xe0] sm:$0xff]   ;;  %v11390_v15 = vld [vmem:[%s13059_s3 + $0xd8] sm:$0xff]   ;;  %v11394_v32 = vld [vmem:[%s13059_s3 + $0xd0] sm:$0xff]  }
 0x4ed   : > { %v11387_v50 = vld [vmem:[%s13059_s3 + $0x20] sm:$0xff]   ;;  %v11391_v23 = vld [vmem:[%s13059_s3 + $0x18] sm:$0xff]   ;;  %v11395_v9 = vld [vmem:[%s13059_s3 + $0x10] sm:$0xff]  }
 0x4ee   : > { %9727 = vmatpush3.bf16.msra.mxu0 %v11379_v43  ;;  %v11388_v29 = vld [vmem:[%s13059_s3 + $0xa0] sm:$0xff]   ;;  %v11392_v53 = vld [vmem:[%s13059_s3 + $0x98] sm:$0xff]   ;;  %v11396_v35 = vld [vmem:[%s13059_s3 + $0x90] sm:$0xff]  }
 0x4ef   : > { %9749 = vmatpush3.bf16.msra.mxu1 %v11380_v4  ;;  %9728 = vmatprep.subr.bf16.mxu0 %v11381_v5  ;;  %v11397_v36 = vld [vmem:[%s13059_s3 + $0x48] sm:$0xff]   ;;  %v11401_v51 = vld [vmem:[%s13059_s3 + $0x40] sm:$0xff]   ;;  %v11405_v55 = vld [vmem:[%s13061_s5 + $0x38] sm:$0xff]  }
 0x4f0   : > { %9750 = vmatprep.subr.bf16.mxu1 %v11382_v52  ;;  %v11398_v33 = vld [vmem:[%s13059_s3 + $0xc8] sm:$0xff]   ;;  %v11402_v37 = vld [vmem:[%s13059_s3 + $0xc0] sm:$0xff]   ;;  %v11406_v48 = vld [vmem:[%s13061_s5 + $0x30] sm:$0xff]  }
 0x4f1   : > { %v11399_v24 = vld [vmem:[%s13059_s3 + $0x8] sm:$0xff]   ;;  %v11403_v21 = vld [vmem:[%s13059_s3] sm:$0xff]   ;;  %v11409_v40 = vld [vmem:[%s13061_s5 + $0x18] sm:$0xff]  }
 0x4f2   : > { %9729 = vmatpush3.bf16.msra.mxu0 %v11383_v46  ;;  %v11400_v45 = vld [vmem:[%s13059_s3 + $0x88] sm:$0xff]   ;;  %v11404_v11 = vld [vmem:[%s13059_s3 + $0x80] sm:$0xff]   ;;  %v11410_v63 = vld [vmem:[%s13061_s5 + $0x10] sm:$0xff]  }
 0x4f3   : > { %9751 = vmatpush3.bf16.msra.mxu1 %v11384_v26  ;;  %9730 = vmatprep.subr.bf16.mxu0 %v11385_v38  ;;  %v8048_v57 = vld [vmem:[%s13058_s2] sm:$0xf]  ;;  %v11411_v20 = vld [vmem:[%s13061_s5 + $0x8] sm:$0xff]  }
 0x4f4   : > { %9752 = vmatprep.subr.bf16.mxu1 %v11386_v28  ;;  %v8053_v0 = vrot.slane %v8048_v57, %v8052_v7  ;;  %v8057_v62 = vrot.slane %v8048_v57, %v8056_v47  ;;  %v8061_v41 = vrot.slane %v8048_v57, %v8060_v58  ;;  %v8065_v44 = vrot.slane %v8048_v57, %v8064_v13  ;;  %v8047_v61 = vld [vmem:[#allocation2] sm:$0xff] }
 0x4f5   : > { %v11408_v18 = vld [vmem:[%s13061_s5 + $0x20] sm:$0xff]  }
 0x4f6   : > { %9731 = vmatpush3.bf16.msra.mxu0 %v11387_v50  ;;  %v8066_v59 = vcombine.low %v8053_v0, %v8057_v62  ;;  %v8067_v8 = vcombine.low %v8061_v41, %v8065_v44  ;;  %v11412_v14 = vld [vmem:[%s13061_s5] sm:$0xff]  }
 0x4f7   : > { %9753 = vmatpush3.bf16.msra.mxu1 %v11388_v29  ;;  %9732 = vmatprep.subr.bf16.mxu0 %v11389_v54  ;;  %v9677_v42 = vld [vmem:[%s13060_s4] ss:$0 sm:$0xff] }
 0x4f8   : > { %9754 = vmatprep.subr.bf16.mxu1 %v11390_v15  ;;  %v8074_v1 = vrot.slane %v8066_v59, %v12885_v16  ;;  %v8081_v2 = vrot.slane %v8067_v8, %v12885_v16 }
 0x4fa   : > { %9733 = vmatpush3.bf16.msra.mxu0 %v11391_v23  ;;  %v8082_v3 = vcombine.low %v8074_v1, %v8081_v2  ;;  %v9710_v23 = vld [vmem:[%s13062_s6] ss:$0 sm:$0xff] }
 0x4fb   : > { %9755 = vmatpush3.bf16.msra.mxu1 %v11392_v53  ;;  %9734 = vmatprep.subr.bf16.mxu0 %v11393_v30 }
 0x4fc   : > { %9756 = vmatprep.subr.bf16.mxu1 %v11394_v32  ;;  %v8084_v25 = vadd.f32 %v8082_v3, %v8047_v61 }
 0x4fe   : > { %9735 = vmatpush3.bf16.msra.mxu0 %v11395_v9  ;;  %v8085_v34 = vmax.f32 %v8084_v25, 0.0 }
 0x4ff   : > { %9757 = vmatpush3.bf16.msra.mxu1 %v11396_v35  ;;  %9736 = vmatprep.subr.bf16.mxu0 %v11397_v36 }
 0x500   : > { %9758 = vmatprep.subr.bf16.mxu1 %v11398_v33  ;;  %v8094_v22 = vrot.slane %v8085_v34, %v12885_v16  ;;  %v8087_v49 = vcombine.high %v8085_v34, %v8085_v34 }
 0x502   : > { %9737 = vmatpush3.bf16.msra.mxu0 %v11399_v24  ;;  %v8102_v56 = vcombine.high %v8094_v22, %v8094_v22  ;;  %v8101_v39 = vrot.slane %v8087_v49, %v12885_v16  ;;  %v8108_v12 = vpack.c.bf16 %v8094_v22, %v8094_v22  ;;  %v11407_v16 = vld [vmem:[%s13061_s5 + $0x28] sm:$0xff]  }
 0x503   : > { %9759 = vmatpush3.bf16.msra.mxu1 %v11400_v45  ;;  %9738 = vmatprep.subr.bf16.mxu0 %v11401_v51 }
 0x504   : > { %9760 = vmatprep.subr.bf16.mxu1 %v11402_v37  ;;  %v8109_v27 = vpack.c.bf16 %v8102_v56, %v8102_v56  ;;  %v8103_v31 = vcombine.high %v8101_v39, %v8101_v39  ;;  %v8110_v60 = vpack.c.bf16 %v8101_v39, %v8101_v39 }
 0x506   : > { %9739 = vmatpush3.bf16.msra.mxu0 %v11403_v21  ;;  %8407 = vmatprep.mubr.bf16.mxu0 %v8109_v27  ;;  %v8111_v6 = vpack.c.bf16 %v8103_v31, %v8103_v31 }
 0x507   : > { %9761 = vmatpush3.bf16.msra.mxu1 %v11404_v11  ;;  %9777 = vmatprep.subr.bf16.mxu0 %v11468_v10 }
 0x508   : > { %8447 = vmatprep.mubr.bf16.mxu1 %v8111_v6 }
 0x509   : > { %8408 = vmatmul.mubr.bf16.vlgmr.msra.gmra.mxu0 %v8108_v12 }
 0x50a   : > { %9778 = vmatpush3.bf16.msra.mxu0 %v11405_v55  ;;  %8448 = vmatmul.mubr.bf16.vlgmr.msra.gmra.mxu1 %v8110_v60 }
 0x50b   : > { %9779 = vmatprep.subr.bf16.mxu0 %v11468_v10  ;;  %9793 = vmatprep.mubr.msk.bf16.mxu0 %vm11469_vm0, %v11468_v10 }
 0x50e   : > { %9780 = vmatpush3.bf16.msra.mxu0 %v11406_v48 }
 0x50f   : > { %9781 = vmatprep.subr.bf16.mxu0 %v11468_v10 }
 0x512   : > { %9782 = vmatpush3.bf16.msra.mxu0 %v11407_v16 }
 0x513   : > { %9783 = vmatprep.subr.bf16.mxu0 %v11468_v10 }
 0x516   : > { %9784 = vmatpush3.bf16.msra.mxu0 %v11408_v18 }
 0x517   : > { %9785 = vmatprep.subr.bf16.mxu0 %v11468_v10 }
 0x51a   : > { %9786 = vmatpush3.bf16.msra.mxu0 %v11409_v40 }
 0x51b   : > { %9787 = vmatprep.subr.bf16.mxu0 %v11468_v10 }
 0x51e   : > { %9788 = vmatpush3.bf16.msra.mxu0 %v11410_v63 }
 0x51f   : > { %9789 = vmatprep.subr.bf16.mxu0 %v11468_v10 }
 0x522   : > { %9790 = vmatpush3.bf16.msra.mxu0 %v11411_v20 }
 0x523   : > { %9791 = vmatprep.subr.bf16.mxu0 %v11468_v10 }
 0x526   : > { %9792 = vmatpush3.bf16.msra.mxu0 %v11412_v14 }
 0x5c9   : > { %v9740_v19 = vpop.f32.mrf.mxu0 }
 0x5ca   : > { %v9762_v17 = vpop.f32.mrf.mxu1 }
 0x5cb   : > { %v9741_v43 = vpop.f32.mrf.mxu0 }
 0x5cc   : > { %v9742_v4 = vadd.f32 %v9741_v43, %v9740_v19  ;;  %v9763_v5 = vpop.f32.mrf.mxu1 }
 0x5cd   : > { %v9743_v52 = vpop.f32.mrf.mxu0  ;;  %v9764_v26 = vadd.f32 %v9763_v5, %v9762_v17 }
 0x5ce   : > { %v8410_v46 = vadd.f32 %v9742_v4, %v9677_v42  ;;  %v9765_v38 = vpop.f32.mrf.mxu1 }
 0x5cf   : > { %v9744_v28 = vpop.f32.mrf.mxu0 }
 0x5d0   : > { %v8450_v50 = vadd.f32 %v9764_v26, %v8410_v46  ;;  %v9766_v29 = vpop.f32.mrf.mxu1 }
 0x5d2   : > { %v8455_v54 = vmax.f32 %v8450_v50, 0.0 }
 0x5d4   : > { %v8456_v15 = vpack.c.bf16 %v8455_v54, %v8455_v54 }
 0x5d6   : > { %9794 = vmatmul.mubr.bf16.vlgmr.msra.gmra.mxu0 %v8456_v15 }
 0x696   : > { %v8562_v53 = vpop.f32.mrf.mxu0 }
 0x697   : > { %v8563_v30 = vadd.f32 %v9710_v23, %v8562_v53 }
 0x698   : > { %v9795_v32 = vpop.f32.mrf.mxu0 }
 0x699   : > { %8568 = vst [vmem:[#allocation3] sm:$0x3] %v8563_v30 }
 0x69a   : > { %v8565_v9 = vpop.f32.mrf.mxu0 }
 0x69c   : > { %v9796_v35 = vpop.f32.mrf.mxu0 }
 0x69d PF: > { %p13032_p8 = scmp.eq.s32.totalorder %s8643_s27, 1  ;;  %s11470_s30 = smov [#allocation3]  }
 0x69e   : > { %s8578_s8 = sshll.u32 %s11470_s30, 4  ;;  %s8579_s8 = int_to_ptr.vmem [resolvable:$true] %s8578_s8 }
 0x69f   : > { %s11413_s9 = scalar_lea.vmem %s8579_s8, 32  ;;  %p11420_p12 = scmp.lt.s32.totalorder %s8579_s8, %s8579_s8 }
 0x6a0   : > { %p11414_p9 = scmp.ne.s32.totalorder %s8579_s8, %s11413_s9  ;;  %p11421_p13 = scmp.lt.s32.totalorder %s11413_s9, %s11413_s9 }
 0x6a2   : > { %p11415_p10 = pnand %p11414_p9, %p13032_p8  ;;  %p11422_p0 = por %p11421_p13, %p11420_p12 }
 0x6a4   : > { %p11416_p11 = pneg %p11415_p10 }
 0x6a6   : > { %p11423_p1 = pnand %p11422_p0, %p11416_p11 }
 0x6a8   : > { %11426 = shalt.err (!%p11423_p1)
}
 0x6a9   : > { %9798 = dma.vmem_to_hbm [thread:$0]  (%p13032_p8), %s8579_s8, 32, %s13063_s7, [#allocation4]  }
 0x6aa   : > { %11450 = dma.done.wait (%p13032_p8), [#allocation4], 32  }
 0x6ab   : > { %11452 = vsyncadd (%p13032_p8), [#allocation4], 4294967264 }
 0x6ac PF: > { %s18_s26 = sadd.s32 1, %s11463_s26   ;;  %s13065_s24 = smov %s11459_s25 }
 0x6ad   : > { %p15_p2 = scmp.ge.s32.totalorder %s18_s26, 4   ;;  %s13066_s25 = smov %s13068_s28 }
 0x6af   :  { %17 = sbr.rel (!%p15_p2) target bundleno = 2 (0x2), region = 87 }
 0x6b4   :  { %8591 = vsyncpa [#allocation4], 1 }
 0x6b5   :  { %8593 = vsyncpa [#allocation4 + $0x1], 1 }

</bundles_post_ra>
